<compile_context>
chip_gen: v7x
topology: tpu7x:2x2x1
jax: 0.10.0
libtpu: 0.0.40
codegen_flags: <defaults>
</compile_context>

<pallas_src>
import functools

import jax
import jax.numpy as jnp
from jax.experimental import pallas as pl
from jax.experimental.pallas import tpu as pltpu

BN_EPS = 1e-5


# --------------------------------------------------------------------------
# Fused dense-block kernel (one image per grid step)
# --------------------------------------------------------------------------
def _dense_block_kernel(x_ref, *rest, num_layers, growth, H, W, pad_rows):
    L = num_layers
    wrefs = rest[: 5 * L]
    out_ref = rest[5 * L]          # (1, HW, c_final) fp32 output sink
    feat_ref = rest[5 * L + 1]     # (HW, c_final)    bf16 concat compute copy
    mid_ref = rest[5 * L + 2]      # (HW + 2*pad, 9G) bf16 halo-padded tap scratch

    HW = H * W
    C0 = x_ref.shape[-1]
    G = growth
    NT = 9 * G

    # Zero only the halo rows (the body region is fully rewritten every layer).
    # Done every grid step so it holds on each TensorCore when the batch axis
    # is sharded ("parallel") on v7x.
    halo_zeros = jnp.zeros((pad_rows, NT), mid_ref.dtype)
    mid_ref[:pad_rows, :] = halo_zeros
    mid_ref[pad_rows + HW:pad_rows + HW + pad_rows, :] = halo_zeros

    # Seed both copies of the channel-concat buffer with x.
    x = x_ref[0]
    out_ref[0, :, :C0] = x
    feat_ref[:, :C0] = x.astype(feat_ref.dtype)

    # Column-validity masks for the dj = -1 / +1 tap groups (row taps are
    # handled by the zero halo).  Shape (HW, 1); broadcast against (HW, G).
    j_idx = jax.lax.broadcasted_iota(jnp.int32, (HW, 1), 0) % W
    mask_l = j_idx >= 1          # input column j-1 exists
    mask_r = j_idx <= W - 2      # input column j+1 exists

    c_in = C0
    for l in range(L):
        s1, b1, w1, b2, w2 = wrefs[5 * l: 5 * l + 5]

        # --- BN1 (eval, folded) + ReLU + 1x1 conv; bf16 VPU/MXU, fp32 acc ---
        a1 = jnp.maximum(feat_ref[:, :c_in] * s1[...] + b1[...], 0.0)
        y1 = jnp.dot(a1, w1[...], preferred_element_type=jnp.float32)   # (HW, Cmid)

        # --- BN2 (scale pre-folded into w1) + ReLU; single bf16 cast ---
        a2 = jnp.maximum(y1 + b2[...], 0.0).astype(jnp.bfloat16)

        # --- 3x3 conv step 1: ONE lane-dense matmul (HW,Cmid)x(Cmid,9G) ---
        taps = jnp.dot(a2, w2[...], preferred_element_type=jnp.float32)  # (HW, 9G)
        mid_ref[pad_rows:pad_rows + HW, :] = taps.astype(mid_ref.dtype)

        # --- 3x3 conv step 2: nine shifted G-wide slab adds from the halo
        #     scratch; one column mask per dj=+-1 group on the (HW,G) partial.
        acc = jnp.zeros((HW, G), jnp.float32)
        for dj, mask in ((-1, mask_l), (0, None), (1, mask_r)):
            part = jnp.zeros((HW, G), jnp.float32)
            for di in (-1, 0, 1):
                t = (di + 1) * 3 + (dj + 1)            # tap = kh*3 + kw
                off = pad_rows + di * W + dj
                part = part + mid_ref[off:off + HW, t * G:(t + 1) * G]
            if mask is not None:
                part = jnp.where(mask, part, 0.0)
            acc = acc + part

        # torch.cat([x, out], dim=1): append to fp32 sink and bf16 copy.
        out_ref[0, :, c_in:c_in + G] = acc
        feat_ref[:, c_in:c_in + G] = acc.astype(feat_ref.dtype)
        c_in += G


# --------------------------------------------------------------------------
# Wrapper: parameter folding + pallas_call plumbing
# --------------------------------------------------------------------------
def _fold_bn(bn):
    inv = 1.0 / jnp.sqrt(bn["var"] + BN_EPS)
    s = (bn["gamma"] * inv).astype(jnp.float32)
    b = (bn["beta"] - bn["mean"] * bn["gamma"] * inv).astype(jnp.float32)
    return s.reshape(1, -1), b.reshape(1, -1)


def dense_block_forward(params, x_nchw):
    """Forward of _DenseBlock.  Input/output are NCHW, matching the PyTorch module."""
    N, C0, H, W = x_nchw.shape
    HW = H * W
    assert HW % 8 == 0, "H*W should be a multiple of 8 for the TPU block layout"

    layers = params["layers"]
    num_layers = len(layers)
    G = params["growth_rate"]
    cmid = params["bn_size"] * G
    c_final = C0 + num_layers * G
    pad_rows = ((W + 1 + 7) // 8) * 8      # zero halo >= W+1 rows, sublane-aligned

    x = jnp.transpose(x_nchw, (0, 2, 3, 1)).reshape(N, HW, C0).astype(jnp.float32)

    args = [x]
    in_specs = [pl.BlockSpec((1, HW, C0), lambda n: (n, 0, 0))]
    map2 = lambda n: (0, 0)

    flops = 0
    c_in = C0
    for lp in layers:
        s1, b1 = _fold_bn(lp["bn1"])
        s2, b2 = _fold_bn(lp["bn2"])
        # 1x1 conv: (Cmid, Cin, 1, 1) -> (Cin, Cmid); BN2 scale folded in.
        w1 = (lp["conv1_w"].reshape(cmid, c_in).T * s2).astype(jnp.bfloat16)
        # 3x3 conv: (G, Cmid, 3, 3) -> (Cmid, 3, 3, G) -> (Cmid, 9G); tap = kh*3+kw.
        w2 = jnp.transpose(lp["conv2_w"], (1, 2, 3, 0)).reshape(cmid, 9 * G)
        w2 = w2.astype(jnp.bfloat16)
        for arr in (s1.astype(jnp.bfloat16), b1.astype(jnp.bfloat16), w1, b2, w2):
            args.append(arr)
            in_specs.append(pl.BlockSpec(arr.shape, map2))
        flops += 2 * HW * (c_in * cmid + cmid * 9 * G)
        c_in += G
    flops *= N

    # VMEM budget: double-buffered in/out blocks + weights + persistent scratch
    # + headroom for per-layer temporaries.  Capped at 64 MiB (v7x physical).
    w_bytes = sum(int(a.size) * a.dtype.itemsize for a in args[1:])
    blk_in = HW * C0 * 4
    blk_out = HW * c_final * 4
    scratch_bytes = HW * c_final * 2 + (HW + 2 * pad_rows) * 9 * G * 2
    temp_bytes = HW * (2 * c_final + 8 * cmid + 8 * 9 * G + 8 * G)
    vmem_limit = 2 * (blk_in + blk_out) + 2 * w_bytes + scratch_bytes + temp_bytes
    vmem_limit = int(min(max(vmem_limit, 16 * 1024 * 1024), 64 * 1024 * 1024))

    bytes_accessed = int(N * (blk_in + blk_out) + w_bytes)
    cost = pl.CostEstimate(flops=int(flops), transcendentals=0,
                           bytes_accessed=bytes_accessed)

    out = pl.pallas_call(
        functools.partial(_dense_block_kernel, num_layers=num_layers,
                          growth=G, H=H, W=W, pad_rows=pad_rows),
        out_shape=jax.ShapeDtypeStruct((N, HW, c_final), jnp.float32),
        grid=(N,),
        in_specs=in_specs,
        out_specs=pl.BlockSpec((1, HW, c_final), lambda n: (n, 0, 0)),
        scratch_shapes=[
            pltpu.VMEM((HW, c_final), jnp.bfloat16),               # bf16 concat copy
            pltpu.VMEM((HW + 2 * pad_rows, 9 * G), jnp.bfloat16),  # halo tap scratch
        ],
        compiler_params=pltpu.CompilerParams(
            dimension_semantics=("parallel",),
            vmem_limit_bytes=vmem_limit,
        ),
        cost_estimate=cost,
    )(*args)

    return out.reshape(N, H, W, c_final).transpose(0, 3, 1, 2)


# --------------------------------------------------------------------------
# Pure-JAX fp32 reference (eval-mode BN, identity dropout) for validation
# --------------------------------------------------------------------------
def _reference(params, x):
    def bn(h, p):
        inv = 1.0 / jnp.sqrt(p["var"] + BN_EPS)
        s = (p["gamma"] * inv)[None, :, None, None]
        b = (p["beta"] - p["mean"] * p["gamma"] * inv)[None, :, None, None]
        return h * s + b

    feats = x
    for lp in params["layers"]:
        h = jnp.maximum(bn(feats, lp["bn1"]), 0.0)
        h = jax.lax.conv_general_dilated(h, lp["conv1_w"], (1, 1), "VALID",
                                         dimension_numbers=("NCHW", "OIHW", "NCHW"))
        h = jnp.maximum(bn(h, lp["bn2"]), 0.0)
        h = jax.lax.conv_general_dilated(h, lp["conv2_w"], (1, 1), ((1, 1), (1, 1)),
                                         dimension_numbers=("NCHW", "OIHW", "NCHW"))
        feats = jnp.concatenate([feats, h], axis=1)
    return feats


# --------------------------------------------------------------------------
# Deterministic parameter init (shapes match the PyTorch module)
# --------------------------------------------------------------------------
def _kaiming(key, shape):
    fan_in = shape[1] * shape[2] * shape[3]
    std = (2.0 / fan_in) ** 0.5
    return std * jax.random.normal(key, shape, jnp.float32)


def _bn_init(key, c):
    kg, kb, km, kv = jax.random.split(key, 4)
    return dict(
        gamma=1.0 + 0.1 * jax.random.normal(kg, (c,), jnp.float32),
        beta=0.1 * jax.random.normal(kb, (c,), jnp.float32),
        mean=0.1 * jax.random.normal(km, (c,), jnp.float32),
        var=jax.random.uniform(kv, (c,), jnp.float32, 0.5, 1.5),
    )


def init_params(key, *, in_channels, growth_rate, bn_size, num_layers, drop_rate=0.0):
    cmid = bn_size * growth_rate
    layers = []
    c_in = in_channels
    keys = jax.random.split(key, num_layers)
    for l in range(num_layers):
        k1, k2, k3, k4 = jax.random.split(keys[l], 4)
        layers.append(dict(
            bn1=_bn_init(k1, c_in),
            conv1_w=_kaiming(k2, (cmid, c_in, 1, 1)),
            bn2=_bn_init(k3, cmid),
            conv2_w=_kaiming(k4, (growth_rate, cmid, 3, 3)),
        ))
        c_in += growth_rate
    return dict(layers=layers, growth_rate=growth_rate, bn_size=bn_size,
                drop_rate=drop_rate)


# --------------------------------------------------------------------------
if __name__ == "__main__":
    key = jax.random.PRNGKey(0)
    pkey, xkey = jax.random.split(key)

    # Small DenseNet-style block: 2 layers, in=64, growth=32, bn_size=4, drop=0.
    # Final channel count = 64 + 2*32 = 128 -> lane-dense output block.
    # N=2 grid steps keep both v7x TensorCores busy.
    params = init_params(pkey, in_channels=64, growth_rate=32, bn_size=4,
                         num_layers=2, drop_rate=0.0)
    x = jax.random.normal(xkey, (2, 64, 16, 16), jnp.float32)

    y = dense_block_forward(params, x)
    jax.block_until_ready(y)

    assert y.shape == (2, 128, 16, 16) and y.dtype == jnp.float32
    # Dense concat passes the input through unchanged in the first 64 channels.
    assert bool(jnp.allclose(y[:, :64], x)), "concat pass-through mismatch"

    # Validate against the fp32 reference with a bf16-appropriate tolerance.
    ref = _reference(params, x)
    err = float(jnp.max(jnp.abs(y - ref)))
    assert err < 0.25, f"max abs error vs fp32 reference too large: {err}"
    print("KERNEL_OK")
</pallas_src>

<mosaic_0001>
module attributes {stable_mosaic.version = 11 : i64} {
  func.func @_dense_block_kernel(%arg0: i32, %arg1: memref<1x256x64xf32, #tpu.memory_space<vmem>>, %arg2: memref<1x64xbf16, #tpu.memory_space<vmem>>, %arg3: memref<1x64xbf16, #tpu.memory_space<vmem>>, %arg4: memref<64x128xbf16, #tpu.memory_space<vmem>>, %arg5: memref<1x128xf32, #tpu.memory_space<vmem>>, %arg6: memref<128x288xbf16, #tpu.memory_space<vmem>>, %arg7: memref<1x96xbf16, #tpu.memory_space<vmem>>, %arg8: memref<1x96xbf16, #tpu.memory_space<vmem>>, %arg9: memref<96x128xbf16, #tpu.memory_space<vmem>>, %arg10: memref<1x128xf32, #tpu.memory_space<vmem>>, %arg11: memref<128x288xbf16, #tpu.memory_space<vmem>>, %arg12: memref<1x256x128xf32, #tpu.memory_space<vmem>>, %arg13: memref<256x128xbf16, #tpu.memory_space<vmem>>, %arg14: memref<304x288xbf16, #tpu.memory_space<vmem>>) attributes {dimension_semantics = [#tpu.dimension_semantics<parallel>], iteration_bounds = array<i64: 2>, scalar_prefetch = 0 : i64, scratch_operands = 2 : i64, tpu.core_type = #tpu.core_type<tc>, window_params = [{transform_indices = @transform_0, window_bounds = array<i64: 1, 256, 64>}, {pipeline_mode = #tpu.pipeline_mode<synchronous>, transform_indices = @transform_1, window_bounds = array<i64: 1, 64>}, {pipeline_mode = #tpu.pipeline_mode<synchronous>, transform_indices = @transform_2, window_bounds = array<i64: 1, 64>}, {pipeline_mode = #tpu.pipeline_mode<synchronous>, transform_indices = @transform_3, window_bounds = array<i64: 64, 128>}, {pipeline_mode = #tpu.pipeline_mode<synchronous>, transform_indices = @transform_4, window_bounds = array<i64: 1, 128>}, {pipeline_mode = #tpu.pipeline_mode<synchronous>, transform_indices = @transform_5, window_bounds = array<i64: 128, 288>}, {pipeline_mode = #tpu.pipeline_mode<synchronous>, transform_indices = @transform_6, window_bounds = array<i64: 1, 96>}, {pipeline_mode = #tpu.pipeline_mode<synchronous>, transform_indices = @transform_7, window_bounds = array<i64: 1, 96>}, {pipeline_mode = #tpu.pipeline_mode<synchronous>, transform_indices = @transform_8, window_bounds = array<i64: 96, 128>}, {pipeline_mode = #tpu.pipeline_mode<synchronous>, transform_indices = @transform_9, window_bounds = array<i64: 1, 128>}, {pipeline_mode = #tpu.pipeline_mode<synchronous>, transform_indices = @transform_10, window_bounds = array<i64: 128, 288>}, {transform_indices = @transform_11, window_bounds = array<i64: 1, 256, 128>}]} {
    %cst = arith.constant 0.000000e+00 : bf16
    %0 = vector.broadcast %cst : bf16 to vector<24x288xbf16>
    %c0 = arith.constant 0 : index
    %c0_0 = arith.constant 0 : index
    %1 = vector.load %arg14[%c0, %c0_0] : memref<304x288xbf16, #tpu.memory_space<vmem>>, vector<24x288xbf16>
    tpu.vector_store %arg14[%c0, %c0_0], %0 {strides = array<i32>} : memref<304x288xbf16, #tpu.memory_space<vmem>>, vector<24x288xbf16>,
    %c280 = arith.constant 280 : index
    %c0_1 = arith.constant 0 : index
    %2 = vector.load %arg14[%c280, %c0_1] : memref<304x288xbf16, #tpu.memory_space<vmem>>, vector<24x288xbf16>
    tpu.vector_store %arg14[%c280, %c0_1], %0 {strides = array<i32>} : memref<304x288xbf16, #tpu.memory_space<vmem>>, vector<24x288xbf16>,
    %c0_2 = arith.constant 0 : index
    %c0_3 = arith.constant 0 : index
    %c0_4 = arith.constant 0 : index
    %3 = vector.load %arg1[%c0_2, %c0_3, %c0_4] : memref<1x256x64xf32, #tpu.memory_space<vmem>>, vector<1x256x64xf32>
    %4 = vector.shape_cast %3 : vector<1x256x64xf32> to vector<256x64xf32>
    %c0_5 = arith.constant 0 : index
    %c0_6 = arith.constant 0 : index
    %c0_7 = arith.constant 0 : index
    %5 = vector.load %arg12[%c0_5, %c0_6, %c0_7] : memref<1x256x128xf32, #tpu.memory_space<vmem>>, vector<1x256x64xf32>
    %6 = vector.shape_cast %5 : vector<1x256x64xf32> to vector<256x64xf32>
    %7 = vector.shape_cast %4 : vector<256x64xf32> to vector<1x256x64xf32>
    tpu.vector_store %arg12[%c0_5, %c0_6, %c0_7], %7 {strides = array<i32>} : memref<1x256x128xf32, #tpu.memory_space<vmem>>, vector<1x256x64xf32>,
    %8 = arith.truncf %4 : vector<256x64xf32> to vector<256x64xbf16>
    %c0_8 = arith.constant 0 : index
    %c0_9 = arith.constant 0 : index
    %9 = vector.load %arg13[%c0_8, %c0_9] : memref<256x128xbf16, #tpu.memory_space<vmem>>, vector<256x64xbf16>
    tpu.vector_store %arg13[%c0_8, %c0_9], %8 {strides = array<i32>} : memref<256x128xbf16, #tpu.memory_space<vmem>>, vector<256x64xbf16>,
    %10 = tpu.iota {dimensions = array<i32: 0>} : vector<256x1xi32>
    %c16_i32 = arith.constant 16 : i32
    %c0_i32 = arith.constant 0 : i32
    %11 = arith.cmpi eq, %c16_i32, %c0_i32 : i32
    %c1_i32 = arith.constant 1 : i32
    %12 = arith.select %11, %c1_i32, %c16_i32 : i32
    %13 = vector.broadcast %12 : i32 to vector<256x1xi32>
    %14 = arith.remsi %10, %13 : vector<256x1xi32>
    %c0_i32_10 = arith.constant 0 : i32
    %15 = vector.broadcast %c0_i32_10 : i32 to vector<256x1xi32>
    %16 = arith.cmpi ne, %14, %15 : vector<256x1xi32>
    %c0_i32_11 = arith.constant 0 : i32
    %17 = vector.broadcast %c0_i32_11 : i32 to vector<256x1xi32>
    %18 = arith.cmpi slt, %14, %17 : vector<256x1xi32>
    %c0_i32_12 = arith.constant 0 : i32
    %19 = arith.cmpi slt, %12, %c0_i32_12 : i32
    %20 = vector.broadcast %19 : i1 to vector<256x1xi1>
    %21 = vector.broadcast %20 : vector<256x1xi1> to vector<256x1xi1>
    %22 = arith.xori %18, %21 : vector<256x1xi1>
    %23 = arith.andi %22, %16 : vector<256x1xi1>
    %24 = vector.broadcast %12 : i32 to vector<256x1xi32>
    %25 = arith.addi %14, %24 : vector<256x1xi32>
    %26 = arith.select %23, %25, %14 : vector<256x1xi1>, vector<256x1xi32>
    %c1_i32_13 = arith.constant 1 : i32
    %27 = vector.broadcast %c1_i32_13 : i32 to vector<256x1xi32>
    %28 = arith.cmpi sge, %26, %27 : vector<256x1xi32>
    %c14_i32 = arith.constant 14 : i32
    %29 = vector.broadcast %c14_i32 : i32 to vector<256x1xi32>
    %30 = arith.cmpi sle, %26, %29 : vector<256x1xi32>
    %c0_14 = arith.constant 0 : index
    %c0_15 = arith.constant 0 : index
    %31 = vector.load %arg13[%c0_14, %c0_15] : memref<256x128xbf16, #tpu.memory_space<vmem>>, vector<256x64xbf16>
    %c0_16 = arith.constant 0 : index
    %c0_17 = arith.constant 0 : index
    %32 = vector.load %arg2[%c0_16, %c0_17] : memref<1x64xbf16, #tpu.memory_space<vmem>>, vector<1x64xbf16>
    %33 = vector.broadcast %32 : vector<1x64xbf16> to vector<256x64xbf16>
    %34 = arith.mulf %31, %33 : vector<256x64xbf16>
    %c0_18 = arith.constant 0 : index
    %c0_19 = arith.constant 0 : index
    %35 = vector.load %arg3[%c0_18, %c0_19] : memref<1x64xbf16, #tpu.memory_space<vmem>>, vector<1x64xbf16>
    %36 = vector.broadcast %35 : vector<1x64xbf16> to vector<256x64xbf16>
    %37 = arith.addf %34, %36 : vector<256x64xbf16>
    %cst_20 = arith.constant 0.000000e+00 : bf16
    %38 = vector.broadcast %cst_20 : bf16 to vector<256x64xbf16>
    %39 = arith.maximumf %37, %38 : vector<256x64xbf16>
    %c0_21 = arith.constant 0 : index
    %c0_22 = arith.constant 0 : index
    %40 = vector.load %arg4[%c0_21, %c0_22] : memref<64x128xbf16, #tpu.memory_space<vmem>>, vector<64x128xbf16>
    %cst_23 = arith.constant dense<0.000000e+00> : vector<256x128xf32>
    %41 = tpu.matmul %39, %40, %cst_23 {dimension_numbers = #tpu.dot_dimension_numbers<[1], [0], [0], [1], [0, 0, 1, 1], [], []>} : vector<256x64xbf16>, vector<64x128xbf16>, vector<256x128xf32> -> vector<256x128xf32>
    %c0_24 = arith.constant 0 : index
    %c0_25 = arith.constant 0 : index
    %42 = vector.load %arg5[%c0_24, %c0_25] : memref<1x128xf32, #tpu.memory_space<vmem>>, vector<1x128xf32>
    %43 = vector.broadcast %42 : vector<1x128xf32> to vector<256x128xf32>
    %44 = arith.addf %41, %43 : vector<256x128xf32>
    %cst_26 = arith.constant 0.000000e+00 : f32
    %45 = vector.broadcast %cst_26 : f32 to vector<256x128xf32>
    %46 = arith.maximumf %44, %45 : vector<256x128xf32>
    %47 = arith.truncf %46 : vector<256x128xf32> to vector<256x128xbf16>
    %c0_27 = arith.constant 0 : index
    %c0_28 = arith.constant 0 : index
    %48 = vector.load %arg6[%c0_27, %c0_28] : memref<128x288xbf16, #tpu.memory_space<vmem>>, vector<128x288xbf16>
    %cst_29 = arith.constant dense<0.000000e+00> : vector<256x288xf32>
    %49 = tpu.matmul %47, %48, %cst_29 {dimension_numbers = #tpu.dot_dimension_numbers<[1], [0], [0], [1], [0, 0, 1, 1], [], []>} : vector<256x128xbf16>, vector<128x288xbf16>, vector<256x288xf32> -> vector<256x288xf32>
    %50 = arith.truncf %49 : vector<256x288xf32> to vector<256x288xbf16>
    %c24 = arith.constant 24 : index
    %c0_30 = arith.constant 0 : index
    %51 = vector.load %arg14[%c24, %c0_30] : memref<304x288xbf16, #tpu.memory_space<vmem>>, vector<256x288xbf16>
    tpu.vector_store %arg14[%c24, %c0_30], %50 {strides = array<i32>} : memref<304x288xbf16, #tpu.memory_space<vmem>>, vector<256x288xbf16>,
    %cst_31 = arith.constant 0.000000e+00 : f32
    %52 = vector.broadcast %cst_31 : f32 to vector<256x32xf32>
    %cst_32 = arith.constant 0.000000e+00 : f32
    %53 = vector.broadcast %cst_32 : f32 to vector<256x32xf32>
    %c7 = arith.constant 7 : index
    %c0_33 = arith.constant 0 : index
    %54 = vector.load %arg14[%c7, %c0_33] : memref<304x288xbf16, #tpu.memory_space<vmem>>, vector<256x32xbf16>
    %55 = arith.extf %54 : vector<256x32xbf16> to vector<256x32xf32>
    %56 = arith.addf %53, %55 : vector<256x32xf32>
    %c23 = arith.constant 23 : index
    %c96 = arith.constant 96 : index
    %57 = vector.load %arg14[%c23, %c96] : memref<304x288xbf16, #tpu.memory_space<vmem>>, vector<256x32xbf16>
    %58 = arith.extf %57 : vector<256x32xbf16> to vector<256x32xf32>
    %59 = arith.addf %56, %58 : vector<256x32xf32>
    %c39 = arith.constant 39 : index
    %c192 = arith.constant 192 : index
    %60 = vector.load %arg14[%c39, %c192] : memref<304x288xbf16, #tpu.memory_space<vmem>>, vector<256x32xbf16>
    %61 = arith.extf %60 : vector<256x32xbf16> to vector<256x32xf32>
    %62 = arith.addf %59, %61 : vector<256x32xf32>
    %cst_34 = arith.constant 0.000000e+00 : f32
    %63 = vector.shape_cast %28 : vector<256x1xi1> to vector<256x1xi1>
    %64 = vector.broadcast %63 : vector<256x1xi1> to vector<256x32xi1>
    %65 = vector.broadcast %cst_34 : f32 to vector<256x32xf32>
    %66 = arith.select %64, %62, %65 : vector<256x32xi1>, vector<256x32xf32>
    %67 = arith.addf %52, %66 : vector<256x32xf32>
    %cst_35 = arith.constant 0.000000e+00 : f32
    %68 = vector.broadcast %cst_35 : f32 to vector<256x32xf32>
    %c8 = arith.constant 8 : index
    %c32 = arith.constant 32 : index
    %69 = vector.load %arg14[%c8, %c32] : memref<304x288xbf16, #tpu.memory_space<vmem>>, vector<256x32xbf16>
    %70 = arith.extf %69 : vector<256x32xbf16> to vector<256x32xf32>
    %71 = arith.addf %68, %70 : vector<256x32xf32>
    %c24_36 = arith.constant 24 : index
    %c128 = arith.constant 128 : index
    %72 = vector.load %arg14[%c24_36, %c128] : memref<304x288xbf16, #tpu.memory_space<vmem>>, vector<256x32xbf16>
    %73 = arith.extf %72 : vector<256x32xbf16> to vector<256x32xf32>
    %74 = arith.addf %71, %73 : vector<256x32xf32>
    %c40 = arith.constant 40 : index
    %c224 = arith.constant 224 : index
    %75 = vector.load %arg14[%c40, %c224] : memref<304x288xbf16, #tpu.memory_space<vmem>>, vector<256x32xbf16>
    %76 = arith.extf %75 : vector<256x32xbf16> to vector<256x32xf32>
    %77 = arith.addf %74, %76 : vector<256x32xf32>
    %78 = arith.addf %67, %77 : vector<256x32xf32>
    %cst_37 = arith.constant 0.000000e+00 : f32
    %79 = vector.broadcast %cst_37 : f32 to vector<256x32xf32>
    %c9 = arith.constant 9 : index
    %c64 = arith.constant 64 : index
    %80 = vector.load %arg14[%c9, %c64] : memref<304x288xbf16, #tpu.memory_space<vmem>>, vector<256x32xbf16>
    %81 = arith.extf %80 : vector<256x32xbf16> to vector<256x32xf32>
    %82 = arith.addf %79, %81 : vector<256x32xf32>
    %c25 = arith.constant 25 : index
    %c160 = arith.constant 160 : index
    %83 = vector.load %arg14[%c25, %c160] : memref<304x288xbf16, #tpu.memory_space<vmem>>, vector<256x32xbf16>
    %84 = arith.extf %83 : vector<256x32xbf16> to vector<256x32xf32>
    %85 = arith.addf %82, %84 : vector<256x32xf32>
    %c41 = arith.constant 41 : index
    %c256 = arith.constant 256 : index
    %86 = vector.load %arg14[%c41, %c256] : memref<304x288xbf16, #tpu.memory_space<vmem>>, vector<256x32xbf16>
    %87 = arith.extf %86 : vector<256x32xbf16> to vector<256x32xf32>
    %88 = arith.addf %85, %87 : vector<256x32xf32>
    %cst_38 = arith.constant 0.000000e+00 : f32
    %89 = vector.shape_cast %30 : vector<256x1xi1> to vector<256x1xi1>
    %90 = vector.broadcast %89 : vector<256x1xi1> to vector<256x32xi1>
    %91 = vector.broadcast %cst_38 : f32 to vector<256x32xf32>
    %92 = arith.select %90, %88, %91 : vector<256x32xi1>, vector<256x32xf32>
    %93 = arith.addf %78, %92 : vector<256x32xf32>
    %c0_39 = arith.constant 0 : index
    %c0_40 = arith.constant 0 : index
    %c64_41 = arith.constant 64 : index
    %94 = vector.load %arg12[%c0_39, %c0_40, %c64_41] : memref<1x256x128xf32, #tpu.memory_space<vmem>>, vector<1x256x32xf32>
    %95 = vector.shape_cast %94 : vector<1x256x32xf32> to vector<256x32xf32>
    %96 = vector.shape_cast %93 : vector<256x32xf32> to vector<1x256x32xf32>
    tpu.vector_store %arg12[%c0_39, %c0_40, %c64_41], %96 {strides = array<i32>} : memref<1x256x128xf32, #tpu.memory_space<vmem>>, vector<1x256x32xf32>,
    %97 = arith.truncf %93 : vector<256x32xf32> to vector<256x32xbf16>
    %c0_42 = arith.constant 0 : index
    %c64_43 = arith.constant 64 : index
    %98 = vector.load %arg13[%c0_42, %c64_43] : memref<256x128xbf16, #tpu.memory_space<vmem>>, vector<256x32xbf16>
    tpu.vector_store %arg13[%c0_42, %c64_43], %97 {strides = array<i32>} : memref<256x128xbf16, #tpu.memory_space<vmem>>, vector<256x32xbf16>,
    %c0_44 = arith.constant 0 : index
    %c0_45 = arith.constant 0 : index
    %99 = vector.load %arg13[%c0_44, %c0_45] : memref<256x128xbf16, #tpu.memory_space<vmem>>, vector<256x96xbf16>
    %c0_46 = arith.constant 0 : index
    %c0_47 = arith.constant 0 : index
    %100 = vector.load %arg7[%c0_46, %c0_47] : memref<1x96xbf16, #tpu.memory_space<vmem>>, vector<1x96xbf16>
    %101 = vector.broadcast %100 : vector<1x96xbf16> to vector<256x96xbf16>
    %102 = arith.mulf %99, %101 : vector<256x96xbf16>
    %c0_48 = arith.constant 0 : index
    %c0_49 = arith.constant 0 : index
    %103 = vector.load %arg8[%c0_48, %c0_49] : memref<1x96xbf16, #tpu.memory_space<vmem>>, vector<1x96xbf16>
    %104 = vector.broadcast %103 : vector<1x96xbf16> to vector<256x96xbf16>
    %105 = arith.addf %102, %104 : vector<256x96xbf16>
    %cst_50 = arith.constant 0.000000e+00 : bf16
    %106 = vector.broadcast %cst_50 : bf16 to vector<256x96xbf16>
    %107 = arith.maximumf %105, %106 : vector<256x96xbf16>
    %c0_51 = arith.constant 0 : index
    %c0_52 = arith.constant 0 : index
    %108 = vector.load %arg9[%c0_51, %c0_52] : memref<96x128xbf16, #tpu.memory_space<vmem>>, vector<96x128xbf16>
    %cst_53 = arith.constant dense<0.000000e+00> : vector<256x128xf32>
    %109 = tpu.matmul %107, %108, %cst_53 {dimension_numbers = #tpu.dot_dimension_numbers<[1], [0], [0], [1], [0, 0, 1, 1], [], []>} : vector<256x96xbf16>, vector<96x128xbf16>, vector<256x128xf32> -> vector<256x128xf32>
    %c0_54 = arith.constant 0 : index
    %c0_55 = arith.constant 0 : index
    %110 = vector.load %arg10[%c0_54, %c0_55] : memref<1x128xf32, #tpu.memory_space<vmem>>, vector<1x128xf32>
    %111 = vector.broadcast %110 : vector<1x128xf32> to vector<256x128xf32>
    %112 = arith.addf %109, %111 : vector<256x128xf32>
    %cst_56 = arith.constant 0.000000e+00 : f32
    %113 = vector.broadcast %cst_56 : f32 to vector<256x128xf32>
    %114 = arith.maximumf %112, %113 : vector<256x128xf32>
    %115 = arith.truncf %114 : vector<256x128xf32> to vector<256x128xbf16>
    %c0_57 = arith.constant 0 : index
    %c0_58 = arith.constant 0 : index
    %116 = vector.load %arg11[%c0_57, %c0_58] : memref<128x288xbf16, #tpu.memory_space<vmem>>, vector<128x288xbf16>
    %cst_59 = arith.constant dense<0.000000e+00> : vector<256x288xf32>
    %117 = tpu.matmul %115, %116, %cst_59 {dimension_numbers = #tpu.dot_dimension_numbers<[1], [0], [0], [1], [0, 0, 1, 1], [], []>} : vector<256x128xbf16>, vector<128x288xbf16>, vector<256x288xf32> -> vector<256x288xf32>
    %118 = arith.truncf %117 : vector<256x288xf32> to vector<256x288xbf16>
    %c24_60 = arith.constant 24 : index
    %c0_61 = arith.constant 0 : index
    %119 = vector.load %arg14[%c24_60, %c0_61] : memref<304x288xbf16, #tpu.memory_space<vmem>>, vector<256x288xbf16>
    tpu.vector_store %arg14[%c24_60, %c0_61], %118 {strides = array<i32>} : memref<304x288xbf16, #tpu.memory_space<vmem>>, vector<256x288xbf16>,
    %cst_62 = arith.constant 0.000000e+00 : f32
    %120 = vector.broadcast %cst_62 : f32 to vector<256x32xf32>
    %cst_63 = arith.constant 0.000000e+00 : f32
    %121 = vector.broadcast %cst_63 : f32 to vector<256x32xf32>
    %c7_64 = arith.constant 7 : index
    %c0_65 = arith.constant 0 : index
    %122 = vector.load %arg14[%c7_64, %c0_65] : memref<304x288xbf16, #tpu.memory_space<vmem>>, vector<256x32xbf16>
    %123 = arith.extf %122 : vector<256x32xbf16> to vector<256x32xf32>
    %124 = arith.addf %121, %123 : vector<256x32xf32>
    %c23_66 = arith.constant 23 : index
    %c96_67 = arith.constant 96 : index
    %125 = vector.load %arg14[%c23_66, %c96_67] : memref<304x288xbf16, #tpu.memory_space<vmem>>, vector<256x32xbf16>
    %126 = arith.extf %125 : vector<256x32xbf16> to vector<256x32xf32>
    %127 = arith.addf %124, %126 : vector<256x32xf32>
    %c39_68 = arith.constant 39 : index
    %c192_69 = arith.constant 192 : index
    %128 = vector.load %arg14[%c39_68, %c192_69] : memref<304x288xbf16, #tpu.memory_space<vmem>>, vector<256x32xbf16>
    %129 = arith.extf %128 : vector<256x32xbf16> to vector<256x32xf32>
    %130 = arith.addf %127, %129 : vector<256x32xf32>
    %cst_70 = arith.constant 0.000000e+00 : f32
    %131 = vector.shape_cast %28 : vector<256x1xi1> to vector<256x1xi1>
    %132 = vector.broadcast %131 : vector<256x1xi1> to vector<256x32xi1>
    %133 = vector.broadcast %cst_70 : f32 to vector<256x32xf32>
    %134 = arith.select %132, %130, %133 : vector<256x32xi1>, vector<256x32xf32>
    %135 = arith.addf %120, %134 : vector<256x32xf32>
    %cst_71 = arith.constant 0.000000e+00 : f32
    %136 = vector.broadcast %cst_71 : f32 to vector<256x32xf32>
    %c8_72 = arith.constant 8 : index
    %c32_73 = arith.constant 32 : index
    %137 = vector.load %arg14[%c8_72, %c32_73] : memref<304x288xbf16, #tpu.memory_space<vmem>>, vector<256x32xbf16>
    %138 = arith.extf %137 : vector<256x32xbf16> to vector<256x32xf32>
    %139 = arith.addf %136, %138 : vector<256x32xf32>
    %c24_74 = arith.constant 24 : index
    %c128_75 = arith.constant 128 : index
    %140 = vector.load %arg14[%c24_74, %c128_75] : memref<304x288xbf16, #tpu.memory_space<vmem>>, vector<256x32xbf16>
    %141 = arith.extf %140 : vector<256x32xbf16> to vector<256x32xf32>
    %142 = arith.addf %139, %141 : vector<256x32xf32>
    %c40_76 = arith.constant 40 : index
    %c224_77 = arith.constant 224 : index
    %143 = vector.load %arg14[%c40_76, %c224_77] : memref<304x288xbf16, #tpu.memory_space<vmem>>, vector<256x32xbf16>
    %144 = arith.extf %143 : vector<256x32xbf16> to vector<256x32xf32>
    %145 = arith.addf %142, %144 : vector<256x32xf32>
    %146 = arith.addf %135, %145 : vector<256x32xf32>
    %cst_78 = arith.constant 0.000000e+00 : f32
    %147 = vector.broadcast %cst_78 : f32 to vector<256x32xf32>
    %c9_79 = arith.constant 9 : index
    %c64_80 = arith.constant 64 : index
    %148 = vector.load %arg14[%c9_79, %c64_80] : memref<304x288xbf16, #tpu.memory_space<vmem>>, vector<256x32xbf16>
    %149 = arith.extf %148 : vector<256x32xbf16> to vector<256x32xf32>
    %150 = arith.addf %147, %149 : vector<256x32xf32>
    %c25_81 = arith.constant 25 : index
    %c160_82 = arith.constant 160 : index
    %151 = vector.load %arg14[%c25_81, %c160_82] : memref<304x288xbf16, #tpu.memory_space<vmem>>, vector<256x32xbf16>
    %152 = arith.extf %151 : vector<256x32xbf16> to vector<256x32xf32>
    %153 = arith.addf %150, %152 : vector<256x32xf32>
    %c41_83 = arith.constant 41 : index
    %c256_84 = arith.constant 256 : index
    %154 = vector.load %arg14[%c41_83, %c256_84] : memref<304x288xbf16, #tpu.memory_space<vmem>>, vector<256x32xbf16>
    %155 = arith.extf %154 : vector<256x32xbf16> to vector<256x32xf32>
    %156 = arith.addf %153, %155 : vector<256x32xf32>
    %cst_85 = arith.constant 0.000000e+00 : f32
    %157 = vector.shape_cast %30 : vector<256x1xi1> to vector<256x1xi1>
    %158 = vector.broadcast %157 : vector<256x1xi1> to vector<256x32xi1>
    %159 = vector.broadcast %cst_85 : f32 to vector<256x32xf32>
    %160 = arith.select %158, %156, %159 : vector<256x32xi1>, vector<256x32xf32>
    %161 = arith.addf %146, %160 : vector<256x32xf32>
    %c0_86 = arith.constant 0 : index
    %c0_87 = arith.constant 0 : index
    %c96_88 = arith.constant 96 : index
    %162 = vector.load %arg12[%c0_86, %c0_87, %c96_88] : memref<1x256x128xf32, #tpu.memory_space<vmem>>, vector<1x256x32xf32>
    %163 = vector.shape_cast %162 : vector<1x256x32xf32> to vector<256x32xf32>
    %164 = vector.shape_cast %161 : vector<256x32xf32> to vector<1x256x32xf32>
    tpu.vector_store %arg12[%c0_86, %c0_87, %c96_88], %164 {strides = array<i32>} : memref<1x256x128xf32, #tpu.memory_space<vmem>>, vector<1x256x32xf32>,
    %165 = arith.truncf %161 : vector<256x32xf32> to vector<256x32xbf16>
    %c0_89 = arith.constant 0 : index
    %c96_90 = arith.constant 96 : index
    %166 = vector.load %arg13[%c0_89, %c96_90] : memref<256x128xbf16, #tpu.memory_space<vmem>>, vector<256x32xbf16>
    tpu.vector_store %arg13[%c0_89, %c96_90], %165 {strides = array<i32>} : memref<256x128xbf16, #tpu.memory_space<vmem>>, vector<256x32xbf16>,
    return
  }
  func.func @transform_0(%arg0: i32) -> (i32, i32, i32) {
    %c0_i32 = arith.constant 0 : i32
    %c0_i32_0 = arith.constant 0 : i32
    %c0_i32_1 = arith.constant 0 : i32
    return %arg0, %c0_i32, %c0_i32_0 : i32, i32, i32
  }
  func.func @transform_1(%arg0: i32) -> (i32, i32) {
    %c0_i32 = arith.constant 0 : i32
    %c0_i32_0 = arith.constant 0 : i32
    %c0_i32_1 = arith.constant 0 : i32
    return %c0_i32, %c0_i32_0 : i32, i32
  }
  func.func @transform_2(%arg0: i32) -> (i32, i32) {
    %c0_i32 = arith.constant 0 : i32
    %c0_i32_0 = arith.constant 0 : i32
    %c0_i32_1 = arith.constant 0 : i32
    return %c0_i32, %c0_i32_0 : i32, i32
  }
  func.func @transform_3(%arg0: i32) -> (i32, i32) {
    %c0_i32 = arith.constant 0 : i32
    %c0_i32_0 = arith.constant 0 : i32
    %c0_i32_1 = arith.constant 0 : i32
    return %c0_i32, %c0_i32_0 : i32, i32
  }
  func.func @transform_4(%arg0: i32) -> (i32, i32) {
    %c0_i32 = arith.constant 0 : i32
    %c0_i32_0 = arith.constant 0 : i32
    %c0_i32_1 = arith.constant 0 : i32
    return %c0_i32, %c0_i32_0 : i32, i32
  }
  func.func @transform_5(%arg0: i32) -> (i32, i32) {
    %c0_i32 = arith.constant 0 : i32
    %c0_i32_0 = arith.constant 0 : i32
    %c0_i32_1 = arith.constant 0 : i32
    return %c0_i32, %c0_i32_0 : i32, i32
  }
  func.func @transform_6(%arg0: i32) -> (i32, i32) {
    %c0_i32 = arith.constant 0 : i32
    %c0_i32_0 = arith.constant 0 : i32
    %c0_i32_1 = arith.constant 0 : i32
    return %c0_i32, %c0_i32_0 : i32, i32
  }
  func.func @transform_7(%arg0: i32) -> (i32, i32) {
    %c0_i32 = arith.constant 0 : i32
    %c0_i32_0 = arith.constant 0 : i32
    %c0_i32_1 = arith.constant 0 : i32
    return %c0_i32, %c0_i32_0 : i32, i32
  }
  func.func @transform_8(%arg0: i32) -> (i32, i32) {
    %c0_i32 = arith.constant 0 : i32
    %c0_i32_0 = arith.constant 0 : i32
    %c0_i32_1 = arith.constant 0 : i32
    return %c0_i32, %c0_i32_0 : i32, i32
  }
  func.func @transform_9(%arg0: i32) -> (i32, i32) {
    %c0_i32 = arith.constant 0 : i32
    %c0_i32_0 = arith.constant 0 : i32
    %c0_i32_1 = arith.constant 0 : i32
    return %c0_i32, %c0_i32_0 : i32, i32
  }
  func.func @transform_10(%arg0: i32) -> (i32, i32) {
    %c0_i32 = arith.constant 0 : i32
    %c0_i32_0 = arith.constant 0 : i32
    %c0_i32_1 = arith.constant 0 : i32
    return %c0_i32, %c0_i32_0 : i32, i32
  }
  func.func @transform_11(%arg0: i32) -> (i32, i32, i32) {
    %c0_i32 = arith.constant 0 : i32
    %c0_i32_0 = arith.constant 0 : i32
    %c0_i32_1 = arith.constant 0 : i32
    return %arg0, %c0_i32, %c0_i32_0 : i32, i32, i32
  }
}

</mosaic_0001>

<bundles_post_ra>
// kernel: tpu_custom_call.1
= control target key start
LH: loop header
LB: loop body
LE: loop exit
PB: predicated region body
PF: predicated region fallthrough
CT: control target
= control target key end

     0   :  { %16 = vsyncpa [#allocation5], 0  ;;  %s14166_s0 = inlined_call_operand.vmem [shape: f32[2,256,64], index: 0, kind: input, shape index: {}]   ;;  %s14167_s1 = inlined_call_operand.vmem [shape: bf16[1,64], index: 1, kind: input, shape index: {}]   ;;  %s14168_s2 = inlined_call_operand.vmem [shape: bf16[1,64], index: 2, kind: input, shape index: {}]   ;;  %s14169_s3 = inlined_call_operand.vmem [shape: bf16[64,128], index: 3, kind: input, shape index: {}]   ;;  %s14170_s4 = inlined_call_operand.vmem [shape: f32[1,128], index: 4, kind: input, shape index: {}]   ;;  %s14171_s5 = inlined_call_operand.vmem [shape: bf16[128,288], index: 5, kind: input, shape index: {}]   ;;  %s14172_s6 = inlined_call_operand.vmem [shape: bf16[1,96], index: 6, kind: input, shape index: {}]   ;;  %s14173_s7 = inlined_call_operand.vmem [shape: bf16[1,96], index: 7, kind: input, shape index: {}]   ;;  %s14174_s8 = inlined_call_operand.vmem [shape: bf16[96,128], index: 8, kind: input, shape index: {}]   ;;  %s14175_s9 = inlined_call_operand.vmem [shape: f32[1,128], index: 9, kind: input, shape index: {}]   ;;  %s14176_s10 = inlined_call_operand.vmem [shape: bf16[128,288], index: 10, kind: input, shape index: {}]   ;;  %s14177_s11 = inlined_call_operand.hbm [shape: f32[2,256,128], index: 11, kind: output, shape index: {}]  }
   0x1   :  { %18 = vsyncpa [#allocation5 + $0x1], 0  ;;  %s9765_s17 = smov 0   ;;  %s9767_s18 = smov 0  }
   0x2   :  { %s9769_s19 = smov 0   ;;  %s9771_s20 = smov 0  }
   0x3 LB: > { %s9786_s21 = sadd.s32 4294967295, %s9696_s20   ;;  %s7971_s22 = sadd.s32 4294967294, %s9696_s20   ;;  %s9696_s20 = sphi %s9771_s20, %s15476_s20   ;;  %s9692_s19 = sphi %s9769_s19, %s15475_s19   ;;  %s9688_s18 = sphi %s9767_s18, %s15474_s18   ;;  %s9684_s17 = sphi %s9765_s17, %s15473_s17  }
   0x4   : > { %s9790_s23 = sadd.s32 1, %s9696_s20   ;;  %s267_s24 = sadd.s32 1, %s9692_s19 }
   0x5   : > { %s264_s25 = ssub.s32 %s9696_s20, %s9790_s23  ;;  %p277_p0 = scmp.ne.s32.totalorder %s9692_s19, %s9688_s18 }
   0x6   : > { %p265_p1 = scmp.eq.s32.totalorder %s264_s25, 0  ;;  %p278_p2 = scmp.eq.s32.totalorder %s9786_s21, 1 }
   0x7   : > { %p283_p3 = scmp.ne.s32.totalorder %s9688_s18, %s9684_s17  ;;  %p284_p4 = scmp.eq.s32.totalorder %s7971_s22, 1 }
   0x8   : > { %s9801_s26 = scalar_select %p265_p1, %s9692_s19, %s267_s24  }
   0x9   : > { %p9803_p5 = por %p278_p2, %p277_p0  ;;  %p9807_p6 = por %p284_p4, %p283_p3 }
   0xa   : > { %p7974_p7 = scmp.ge.s32.totalorder %s9696_s20, 1  ;;  %p340_p8 = scmp.lt.s32.totalorder %s9696_s20, 3 }
   0xc   : > { %p341_p9 = pnand %p7974_p7, %p340_p8 }
   0xe   : > { %344 = sbr.rel (%p341_p9) target bundleno = 2211 (0x8a3), region = 64 }
  0x15   : > { %v9222_v0 = vld [vmem:[%s14169_s3] sm:$0xff]   ;;  %p380_p10 = scmp.lt.s32.totalorder %s9786_s21, 1  ;;  %v498_v1 = vlaneseq  ;;  %v9223_v2 = vld [vmem:[%s14169_s3 + $0x8] sm:$0xff]   ;;  %v9698_v3 = vmov 0   ;;  %v9224_v4 = vld [vmem:[%s14169_s3 + $0x10] sm:$0xff]   ;;  %vm14357_vm0 = vcmask 523264  }
  0x16   : > { %8167 = vmatprep.subr.bf16.mxu0 %v9222_v0  ;;  %387 = vst [vmem:[#allocation3 + $0x8] sm:$0xff] %v9698_v3  ;;  %386 = vst [vmem:[#allocation3] sm:$0xff] %v9698_v3  ;;  %1547 = vmatprep.mubr.bf16.mxu1 %v9698_v3  ;;  %v995_v6 = vld [vmem:[%s14167_s1] sm:$0x1]  ;;  %v9225_v7 = vld [vmem:[%s14169_s3 + $0x18] sm:$0xff]   ;;  %vm14355_vm1 = vcmask 261120  }
  0x17   : > { %s381_s14 = scalar_select %p380_p10, %s9786_s21, 1  ;;  %390 = vst [vmem:[#allocation3 + $0x18] sm:$0xf] %v9698_v3  ;;  %395 = vst [vmem:[#allocation3 + $0x1a0] sm:$0xf0] %v9698_v3  ;;  %8168 = vmatpush3.bf16.msra.mxu0 %v9222_v0  ;;  %v9830_v5 = vshrl.u32 %v498_v1, 7  ;;  %v997_v21 = vpack.i.b16 %v995_v6, %v995_v6 }
  0x18   : > { %399 = vst [vmem:[#allocation3 + $0x1b8] sm:$0xff] %v9698_v3  ;;  %8169 = vmatprep.subr.bf16.mxu0 %v9223_v2  ;;  %v1019_v10 = vld [vmem:[%s14168_s2] sm:$0x1]  ;;  %v9912_v32 = vld [vmem:[%s14171_s5 + $0x8] ss:$12 sps:$4 sm:$0xff]   ;;  %vm396_vm2 = vcmask 261124  }
  0x19   : > { %s8075_s22 = sshll.u32 %s381_s14, 8  ;;  %14552 = vst [vmem:[#allocation7_spill] sm:$0xff] %v9830_v5  ;;  %v9881_v22 = vsub.s32 0, %v9830_v5  ;;  %v1021_v33 = vpack.i.b16 %v1019_v10, %v1019_v10  ;;  %397 = vst.msk [vmem:[#allocation3 + $0x1a8] sm:$0xf0] %vm396_vm2, %v9698_v3  ;;  %vm14354_vm3 = vcmask 257024  }
  0x1a   : > { %s9835_s29 = scalar_lea.vmem %s14166_s0, %s8075_s22  ;;  %400 = vst.msk [vmem:[#allocation3 + $0x1c0] sm:$0xff] %vm14355_vm1, %v9698_v3  ;;  %vm14356_vm4 = vcmask 1043456   ;;  %s14407_s22 = smov 32   ;;  %vm14358_vm5 = vcmask 1046528   ;;  %vm14360_vm6 = vcmask 1040384  }
  0x1b   : > { %v9844_v8 = vld [vmem:[%s9835_s29] sm:$0xff]  ;;  %v9847_v9 = vld [vmem:[%s9835_s29 + $0x8] sm:$0xff]  ;;  %v9853_v11 = vld [vmem:[%s9835_s29 + $0x10] sm:$0xff]  ;;  %8170 = vmatpush3.bf16.msra.mxu0 %v9223_v2  ;;  %14562 = vst [vmem:[#allocation17_spill] sm:$0xff] %v9881_v22  ;;  %v9942_v43 = vrot.slane %v997_v21, %v9881_v22  ;;  %v9972_v53 = vrot.slane %v1021_v33, %v9881_v22  ;;  %s9700_s24 = smov 64   ;;  %s14405_s25 = smov 96  }
  0x1c   : > { %14553 = vst [vmem:[#allocation8_spill] sm:$0xff] %v9844_v8  ;;  %14554 = vst [vmem:[#allocation9_spill] sm:$0xff] %v9847_v9  ;;  %v466_v12 = vpack.c.bf16 %v9847_v9, %v9844_v8  ;;  %v9858_v13 = vld [vmem:[%s9835_s29 + $0x18] sm:$0xff]  ;;  %v9861_v14 = vld [vmem:[%s9835_s29 + $0x20] sm:$0xff]  ;;  %8171 = vmatprep.subr.bf16.mxu0 %v9224_v4  ;;  %s14404_s16 = sand.u32 1, %s9688_s18   ;;  %s15040_s13 = smov 32  }
  0x1d   : > { %14555 = vst [vmem:[#allocation10_spill] sm:$0xff] %v9853_v11  ;;  %14556 = vst [vmem:[#allocation11_spill] sm:$0xff] %v9858_v13  ;;  %v9864_v15 = vld [vmem:[%s9835_s29 + $0x28] sm:$0xff]  ;;  %v467_v16 = vpack.c.bf16 %v9858_v13, %v9853_v11  ;;  %v9871_v18 = vld [vmem:[%s9835_s29 + $0x30] sm:$0xff]  ;;  %s15204_s14 = smov 96  }
  0x1e   : > { %14557 = vst [vmem:[#allocation12_spill] sm:$0xff] %v9861_v14  ;;  %14558 = vst [vmem:[#allocation13_spill] sm:$0xff] %v9864_v15  ;;  %v468_v17 = vpack.c.bf16 %v9864_v15, %v9861_v14  ;;  %v9874_v19 = vld [vmem:[%s9835_s29 + $0x38] sm:$0xff]  ;;  %v9877_v20 = vld [vmem:[%s9835_s29 + $0x40] sm:$0xff] }
  0x1f   : > { %14559 = vst [vmem:[#allocation14_spill] sm:$0xff] %v9871_v18  ;;  %14560 = vst [vmem:[#allocation15_spill] sm:$0xff] %v9874_v19  ;;  %v469_v23 = vpack.c.bf16 %v9874_v19, %v9871_v18  ;;  %v9886_v24 = vld [vmem:[%s9835_s29 + $0x48] sm:$0xff]  ;;  %v9889_v25 = vld [vmem:[%s9835_s29 + $0x50] sm:$0xff]  ;;  %8172 = vmatpush3.bf16.msra.mxu0 %v9224_v4 }
  0x20   : > { %14561 = vst [vmem:[#allocation16_spill] sm:$0xff] %v9877_v20  ;;  %482 = vst.msk [vmem:[#allocation2] sm:$0xff] %vm14357_vm0, %v466_v12  ;;  %v9892_v26 = vld [vmem:[%s9835_s29 + $0x58] sm:$0xff]  ;;  %v470_v27 = vpack.c.bf16 %v9886_v24, %v9877_v20  ;;  %v9901_v29 = vld [vmem:[%s9835_s29 + $0x60] sm:$0xff]  ;;  %8173 = vmatprep.subr.bf16.mxu0 %v9225_v7 }
  0x21   : > { %14563 = vst [vmem:[#allocation18_spill] sm:$0xff] %v9886_v24  ;;  %14564 = vst [vmem:[#allocation19_spill] sm:$0xff] %v9889_v25  ;;  %v471_v28 = vpack.c.bf16 %v9892_v26, %v9889_v25  ;;  %v9904_v30 = vld [vmem:[%s9835_s29 + $0x68] sm:$0xff]  ;;  %v9907_v31 = vld [vmem:[%s9835_s29 + $0x70] sm:$0xff] }
  0x22   : > { %14565 = vst [vmem:[#allocation20_spill] sm:$0xff] %v9892_v26  ;;  %483 = vst.msk [vmem:[#allocation2 + $0x8] sm:$0xff] %vm14357_vm0, %v467_v16  ;;  %v472_v34 = vpack.c.bf16 %v9904_v30, %v9901_v29  ;;  %v9918_v35 = vld [vmem:[%s9835_s29 + $0x78] sm:$0xff]  ;;  %v9921_v36 = vld [vmem:[%s9835_s29 + $0x80] sm:$0xff] }
  0x23   : > { %484 = vst.msk [vmem:[#allocation2 + $0x10] sm:$0xff] %vm14357_vm0, %v468_v17  ;;  %14566 = vst [vmem:[#allocation21_spill] sm:$0xff] %v9901_v29  ;;  %v9924_v37 = vld [vmem:[%s9835_s29 + $0x88] sm:$0xff]  ;;  %v473_v38 = vpack.c.bf16 %v9918_v35, %v9907_v31  ;;  %v9933_v40 = vld [vmem:[%s9835_s29 + $0x90] sm:$0xff]  ;;  %8174 = vmatpush3.bf16.msra.mxu0 %v9225_v7 }
  0x24   : > { %14567 = vst [vmem:[#allocation22_spill] sm:$0xff] %v9904_v30  ;;  %14568 = vst [vmem:[#allocation23_spill] sm:$0xff] %v9907_v31  ;;  %v474_v39 = vpack.c.bf16 %v9924_v37, %v9921_v36  ;;  %v9936_v41 = vld [vmem:[%s9835_s29 + $0x98] sm:$0xff]  ;;  %v9939_v42 = vld [vmem:[%s9835_s29 + $0xa0] sm:$0xff]  ;;  %8207 = vmatprep.subr.bf16.mxu0 %v9912_v32 }
  0x25   : > { %485 = vst.msk [vmem:[#allocation2 + $0x18] sm:$0xff] %vm14357_vm0, %v469_v23  ;;  %14569 = vst [vmem:[#allocation24_spill] sm:$0xff] %v9918_v35  ;;  %v475_v44 = vpack.c.bf16 %v9936_v41, %v9933_v40  ;;  %v9948_v45 = vld [vmem:[%s9835_s29 + $0xa8] sm:$0xff]  ;;  %v9951_v46 = vld [vmem:[%s9835_s29 + $0xb0] sm:$0xff] }
  0x26   : > { %14570 = vst [vmem:[#allocation25_spill] sm:$0xff] %v9921_v36  ;;  %14571 = vst [vmem:[#allocation26_spill] sm:$0xff] %v9924_v37  ;;  %v9954_v47 = vld [vmem:[%s9835_s29 + $0xb8] sm:$0xff]  ;;  %v476_v48 = vpack.c.bf16 %v9948_v45, %v9939_v42  ;;  %v9963_v50 = vld [vmem:[%s9835_s29 + $0xc0] sm:$0xff] }
  0x27   : > { %486 = vst.msk [vmem:[#allocation2 + $0x20] sm:$0xff] %vm14357_vm0, %v470_v27  ;;  %487 = vst.msk [vmem:[#allocation2 + $0x28] sm:$0xff] %vm14357_vm0, %v471_v28  ;;  %v477_v49 = vpack.c.bf16 %v9954_v47, %v9951_v46  ;;  %v9966_v51 = vld [vmem:[%s9835_s29 + $0xc8] sm:$0xff]  ;;  %v9969_v52 = vld [vmem:[%s9835_s29 + $0xd0] sm:$0xff] }
  0x28   : > { %14572 = vst [vmem:[#allocation27_spill] sm:$0xff] %v9933_v40  ;;  %14573 = vst [vmem:[#allocation28_spill] sm:$0xff] %v9936_v41  ;;  %v478_v54 = vpack.c.bf16 %v9966_v51, %v9963_v50  ;;  %v9978_v55 = vld [vmem:[%s9835_s29 + $0xd8] sm:$0xff]  ;;  %v9981_v56 = vld [vmem:[%s9835_s29 + $0xe0] sm:$0xff] }
  0x29   : > { %14574 = vst [vmem:[#allocation29_spill] sm:$0xff] %v9939_v42  ;;  %488 = vst.msk [vmem:[#allocation2 + $0x30] sm:$0xff] %vm14357_vm0, %v472_v34  ;;  %v9984_v57 = vld [vmem:[%s9835_s29 + $0xe8] sm:$0xff]  ;;  %v979_v58 = vld [vmem:[#allocation2] sm:$0xff]  ;;  %v479_v59 = vpack.c.bf16 %v9978_v55, %v9969_v52 }
  0x2a   : > { %14575 = vst [vmem:[#allocation30_spill] sm:$0xff] %v9948_v45  ;;  %14576 = vst [vmem:[#allocation31_spill] sm:$0xff] %v9951_v46  ;;  %v480_v60 = vpack.c.bf16 %v9984_v57, %v9981_v56  ;;  %v9993_v61 = vld [vmem:[%s9835_s29 + $0xf0] sm:$0xff]  ;;  %v9996_v62 = vld [vmem:[%s9835_s29 + $0xf8] sm:$0xff]  ;;  %v1003_v63 = vmul.bf16 %v9942_v43, %v979_v58  ;;  %s7975_s29 = sshll.u32 %s14404_s16, 8 }
  0x2b   : > { %14577 = vst [vmem:[#allocation32_spill] sm:$0xff] %v9954_v47  ;;  %489 = vst.msk [vmem:[#allocation2 + $0x38] sm:$0xff] %vm14357_vm0, %v473_v38  ;;  %v980_v0 = vld [vmem:[#allocation2 + $0x8] sm:$0xff]  ;;  %v981_v1 = vld [vmem:[#allocation2 + $0x10] sm:$0xff]  ;;  %v481_v2 = vpack.c.bf16 %v9996_v62, %v9993_v61  ;;  %s12064_s30 = scalar_lea.vmem [#allocation4], %s7975_s29 }
  0x2c   : > { %490 = vst.msk [vmem:[#allocation2 + $0x40] sm:$0xff] %vm14357_vm0, %v474_v39  ;;  %14578 = vst [vmem:[#allocation33_spill] sm:$0xff] %v9963_v50  ;;  %v1004_v4 = vmul.bf16 %v9942_v43, %v980_v0  ;;  %v1005_v6 = vmul.bf16 %v9942_v43, %v981_v1  ;;  %v982_v7 = vld [vmem:[#allocation2 + $0x18] sm:$0xff]  ;;  %v1027_v10 = vadd.bf16 %v9972_v53, %v1003_v63  ;;  %v9227_v34 = vld [vmem:[%s14171_s5 + $0x20] ss:$12 sps:$4 sm:$0xff]   ;;  %s7909_s15 = sshll.u32 %s12064_s30, 4  ;;  %s14114_s15 = int_to_ptr.vmem [resolvable:$true] %s7909_s15 }
  0x2d   : > { %14579 = vst [vmem:[#allocation34_spill] sm:$0xff] %v9966_v51  ;;  %14580 = vst [vmem:[#allocation35_spill] sm:$0xff] %v9969_v52  ;;  %v1006_v21 = vmul.bf16 %v9942_v43, %v982_v7  ;;  %v9230_v39 = vld [vmem:[%s14171_s5 + $0x4] ss:$12 sps:$4 sm:$0xff]  }
  0x2e   : > { %491 = vst.msk [vmem:[#allocation2 + $0x48] sm:$0xff] %vm14357_vm0, %v475_v44  ;;  %14581 = vst [vmem:[#allocation36_spill] sm:$0xff] %v9978_v55  ;;  %v983_v12 = vld [vmem:[#allocation2 + $0x20] sm:$0xff]  ;;  %v1028_v16 = vadd.bf16 %v9972_v53, %v1004_v4  ;;  %v1029_v17 = vadd.bf16 %v9972_v53, %v1005_v6  ;;  %v1043_v23 = vmax.bf16 %v9698_v3, %v1027_v10  ;;  %1515 = vmatprep.subr.bf16.mxu1 %v9230_v39  ;;  %v9229_v4 = vld [vmem:[%s14171_s5 + $0x50] ss:$12 sps:$4 sm:$0xff]  }
  0x2f   : > { %14582 = vst [vmem:[#allocation37_spill] sm:$0xff] %v9981_v56  ;;  %14583 = vst [vmem:[#allocation38_spill] sm:$0xff] %v9984_v57  ;;  %v1007_v27 = vmul.bf16 %v9942_v43, %v983_v12  ;;  %v1030_v38 = vadd.bf16 %v9972_v53, %v1006_v21  ;;  %v9228_v58 = vld [vmem:[%s14171_s5 + $0x38] ss:$12 sps:$4 sm:$0xff]   ;;  %v9235_v21 = vld [vmem:[%s14171_s5 + $0x68] ss:$12 sps:$4 sm:$0xff]  }
  0x30   : > { %492 = vst.msk [vmem:[#allocation2 + $0x50] sm:$0xff] %vm14357_vm0, %v476_v48  ;;  %493 = vst.msk [vmem:[#allocation2 + $0x58] sm:$0xff] %vm14357_vm0, %v477_v49  ;;  %v1044_v28 = vmax.bf16 %v9698_v3, %v1028_v16  ;;  %v1045_v33 = vmax.bf16 %v9698_v3, %v1029_v17  ;;  %8175 = vmatprep.mubr.msk.bf16.mxu0 %vm14357_vm0, %v1043_v23  ;;  %v984_v48 = vld [vmem:[#allocation2 + $0x28] sm:$0xff]  ;;  %v985_v49 = vld [vmem:[#allocation2 + $0x30] sm:$0xff] }
  0x31   : > { %14584 = vst [vmem:[#allocation39_spill] sm:$0xff] %v9993_v61  ;;  %14585 = vst [vmem:[#allocation40_spill] sm:$0xff] %v9996_v62  ;;  %v1031_v44 = vadd.bf16 %v9972_v53, %v1007_v27  ;;  %v1008_v63 = vmul.bf16 %v9942_v43, %v984_v48  ;;  %v1009_v1 = vmul.bf16 %v9942_v43, %v985_v49  ;;  %v9239_v16 = vld [vmem:[%s14171_s5 + $0x30] ss:$12 sps:$4 sm:$0xff]   ;;  %v9240_v17 = vld [vmem:[%s14171_s5 + $0x4c] ss:$12 sps:$4 sm:$0xff]  }
  0x32   : > { %494 = vst.msk [vmem:[#allocation2 + $0x60] sm:$0xff] %vm14357_vm0, %v478_v54  ;;  %495 = vst.msk [vmem:[#allocation2 + $0x68] sm:$0xff] %vm14357_vm0, %v479_v59  ;;  %8176 = vmatmul.mubr.msk.bf16.vlgmr.msra.gmra.mrb[0].mxu0 %vm14357_vm0, %v1044_v28  ;;  %v9232_v54 = vld [vmem:[%s14171_s5] ss:$12 sps:$4 sm:$0xff]   ;;  %v9233_v59 = vld [vmem:[%s14171_s5 + $0x1c] ss:$12 sps:$4 sm:$0xff]  }
  0x33   : > { %496 = vst.msk [vmem:[#allocation2 + $0x70] sm:$0xff] %vm14357_vm0, %v480_v60  ;;  %497 = vst.msk [vmem:[#allocation2 + $0x78] sm:$0xff] %vm14357_vm0, %v481_v2  ;;  %8179 = vmatprep.mubr.msk.bf16.mxu0 %vm14357_vm0, %v1045_v33  ;;  %8208 = vmatpush3.bf16.msra.mxu0 %v9912_v32  ;;  %v1046_v60 = vmax.bf16 %v9698_v3, %v1030_v38  ;;  %v1047_v0 = vmax.bf16 %v9698_v3, %v1031_v44  ;;  %v9236_v32 = vld [vmem:[%s14171_s5 + $0x18] ss:$12 sps:$4 sm:$0xff]   ;;  %v9237_v2 = vld [vmem:[%s14171_s5 + $0x34] ss:$12 sps:$4 sm:$0xff]  }
  0x34   : > { %8209 = vmatprep.subr.bf16.mxu0 %v9227_v34  ;;  %1516 = vmatpush1.bf16.msra.mxu1 %v9232_v54  ;;  %v1032_v6 = vadd.bf16 %v9972_v53, %v1008_v63  ;;  %v986_v7 = vld [vmem:[#allocation2 + $0x38] sm:$0xff]  ;;  %v1033_v10 = vadd.bf16 %v9972_v53, %v1009_v1  ;;  %v987_v12 = vld [vmem:[#allocation2 + $0x40] sm:$0xff]  ;;  %v9243_v23 = vld [vmem:[%s14171_s5 + $0x48] ss:$12 sps:$4 sm:$0xff]  }
  0x35   : > { %1517 = vmatprep.subr.bf16.mxu1 %v9233_v59  ;;  %v1010_v28 = vmul.bf16 %v9942_v43, %v986_v7  ;;  %v9244_v33 = vld [vmem:[%s14171_s5 + $0x64] ss:$12 sps:$4 sm:$0xff]   ;;  %v1011_v38 = vmul.bf16 %v9942_v43, %v987_v12  ;;  %v9242_v39 = vld [vmem:[%s14171_s5 + $0x80] ss:$12 sps:$4 sm:$0xff]  }
  0x36   : > { %v1048_v27 = vmax.bf16 %v9698_v3, %v1032_v6  ;;  %v988_v44 = vld [vmem:[#allocation2 + $0x48] sm:$0xff]  ;;  %v9250_v63 = vld [vmem:[%s14171_s5 + $0x78] ss:$12 sps:$4 sm:$0xff]  }
  0x37   : > { %8210 = vmatpush3.bf16.msra.mxu0 %v9227_v34  ;;  %v1049_v34 = vmax.bf16 %v9698_v3, %v1033_v10  ;;  %v9246_v48 = vld [vmem:[%s14171_s5 + $0x60] ss:$12 sps:$4 sm:$0xff]   ;;  %v1034_v49 = vadd.bf16 %v9972_v53, %v1010_v28  ;;  %v989_v54 = vld [vmem:[#allocation2 + $0x50] sm:$0xff]  ;;  %v1035_v59 = vadd.bf16 %v9972_v53, %v1011_v38  ;;  %v1012_v1 = vmul.bf16 %v9942_v43, %v988_v44 }
  0x38   : > { %8211 = vmatprep.subr.bf16.mxu0 %v9228_v58  ;;  %1518 = vmatpush1.bf16.msra.mxu1 %v9236_v32 }
  0x39   : > { %1519 = vmatprep.subr.bf16.mxu1 %v9237_v2  ;;  %v1051_v32 = vmax.bf16 %v9698_v3, %v1035_v59  ;;  %v1013_v2 = vmul.bf16 %v9942_v43, %v989_v54  ;;  %v1036_v6 = vadd.bf16 %v9972_v53, %v1012_v1  ;;  %v991_v7 = vld [vmem:[#allocation2 + $0x60] sm:$0xff]  ;;  %v992_v28 = vld [vmem:[#allocation2 + $0x68] sm:$0xff] }
  0x3a   : > { %8180 = vmatmul.mubr.msk.bf16.gmra.mrb[4].mxu0 %vm14357_vm0, %v1046_v60  ;;  %v9249_v60 = vld [vmem:[%s14171_s5 + $0x98] ss:$12 sps:$4 sm:$0xff]   ;;  %v1016_v38 = vmul.bf16 %v9942_v43, %v992_v28  ;;  %v9251_v1 = vld [vmem:[%s14171_s5 + $0x94] ss:$12 sps:$4 sm:$0xff]  }
  0x3b   : > { %8183 = vmatprep.mubr.msk.bf16.mxu0 %vm14357_vm0, %v1047_v0  ;;  %8212 = vmatpush3.bf16.msra.mxu0 %v9228_v58  ;;  %v9247_v58 = vld [vmem:[%s14171_s5 + $0x7c] ss:$12 sps:$4 sm:$0xff]   ;;  %v1050_v0 = vmax.bf16 %v9698_v3, %v1034_v49  ;;  %v1037_v10 = vadd.bf16 %v9972_v53, %v1013_v2  ;;  %v1052_v12 = vmax.bf16 %v9698_v3, %v1036_v6 }
  0x3c   : > { %8213 = vmatprep.subr.bf16.mxu0 %v9229_v4  ;;  %1520 = vmatpush1.bf16.msra.mxu1 %v9239_v16  ;;  %v994_v54 = vld [vmem:[#allocation2 + $0x78] sm:$0xff]  ;;  %v9257_v2 = vld [vmem:[%s14171_s5 + $0xa8] ss:$12 sps:$4 sm:$0xff]  }
  0x3d   : > { %1521 = vmatprep.subr.bf16.mxu1 %v9240_v17  ;;  %v1053_v17 = vmax.bf16 %v9698_v3, %v1037_v10  ;;  %v1018_v59 = vmul.bf16 %v9942_v43, %v994_v54 }
  0x3f   : > { %8214 = vmatpush3.bf16.msra.mxu0 %v9229_v4  ;;  %v990_v4 = vld [vmem:[#allocation2 + $0x58] sm:$0xff] }
  0x40   : > { %8215 = vmatprep.subr.bf16.mxu0 %v9235_v21  ;;  %1522 = vmatpush1.bf16.msra.mxu1 %v9243_v23  ;;  %v1014_v16 = vmul.bf16 %v9942_v43, %v990_v4  ;;  %v10142_v4 = vld [vmem:[%s14170_s4] ss:$0 sm:$0xff] }
  0x41   : > { %1523 = vmatprep.subr.bf16.mxu1 %v9244_v33  ;;  %v993_v33 = vld [vmem:[#allocation2 + $0x70] sm:$0xff] }
  0x42   : > { %8184 = vmatmul.mubr.msk.bf16.gmra.mrb[8].mxu0 %vm14357_vm0, %v1048_v27  ;;  %v1038_v23 = vadd.bf16 %v9972_v53, %v1014_v16  ;;  %v1017_v44 = vmul.bf16 %v9942_v43, %v993_v33 }
  0x43   : > { %8187 = vmatprep.mubr.msk.bf16.mxu0 %vm14357_vm0, %v1049_v34  ;;  %8216 = vmatpush3.bf16.msra.mxu0 %v9235_v21  ;;  %v1015_v21 = vmul.bf16 %v9942_v43, %v991_v7  ;;  %v9253_v43 = vld [vmem:[%s14171_s5 + $0x90] ss:$12 sps:$4 sm:$0xff]  }
  0x44   : > { %8217 = vmatprep.subr.bf16.mxu0 %v9242_v39  ;;  %1524 = vmatpush1.bf16.msra.mxu1 %v9246_v48  ;;  %v1054_v34 = vmax.bf16 %v9698_v3, %v1038_v23  ;;  %v1040_v48 = vadd.bf16 %v9972_v53, %v1016_v38  ;;  %v1041_v49 = vadd.bf16 %v9972_v53, %v1017_v44 }
  0x45   : > { %1525 = vmatprep.subr.bf16.mxu1 %v9247_v58  ;;  %v1039_v27 = vadd.bf16 %v9972_v53, %v1015_v21 }
  0x46   : > { %v1056_v58 = vmax.bf16 %v9698_v3, %v1040_v48 }
  0x47   : > { %8218 = vmatpush3.bf16.msra.mxu0 %v9242_v39  ;;  %v1055_v39 = vmax.bf16 %v9698_v3, %v1039_v27 }
  0x48   : > { %8219 = vmatprep.subr.bf16.mxu0 %v9249_v60  ;;  %1526 = vmatpush1.bf16.msra.mxu1 %v9250_v63  ;;  %v1042_v63 = vadd.bf16 %v9972_v53, %v1018_v59  ;;  %v9254_v53 = vld [vmem:[%s14171_s5 + $0xac] ss:$12 sps:$4 sm:$0xff]  }
  0x49   : > { %1527 = vmatprep.subr.bf16.mxu1 %v9251_v1 }
  0x4a   : > { %8188 = vmatmul.mubr.msk.bf16.gmra.mrb[12].mxu0 %vm14357_vm0, %v1050_v0  ;;  %v1058_v0 = vmax.bf16 %v9698_v3, %v1042_v63 }
  0x4b   : > { %8191 = vmatprep.mubr.msk.bf16.mxu0 %vm14357_vm0, %v1051_v32  ;;  %8220 = vmatpush3.bf16.msra.mxu0 %v9249_v60  ;;  %v1057_v60 = vmax.bf16 %v9698_v3, %v1041_v49  ;;  %v9256_v32 = vld [vmem:[%s14171_s5 + $0xb0] ss:$12 sps:$4 sm:$0xff]  }
  0x4c   : > { %1528 = vmatpush1.bf16.msra.mxu1 %v9253_v43  ;;  %8221 = vmatprep.subr.bf16.mxu0 %v9256_v32 }
  0x4d   : > { %1529 = vmatprep.subr.bf16.mxu1 %v9254_v53 }
  0x4f   : > { %8222 = vmatpush3.bf16.msra.mxu0 %v9256_v32 }
  0x50   : > { %1530 = vmatpush1.bf16.msra.mxu1 %v9257_v2 }
  0x52   : > { %8192 = vmatmul.mubr.msk.bf16.gmra.mrb[16].mxu0 %vm14357_vm0, %v1052_v12 }
  0x53   : > { %8195 = vmatprep.mubr.msk.bf16.mxu0 %vm14357_vm0, %v1053_v17 }
  0x5a   : > { %8196 = vmatmul.mubr.msk.bf16.gmra.mrb[20].mxu0 %vm14357_vm0, %v1054_v34 }
  0x5b   : > { %8199 = vmatprep.mubr.msk.bf16.mxu0 %vm14357_vm0, %v1055_v39 }
  0x62   : > { %8200 = vmatmul.mubr.msk.bf16.gmra.mrb[24].mxu0 %vm14357_vm0, %v1056_v58 }
  0x63   : > { %8203 = vmatprep.mubr.msk.bf16.mxu0 %vm14357_vm0, %v1057_v60 }
  0x6a   : > { %8204 = vmatmul.mubr.msk.bf16.gmra.mrb[28].mxu0 %vm14357_vm0, %v1058_v0 }
 0x105   : > { %v8177_v6 = vpop.f32.mrb[0].mxu0 }
 0x106   : > { %v1189_v7 = vadd.f32 %v8177_v6, %v10142_v4  ;;  %v1180_v10 = vpop.f32.mrb[1].mxu0 }
 0x107   : > { %v1181_v12 = vadd.f32 %v10142_v4, %v1180_v10  ;;  %v8178_v16 = vpop.f32.mrb[2].mxu0 }
 0x108   : > { %v1192_v17 = vadd.f32 %v8178_v16, %v10142_v4  ;;  %v1183_v21 = vpop.f32.mrb[3].mxu0  ;;  %v1309_v27 = vmax.f32 %v1189_v7, 0.0 }
 0x109   : > { %v1184_v23 = vadd.f32 %v10142_v4, %v1183_v21  ;;  %v1307_v33 = vmax.f32 %v1181_v12, 0.0 }
 0x10a   : > { %v1310_v28 = vmax.f32 %v1192_v17, 0.0 }
 0x10b   : > { %v1308_v34 = vmax.f32 %v1184_v23, 0.0 }
 0x10c   : > { %v1340_v38 = vpack.c.bf16 %v1310_v28, %v1309_v27 }
 0x10d   : > { %v1339_v39 = vpack.c.bf16 %v1308_v34, %v1307_v33  ;;  %v8181_v44 = vpop.f32.mrb[4].mxu0 }
 0x10e   : > { %v1205_v48 = vadd.f32 %v8181_v44, %v10142_v4  ;;  %v1196_v49 = vpop.f32.mrb[5].mxu0 }
 0x10f   : > { %v1197_v54 = vadd.f32 %v10142_v4, %v1196_v49  ;;  %v8182_v58 = vpop.f32.mrb[6].mxu0  ;;  %1548 = vmatmul.mubr.bf16.vlgmr.msra.gmra.mrb[0].mxu1 %v1339_v39  ;;  %8223 = vmatprep.mubr.bf16.mxu0 %v1339_v39 }
 0x110   : > { %v1208_v59 = vadd.f32 %v8182_v58, %v10142_v4  ;;  %v1199_v60 = vpop.f32.mrb[7].mxu0  ;;  %8224 = vmatmul.mubr.bf16.vlgmr.msra.gmra.mrb[32].mxu0 %v1340_v38  ;;  %1557 = vmatprep.mubr.bf16.mxu1 %v9698_v3  ;;  %v1313_v0 = vmax.f32 %v1205_v48, 0.0 }
 0x111   : > { %v1200_v63 = vadd.f32 %v10142_v4, %v1199_v60  ;;  %v1311_v43 = vmax.f32 %v1197_v54, 0.0 }
 0x112   : > { %v1314_v1 = vmax.f32 %v1208_v59, 0.0 }
 0x113   : > { %v1312_v53 = vmax.f32 %v1200_v63, 0.0 }
 0x114   : > { %v1342_v32 = vpack.c.bf16 %v1314_v1, %v1313_v0 }
 0x115   : > { %v1341_v2 = vpack.c.bf16 %v1312_v53, %v1311_v43  ;;  %v8185_v6 = vpop.f32.mrb[8].mxu0 }
 0x116   : > { %v1221_v7 = vadd.f32 %v8185_v6, %v10142_v4  ;;  %v1212_v10 = vpop.f32.mrb[9].mxu0 }
 0x117   : > { %v1213_v12 = vadd.f32 %v10142_v4, %v1212_v10  ;;  %v8186_v16 = vpop.f32.mrb[10].mxu0  ;;  %1558 = vmatmul.mubr.bf16.gmra.mrb[4].mxu1 %v1340_v38  ;;  %8227 = vmatprep.mubr.bf16.mxu0 %v1341_v2 }
 0x118   : > { %v1224_v17 = vadd.f32 %v8186_v16, %v10142_v4  ;;  %v1215_v21 = vpop.f32.mrb[11].mxu0  ;;  %8228 = vmatmul.mubr.bf16.gmra.mrb[36].mxu0 %v1342_v32  ;;  %1567 = vmatprep.mubr.bf16.mxu1 %v9698_v3  ;;  %v1317_v27 = vmax.f32 %v1221_v7, 0.0 }
 0x119   : > { %v1216_v23 = vadd.f32 %v10142_v4, %v1215_v21  ;;  %v1315_v33 = vmax.f32 %v1213_v12, 0.0 }
 0x11a   : > { %v1318_v28 = vmax.f32 %v1224_v17, 0.0 }
 0x11b   : > { %v1316_v34 = vmax.f32 %v1216_v23, 0.0 }
 0x11c   : > { %v1344_v39 = vpack.c.bf16 %v1318_v28, %v1317_v27 }
 0x11d   : > { %v1343_v44 = vpack.c.bf16 %v1316_v34, %v1315_v33  ;;  %v8189_v48 = vpop.f32.mrb[12].mxu0 }
 0x11e   : > { %v1237_v49 = vadd.f32 %v8189_v48, %v10142_v4  ;;  %v1228_v54 = vpop.f32.mrb[13].mxu0 }
 0x11f   : > { %v1229_v38 = vadd.f32 %v10142_v4, %v1228_v54  ;;  %v8190_v58 = vpop.f32.mrb[14].mxu0  ;;  %1568 = vmatmul.mubr.bf16.gmra.mrb[8].mxu1 %v1341_v2  ;;  %8231 = vmatprep.mubr.bf16.mxu0 %v1343_v44 }
 0x120   : > { %v1240_v59 = vadd.f32 %v8190_v58, %v10142_v4  ;;  %v1231_v60 = vpop.f32.mrb[15].mxu0  ;;  %8232 = vmatmul.mubr.bf16.gmra.mrb[40].mxu0 %v1344_v39  ;;  %1577 = vmatprep.mubr.bf16.mxu1 %v9698_v3  ;;  %v1321_v0 = vmax.f32 %v1237_v49, 0.0 }
 0x121   : > { %v1232_v63 = vadd.f32 %v10142_v4, %v1231_v60  ;;  %v1319_v43 = vmax.f32 %v1229_v38, 0.0 }
 0x122   : > { %v1322_v1 = vmax.f32 %v1240_v59, 0.0 }
 0x123   : > { %v1320_v53 = vmax.f32 %v1232_v63, 0.0 }
 0x124   : > { %v10163_v6 = vpack.c.bf16 %v1322_v1, %v1321_v0 }
 0x125   : > { %v1345_v7 = vpack.c.bf16 %v1320_v53, %v1319_v43  ;;  %v8193_v10 = vpop.f32.mrb[16].mxu0 }
 0x126   : > { %v1253_v12 = vadd.f32 %v8193_v10, %v10142_v4  ;;  %v1244_v2 = vpop.f32.mrb[17].mxu0 }
 0x127   : > { %v1245_v16 = vadd.f32 %v10142_v4, %v1244_v2  ;;  %v8194_v17 = vpop.f32.mrb[18].mxu0  ;;  %1578 = vmatmul.mubr.bf16.gmra.mrb[12].mxu1 %v1342_v32  ;;  %8235 = vmatprep.mubr.bf16.mxu0 %v1345_v7 }
 0x128   : > { %v1325_v21 = vmax.f32 %v1253_v12, 0.0  ;;  %v1256_v23 = vadd.f32 %v8194_v17, %v10142_v4  ;;  %v1247_v27 = vpop.f32.mrb[19].mxu0  ;;  %8236 = vmatmul.mubr.bf16.gmra.mrb[44].mxu0 %v10163_v6  ;;  %1587 = vmatprep.mubr.bf16.mxu1 %v9698_v3 }
 0x129   : > { %v1323_v28 = vmax.f32 %v1245_v16, 0.0  ;;  %v1248_v33 = vadd.f32 %v10142_v4, %v1247_v27 }
 0x12a   : > { %v1326_v34 = vmax.f32 %v1256_v23, 0.0 }
 0x12b   : > { %v1324_v48 = vmax.f32 %v1248_v33, 0.0 }
 0x12c   : > { %v1348_v49 = vpack.c.bf16 %v1326_v34, %v1325_v21 }
 0x12d   : > { %v1347_v54 = vpack.c.bf16 %v1324_v48, %v1323_v28  ;;  %v8197_v38 = vpop.f32.mrb[20].mxu0 }
 0x12e   : > { %v1269_v58 = vadd.f32 %v8197_v38, %v10142_v4  ;;  %v1260_v32 = vpop.f32.mrb[21].mxu0 }
 0x12f   : > { %v1261_v59 = vadd.f32 %v10142_v4, %v1260_v32  ;;  %v8198_v60 = vpop.f32.mrb[22].mxu0  ;;  %1588 = vmatmul.mubr.bf16.gmra.mrb[16].mxu1 %v1343_v44  ;;  %8239 = vmatprep.mubr.bf16.mxu0 %v1347_v54 }
 0x130   : > { %v1329_v63 = vmax.f32 %v1269_v58, 0.0  ;;  %v1272_v0 = vadd.f32 %v8198_v60, %v10142_v4  ;;  %v1263_v1 = vpop.f32.mrb[23].mxu0  ;;  %8240 = vmatmul.mubr.bf16.gmra.mrb[48].mxu0 %v1348_v49  ;;  %1597 = vmatprep.mubr.bf16.mxu1 %v9698_v3 }
 0x131   : > { %v1327_v43 = vmax.f32 %v1261_v59, 0.0  ;;  %v1264_v53 = vadd.f32 %v10142_v4, %v1263_v1 }
 0x132   : > { %v1330_v10 = vmax.f32 %v1272_v0, 0.0 }
 0x133   : > { %v1328_v12 = vmax.f32 %v1264_v53, 0.0 }
 0x134   : > { %v1350_v2 = vpack.c.bf16 %v1330_v10, %v1329_v63 }
 0x135   : > { %v1349_v16 = vpack.c.bf16 %v1328_v12, %v1327_v43  ;;  %v8201_v17 = vpop.f32.mrb[24].mxu0 }
 0x136   : > { %v1285_v21 = vadd.f32 %v8201_v17, %v10142_v4  ;;  %v1276_v23 = vpop.f32.mrb[25].mxu0 }
 0x137   : > { %v1277_v44 = vadd.f32 %v10142_v4, %v1276_v23  ;;  %v8202_v27 = vpop.f32.mrb[26].mxu0  ;;  %1598 = vmatmul.mubr.bf16.gmra.mrb[20].mxu1 %v1344_v39  ;;  %8243 = vmatprep.mubr.bf16.mxu0 %v1349_v16 }
 0x138   : > { %v1333_v28 = vmax.f32 %v1285_v21, 0.0  ;;  %v1288_v33 = vadd.f32 %v8202_v27, %v10142_v4  ;;  %v1279_v34 = vpop.f32.mrb[27].mxu0  ;;  %8244 = vmatmul.mubr.bf16.gmra.mrb[52].mxu0 %v1350_v2  ;;  %1607 = vmatprep.mubr.bf16.mxu1 %v9698_v3 }
 0x139   : > { %v1331_v48 = vmax.f32 %v1277_v44, 0.0  ;;  %v1280_v38 = vadd.f32 %v10142_v4, %v1279_v34 }
 0x13a   : > { %v1334_v58 = vmax.f32 %v1288_v33, 0.0 }
 0x13b   : > { %v1332_v32 = vmax.f32 %v1280_v38, 0.0 }
 0x13c   : > { %v1352_v59 = vpack.c.bf16 %v1334_v58, %v1333_v28 }
 0x13d   : > { %v1351_v60 = vpack.c.bf16 %v1332_v32, %v1331_v48  ;;  %v8205_v63 = vpop.f32.mrb[28].mxu0 }
 0x13e   : > { %v1301_v0 = vadd.f32 %v8205_v63, %v10142_v4  ;;  %v1292_v1 = vpop.f32.mrb[29].mxu0 }
 0x13f   : > { %v1293_v39 = vadd.f32 %v10142_v4, %v1292_v1  ;;  %v8206_v43 = vpop.f32.mrb[30].mxu0  ;;  %1608 = vmatmul.mubr.bf16.gmra.mrb[24].mxu1 %v1345_v7  ;;  %8247 = vmatprep.mubr.bf16.mxu0 %v1351_v60 }
 0x140   : > { %v1337_v53 = vmax.f32 %v1301_v0, 0.0  ;;  %v1304_v10 = vadd.f32 %v8206_v43, %v10142_v4  ;;  %v1295_v12 = vpop.f32.mrb[31].mxu0  ;;  %8248 = vmatmul.mubr.bf16.gmra.mrb[56].mxu0 %v1352_v59  ;;  %1617 = vmatprep.mubr.bf16.mxu1 %v9698_v3 }
 0x141   : > { %v1335_v17 = vmax.f32 %v1293_v39, 0.0  ;;  %v1296_v21 = vadd.f32 %v10142_v4, %v1295_v12 }
 0x142   : > { %v1338_v23 = vmax.f32 %v1304_v10, 0.0 }
 0x143   : > { %v1336_v44 = vmax.f32 %v1296_v21, 0.0 }
 0x144   : > { %v1354_v27 = vpack.c.bf16 %v1338_v23, %v1337_v53 }
 0x145   : > { %v1353_v28 = vpack.c.bf16 %v1336_v44, %v1335_v17 }
 0x147   : > { %1618 = vmatmul.mubr.bf16.gmra.mrb[28].mxu1 %v10163_v6  ;;  %8251 = vmatprep.mubr.bf16.mxu0 %v1353_v28 }
 0x148   : > { %8252 = vmatmul.mubr.bf16.gmra.mrb[60].mxu0 %v1354_v27  ;;  %1627 = vmatprep.mubr.bf16.mxu1 %v9698_v3 }
 0x14f   : > { %1628 = vmatmul.mubr.bf16.gmra.mrb[32].mxu1 %v1347_v54 }
 0x150   : > { %1637 = vmatprep.mubr.bf16.mxu1 %v9698_v3 }
 0x157   : > { %1638 = vmatmul.mubr.bf16.gmra.mrb[36].mxu1 %v1348_v49 }
 0x158   : > { %1647 = vmatprep.mubr.bf16.mxu1 %v9698_v3 }
 0x15f   : > { %1648 = vmatmul.mubr.bf16.gmra.mrb[40].mxu1 %v1349_v16 }
 0x160   : > { %1657 = vmatprep.mubr.bf16.mxu1 %v9698_v3 }
 0x167   : > { %1658 = vmatmul.mubr.bf16.gmra.mrb[44].mxu1 %v1350_v2 }
 0x168   : > { %1667 = vmatprep.mubr.bf16.mxu1 %v9698_v3 }
 0x16f   : > { %1668 = vmatmul.mubr.bf16.gmra.mrb[48].mxu1 %v1351_v60 }
 0x170   : > { %1677 = vmatprep.mubr.bf16.mxu1 %v9698_v3 }
 0x177   : > { %1678 = vmatmul.mubr.bf16.gmra.mrb[52].mxu1 %v1352_v59 }
 0x178   : > { %1687 = vmatprep.mubr.bf16.mxu1 %v9698_v3 }
 0x17f   : > { %1688 = vmatmul.mubr.bf16.gmra.mrb[56].mxu1 %v1353_v28 }
 0x180   : > { %1697 = vmatprep.mubr.bf16.mxu1 %v9698_v3 }
 0x187   : > { %1698 = vmatmul.mubr.bf16.gmra.mrb[60].mxu1 %v1354_v27 }
 0x188   : > { %5079 = vmatprep.mubr.bf16.mxu1 %v9698_v3 }
 0x1e2   : > { %v1549_v4 = vpop.f32.mrb[0].mxu1 }
 0x1e3   : > { %v1551_v6 = vpop.f32.mrb[1].mxu1  ;;  %v8225_v7 = vpop.f32.mrb[32].mxu0 }
 0x1e4   : > { %v1553_v49 = vpop.f32.mrb[2].mxu1  ;;  %v1742_v54 = vpop.f32.mrb[33].mxu0 }
 0x1e5   : > { %v1869_v2 = vpack.c.bf16 %v1553_v49, %v1549_v4  ;;  %v1555_v16 = vpop.f32.mrb[3].mxu1  ;;  %v8226_v33 = vpop.f32.mrb[34].mxu0 }
 0x1e6   : > { %v1870_v34 = vpack.c.bf16 %v1555_v16, %v1551_v6  ;;  %v1874_v48 = vpack.c.bf16 %v8226_v33, %v8225_v7  ;;  %v1745_v38 = vpop.f32.mrb[35].mxu0 }
 0x1e7   : > { %v1966_v58 = vrot.slane %v1869_v2, 4  ;;  %v1871_v32 = vpack.c.bf16 %v1745_v38, %v1742_v54 }
 0x1e8   : > { %v1967_v59 = vrot.slane %v1870_v34, 4  ;;  %v1973_v60 = vrot.slane %v1874_v48, 4 }
 0x1e9   : > { %2110 = vst [vmem:[#allocation3 + $0x18] sm:$0xf0] %v1966_v58  ;;  %v1968_v63 = vrot.slane %v1871_v32, 4 }
 0x1ea   : > { %2111 = vst [vmem:[#allocation3 + $0x20] sm:$0xf0] %v1967_v59  ;;  %v1559_v3 = vpop.f32.mrb[4].mxu1 }
 0x1eb   : > { %v1974_v0 = vsel %vm14356_vm4, %v1968_v63, %v1973_v60  ;;  %v1561_v1 = vpop.f32.mrb[5].mxu1  ;;  %v8229_v39 = vpop.f32.mrb[36].mxu0 }
 0x1ec   : > { %2115 = vst.msk [vmem:[#allocation3 + $0x40] sm:$0xff] %vm14355_vm1, %v1974_v0  ;;  %v1563_v43 = vpop.f32.mrb[6].mxu1  ;;  %v1758_v53 = vpop.f32.mrb[37].mxu0 }
 0x1ed   : > { %v1872_v10 = vpack.c.bf16 %v1563_v43, %v1559_v3  ;;  %v1565_v12 = vpop.f32.mrb[7].mxu1  ;;  %v8230_v17 = vpop.f32.mrb[38].mxu0 }
 0x1ee   : > { %v1873_v21 = vpack.c.bf16 %v1565_v12, %v1561_v1  ;;  %v1880_v23 = vpack.c.bf16 %v8230_v17, %v8229_v39  ;;  %v1761_v44 = vpop.f32.mrb[39].mxu0 }
 0x1ef   : > { %v1969_v27 = vrot.slane %v1872_v10, 4  ;;  %v1877_v28 = vpack.c.bf16 %v1761_v44, %v1758_v53  ;;  %v2433_v44 = vld [vmem:[#allocation3 + $0x1b8] sm:$0xf] }
 0x1f0   : > { %v1971_v4 = vrot.slane %v1873_v21, 4  ;;  %v1985_v6 = vrot.slane %v1880_v23, 4  ;;  %v2244_v7 = vld [vmem:[#allocation3 + $0x18] sm:$0xf8] }
 0x1f1   : > { %v10202_v49 = vsel %vm14356_vm4, %v1966_v58, %v1969_v27  ;;  %v1979_v54 = vrot.slane %v1877_v28, 4  ;;  %v2247_v2 = vunpack.c.l.bf16 %v2244_v7  ;;  %v2248_v16 = vunpack.c.h.bf16 %v2244_v7  ;;  %v3022_v33 = vld [vmem:[#allocation3 + $0x20] sm:$0xf0] }
 0x1f2   : > { %14586 = vst [vmem:[#allocation41_spill] sm:$0xff] %v10202_v49  ;;  %v10205_v34 = vsel %vm14356_vm4, %v1967_v59, %v1971_v4  ;;  %v1569_v48 = vpop.f32.mrb[8].mxu1  ;;  %v14179_v38 = vunpack.c.l.bf16 %v10202_v49  ;;  %v14178_v32 = vunpack.c.h.bf16 %v10202_v49  ;;  %v3042_v63 = vrot.slane %v3022_v33, 4 }
 0x1f3   : > { %2114 = vst [vmem:[#allocation3 + $0x38] sm:$0xff] %v10205_v34  ;;  %v1980_v3 = vsel %vm14356_vm4, %v1973_v60, %v1979_v54  ;;  %v1986_v58 = vsel %vm14356_vm4, %v1979_v54, %v1985_v6  ;;  %v1571_v0 = vpop.f32.mrb[9].mxu1  ;;  %v8233_v1 = vpop.f32.mrb[40].mxu0  ;;  %v8392_v39 = vpack.i.bf16 %v2248_v16, %v2247_v2  ;;  %v14180_v43 = vrot.slane %v10205_v34, 4  ;;  %v3632_v2 = vld [vmem:[#allocation3 + $0x40] sm:$0xf0] }
 0x1f4   : > { %2118 = vst.msk [vmem:[#allocation3 + $0x58] sm:$0xff] %vm14355_vm1, %v1980_v3  ;;  %2121 = vst.msk [vmem:[#allocation3 + $0x70] sm:$0xff] %vm14355_vm1, %v1986_v58  ;;  %v1573_v59 = vpop.f32.mrb[10].mxu1  ;;  %v1774_v53 = vpop.f32.mrb[41].mxu0  ;;  %v8397_v54 = vpack.i.bf16 %v14178_v32, %v14179_v38 }
 0x1f5   : > { %v1875_v10 = vpack.c.bf16 %v1573_v59, %v1569_v48  ;;  %v8234_v12 = vpop.f32.mrb[42].mxu0  ;;  %8393 = vrot.lane.b32.xlu0 %v8392_v39, %s14407_s22  ;;  %v1575_v17 = vpop.f32.mrb[11].mxu1  ;;  %v10223_v16 = vsel %vm14356_vm4, %v3042_v63, %v14180_v43 }
 0x1f6   : > { %v1886_v60 = vpack.c.bf16 %v8234_v12, %v8233_v1  ;;  %v1876_v21 = vpack.c.bf16 %v1575_v17, %v1571_v0  ;;  %v1777_v23 = vpop.f32.mrb[43].mxu0  ;;  %v2466_v0 = vunpack.c.l.bf16 %v2433_v44  ;;  %v3092_v12 = vunpack.c.h.bf16 %v10223_v16 }
 0x1f7   : > { %v1975_v28 = vrot.slane %v1875_v10, 4  ;;  %v1883_v7 = vpack.c.bf16 %v1777_v23, %v1774_v53  ;;  %v3666_v53 = vrot.slane %v3632_v2, 4 }
 0x1f8   : > { %v1997_v33 = vrot.slane %v1886_v60, 4  ;;  %v1977_v48 = vrot.slane %v1876_v21, 4 }
 0x1f9   : > { %v10226_v3 = vsel %vm14356_vm4, %v1969_v27, %v1975_v28  ;;  %v1991_v58 = vrot.slane %v1883_v7, 4  ;;  %8398 = vrot.lane.b32.xlu0 %v8397_v54, %s14407_s22 }
 0x1fa   : > { %14587 = vst [vmem:[#allocation42_spill] sm:$0xff] %v10226_v3  ;;  %v1978_v1 = vsel %vm14356_vm4, %v1971_v4, %v1977_v48  ;;  %v1579_v39 = vpop.f32.mrb[12].mxu1  ;;  %v2417_v59 = vld [vmem:[#allocation3 + $0x38] sm:$0xf8]  ;;  %v2914_v40 = vrot.slane %v10226_v3, 4 }
 0x1fb   : > { %v1992_v63 = vsel %vm14356_vm4, %v1985_v6, %v1991_v58  ;;  %v1998_v17 = vsel %vm14356_vm4, %v1991_v58, %v1997_v33  ;;  %v1581_v60 = vpop.f32.mrb[13].mxu1  ;;  %v8237_v27 = vpop.f32.mrb[44].mxu0  ;;  %v2434_v21 = vunpack.c.l.bf16 %v2417_v59  ;;  %v2435_v23 = vunpack.c.h.bf16 %v2417_v59  ;;  %v3633_v7 = vld [vmem:[#allocation3 + $0x58] sm:$0xff]  ;;  %v10234_v54 = vld [vmem:[#allocation3 + $0x70] sm:$0xff] }
 0x1fc   : > { %2124 = vst.msk [vmem:[#allocation3 + $0x88] sm:$0xff] %vm14355_vm1, %v1992_v63  ;;  %2127 = vst.msk [vmem:[#allocation3 + $0xa0] sm:$0xff] %vm14355_vm1, %v1998_v17  ;;  %v1583_v4 = vpop.f32.mrb[14].mxu1  ;;  %v1790_v44 = vpop.f32.mrb[45].mxu0  ;;  %v3667_v2 = vrot.slane %v3633_v7, 4  ;;  %v14188_v32 = vrot.slane %v10234_v54, 4  ;;  %v2436_v38 = vunpack.c.l.bf16 %v1978_v1  ;;  %v2437_v6 = vunpack.c.h.bf16 %v1978_v1 }
 0x1fd   : > { %v1878_v10 = vpack.c.bf16 %v1583_v4, %v1579_v39  ;;  %v1585_v58 = vpop.f32.mrb[15].mxu1  ;;  %v8238_v43 = vpop.f32.mrb[46].mxu0  ;;  %v8402_v62 = vpack.i.bf16 %v2435_v23, %v2434_v21  ;;  %v14187_v59 = vunpack.c.h.bf16 %v10226_v3  ;;  %v3045_v61 = vrot.slane %v1978_v1, 4  ;;  %v3283_v23 = vld [vmem:[#allocation3 + $0x38] sm:$0xf0] }
 0x1fe   : > { %v1879_v57 = vpack.c.bf16 %v1585_v58, %v1581_v60  ;;  %v1892_v56 = vpack.c.bf16 %v8238_v43, %v8237_v27  ;;  %v1793_v55 = vpop.f32.mrb[47].mxu0  ;;  %v3668_v63 = vsel %vm14356_vm4, %v3666_v53, %v3667_v2  ;;  %v10244_v17 = vsel %vm14356_vm4, %v3667_v2, %v14188_v32 }
 0x1ff   : > { %v1981_v7 = vrot.slane %v1878_v10, 4  ;;  %v1889_v52 = vpack.c.bf16 %v1793_v55, %v1790_v44  ;;  %8403 = vrot.lane.b32.xlu1 %v8402_v62, %s9700_s24  ;;  %v3717_v39 = vunpack.c.h.bf16 %v3668_v63  ;;  %v3716_v21 = vunpack.c.l.bf16 %v3668_v63 }
 0x200   : > { %v1983_v4 = vrot.slane %v1879_v57, 4  ;;  %v2009_v1 = vrot.slane %v1892_v56, 4  ;;  %v3718_v43 = vunpack.c.l.bf16 %v10244_v17  ;;  %v8422_v60 = vpack.i.bf16 %v2437_v6, %v2436_v38 }
 0x201   : > { %v10249_v53 = vsel %vm14356_vm4, %v1975_v28, %v1981_v7  ;;  %v2003_v27 = vrot.slane %v1889_v52, 4  ;;  %v8407_v58 = vpack.i.bf16 %v3717_v39, %v2466_v0  ;;  %v14589_v2 = vrot.slane %v10205_v34, 4 }
 0x202   : > { %14588 = vst [vmem:[#allocation43_spill] sm:$0xff] %v10249_v53  ;;  %v10257_v62 = vsel %vm14356_vm4, %v1977_v48, %v1983_v4  ;;  %v1589_v10 = vpop.f32.mrb[16].mxu1  ;;  %8423 = vrot.lane.b32.xlu0 %v8422_v60, %s9700_s24  ;;  %v14590_v56 = vunpack.c.l.bf16 %v10226_v3  ;;  %v3287_v52 = vrot.slane %v3283_v23, 4  ;;  %v8412_v44 = vpack.i.bf16 %v3716_v21, %v3718_v43 }
 0x203   : > { %v10254_v55 = vsel %vm14356_vm4, %v14589_v2, %v3045_v61  ;;  %v2004_v28 = vsel %vm14356_vm4, %v1997_v33, %v2003_v27  ;;  %v2010_v34 = vsel %vm14356_vm4, %v2003_v27, %v2009_v1  ;;  %v8241_v0 = vpop.f32.mrb[48].mxu0  ;;  %8408 = vrot.lane.b32.xlu1 %v8407_v58, %s9700_s24  ;;  %v1591_v48 = vpop.f32.mrb[17].mxu1  ;;  %v3635_v6 = vld [vmem:[#allocation3 + $0x88] sm:$0xff]  ;;  %v10268_v63 = vld [vmem:[#allocation3 + $0xa0] sm:$0xff]  ;;  %v14191_v39 = vrot.slane %v10257_v62, 4 }
 0x204   : > { %v8417_v57 = vpack.i.bf16 %v14187_v59, %v14590_v56  ;;  %v3093_v38 = vunpack.c.l.bf16 %v10254_v55  ;;  %2130 = vst.msk [vmem:[#allocation3 + $0xb8] sm:$0xff] %vm14355_vm1, %v2004_v28  ;;  %2133 = vst.msk [vmem:[#allocation3 + $0xd0] sm:$0xff] %vm14355_vm1, %v2010_v34  ;;  %v1593_v60 = vpop.f32.mrb[18].mxu1  ;;  %v1806_v23 = vpop.f32.mrb[49].mxu0  ;;  %v3288_v33 = vsel %vm14356_vm4, %v3287_v52, %v3045_v61  ;;  %v3671_v27 = vrot.slane %v3635_v6, 4 }
 0x205   : > { %v3673_v56 = vrot.slane %v10268_v63, 4  ;;  %v1881_v58 = vpack.c.bf16 %v1593_v60, %v1589_v10  ;;  %v1595_v59 = vpop.f32.mrb[19].mxu1  ;;  %v8242_v21 = vpop.f32.mrb[50].mxu0  ;;  %v3296_v43 = vunpack.c.l.bf16 %v3288_v33  ;;  %v3719_v32 = vunpack.c.h.bf16 %v10244_v17 }
 0x206   : > { %v8427_v2 = vpack.i.bf16 %v3093_v38, %v3092_v12  ;;  %v10279_v28 = vsel %vm14356_vm4, %v3045_v61, %v14191_v39  ;;  %v1882_v34 = vpack.c.bf16 %v1595_v59, %v1591_v48  ;;  %v1898_v51 = vpack.c.bf16 %v8242_v21, %v8241_v0  ;;  %v1809_v50 = vpop.f32.mrb[51].mxu0 }
 0x207   : > { %v14591_v12 = vrot.slane %v10234_v54, 4  ;;  %v3674_v10 = vsel %vm14356_vm4, %v3671_v27, %v3673_v56  ;;  %v1987_v52 = vrot.slane %v1881_v58, 4  ;;  %v1895_v6 = vpack.c.bf16 %v1809_v50, %v1806_v23  ;;  %8413 = vrot.lane.b32.xlu1 %v8412_v44, %s9700_s24 }
 0x208   : > { %8428 = vrot.lane.b32.xlu0 %v8427_v2, %s14407_s22  ;;  %v3297_v17 = vunpack.c.h.bf16 %v3288_v33  ;;  %v1989_v60 = vrot.slane %v1882_v34, 4  ;;  %v2021_v61 = vrot.slane %v1898_v51, 4  ;;  %v3722_v59 = vunpack.c.l.bf16 %v3674_v10 }
 0x209   : > { %v3672_v38 = vsel %vm14356_vm4, %v14591_v12, %v3671_v27  ;;  %v10288_v0 = vsel %vm14356_vm4, %v1981_v7, %v1987_v52  ;;  %v2015_v48 = vrot.slane %v1895_v6, 4  ;;  %v3095_v54 = vunpack.c.l.bf16 %v10279_v28 }
 0x20a   : > { %v3720_v63 = vunpack.c.l.bf16 %v3672_v38  ;;  %v3721_v39 = vunpack.c.h.bf16 %v3672_v38  ;;  %14592 = vst [vmem:[#allocation44_spill] sm:$0xff] %v10288_v0  ;;  %v10292_v21 = vsel %vm14356_vm4, %v1983_v4, %v1989_v60  ;;  %v1599_v27 = vpop.f32.mrb[20].mxu1  ;;  %v14195_v50 = vunpack.c.h.bf16 %v10279_v28 }
 0x20b   : > { %v2016_v44 = vsel %vm14356_vm4, %v2009_v1, %v2015_v48  ;;  %v2022_v23 = vsel %vm14356_vm4, %v2015_v48, %v2021_v61  ;;  %v8245_v51 = vpop.f32.mrb[52].mxu0  ;;  %8418 = vrot.lane.b32.xlu1 %v8417_v57, %s14407_s22  ;;  %v1601_v33 = vpop.f32.mrb[21].mxu1  ;;  %v8432_v7 = vpack.i.bf16 %v3297_v17, %v3296_v43  ;;  %v10299_v58 = vld [vmem:[#allocation3 + $0xd0] sm:$0xff]  ;;  %v14199_v1 = vunpack.c.l.bf16 %v10249_v53 }
 0x20c   : > { %v8437_v2 = vpack.i.bf16 %v3720_v63, %v3719_v32  ;;  %v3637_v32 = vld [vmem:[#allocation3 + $0xb8] sm:$0xff]  ;;  %2136 = vst.msk [vmem:[#allocation3 + $0xe8] sm:$0xff] %vm14355_vm1, %v2016_v44  ;;  %2139 = vst.msk [vmem:[#allocation3 + $0x100] sm:$0xff] %vm14355_vm1, %v2022_v23  ;;  %v1603_v4 = vpop.f32.mrb[22].mxu1  ;;  %v1822_v34 = vpop.f32.mrb[53].mxu0  ;;  %v8442_v12 = vpack.i.bf16 %v3722_v59, %v3721_v39  ;;  %v14194_v6 = vrot.slane %v10299_v58, 4  ;;  %v8462_v17 = vpack.i.bf16 %v14195_v50, %v3095_v54 }
 0x20d   : > { %v3675_v38 = vrot.slane %v3637_v32, 4  ;;  %v1884_v57 = vpack.c.bf16 %v1603_v4, %v1599_v27  ;;  %v1605_v63 = vpop.f32.mrb[23].mxu1  ;;  %v8246_v43 = vpop.f32.mrb[54].mxu0  ;;  %v14198_v48 = vunpack.c.h.bf16 %v10249_v53  ;;  %v3094_v4 = vunpack.c.h.bf16 %v10254_v55 }
 0x20e   : > { %8438 = vrot.lane.b32.xlu0 %v8437_v2, %s9700_s24  ;;  %v3723_v2 = vunpack.c.h.bf16 %v3674_v10  ;;  %v1885_v44 = vpack.c.bf16 %v1605_v63, %v1601_v33  ;;  %v1904_v47 = vpack.c.bf16 %v8246_v43, %v8245_v51  ;;  %v1825_v23 = vpop.f32.mrb[55].mxu0 }
 0x20f   : > { %v3676_v46 = vsel %vm14356_vm4, %v3673_v56, %v3675_v38  ;;  %v10312_v39 = vsel %vm14356_vm4, %v3675_v38, %v14194_v6  ;;  %v1993_v59 = vrot.slane %v1884_v57, 4  ;;  %v1901_v27 = vpack.c.bf16 %v1825_v23, %v1822_v34  ;;  %8433 = vrot.lane.b32.xlu1 %v8432_v7, %s9700_s24 }
 0x210   : > { %v3724_v32 = vunpack.c.l.bf16 %v3676_v46  ;;  %v1995_v10 = vrot.slane %v1885_v44, 4  ;;  %v2033_v33 = vrot.slane %v1904_v47, 4  ;;  %v3725_v51 = vunpack.c.h.bf16 %v3676_v46 }
 0x211   : > { %v3726_v63 = vunpack.c.l.bf16 %v10312_v39  ;;  %v10319_v56 = vsel %vm14356_vm4, %v1987_v52, %v1993_v59  ;;  %v2027_v43 = vrot.slane %v1901_v27, 4  ;;  %v10321_v6 = vpack.i.bf16 %v3095_v54, %v3094_v4 }
 0x212   : > { %8463 = vrot.lane.b32.xlu0 %v8462_v17, %s9700_s24  ;;  %14593 = vst [vmem:[#allocation45_spill] sm:$0xff] %v10319_v56  ;;  %v8467_v38 = vpack.i.bf16 %v3724_v32, %v3723_v2  ;;  %v10324_v34 = vsel %vm14356_vm4, %v1989_v60, %v1995_v10  ;;  %v1609_v7 = vpop.f32.mrb[24].mxu1  ;;  %v2438_v57 = vunpack.c.l.bf16 %v10257_v62  ;;  %v2439_v52 = vunpack.c.h.bf16 %v10257_v62 }
 0x213   : > { %v2028_v55 = vsel %vm14356_vm4, %v2021_v61, %v2027_v43  ;;  %v2034_v47 = vsel %vm14356_vm4, %v2027_v43, %v2033_v33  ;;  %v8249_v46 = vpop.f32.mrb[56].mxu0  ;;  %8443 = vrot.lane.b32.xlu1 %v8442_v12, %s9700_s24  ;;  %v1611_v17 = vpop.f32.mrb[25].mxu1  ;;  %v3049_v54 = vrot.slane %v10292_v21, 4  ;;  %v8447_v32 = vpack.i.bf16 %v14198_v48, %v14199_v1  ;;  %v3639_v61 = vld [vmem:[#allocation3 + $0xe8] sm:$0xff]  ;;  %v10347_v48 = vld [vmem:[#allocation3 + $0x100] sm:$0xff] }
 0x214   : > { %2142 = vst.msk [vmem:[#allocation3 + $0x118] sm:$0xff] %vm14355_vm1, %v2028_v55  ;;  %2145 = vst.msk [vmem:[#allocation3 + $0x130] sm:$0xff] %vm14355_vm1, %v2034_v47  ;;  %v1613_v60 = vpop.f32.mrb[26].mxu1  ;;  %v1838_v2 = vpop.f32.mrb[57].mxu0  ;;  %v8472_v4 = vpack.i.bf16 %v3726_v63, %v3725_v51  ;;  %v14594_v43 = vrot.slane %v10257_v62, 4  ;;  %v14595_v63 = vunpack.c.l.bf16 %v10288_v0  ;;  %v2920_v24 = vrot.slane %v10319_v56, 4 }
 0x215   : > { %v1887_v23 = vpack.c.bf16 %v1613_v60, %v1609_v7  ;;  %v1615_v27 = vpop.f32.mrb[27].mxu1  ;;  %v8250_v12 = vpop.f32.mrb[58].mxu0  ;;  %v8452_v7 = vpack.i.bf16 %v2439_v52, %v2438_v57  ;;  %v2440_v60 = vunpack.c.l.bf16 %v10292_v21  ;;  %v14598_v57 = vunpack.c.h.bf16 %v10279_v28 }
 0x216   : > { %8468 = vrot.lane.b32.xlu0 %v8467_v38, %s9700_s24  ;;  %v3050_v38 = vsel %vm14356_vm4, %v14594_v43, %v3049_v54  ;;  %v1888_v55 = vpack.c.bf16 %v1615_v27, %v1611_v17  ;;  %v1910_v47 = vpack.c.bf16 %v8250_v12, %v8249_v46  ;;  %v1841_v50 = vpop.f32.mrb[59].mxu0  ;;  %v14596_v46 = vunpack.c.h.bf16 %v10288_v0 }
 0x217   : > { %v3097_v45 = vunpack.c.l.bf16 %v3050_v38  ;;  %v1999_v42 = vrot.slane %v1887_v23, 4  ;;  %v1907_v44 = vpack.c.bf16 %v1841_v50, %v1838_v2  ;;  %8448 = vrot.lane.b32.xlu1 %v8447_v32, %s14407_s22  ;;  %v2441_v27 = vunpack.c.h.bf16 %v10292_v21 }
 0x218   : > { %v2001_v51 = vrot.slane %v1888_v55, 4  ;;  %v2045_v62 = vrot.slane %v1910_v47, 4  ;;  %v8477_v17 = vpack.i.bf16 %v14596_v46, %v14595_v63  ;;  %v3679_v23 = vrot.slane %v3639_v61, 4 }
 0x219   : > { %v10355_v50 = vsel %vm14356_vm4, %v1993_v59, %v1999_v42  ;;  %v2039_v2 = vrot.slane %v1907_v44, 4  ;;  %v8487_v52 = vpack.i.bf16 %v3097_v45, %v14598_v57  ;;  %v3098_v59 = vunpack.c.h.bf16 %v3050_v38 }
 0x21a   : > { %8473 = vrot.lane.b32.xlu0 %v8472_v4, %s9700_s24  ;;  %14597 = vst [vmem:[#allocation46_spill] sm:$0xff] %v10355_v50  ;;  %v10360_v12 = vsel %vm14356_vm4, %v1995_v10, %v2001_v51  ;;  %v1619_v32 = vpop.f32.mrb[28].mxu1  ;;  %v3681_v4 = vrot.slane %v10347_v48, 4  ;;  %v3051_v28 = vrot.slane %v10324_v34, 4  ;;  %v8482_v46 = vpack.i.bf16 %v2441_v27, %v2440_v60 }
 0x21b   : > { %v2040_v43 = vsel %vm14356_vm4, %v2033_v33, %v2039_v2  ;;  %v2046_v55 = vsel %vm14356_vm4, %v2039_v2, %v2045_v62  ;;  %v8253_v47 = vpop.f32.mrb[60].mxu0  ;;  %8453 = vrot.lane.b32.xlu1 %v8452_v7, %s9700_s24  ;;  %v1621_v21 = vpop.f32.mrb[29].mxu1  ;;  %v14599_v2 = vrot.slane %v10299_v58, 4  ;;  %v8492_v60 = vpack.i.bf16 %v3098_v59, %v3097_v45 }
 0x21c   : > { %2148 = vst.msk [vmem:[#allocation3 + $0x148] sm:$0xff] %vm14355_vm1, %v2040_v43  ;;  %2151 = vst.msk [vmem:[#allocation3 + $0x160] sm:$0xff] %vm14355_vm1, %v2046_v55  ;;  %v1623_v10 = vpop.f32.mrb[30].mxu1  ;;  %v1854_v61 = vpop.f32.mrb[61].mxu0  ;;  %v3052_v57 = vsel %vm14356_vm4, %v3049_v54, %v3051_v28  ;;  %v10377_v43 = vsel %vm14356_vm4, %v3679_v23, %v3681_v4 }
 0x21d   : > { %v1890_v44 = vpack.c.bf16 %v1623_v10, %v1619_v32  ;;  %v1625_v63 = vpop.f32.mrb[31].mxu1  ;;  %v8254_v33 = vpop.f32.mrb[62].mxu0  ;;  %v3680_v7 = vsel %vm14356_vm4, %v14599_v2, %v3679_v23  ;;  %v3099_v55 = vunpack.c.l.bf16 %v3052_v57 }
 0x21e   : > { %8478 = vrot.lane.b32.xlu0 %v8477_v17, %s14407_s22  ;;  %v1891_v17 = vpack.c.bf16 %v1625_v63, %v1621_v21  ;;  %v1916_v38 = vpack.c.bf16 %v8254_v33, %v8253_v47  ;;  %v1857_v1 = vpop.f32.mrb[63].mxu0  ;;  %v3728_v54 = vunpack.c.l.bf16 %v3680_v7  ;;  %v3729_v23 = vunpack.c.h.bf16 %v3680_v7 }
 0x21f   : > { %v2005_v41 = vrot.slane %v1890_v44, 4  ;;  %v1913_v32 = vpack.c.bf16 %v1857_v1, %v1854_v61  ;;  %8458 = vrot.lane.b32.xlu1 %v10321_v6, %s14407_s22  ;;  %v10382_v21 = vpack.i.bf16 %v3099_v55, %v3098_v59  ;;  %v3730_v63 = vunpack.c.l.bf16 %v10377_v43 }
 0x220   : > { %v2007_v58 = vrot.slane %v1891_v17, 4  ;;  %v2057_v27 = vrot.slane %v1916_v38, 4  ;;  %v3727_v6 = vunpack.c.h.bf16 %v10312_v39  ;;  %v3053_v44 = vrot.slane %v10360_v12, 4  ;;  %v3641_v38 = vld [vmem:[#allocation3 + $0x118] sm:$0xff] }
 0x221   : > { %v10385_v47 = vsel %vm14356_vm4, %v1999_v42, %v2005_v41  ;;  %v2051_v10 = vrot.slane %v1913_v32, 4  ;;  %v14201_v39 = vunpack.c.h.bf16 %v10319_v56  ;;  %v8502_v7 = vpack.i.bf16 %v3730_v63, %v3729_v23 }
 0x222   : > { %8483 = vrot.lane.b32.xlu0 %v8482_v46, %s9700_s24  ;;  %14600 = vst [vmem:[#allocation47_spill] sm:$0xff] %v10385_v47  ;;  %v10389_v1 = vsel %vm14356_vm4, %v2001_v51, %v2007_v58  ;;  %2160 = vst.msk [vmem:[#allocation3 + $0x1a8] sm:$0xf] %vm14354_vm3, %v2057_v27  ;;  %v1629_v45 = vpop.f32.mrb[32].mxu1  ;;  %v8497_v33 = vpack.i.bf16 %v3728_v54, %v3727_v6  ;;  %v14202_v46 = vunpack.c.l.bf16 %v10319_v56  ;;  %v3100_v17 = vunpack.c.h.bf16 %v3052_v57 }
 0x223   : > { %v2052_v61 = vsel %vm14356_vm4, %v2045_v62, %v2051_v10  ;;  %v2058_v59 = vsel %vm14356_vm4, %v2051_v10, %v2057_v27  ;;  %8493 = vrot.lane.b32.xlu1 %v8492_v60, %s9700_s24  ;;  %v1631_v42 = vpop.f32.mrb[33].mxu1  ;;  %v10403_v32 = vsel %vm14356_vm4, %v3051_v28, %v3053_v44  ;;  %v3642_v60 = vld [vmem:[#allocation3 + $0x130] sm:$0xff]  ;;  %v2442_v54 = vunpack.c.l.bf16 %v10324_v34 }
 0x224   : > { %2154 = vst.msk [vmem:[#allocation3 + $0x178] sm:$0xff] %vm14355_vm1, %v2052_v61  ;;  %2157 = vst.msk [vmem:[#allocation3 + $0x190] sm:$0xff] %vm14355_vm1, %v2058_v59  ;;  %v1633_v51 = vpop.f32.mrb[34].mxu1  ;;  %v14205_v27 = vunpack.c.l.bf16 %v10403_v32  ;;  %v14204_v23 = vunpack.c.l.bf16 %v10355_v50  ;;  %v14203_v63 = vunpack.c.h.bf16 %v10355_v50  ;;  %v3683_v28 = vrot.slane %v3641_v38, 4 }
 0x225   : > { %v1893_v62 = vpack.c.bf16 %v1633_v51, %v1629_v45  ;;  %v1635_v2 = vpop.f32.mrb[35].mxu1  ;;  %v2443_v45 = vunpack.c.h.bf16 %v10324_v34  ;;  %v8507_v59 = vpack.i.bf16 %v14201_v39, %v14202_v46  ;;  %v3685_v34 = vrot.slane %v3642_v60, 4 }
 0x226   : > { %8488 = vrot.lane.b32.xlu0 %v8487_v52, %s14407_s22  ;;  %v1894_v52 = vpack.c.bf16 %v1635_v2, %v1631_v42  ;;  %v10414_v6 = vpack.i.bf16 %v14205_v27, %v3100_v17  ;;  %v8522_v42 = vpack.i.bf16 %v3100_v17, %v3099_v55  ;;  %v3643_v2 = vld [vmem:[#allocation3 + $0x148] sm:$0xff]  ;;  %v8537_v55 = vpack.i.bf16 %v14203_v63, %v14204_v23 }
 0x227   : > { %v2011_v10 = vrot.slane %v1893_v62, 4  ;;  %8498 = vrot.lane.b32.xlu1 %v8497_v33, %s9700_s24  ;;  %v8512_v38 = vpack.i.bf16 %v2443_v45, %v2442_v54  ;;  %v2444_v17 = vunpack.c.l.bf16 %v10360_v12  ;;  %v3055_v54 = vrot.slane %v10389_v1, 4 }
 0x228   : > { %v2013_v57 = vrot.slane %v1894_v52, 4  ;;  %v3687_v39 = vrot.slane %v3643_v2, 4 }
 0x229   : > { %v10417_v61 = vsel %vm14356_vm4, %v2005_v41, %v2011_v10 }
 0x22a   : > { %8503 = vrot.lane.b32.xlu0 %v8502_v7, %s9700_s24  ;;  %14601 = vst [vmem:[#allocation48_spill] sm:$0xff] %v10417_v61  ;;  %v10424_v51 = vsel %vm14356_vm4, %v2007_v58, %v2013_v57  ;;  %v1639_v33 = vpop.f32.mrb[36].mxu1  ;;  %v10428_v7 = vld [vmem:[#allocation3 + $0x160] sm:$0xff]  ;;  %v3684_v58 = vsel %vm14356_vm4, %v3681_v4, %v3683_v28 }
 0x22b   : > { %8508 = vrot.lane.b32.xlu1 %v8507_v59, %s14407_s22  ;;  %v1641_v62 = vpop.f32.mrb[37].mxu1  ;;  %v2445_v59 = vunpack.c.h.bf16 %v10360_v12  ;;  %v3689_v46 = vrot.slane %v10428_v7, 4  ;;  %v3732_v48 = vunpack.c.l.bf16 %v3684_v58  ;;  %v10447_v12 = vld [vmem:[#allocation3 + $0x1c0] sm:$0x1f]  ;;  %v3102_v7 = vunpack.c.h.bf16 %v10403_v32 }
 0x22c   : > { %v1643_v41 = vpop.f32.mrb[38].mxu1 }
 0x22d   : > { %v1896_v52 = vpack.c.bf16 %v1643_v41, %v1639_v33  ;;  %v1645_v60 = vpop.f32.mrb[39].mxu1  ;;  %v3733_v33 = vunpack.c.h.bf16 %v3684_v58  ;;  %v8542_v2 = vpack.i.bf16 %v2445_v59, %v2444_v17  ;;  %v3057_v17 = vrot.slane %v10424_v51, 4 }
 0x22e   : > { %8523 = vrot.lane.b32.xlu0 %v8522_v42, %s9700_s24  ;;  %v10440_v42 = vsel %vm14356_vm4, %v3683_v28, %v3685_v34  ;;  %v1897_v45 = vpack.c.bf16 %v1645_v60, %v1641_v62  ;;  %v10450_v28 = vsel %vm14356_vm4, %v3053_v44, %v3055_v54  ;;  %v3731_v60 = vunpack.c.h.bf16 %v10377_v43 }
 0x22f   : > { %v2017_v63 = vrot.slane %v1896_v52, 4  ;;  %8513 = vrot.lane.b32.xlu1 %v8512_v38, %s9700_s24  ;;  %v3734_v41 = vunpack.c.l.bf16 %v10440_v42  ;;  %v3645_v52 = vld [vmem:[#allocation3 + $0x178] sm:$0xff]  ;;  %v14210_v38 = vunpack.c.l.bf16 %v10450_v28  ;;  %v10463_v44 = vsel %vm14356_vm4, %v3687_v39, %v3689_v46 }
 0x230   : > { %v2019_v4 = vrot.slane %v1897_v45, 4  ;;  %v3688_v45 = vsel %vm14356_vm4, %v3685_v34, %v3687_v39  ;;  %v8527_v23 = vpack.i.bf16 %v3732_v48, %v3731_v60  ;;  %v3691_v27 = vrot.slane %v3645_v52, 4  ;;  %v3646_v39 = vld [vmem:[#allocation3 + $0x190] sm:$0xff]  ;;  %v3647_v48 = vld [vmem:[#allocation3 + $0x1a8] sm:$0xff] }
 0x231   : > { %v10453_v62 = vsel %vm14356_vm4, %v2011_v10, %v2017_v63  ;;  %v8532_v34 = vpack.i.bf16 %v3734_v41, %v3733_v33  ;;  %v3737_v36 = vunpack.c.h.bf16 %v3688_v45  ;;  %v3735_v59 = vunpack.c.h.bf16 %v10440_v42 }
 0x232   : > { %8538 = vrot.lane.b32.xlu0 %v8537_v55, %s14407_s22  ;;  %14602 = vst [vmem:[#allocation49_spill] sm:$0xff] %v10453_v62  ;;  %v10458_v55 = vsel %vm14356_vm4, %v2013_v57, %v2019_v4  ;;  %v1649_v58 = vpop.f32.mrb[40].mxu1  ;;  %v10471_v57 = vpack.i.bf16 %v14210_v38, %v3102_v7  ;;  %v14603_v38 = vunpack.c.l.bf16 %v10403_v32  ;;  %v3736_v30 = vunpack.c.l.bf16 %v3688_v45 }
 0x233   : > { %8518 = vrot.lane.b32.xlu1 %v10382_v21, %s14407_s22  ;;  %v1651_v10 = vpop.f32.mrb[41].mxu1  ;;  %v14218_v41 = vunpack.c.l.bf16 %v10385_v47  ;;  %v3693_v52 = vrot.slane %v3646_v39, 4  ;;  %v10488_v32 = vsel %vm14356_vm4, %v3689_v46, %v3691_v27  ;;  %v14214_v42 = vunpack.c.h.bf16 %v10450_v28 }
 0x234   : > { %v1653_v43 = vpop.f32.mrb[42].mxu1  ;;  %v8552_v31 = vpack.i.bf16 %v3102_v7, %v14603_v38  ;;  %v3059_v38 = vrot.slane %v10458_v55, 4  ;;  %v3739_v46 = vunpack.c.h.bf16 %v10463_v44  ;;  %v3740_v39 = vunpack.c.l.bf16 %v10488_v32 }
 0x235   : > { %v1899_v37 = vpack.c.bf16 %v1653_v43, %v1649_v58  ;;  %v1655_v21 = vpop.f32.mrb[43].mxu1  ;;  %v10485_v58 = vsel %vm14356_vm4, %v3055_v54, %v3057_v17  ;;  %v8557_v43 = vpack.i.bf16 %v3736_v30, %v3735_v59  ;;  %v2916_v30 = vrot.slane %v10249_v53, 4 }
 0x236   : > { %8543 = vrot.lane.b32.xlu0 %v8542_v2, %s9700_s24  ;;  %v3738_v2 = vunpack.c.l.bf16 %v10463_v44  ;;  %v1900_v35 = vpack.c.bf16 %v1655_v21, %v1651_v10  ;;  %v14213_v7 = vunpack.c.l.bf16 %v10485_v58  ;;  %v10515_v21 = vsel %vm14356_vm4, %v3057_v17, %v3059_v38 }
 0x237   : > { %v2023_v33 = vrot.slane %v1899_v37, 4  ;;  %8528 = vrot.lane.b32.xlu1 %v8527_v23, %s9700_s24  ;;  %v14217_v23 = vunpack.c.h.bf16 %v10385_v47  ;;  %v2928_v14 = vrot.slane %v10453_v62, 4 }
 0x238   : > { %v2025_v60 = vrot.slane %v1900_v35, 4  ;;  %v8562_v35 = vpack.i.bf16 %v3738_v2, %v3737_v36  ;;  %v10505_v10 = vpack.i.bf16 %v14213_v7, %v14214_v42  ;;  %v10512_v36 = vsel %vm14356_vm4, %v3691_v27, %v3693_v52 }
 0x239   : > { %v10493_v37 = vsel %vm14356_vm4, %v2017_v63, %v2023_v33  ;;  %v14220_v27 = vunpack.c.h.bf16 %v10485_v58  ;;  %v14219_v42 = vunpack.c.l.bf16 %v10515_v21  ;;  %v8567_v29 = vpack.i.bf16 %v14217_v23, %v14218_v41 }
 0x23a   : > { %8548 = vrot.lane.b32.xlu0 %v10414_v6, %s14407_s22  ;;  %14604 = vst [vmem:[#allocation50_spill] sm:$0xff] %v10493_v37  ;;  %v3695_v6 = vrot.slane %v3647_v48, 4  ;;  %v10498_v45 = vsel %vm14356_vm4, %v2019_v4, %v2025_v60  ;;  %v1659_v54 = vpop.f32.mrb[44].mxu1  ;;  %v2446_v4 = vunpack.c.l.bf16 %v10389_v1  ;;  %v14605_v48 = vrot.slane %v10202_v49, 4 }
 0x23b   : > { %8533 = vrot.lane.b32.xlu1 %v8532_v34, %s9700_s24  ;;  %v1661_v63 = vpop.f32.mrb[45].mxu1  ;;  %v3061_v2 = vrot.slane %v10498_v45, 4  ;;  %v14607_v23 = vrot.slane %v10447_v12, 4  ;;  %v14228_v12 = vunpack.c.h.bf16 %v10417_v61  ;;  %v14240_v9 = vunpack.c.h.bf16 %v10493_v37 }
 0x23c   : > { %v1663_v44 = vpop.f32.mrb[46].mxu1  ;;  %v10521_v34 = vsel %vm14356_vm4, %v14605_v48, %v2914_v40  ;;  %v10525_v7 = vsel %vm14356_vm4, %v3693_v52, %v3695_v6  ;;  %v2447_v48 = vunpack.c.h.bf16 %v10389_v1  ;;  %v10543_v52 = vpack.i.bf16 %v14219_v42, %v14220_v27 }
 0x23d   : > { %v1665_v59 = vpop.f32.mrb[47].mxu1  ;;  %v10535_v26 = vsel %vm14356_vm4, %v3059_v38, %v3061_v2  ;;  %v3743_v1 = vunpack.c.h.bf16 %v10512_v36  ;;  %v3744_v38 = vunpack.c.l.bf16 %v10525_v7  ;;  %v10558_v41 = vsel %vm14356_vm4, %v3695_v6, %v14607_v23 }
 0x23e   : > { %8553 = vrot.lane.b32.xlu0 %v8552_v31, %s9700_s24  ;;  %v1902_v31 = vpack.c.bf16 %v1663_v44, %v1659_v54  ;;  %v1903_v17 = vpack.c.bf16 %v1665_v59, %v1661_v63  ;;  %v14221_v63 = vunpack.c.h.bf16 %v10515_v21  ;;  %v14222_v44 = vunpack.c.l.bf16 %v10535_v26 }
 0x23f   : > { %8563 = vrot.lane.b32.xlu1 %v8562_v35, %s9700_s24  ;;  %v2918_v27 = vrot.slane %v10288_v0, 4  ;;  %v3748_v6 = vunpack.c.l.bf16 %v14607_v23 }
 0x240   : > { %v2029_v54 = vrot.slane %v1902_v31, 4  ;;  %v2031_v59 = vrot.slane %v1903_v17, 4  ;;  %v10550_v31 = vsel %vm14356_vm4, %v2914_v40, %v2916_v30  ;;  %v10564_v17 = vpack.i.bf16 %v14222_v44, %v14221_v63 }
 0x241   : > { %v10578_v25 = vsel %vm14356_vm4, %v2916_v30, %v2918_v27  ;;  %v10589_v30 = vsel %vm14356_vm4, %v2918_v27, %v2920_v24 }
 0x242   : > { %8558 = vrot.lane.b32.xlu0 %v8557_v43, %s9700_s24  ;;  %v10553_v35 = vsel %vm14356_vm4, %v2023_v33, %v2029_v54  ;;  %v8592_v43 = vpack.i.bf16 %v3740_v39, %v3739_v46  ;;  %v10567_v42 = vsel %vm14356_vm4, %v2025_v60, %v2031_v59  ;;  %v1669_v40 = vpop.f32.mrb[48].mxu1  ;;  %v8572_v46 = vpack.i.bf16 %v2447_v48, %v2446_v4 }
 0x243   : > { %14606 = vst [vmem:[#allocation51_spill] sm:$0xff] %v10553_v35  ;;  %8568 = vrot.lane.b32.xlu1 %v8567_v29, %s14407_s22  ;;  %v1671_v33 = vpop.f32.mrb[49].mxu1  ;;  %v3063_v63 = vrot.slane %v10567_v42, 4  ;;  %v3747_v60 = vunpack.c.h.bf16 %v10558_v41  ;;  %v2922_v29 = vrot.slane %v10355_v50, 4  ;;  %v8602_v4 = vpack.i.bf16 %v3744_v38, %v3743_v1 }
 0x244   : > { %v1673_v44 = vpop.f32.mrb[50].mxu1  ;;  %v14230_v39 = vunpack.c.h.bf16 %v10535_v26 }
 0x245   : > { %v1905_v20 = vpack.c.bf16 %v1673_v44, %v1669_v40  ;;  %v10584_v48 = vsel %vm14356_vm4, %v3061_v2, %v3063_v63  ;;  %v10594_v44 = vsel %vm14356_vm4, %v2920_v24, %v2922_v29  ;;  %v8577_v38 = vpack.i.bf16 %v3748_v6, %v3747_v60 }
 0x246   : > { %8593 = vrot.lane.b32.xlu0 %v8592_v43, %s9700_s24  ;;  %v1675_v43 = vpop.f32.mrb[51].mxu1  ;;  %v14229_v19 = vunpack.c.l.bf16 %v10584_v48  ;;  %v2448_v2 = vunpack.c.l.bf16 %v10424_v51  ;;  %v2449_v24 = vunpack.c.h.bf16 %v10424_v51 }
 0x247   : > { %v1906_v23 = vpack.c.bf16 %v1675_v43, %v1671_v33  ;;  %v2035_v18 = vrot.slane %v1905_v20, 4  ;;  %8573 = vrot.lane.b32.xlu1 %v8572_v46, %s9700_s24  ;;  %v14609_v20 = vunpack.c.l.bf16 %v10417_v61  ;;  %v2924_v46 = vrot.slane %v10385_v47, 4 }
 0x248   : > { %v10601_v40 = vpack.i.bf16 %v14229_v19, %v14230_v39  ;;  %v2926_v43 = vrot.slane %v10417_v61, 4  ;;  %v8617_v19 = vpack.i.bf16 %v2449_v24, %v2448_v2  ;;  %v2930_v2 = vrot.slane %v10493_v37, 4 }
 0x249   : > { %v2037_v1 = vrot.slane %v1906_v23, 4  ;;  %v10604_v27 = vsel %vm14356_vm4, %v2029_v54, %v2035_v18  ;;  %v8612_v33 = vpack.i.bf16 %v14228_v12, %v14609_v20  ;;  %v10620_v23 = vsel %vm14356_vm4, %v2922_v29, %v2924_v46 }
 0x24a   : > { %8603 = vrot.lane.b32.xlu0 %v8602_v4, %s9700_s24  ;;  %14608 = vst [vmem:[#allocation52_spill] sm:$0xff] %v10604_v27  ;;  %v1679_v60 = vpop.f32.mrb[52].mxu1  ;;  %v10623_v51 = vsel %vm14356_vm4, %v2924_v46, %v2926_v43  ;;  %v3741_v29 = vunpack.c.h.bf16 %v10488_v32  ;;  %v3742_v46 = vunpack.c.l.bf16 %v10512_v36  ;;  %v14612_v32 = vunpack.c.h.bf16 %v10450_v28 }
 0x24b   : > { %v10613_v6 = vsel %vm14356_vm4, %v2031_v59, %v2037_v1  ;;  %8578 = vrot.lane.b32.xlu1 %v8577_v38, %s9700_s24  ;;  %v1681_v4 = vpop.f32.mrb[53].mxu1  ;;  %v14234_v38 = vunpack.c.h.bf16 %v10584_v48 }
 0x24c   : > { %v3065_v54 = vrot.slane %v10613_v6, 4  ;;  %v1683_v20 = vpop.f32.mrb[54].mxu1 }
 0x24d   : > { %v1908_v12 = vpack.c.bf16 %v1683_v20, %v1679_v60  ;;  %v1685_v59 = vpop.f32.mrb[55].mxu1 }
 0x24e   : > { %8613 = vrot.lane.b32.xlu0 %v8612_v33, %s14407_s22  ;;  %v10626_v39 = vsel %vm14356_vm4, %v3063_v63, %v3065_v54  ;;  %v1909_v15 = vpack.c.bf16 %v1685_v59, %v1681_v4  ;;  %v2932_v63 = vrot.slane %v10553_v35, 4 }
 0x24f   : > { %v14235_v33 = vunpack.c.l.bf16 %v10626_v39  ;;  %v2041_v13 = vrot.slane %v1908_v12, 4  ;;  %8583 = vrot.lane.b32.xlu1 %v10471_v57, %s14407_s22  ;;  %v10645_v12 = vsel %vm14356_vm4, %v2926_v43, %v2928_v14  ;;  %v14611_v57 = vunpack.c.l.bf16 %v10450_v28 }
 0x250   : > { %v2043_v24 = vrot.slane %v1909_v15, 4  ;;  %v10655_v15 = vsel %vm14356_vm4, %v2928_v14, %v2930_v2  ;;  %v10666_v28 = vsel %vm14356_vm4, %v2930_v2, %v2932_v63  ;;  %v8597_v14 = vpack.i.bf16 %v3742_v46, %v3741_v29 }
 0x251   : > { %v10642_v60 = vpack.i.bf16 %v14235_v33, %v14234_v38  ;;  %v8587_v4 = vpack.i.bf16 %v14612_v32, %v14611_v57  ;;  %v3746_v32 = vunpack.c.l.bf16 %v10558_v41  ;;  %v14614_v38 = vunpack.c.h.bf16 %v10485_v58 }
 0x252   : > { %8618 = vrot.lane.b32.xlu0 %v8617_v19, %s9700_s24  ;;  %v10648_v19 = vsel %vm14356_vm4, %v2035_v18, %v2041_v13  ;;  %v10658_v36 = vsel %vm14356_vm4, %v2037_v1, %v2043_v24  ;;  %v1689_v20 = vpop.f32.mrb[56].mxu1  ;;  %v3745_v18 = vunpack.c.h.bf16 %v10525_v7  ;;  %v14613_v1 = vunpack.c.l.bf16 %v10485_v58 }
 0x253   : > { %14610 = vst [vmem:[#allocation53_spill] sm:$0xff] %v10648_v19  ;;  %8588 = vrot.lane.b32.xlu1 %v8587_v4, %s9700_s24  ;;  %v1691_v59 = vpop.f32.mrb[57].mxu1  ;;  %v3067_v43 = vrot.slane %v10658_v36, 4  ;;  %v2934_v33 = vrot.slane %v10604_v27, 4  ;;  %v14241_v7 = vunpack.c.l.bf16 %v10493_v37  ;;  %v14242_v29 = vunpack.c.h.bf16 %v10626_v39 }
 0x254   : > { %v1693_v57 = vpop.f32.mrb[58].mxu1  ;;  %v8627_v4 = vpack.i.bf16 %v14614_v38, %v14613_v1  ;;  %v14256_v38 = vunpack.c.l.bf16 %v10453_v62  ;;  %v2452_v1 = vunpack.c.l.bf16 %v10498_v45 }
 0x255   : > { %v1911_v11 = vpack.c.bf16 %v1693_v57, %v1689_v20  ;;  %v10677_v2 = vsel %vm14356_vm4, %v3065_v54, %v3067_v43  ;;  %v10682_v46 = vsel %vm14356_vm4, %v2932_v63, %v2934_v33  ;;  %v14251_v20 = vunpack.c.h.bf16 %v10453_v62 }
 0x256   : > { %8623 = vrot.lane.b32.xlu0 %v10505_v10, %s14407_s22  ;;  %v1695_v10 = vpop.f32.mrb[59].mxu1  ;;  %v14239_v41 = vunpack.c.l.bf16 %v10677_v2  ;;  %v2936_v54 = vrot.slane %v10648_v19, 4  ;;  %v3116_v61 = vunpack.c.h.bf16 %v10677_v2 }
 0x257   : > { %v1912_v8 = vpack.c.bf16 %v1695_v10, %v1691_v59  ;;  %v2047_v58 = vrot.slane %v1911_v11, 4  ;;  %8598 = vrot.lane.b32.xlu1 %v8597_v14, %s9700_s24  ;;  %v8607_v59 = vpack.i.bf16 %v3746_v32, %v3745_v18  ;;  %v8652_v14 = vpack.i.bf16 %v14240_v9, %v14241_v7 }
 0x258   : > { %v10694_v63 = vpack.i.bf16 %v14239_v41, %v14242_v29 }
 0x259   : > { %v2049_v57 = vrot.slane %v1912_v8, 4  ;;  %v10697_v11 = vsel %vm14356_vm4, %v2041_v13, %v2047_v58  ;;  %v10705_v8 = vsel %vm14356_vm4, %v2934_v33, %v2936_v54  ;;  %v2450_v33 = vunpack.c.l.bf16 %v10458_v55 }
 0x25a   : > { %8628 = vrot.lane.b32.xlu0 %v8627_v4, %s9700_s24  ;;  %14615 = vst [vmem:[#allocation54_spill] sm:$0xff] %v10697_v11  ;;  %v2453_v4 = vunpack.c.h.bf16 %v10498_v45  ;;  %v1699_v32 = vpop.f32.mrb[60].mxu1  ;;  %v10714_v41 = vrot.slane %v10697_v11, 4  ;;  %v8632_v45 = vpack.i.bf16 %v14251_v20, %v14256_v38  ;;  %v14263_v38 = vunpack.c.l.bf16 %v10648_v19 }
 0x25b   : > { %v10708_v18 = vsel %vm14356_vm4, %v2043_v24, %v2049_v57  ;;  %8608 = vrot.lane.b32.xlu1 %v8607_v59, %s9700_s24  ;;  %v1701_v10 = vpop.f32.mrb[61].mxu1  ;;  %v2451_v24 = vunpack.c.h.bf16 %v10458_v55 }
 0x25c   : > { %v3069_v13 = vrot.slane %v10708_v18, 4  ;;  %v1703_v9 = vpop.f32.mrb[62].mxu1  ;;  %v8657_v29 = vpack.i.bf16 %v2453_v4, %v2452_v1  ;;  %v10727_v22 = vsel %vm14356_vm4, %v2936_v54, %v10714_v41  ;;  %v14253_v1 = vunpack.c.l.bf16 %v10604_v27 }
 0x25d   : > { %v1914_v7 = vpack.c.bf16 %v1703_v9, %v1699_v32  ;;  %v1705_v59 = vpop.f32.mrb[63].mxu1  ;;  %v8637_v54 = vpack.i.bf16 %v2451_v24, %v2450_v33  ;;  %v14252_v4 = vunpack.c.h.bf16 %v10604_v27  ;;  %v14255_v33 = vunpack.c.l.bf16 %v10553_v35 }
 0x25e   : > { %8653 = vrot.lane.b32.xlu0 %v8652_v14, %s14407_s22  ;;  %v10723_v14 = vsel %vm14356_vm4, %v3067_v43, %v3069_v13  ;;  %v1915_v37 = vpack.c.bf16 %v1705_v59, %v1701_v10  ;;  %v14619_v10 = vunpack.c.h.bf16 %v10515_v21  ;;  %v14254_v24 = vunpack.c.h.bf16 %v10553_v35 }
 0x25f   : > { %v3117_v62 = vunpack.c.l.bf16 %v10723_v14  ;;  %v2053_v20 = vrot.slane %v1914_v7, 4  ;;  %8633 = vrot.lane.b32.xlu1 %v8632_v45, %s14407_s22  ;;  %v3118_v32 = vunpack.c.h.bf16 %v10723_v14  ;;  %v2456_v59 = vunpack.c.l.bf16 %v10613_v6 }
 0x260   : > { %v2055_v9 = vrot.slane %v1915_v37, 4 }
 0x261   : > { %v10737_v55 = vpack.i.bf16 %v3117_v62, %v3116_v61  ;;  %v10740_v43 = vsel %vm14356_vm4, %v2047_v58, %v2053_v20  ;;  %2158 = vst [vmem:[#allocation3 + $0x198] sm:$0xf] %v2053_v20  ;;  %v14617_v58 = vunpack.c.h.bf16 %v10535_v26 }
 0x262   : > { %8658 = vrot.lane.b32.xlu0 %v8657_v29, %s9700_s24  ;;  %2155 = vst [vmem:[#allocation3 + $0x180] sm:$0xff] %v10740_v43  ;;  %v10744_v7 = vsel %vm14356_vm4, %v2049_v57, %v2055_v9  ;;  %2159 = vst [vmem:[#allocation3 + $0x1a0] sm:$0xf] %v2055_v9  ;;  %v14616_v29 = vunpack.c.l.bf16 %v10535_v26  ;;  %v14618_v26 = vunpack.c.l.bf16 %v10515_v21  ;;  %v2457_v21 = vunpack.c.h.bf16 %v10613_v6 }
 0x263   : > { %8638 = vrot.lane.b32.xlu1 %v8637_v54, %s9700_s24  ;;  %v10750_v37 = vrot.slane %v10744_v7, 4 }
 0x264   : > { %v8667_v20 = vpack.i.bf16 %v14617_v58, %v14616_v29  ;;  %v8647_v45 = vpack.i.bf16 %v14619_v10, %v14618_v26  ;;  %v2454_v58 = vunpack.c.l.bf16 %v10567_v42  ;;  %v2455_v26 = vunpack.c.h.bf16 %v10567_v42 }
 0x265   : > { %v10760_v57 = vsel %vm14356_vm4, %v3069_v13, %v10750_v37  ;;  %v8697_v6 = vpack.i.bf16 %v2457_v21, %v2456_v59 }
 0x266   : > { %8663 = vrot.lane.b32.xlu0 %v10564_v17, %s14407_s22  ;;  %v14261_v17 = vunpack.c.l.bf16 %v10760_v57  ;;  %v8677_v42 = vpack.i.bf16 %v2455_v26, %v2454_v58  ;;  %v14260_v58 = vunpack.c.l.bf16 %v10697_v11  ;;  %v14259_v26 = vunpack.c.h.bf16 %v10697_v11 }
 0x267   : > { %8643 = vrot.lane.b32.xlu1 %v10543_v52, %s14407_s22  ;;  %v8692_v52 = vpack.i.bf16 %v14252_v4, %v14253_v1  ;;  %v10787_v54 = vpop.permute.xlu0 %8393  ;;  %v2250_v11 = vunpack.c.h.bf16 %v10740_v43 }
 0x268   : > { %v10776_v13 = vpack.i.bf16 %v14261_v17, %v3118_v32  ;;  %14620 = vst [vmem:[#allocation55_spill] sm:$0xff] %v10787_v54  ;;  %v2246_v17 = vld [vmem:[#allocation3 + $0x198] sm:$0xf] }
 0x269   : > { %v10785_v9 = vld [vmem:[#allocation3 + $0x1a0] sm:$0x1f] }
 0x26a   : > { %8668 = vrot.lane.b32.xlu0 %v8667_v20, %s9700_s24  ;;  %v14257_v29 = vrot.slane %v10785_v9, 4  ;;  %v8672_v20 = vpack.i.bf16 %v14254_v24, %v14255_v33  ;;  %v14626_v24 = vunpack.c.h.bf16 %v10626_v39 }
 0x26b   : > { %8648 = vrot.lane.b32.xlu1 %v8647_v45, %s9700_s24  ;;  %v14258_v45 = vunpack.c.h.bf16 %v10760_v57  ;;  %v10808_v4 = vpop.permute.xlu0 %8398 }
 0x26c   : > { %v10802_v10 = vsel %vm14356_vm4, %v10750_v37, %v14257_v29  ;;  %14621 = vst [vmem:[#allocation56_spill] sm:$0xff] %v10808_v4 }
 0x26e   : > { %8693 = vrot.lane.b32.xlu0 %v8692_v52, %s14407_s22  ;;  %v3614_v52 = vunpack.c.l.bf16 %v10802_v10 }
 0x26f   : > { %8673 = vrot.lane.b32.xlu1 %v8672_v20, %s14407_s22 }
 0x270   : > { %v10814_v59 = vpack.i.bf16 %v3614_v52, %v14258_v45  ;;  %v14628_v52 = vunpack.c.h.bf16 %v10584_v48  ;;  %v2458_v45 = vunpack.c.l.bf16 %v10658_v36 }
 0x271   : > { %v10810_v1 = vpop.permute.xlu1 %8403 }
 0x272   : > { %8698 = vrot.lane.b32.xlu0 %v8697_v6, %s9700_s24  ;;  %14622 = vst [vmem:[#allocation57_spill] sm:$0xff] %v10810_v1  ;;  %v14625_v6 = vunpack.c.l.bf16 %v10626_v39 }
 0x273   : > { %8678 = vrot.lane.b32.xlu1 %v8677_v42, %s9700_s24 }
 0x274   : > { %v10819_v21 = vpop.permute.xlu0 %8423  ;;  %v8707_v33 = vpack.i.bf16 %v14626_v24, %v14625_v6  ;;  %v14262_v24 = vunpack.c.h.bf16 %v10648_v19  ;;  %v2461_v6 = vunpack.c.h.bf16 %v10708_v18 }
 0x275   : > { %14623 = vst [vmem:[#allocation58_spill] sm:$0xff] %v10819_v21  ;;  %v10821_v20 = vpop.permute.xlu1 %8408 }
 0x276   : > { %8703 = vrot.lane.b32.xlu0 %v10642_v60, %s14407_s22  ;;  %14624 = vst [vmem:[#allocation59_spill] sm:$0xff] %v10821_v20  ;;  %v14627_v60 = vunpack.c.l.bf16 %v10584_v48 }
 0x277   : > { %8683 = vrot.lane.b32.xlu1 %v10601_v40, %s14407_s22  ;;  %v8732_v40 = vpack.i.bf16 %v14259_v26, %v14260_v58  ;;  %v2459_v26 = vunpack.c.h.bf16 %v10658_v36 }
 0x278   : > { %v8687_v42 = vpack.i.bf16 %v14628_v52, %v14627_v60  ;;  %v8712_v60 = vpack.i.bf16 %v14262_v24, %v14263_v38  ;;  %v10869_v24 = vld [vmem:[#allocation3 + $0x1a0] sm:$0xff] }
 0x279   : > { %v10837_v29 = vpop.permute.xlu1 %8413 }
 0x27a   : > { %8708 = vrot.lane.b32.xlu0 %v8707_v33, %s9700_s24  ;;  %v10839_v39 = vpop.permute.xlu0 %8428  ;;  %v2460_v33 = vunpack.c.l.bf16 %v10708_v18 }
 0x27b   : > { %8688 = vrot.lane.b32.xlu1 %v8687_v42, %s9700_s24  ;;  %v8717_v42 = vpack.i.bf16 %v2459_v26, %v2458_v45  ;;  %v2251_v45 = vunpack.c.l.bf16 %v2246_v17  ;;  %v9296_v26 = vld [vmem:[#allocation3 + $0x1b8] sm:$0xf] }
 0x27c   : > { %v8737_v58 = vpack.i.bf16 %v2461_v6, %v2460_v33  ;;  %v3291_v33 = vrot.slane %v9296_v26, 4  ;;  %v3289_v6 = vrot.slane %v10869_v24, 4 }
 0x27d   : > { %v10850_v48 = vpop.permute.xlu1 %8418 }
 0x27e   : > { %8733 = vrot.lane.b32.xlu0 %v8732_v40, %s14407_s22  ;;  %14629 = vst [vmem:[#allocation60_spill] sm:$0xff] %v10850_v48  ;;  %v3292_v19 = vsel %vm14356_vm4, %v3289_v6, %v3291_v33 }
 0x27f   : > { %8713 = vrot.lane.b32.xlu1 %v8712_v60, %s14407_s22  ;;  %v10880_v60 = vld [vmem:[#allocation3 + $0x18] sm:$0xff]  ;;  %v3301_v35 = vunpack.c.h.bf16 %v3292_v19 }
 0x280   : > { %v10856_v52 = vpop.permute.xlu0 %8438  ;;  %14630 = vst [vmem:[#allocation61_spill] sm:$0xff] %v10880_v60  ;;  %v14636_v33 = vrot.slane %v10880_v60, 4 }
 0x281   : > { %v10862_v18 = vpop.permute.xlu1 %8433 }
 0x282   : > { %8738 = vrot.lane.b32.xlu0 %v8737_v58, %s9700_s24  ;;  %v8747_v58 = vpack.i.bf16 %v3118_v32, %v3117_v62  ;;  %v2249_v62 = vunpack.c.l.bf16 %v10740_v43 }
 0x283   : > { %8718 = vrot.lane.b32.xlu1 %v8717_v42, %s9700_s24  ;;  %v14631_v42 = vunpack.c.l.bf16 %v10677_v2  ;;  %v2462_v2 = vunpack.c.l.bf16 %v10744_v7 }
 0x284   : > { %v10864_v40 = vpop.permute.xlu0 %8463  ;;  %v8757_v43 = vpack.i.bf16 %v2250_v11, %v2249_v62 }
 0x285   : > { %v10871_v38 = vpop.permute.xlu1 %8443  ;;  %v8727_v14 = vpack.i.bf16 %v3116_v61, %v14631_v42  ;;  %v3024_v61 = vld [vmem:[#allocation3 + $0x1a0] sm:$0xf]  ;;  %v2463_v42 = vunpack.c.h.bf16 %v10744_v7 }
 0x286   : > { %8743 = vrot.lane.b32.xlu0 %v10737_v55, %s14407_s22  ;;  %v3091_v55 = vunpack.c.l.bf16 %v10223_v16  ;;  %v14635_v16 = vrot.slane %v10202_v49, 4 }
 0x287   : > { %8723 = vrot.lane.b32.xlu1 %v10694_v63, %s14407_s22  ;;  %v2464_v63 = vunpack.c.l.bf16 %v10869_v24  ;;  %v8767_v62 = vpack.i.bf16 %v2463_v42, %v2462_v2  ;;  %v2963_v2 = vunpack.c.h.bf16 %v10521_v34 }
 0x288   : > { %v10873_v36 = vpop.permute.xlu0 %8468  ;;  %v8752_v26 = vpack.i.bf16 %v3091_v55, %v2251_v45 }
 0x289   : > { %v10891_v32 = vpop.permute.xlu1 %8448 }
 0x28a   : > { %8748 = vrot.lane.b32.xlu0 %v8747_v58, %s9700_s24  ;;  %14632 = vst [vmem:[#allocation62_spill] sm:$0xff] %v10891_v32  ;;  %v2465_v58 = vunpack.c.h.bf16 %v10869_v24  ;;  %v3300_v24 = vunpack.c.l.bf16 %v3292_v19  ;;  %v2962_v19 = vunpack.c.l.bf16 %v10521_v34  ;;  %v14640_v34 = vrot.slane %v10785_v9, 4 }
 0x28b   : > { %8728 = vrot.lane.b32.xlu1 %v8727_v14, %s9700_s24  ;;  %v10913_v14 = vsel %vm14356_vm4, %v14636_v33, %v14635_v16  ;;  %v14638_v33 = vunpack.c.l.bf16 %v10760_v57  ;;  %v2969_v32 = vunpack.c.h.bf16 %v10589_v30 }
 0x28c   : > { %v10893_v17 = vpop.permute.xlu0 %8473  ;;  %v8762_v27 = vpack.i.bf16 %v2465_v58, %v2464_v63  ;;  %v2961_v7 = vunpack.c.h.bf16 %v10913_v14  ;;  %v8772_v63 = vpack.i.bf16 %v3301_v35, %v3300_v24  ;;  %v2964_v24 = vunpack.c.l.bf16 %v10550_v31 }
 0x28d   : > { %v10904_v45 = vpop.permute.xlu1 %8453 }
 0x28e   : > { %8753 = vrot.lane.b32.xlu0 %v8752_v26, %s14407_s22  ;;  %14633 = vst [vmem:[#allocation63_spill] sm:$0xff] %v10904_v45  ;;  %v3073_v26 = vrot.slane %v3024_v61, 4  ;;  %v2970_v45 = vunpack.c.l.bf16 %v10594_v44 }
 0x28f   : > { %8758 = vrot.lane.b32.xlu1 %v8757_v43, %s14407_s22 }
 0x290   : > { %v10906_v55 = vpop.permute.xlu0 %8478  ;;  %v3074_v58 = vsel %vm14356_vm4, %v10750_v37, %v3073_v26  ;;  %v14639_v26 = vunpack.c.h.bf16 %v10760_v57 }
 0x291   : > { %14634 = vst [vmem:[#allocation64_spill] sm:$0xff] %v10906_v55  ;;  %v8459_v11 = vpop.permute.xlu1 %8458  ;;  %v3121_v43 = vunpack.c.l.bf16 %v3074_v58  ;;  %v3122_v35 = vunpack.c.h.bf16 %v3074_v58 }
 0x292   : > { %8763 = vrot.lane.b32.xlu0 %v8762_v27, %s9700_s24  ;;  %v10925_v16 = vadd.high.f32.bf16 %v2962_v19, %v8459_v11  ;;  %v10927_v61 = vadd.low.f32.bf16 %v2961_v7, %v8459_v11  ;;  %v8782_v7 = vpack.i.bf16 %v14639_v26, %v14638_v33  ;;  %v3615_v11 = vunpack.c.h.bf16 %v10802_v10 }
 0x293   : > { %8768 = vrot.lane.b32.xlu1 %v8767_v62, %s9700_s24  ;;  %v3616_v62 = vunpack.c.l.bf16 %v14640_v34  ;;  %v8797_v10 = vpack.i.bf16 %v3122_v35, %v3121_v43 }
 0x294   : > { %v10918_v47 = vpop.permute.xlu0 %8483 }
 0x295   : > { %14637 = vst [vmem:[#allocation65_spill] sm:$0xff] %v10918_v47  ;;  %v10929_v27 = vpop.permute.xlu1 %8493 }
 0x296   : > { %8773 = vrot.lane.b32.xlu0 %v8772_v63, %s9700_s24  ;;  %v9304_v63 = vadd.low.f32.bf16 %v10927_v61, %v10856_v52 }
 0x297   : > { %8778 = vrot.lane.b32.xlu1 %v10776_v13, %s14407_s22  ;;  %v3290_v13 = vsel %vm14356_vm4, %v10750_v37, %v3289_v6 }
 0x298   : > { %v8489_v42 = vpop.permute.xlu0 %8488  ;;  %v10958_v9 = vrot.slane %v9304_v63, 1  ;;  %v3298_v6 = vunpack.c.l.bf16 %v3290_v13  ;;  %v3299_v35 = vunpack.c.h.bf16 %v3290_v13 }
 0x299   : > { %v10946_v19 = vadd.high.f32.bf16 %v2964_v24, %v8489_v42  ;;  %v10948_v58 = vadd.low.f32.bf16 %v2963_v2, %v8489_v42  ;;  %v10954_v57 = vpop.permute.xlu1 %8498 }
 0x29a   : > { %8788 = vrot.lane.b32.xlu0 %v10814_v59, %s14407_s22  ;;  %v9307_v59 = vadd.high.f32.bf16 %v10925_v16, %v10856_v52  ;;  %v8792_v52 = vpack.i.bf16 %v3616_v62, %v3615_v11  ;;  %v8802_v62 = vpack.i.bf16 %v3299_v35, %v3298_v6  ;;  %v2968_v35 = vunpack.c.l.bf16 %v10589_v30 }
 0x29b   : > { %8783 = vrot.lane.b32.xlu1 %v8782_v7, %s9700_s24  ;;  %v9308_v2 = vadd.low.f32.bf16 %v10948_v58, %v10871_v38  ;;  %v9309_v37 = vadd.high.f32.bf16 %v10946_v19, %v10871_v38 }
 0x29c   : > { %v10956_v33 = vpop.permute.xlu0 %8503  ;;  %v10962_v24 = vrot.slane %v9307_v59, 1 }
 0x29d   : > { %v10968_v42 = vpop.permute.xlu1 %8508  ;;  %v10977_v7 = vrot.slane %v9308_v2, 1  ;;  %v10979_v34 = vrot.slane %v9309_v37, 1  ;;  %v2966_v2 = vunpack.c.l.bf16 %v10578_v25 }
 0x29e   : > { %8798 = vrot.lane.b32.xlu0 %v8797_v10, %s14407_s22  ;;  %14641 = vst [vmem:[#allocation66_spill] sm:$0xff] %v10968_v42  ;;  %v10975_v26 = vsel %vm14358_vm5, %v10958_v9, %v10962_v24  ;;  %v2965_v10 = vunpack.c.h.bf16 %v10550_v31 }
 0x29f   : > { %8793 = vrot.lane.b32.xlu1 %v8792_v52, %s14407_s22  ;;  %v10985_v38 = vsel %vm14358_vm5, %v10977_v7, %v10979_v34 }
 0x2a0   : > { %v10970_v43 = vpop.permute.xlu0 %8523 }
 0x2a1   : > { %v10987_v11 = vpop.permute.xlu1 %8513 }
 0x2a2   : > { %14642 = vst [vmem:[#allocation67_spill] sm:$0xff] %v10987_v11 }
 0x2a3   : > { %8803 = vrot.lane.b32.xlu1 %v8802_v62, %s9700_s24  ;;  %v2967_v62 = vunpack.c.h.bf16 %v10578_v25 }
 0x2a4   : > { %v10989_v63 = vpop.permute.xlu0 %8538 }
 0x2a5   : > { %14643 = vst [vmem:[#allocation68_spill] sm:$0xff] %v10989_v63  ;;  %v8519_v13 = vpop.permute.xlu1 %8518 }
 0x2a6   : > { %v10996_v37 = vadd.high.f32.bf16 %v2966_v2, %v8519_v13  ;;  %v10998_v52 = vadd.low.f32.bf16 %v2965_v10, %v8519_v13 }
 0x2a8   : > { %v10992_v59 = vpop.permute.xlu0 %8543  ;;  %v9312_v6 = vadd.high.f32.bf16 %v10996_v37, %v10873_v36  ;;  %v9313_v63 = vadd.low.f32.bf16 %v10998_v52, %v10873_v36 }
 0x2a9   : > { %14644 = vst [vmem:[#allocation69_spill] sm:$0xff] %v10992_v59  ;;  %v11000_v50 = vpop.permute.xlu1 %8528 }
 0x2aa   : > { %v11010_v59 = vrot.slane %v9312_v6, 1  ;;  %v11018_v0 = vrot.slane %v9313_v63, 1 }
 0x2ac   : > { %v8549_v56 = vpop.permute.xlu0 %8548  ;;  %v11027_v36 = vsel %vm14358_vm5, %v11018_v0, %v11010_v59 }
 0x2ad   : > { %v11008_v31 = vadd.high.f32.bf16 %v2968_v35, %v8549_v56  ;;  %v11012_v2 = vpop.permute.xlu1 %8533  ;;  %v11014_v13 = vadd.low.f32.bf16 %v2967_v62, %v8549_v56 }
 0x2af   : > { %v9316_v42 = vadd.high.f32.bf16 %v11008_v31, %v10893_v17  ;;  %v9317_v25 = vadd.low.f32.bf16 %v11014_v13, %v10893_v17 }
 0x2b0   : > { %v11016_v10 = vpop.permute.xlu0 %8553 }
 0x2b1   : > { %v11029_v6 = vrot.slane %v9316_v42, 1  ;;  %v11031_v35 = vpop.permute.xlu1 %8563  ;;  %v11035_v62 = vrot.slane %v9317_v25, 1 }
 0x2b3   : > { %v11040_v63 = vsel %vm14358_vm5, %v11035_v62, %v11029_v6 }
 0x2b4   : > { %v11033_v56 = vpop.permute.xlu0 %8558 }
 0x2b5   : > { %v11042_v11 = vpop.permute.xlu1 %8568 }
 0x2b6   : > { %14645 = vst [vmem:[#allocation70_spill] sm:$0xff] %v11042_v11 }
 0x2b8   : > { %v11044_v17 = vpop.permute.xlu0 %8593 }
 0x2b9   : > { %v11046_v53 = vpop.permute.xlu1 %8573 }
 0x2ba   : > { %14646 = vst [vmem:[#allocation71_spill] sm:$0xff] %v11046_v53 }
 0x2bc   : > { %v11048_v55 = vpop.permute.xlu0 %8603 }
 0x2bd   : > { %v11050_v42 = vpop.permute.xlu1 %8578 }
 0x2be   : > { %14647 = vst [vmem:[#allocation72_spill] sm:$0xff] %v11050_v42  ;;  %v2971_v42 = vunpack.c.h.bf16 %v10594_v44 }
 0x2c0   : > { %v11052_v47 = vpop.permute.xlu0 %8613 }
 0x2c1   : > { %14648 = vst [vmem:[#allocation73_spill] sm:$0xff] %v11052_v47  ;;  %v8584_v3 = vpop.permute.xlu1 %8583 }
 0x2c2   : > { %v11058_v49 = vadd.high.f32.bf16 %v2970_v45, %v8584_v3  ;;  %v11060_v11 = vadd.low.f32.bf16 %v2969_v32, %v8584_v3 }
 0x2c4   : > { %v11054_v25 = vpop.permute.xlu0 %8618  ;;  %14650 = vst [vmem:[#allocation75_spill] sm:$0xff] %v11058_v49  ;;  %v9320_v21 = vadd.high.f32.bf16 %v11058_v49, %v10954_v57  ;;  %v9321_v47 = vadd.low.f32.bf16 %v11060_v11, %v10954_v57 }
 0x2c5   : > { %14649 = vst [vmem:[#allocation74_spill] sm:$0xff] %v11054_v25  ;;  %v11062_v48 = vpop.permute.xlu1 %8588  ;;  %v2972_v25 = vunpack.c.l.bf16 %v10620_v23 }
 0x2c6   : > { %v11070_v30 = vrot.slane %v9321_v47, 1  ;;  %v11072_v4 = vrot.slane %v9320_v21, 1 }
 0x2c8   : > { %v8624_v53 = vpop.permute.xlu0 %8623  ;;  %14651 = vst [vmem:[#allocation76_spill] sm:$0xff] %v11072_v4  ;;  %v11089_v47 = vsel %vm14358_vm5, %v11070_v30, %v11072_v4 }
 0x2c9   : > { %v11074_v45 = vpop.permute.xlu1 %8598  ;;  %v11076_v3 = vadd.high.f32.bf16 %v2972_v25, %v8624_v53  ;;  %v11078_v32 = vadd.low.f32.bf16 %v2971_v42, %v8624_v53 }
 0x2cb   : > { %14652 = vst [vmem:[#allocation77_spill] sm:$0xff] %v11076_v3  ;;  %14653 = vst [vmem:[#allocation78_spill] sm:$0xff] %v11078_v32  ;;  %v9324_v1 = vadd.high.f32.bf16 %v11076_v3, %v10956_v33  ;;  %v9325_v44 = vadd.low.f32.bf16 %v11078_v32, %v10956_v33  ;;  %v2975_v3 = vunpack.c.h.bf16 %v10623_v51 }
 0x2cc   : > { %v11080_v5 = vpop.permute.xlu0 %8628 }
 0x2cd   : > { %14654 = vst [vmem:[#allocation79_spill] sm:$0xff] %v11080_v5  ;;  %v11091_v21 = vpop.permute.xlu1 %8608  ;;  %v11095_v25 = vrot.slane %v9325_v44, 1  ;;  %v11097_v53 = vrot.slane %v9324_v1, 1 }
 0x2cf   : > { %14656 = vst [vmem:[#allocation81_spill] sm:$0xff] %v11095_v25  ;;  %14657 = vst [vmem:[#allocation82_spill] sm:$0xff] %v11097_v53  ;;  %v11102_v42 = vsel %vm14358_vm5, %v11095_v25, %v11097_v53  ;;  %v2973_v53 = vunpack.c.h.bf16 %v10620_v23 }
 0x2d0   : > { %v11093_v57 = vpop.permute.xlu0 %8653  ;;  %14658 = vst [vmem:[#allocation83_spill] sm:$0xff] %v11102_v42 }
 0x2d1   : > { %14655 = vst [vmem:[#allocation80_spill] sm:$0xff] %v11093_v57  ;;  %v11104_v54 = vpop.permute.xlu1 %8633  ;;  %v2976_v57 = vunpack.c.l.bf16 %v10645_v12 }
 0x2d2   : > { %14659 = vst [vmem:[#allocation84_spill] sm:$0xff] %v11104_v54  ;;  %v2974_v54 = vunpack.c.l.bf16 %v10623_v51 }
 0x2d4   : > { %v11106_v33 = vpop.permute.xlu0 %8658 }
 0x2d5   : > { %14660 = vst [vmem:[#allocation85_spill] sm:$0xff] %v11106_v33  ;;  %v11108_v32 = vpop.permute.xlu1 %8638 }
 0x2d6   : > { %14661 = vst [vmem:[#allocation86_spill] sm:$0xff] %v11108_v32 }
 0x2d8   : > { %v8664_v4 = vpop.permute.xlu0 %8663 }
 0x2d9   : > { %v8644_v44 = vpop.permute.xlu1 %8643  ;;  %v11112_v49 = vadd.high.f32.bf16 %v2976_v57, %v8664_v4  ;;  %v11114_v1 = vadd.low.f32.bf16 %v2975_v3, %v8664_v4 }
 0x2da   : > { %v11124_v42 = vadd.high.f32.bf16 %v2974_v54, %v8644_v44  ;;  %v11126_v25 = vadd.low.f32.bf16 %v2973_v53, %v8644_v44 }
 0x2db   : > { %14662 = vst [vmem:[#allocation87_spill] sm:$0xff] %v11112_v49  ;;  %14663 = vst [vmem:[#allocation88_spill] sm:$0xff] %v11114_v1  ;;  %v9328_v33 = vadd.high.f32.bf16 %v11112_v49, %v11012_v2  ;;  %v9329_v32 = vadd.low.f32.bf16 %v11114_v1, %v11012_v2  ;;  %v2979_v49 = vunpack.c.h.bf16 %v10655_v15  ;;  %v2978_v1 = vunpack.c.l.bf16 %v10655_v15 }
 0x2dc   : > { %v11116_v5 = vpop.permute.xlu0 %8668  ;;  %14665 = vst [vmem:[#allocation90_spill] sm:$0xff] %v11126_v25  ;;  %v9332_v23 = vadd.high.f32.bf16 %v11124_v42, %v11000_v50  ;;  %v9333_v51 = vadd.low.f32.bf16 %v11126_v25, %v11000_v50 }
 0x2dd   : > { %14664 = vst [vmem:[#allocation89_spill] sm:$0xff] %v11116_v5  ;;  %v11128_v57 = vpop.permute.xlu1 %8648  ;;  %v11132_v3 = vrot.slane %v9329_v32, 1  ;;  %v11134_v5 = vrot.slane %v9328_v33, 1 }
 0x2de   : > { %v11145_v2 = vrot.slane %v9333_v51, 1  ;;  %v11147_v53 = vrot.slane %v9332_v23, 1 }
 0x2df   : > { %14667 = vst [vmem:[#allocation92_spill] sm:$0xff] %v11132_v3  ;;  %14668 = vst [vmem:[#allocation93_spill] sm:$0xff] %v11134_v5  ;;  %v11143_v54 = vsel %vm14358_vm5, %v11132_v3, %v11134_v5  ;;  %v2980_v5 = vunpack.c.l.bf16 %v10666_v28 }
 0x2e0   : > { %v11130_v4 = vpop.permute.xlu0 %8693  ;;  %14669 = vst [vmem:[#allocation94_spill] sm:$0xff] %v11143_v54  ;;  %14670 = vst [vmem:[#allocation95_spill] sm:$0xff] %v11147_v53  ;;  %v11156_v33 = vsel %vm14358_vm5, %v11145_v2, %v11147_v53 }
 0x2e1   : > { %14666 = vst [vmem:[#allocation91_spill] sm:$0xff] %v11130_v4  ;;  %v11149_v44 = vpop.permute.xlu1 %8673 }
 0x2e2   : > { %14671 = vst [vmem:[#allocation96_spill] sm:$0xff] %v11149_v44 }
 0x2e4   : > { %v11151_v32 = vpop.permute.xlu0 %8698 }
 0x2e5   : > { %14672 = vst [vmem:[#allocation97_spill] sm:$0xff] %v11151_v32  ;;  %v11158_v4 = vpop.permute.xlu1 %8678  ;;  %v2977_v32 = vunpack.c.h.bf16 %v10645_v12  ;;  %v2891_v12 = vld [vmem:[#allocation3] sm:$0xf0] }
 0x2e6   : > { %14673 = vst [vmem:[#allocation98_spill] sm:$0xff] %v11158_v4 }
 0x2e8   : > { %v8704_v50 = vpop.permute.xlu0 %8703 }
 0x2e9   : > { %v8684_v51 = vpop.permute.xlu1 %8683  ;;  %v11162_v54 = vadd.high.f32.bf16 %v2980_v5, %v8704_v50  ;;  %v11164_v23 = vadd.low.f32.bf16 %v2979_v49, %v8704_v50 }
 0x2ea   : > { %v11174_v3 = vadd.high.f32.bf16 %v2978_v1, %v8684_v51  ;;  %v11176_v25 = vadd.low.f32.bf16 %v2977_v32, %v8684_v51 }
 0x2eb   : > { %14674 = vst [vmem:[#allocation99_spill] sm:$0xff] %v11162_v54  ;;  %14675 = vst [vmem:[#allocation100_spill] sm:$0xff] %v11164_v23  ;;  %v9336_v53 = vadd.high.f32.bf16 %v11162_v54, %v11031_v35  ;;  %v9337_v4 = vadd.low.f32.bf16 %v11164_v23, %v11031_v35 }
 0x2ec   : > { %v11166_v44 = vpop.permute.xlu0 %8708  ;;  %14677 = vst [vmem:[#allocation102_spill] sm:$0xff] %v11174_v3  ;;  %v9340_v15 = vadd.high.f32.bf16 %v11174_v3, %v11033_v56  ;;  %v9341_v54 = vadd.low.f32.bf16 %v11176_v25, %v11033_v56  ;;  %v14686_v56 = vrot.slane %v10880_v60, 4  ;;  %v2982_v60 = vunpack.c.l.bf16 %v10682_v46 }
 0x2ed   : > { %14676 = vst [vmem:[#allocation101_spill] sm:$0xff] %v11166_v44  ;;  %v11178_v5 = vpop.permute.xlu1 %8688  ;;  %v11182_v50 = vrot.slane %v9337_v4, 1  ;;  %v11184_v44 = vrot.slane %v9336_v53, 1  ;;  %v2909_v4 = vrot.slane %v2891_v12, 4  ;;  %v2984_v12 = vunpack.c.l.bf16 %v10705_v8 }
 0x2ee   : > { %v11195_v1 = vrot.slane %v9341_v54, 1  ;;  %v11197_v32 = vrot.slane %v9340_v15, 1  ;;  %v2983_v15 = vunpack.c.h.bf16 %v10682_v46 }
 0x2ef   : > { %14679 = vst [vmem:[#allocation104_spill] sm:$0xff] %v11182_v50  ;;  %14680 = vst [vmem:[#allocation105_spill] sm:$0xff] %v11184_v44  ;;  %v11193_v35 = vsel %vm14358_vm5, %v11182_v50, %v11184_v44  ;;  %v2911_v23 = vsel %vm14356_vm4, %v2909_v4, %v14686_v56 }
 0x2f0   : > { %v11180_v49 = vpop.permute.xlu0 %8733  ;;  %14681 = vst [vmem:[#allocation106_spill] sm:$0xff] %v11193_v35  ;;  %14682 = vst [vmem:[#allocation107_spill] sm:$0xff] %v11195_v1  ;;  %v2959_v35 = vunpack.c.h.bf16 %v2911_v23 }
 0x2f1   : > { %14678 = vst [vmem:[#allocation103_spill] sm:$0xff] %v11180_v49  ;;  %14683 = vst [vmem:[#allocation108_spill] sm:$0xff] %v11197_v32  ;;  %v11199_v51 = vpop.permute.xlu1 %8713  ;;  %v11206_v49 = vsel %vm14358_vm5, %v11195_v1, %v11197_v32  ;;  %v2981_v32 = vunpack.c.h.bf16 %v10666_v28 }
 0x2f2   : > { %14684 = vst [vmem:[#allocation109_spill] sm:$0xff] %v11199_v51  ;;  %v9344_v4 = vadd.low.f32.bf16 %v2959_v35, %v10839_v39 }
 0x2f4   : > { %v11201_v53 = vpop.permute.xlu0 %8738 }
 0x2f5   : > { %14685 = vst [vmem:[#allocation110_spill] sm:$0xff] %v11201_v53  ;;  %v11211_v44 = vpop.permute.xlu1 %8718 }
 0x2f6   : > { %14687 = vst [vmem:[#allocation111_spill] sm:$0xff] %v11211_v44 }
 0x2f8   : > { %v8744_v54 = vpop.permute.xlu0 %8743 }
 0x2f9   : > { %v8724_v51 = vpop.permute.xlu1 %8723  ;;  %v11215_v50 = vadd.high.f32.bf16 %v2984_v12, %v8744_v54  ;;  %v11217_v53 = vadd.low.f32.bf16 %v2983_v15, %v8744_v54  ;;  %v2960_v54 = vunpack.c.l.bf16 %v10913_v14 }
 0x2fa   : > { %v11228_v1 = vadd.high.f32.bf16 %v2982_v60, %v8724_v51  ;;  %v11230_v12 = vadd.low.f32.bf16 %v2981_v32, %v8724_v51  ;;  %v2958_v60 = vunpack.c.l.bf16 %v2911_v23  ;;  %v9352_v51 = vadd.high.f32.bf16 %v9344_v4, %v10821_v20 }
 0x2fb   : > { %14688 = vst [vmem:[#allocation112_spill] sm:$0xff] %v11215_v50  ;;  %14689 = vst [vmem:[#allocation113_spill] sm:$0xff] %v11217_v53  ;;  %v9345_v56 = vadd.high.f32.bf16 %v11215_v50, %v11074_v45  ;;  %v9346_v44 = vadd.low.f32.bf16 %v11217_v53, %v11074_v45  ;;  %v9351_v14 = vadd.high.f32.bf16 %v2960_v54, %v10839_v39 }
 0x2fc   : > { %v11219_v3 = vpop.permute.xlu0 %8748  ;;  %14691 = vst [vmem:[#allocation115_spill] sm:$0xff] %v11228_v1  ;;  %v9349_v35 = vadd.high.f32.bf16 %v11228_v1, %v11044_v17  ;;  %v9350_v45 = vadd.low.f32.bf16 %v11230_v12, %v11044_v17  ;;  %v11257_v1 = vld [vmem:[#allocation3 + $0x180] sm:$0x1f] }
 0x2fd   : > { %14690 = vst [vmem:[#allocation114_spill] sm:$0xff] %v11219_v3  ;;  %v11233_v15 = vpop.permute.xlu1 %8728  ;;  %v11237_v28 = vrot.slane %v9346_v44, 1  ;;  %v11239_v46 = vrot.slane %v9345_v56, 1  ;;  %14696 = vst [vmem:[#allocation120_spill] sm:$0xff] %v11257_v1  ;;  %v9354_v23 = vadd.low.f32.bf16 %v9351_v14, %v10837_v29  ;;  %v14353_v54 = vrot.slane %v11257_v1, 4 }
 0x2fe   : > { %v11259_v53 = vrot.slane %v9350_v45, 1  ;;  %v11261_v17 = vrot.slane %v9349_v35, 1  ;;  %v4013_v45 = vrot.slane %v9352_v51, 1  ;;  %v2985_v51 = vunpack.c.h.bf16 %v10705_v8 }
 0x2ff   : > { %14693 = vst [vmem:[#allocation117_spill] sm:$0xff] %v11239_v46  ;;  %v11248_v32 = vsel %vm14358_vm5, %v11237_v28, %v11239_v46 }
 0x300   : > { %v11235_v3 = vpop.permute.xlu0 %8753  ;;  %v11275_v35 = vsel %vm14358_vm5, %v11259_v53, %v11261_v17 }
 0x301   : > { %14692 = vst [vmem:[#allocation116_spill] sm:$0xff] %v11235_v3  ;;  %v9353_v44 = vadd.high.f32.bf16 %v2958_v60, %v11235_v3  ;;  %v11253_v56 = vpop.permute.xlu1 %8758  ;;  %14698 = vst [vmem:[#allocation122_spill] sm:$0xff] %v11275_v35 }
 0x302   : > { %14694 = vst [vmem:[#allocation118_spill] sm:$0xff] %v11253_v56 }
 0x303   : > { %v9355_v46 = vadd.low.f32.bf16 %v9353_v44, %v10862_v18  ;;  %v9356_v39 = vadd.high.f32.bf16 %v9353_v44, %v10837_v29  ;;  %v2986_v44 = vunpack.c.l.bf16 %v10727_v22 }
 0x304   : > { %v11255_v50 = vpop.permute.xlu0 %8763 }
 0x305   : > { %14695 = vst [vmem:[#allocation119_spill] sm:$0xff] %v11255_v50  ;;  %v11267_v20 = vpop.permute.xlu1 %8768  ;;  %3468 = vrot.lane.b32.xlu1 %v9355_v46, %s14405_s25  ;;  %v4012_v3 = vrot.slane %v9356_v39, 1  ;;  %v4015_v50 = vrot.slane %v9354_v23, 1  ;;  %v11285_v46 = vsel %vm14356_vm4, %v10714_v41, %v14353_v54 }
 0x306   : > { %14697 = vst [vmem:[#allocation121_spill] sm:$0xff] %v11267_v20  ;;  %v9358_v20 = vadd.high.f32.bf16 %v10927_v61, %v10864_v40 }
 0x307   : > { %v4014_v56 = vsel %vm14358_vm5, %v4012_v3, %v4013_v45  ;;  %v4018_v29 = vsel %vm14358_vm5, %v4015_v50, %v10958_v9  ;;  %v2987_v3 = vunpack.c.h.bf16 %v10727_v22  ;;  %v3602_v9 = vunpack.c.l.bf16 %v11285_v46 }
 0x308   : > { %v11270_v60 = vpop.permute.xlu0 %8773  ;;  %4077 = vrot.lane.b32.xlu0 %v4014_v56, %s9700_s24  ;;  %v9357_v56 = vadd.high.f32.bf16 %v9344_v4, %v10862_v18 }
 0x309   : > { %v8779_v39 = vpop.permute.xlu1 %8778  ;;  %4081 = vrot.lane.b32.xlu1 %v4018_v29, %s9700_s24  ;;  %v4016_v29 = vsel %vm14358_vm5, %v4013_v45, %v4015_v50 }
 0x30a   : > { %v11295_v1 = vadd.high.f32.bf16 %v2986_v44, %v8779_v39  ;;  %v11297_v54 = vadd.low.f32.bf16 %v2985_v51, %v8779_v39 }
 0x30c   : > { %v8789_v23 = vpop.permute.xlu0 %8788  ;;  %3470 = vrot.lane.b32.xlu0 %v9357_v56, %s14405_s25  ;;  %v9363_v22 = vadd.high.f32.bf16 %v11295_v1, %v11048_v55  ;;  %v9364_v18 = vadd.low.f32.bf16 %v11297_v54, %v11048_v55  ;;  %v9367_v55 = vadd.low.f32.bf16 %v9351_v14, %v10864_v40  ;;  %v4022_v40 = vsel %vm14358_vm5, %v10962_v24, %v10977_v7 }
 0x30d   : > { %v9361_v8 = vadd.high.f32.bf16 %v3602_v9, %v8789_v23  ;;  %v11300_v35 = vadd.low.f32.bf16 %v2987_v3, %v8789_v23  ;;  %3474 = vrot.lane.b32.xlu1 %v9358_v20, %s14405_s25  ;;  %v9370_v14 = vadd.high.f32.bf16 %v10998_v52, %v10970_v43  ;;  %v9372_v24 = vadd.low.f32.bf16 %v10996_v37, %v11016_v10  ;;  %v14702_v52 = vld [vmem:[#allocation81_spill] sm:$0xff]  ;;  %v14710_v3 = vld [vmem:[#allocation102_spill] sm:$0xff]  ;;  %v14712_v9 = vld [vmem:[#allocation95_spill] sm:$0xff] }
 0x30e   : > { %v11312_v51 = vrot.slane %v9364_v18, 1  ;;  %v11314_v44 = vrot.slane %v9363_v22, 1  ;;  %v9375_v7 = vadd.low.f32.bf16 %v11008_v31, %v11062_v48  ;;  %v14715_v18 = vld [vmem:[#allocation107_spill] sm:$0xff] }
 0x30f   : > { %v9365_v4 = vadd.high.f32.bf16 %v9361_v8, %v11091_v21  ;;  %v9366_v61 = vadd.low.f32.bf16 %v11300_v35, %v11091_v21  ;;  %v9368_v21 = vadd.low.f32.bf16 %v10925_v16, %v10929_v27  ;;  %v4026_v16 = vsel %vm14358_vm5, %v10979_v34, %v11018_v0  ;;  %v14699_v34 = vld [vmem:[#allocation79_spill] sm:$0xff] }
 0x310   : > { %4079 = vrot.lane.b32.xlu0 %v4016_v29, %s9700_s24  ;;  %v11333_v45 = vsel %vm14358_vm5, %v11312_v51, %v11314_v44  ;;  %v9371_v0 = vadd.low.f32.bf16 %v10946_v19, %v10970_v43  ;;  %v9373_v19 = vadd.high.f32.bf16 %v11014_v13, %v11016_v10  ;;  %v9374_v43 = vadd.high.f32.bf16 %v11060_v11, %v11062_v48  ;;  %v14701_v11 = vld [vmem:[#allocation77_spill] sm:$0xff]  ;;  %v14703_v13 = vld [vmem:[#allocation76_spill] sm:$0xff]  ;;  %v14704_v48 = vld [vmem:[#allocation78_spill] sm:$0xff] }
 0x311   : > { %4083 = vrot.lane.b32.xlu1 %v10975_v26, %s9700_s24  ;;  %v11318_v20 = vrot.slane %v9366_v61, 1  ;;  %v11320_v39 = vrot.slane %v9365_v4, 1  ;;  %v9369_v26 = vadd.high.f32.bf16 %v10948_v58, %v10929_v27  ;;  %v4030_v27 = vsel %vm14358_vm5, %v11010_v59, %v11035_v62  ;;  %v14706_v62 = vld [vmem:[#allocation83_spill] sm:$0xff]  ;;  %v14716_v4 = vld [vmem:[#allocation93_spill] sm:$0xff] }
 0x312   : > { %v4034_v58 = vsel %vm14358_vm5, %v11029_v6, %v11070_v30  ;;  %v9377_v37 = vadd.low.f32.bf16 %v14701_v11, %v11128_v57  ;;  %v4038_v10 = vsel %vm14358_vm5, %v14703_v13, %v14702_v52  ;;  %v9378_v31 = vadd.high.f32.bf16 %v14704_v48, %v14699_v34  ;;  %v14707_v30 = vld [vmem:[#allocation82_spill] sm:$0xff]  ;;  %v14717_v29 = vld [vmem:[#allocation87_spill] sm:$0xff]  ;;  %v14726_v52 = vld [vmem:[#allocation113_spill] sm:$0xff] }
 0x313   : > { %v11328_v50 = vsel %vm14358_vm5, %v11318_v20, %v11320_v39  ;;  %v4050_v61 = vsel %vm14358_vm5, %v14716_v4, %v14715_v18  ;;  %v14727_v48 = vld [vmem:[#allocation57_spill] sm:$0xff]  ;;  %v14732_v18 = vld [vmem:[#allocation58_spill] sm:$0xff] }
 0x314   : > { %3472 = vrot.lane.b32.xlu0 %v9367_v55, %s14405_s25  ;;  %v9385_v55 = vadd.low.f32.bf16 %v14717_v29, %v11178_v5 }
 0x315   : > { %3476 = vrot.lane.b32.xlu1 %v9368_v21, %s14405_s25  ;;  %v14718_v21 = vld [vmem:[#allocation104_spill] sm:$0xff] }
 0x318   : > { %4085 = vrot.lane.b32.xlu0 %v4022_v40, %s9700_s24 }
 0x319   : > { %4089 = vrot.lane.b32.xlu1 %v4026_v16, %s9700_s24  ;;  %v14720_v16 = vld [vmem:[#allocation100_spill] sm:$0xff] }
 0x31c   : > { %3478 = vrot.lane.b32.xlu0 %v9369_v26, %s14405_s25 }
 0x31d   : > { %3482 = vrot.lane.b32.xlu1 %v9370_v14, %s14405_s25  ;;  %v11443_v14 = vpop.permute.xlu1 %8783 }
 0x320   : > { %4087 = vrot.lane.b32.xlu0 %v10985_v38, %s9700_s24  ;;  %v14700_v38 = vld [vmem:[#allocation75_spill] sm:$0xff] }
 0x321   : > { %4091 = vrot.lane.b32.xlu1 %v11027_v36, %s9700_s24  ;;  %v9376_v59 = vadd.low.f32.bf16 %v14700_v38, %v14699_v34  ;;  %v14705_v36 = vld [vmem:[#allocation89_spill] sm:$0xff]  ;;  %v14724_v38 = vld [vmem:[#allocation55_spill] sm:$0xff] }
 0x322   : > { %v9379_v6 = vadd.low.f32.bf16 %v11124_v42, %v14705_v36  ;;  %v14709_v42 = vld [vmem:[#allocation101_spill] sm:$0xff] }
 0x323   : > { %v9382_v56 = vadd.low.f32.bf16 %v14710_v3, %v14709_v42  ;;  %v9386_v26 = vadd.high.f32.bf16 %v14720_v16, %v14709_v42  ;;  %v14731_v3 = vld [vmem:[#allocation56_spill] sm:$0xff]  ;;  %v14734_v16 = vld [vmem:[#allocation41_spill] sm:$0xff] }
 0x324   : > { %3480 = vrot.lane.b32.xlu0 %v9371_v0, %s14405_s25  ;;  %v14721_v0 = vld [vmem:[#allocation106_spill] sm:$0xff] }
 0x325   : > { %3484 = vrot.lane.b32.xlu1 %v9372_v24, %s14405_s25  ;;  %v2161_v24 = vld [vmem:[#allocation3] sm:$0xf8] }
 0x328   : > { %4093 = vrot.lane.b32.xlu0 %v4030_v27, %s9700_s24 }
 0x329   : > { %4097 = vrot.lane.b32.xlu1 %v4034_v58, %s9700_s24  ;;  %v2178_v58 = vunpack.c.l.bf16 %v2161_v24 }
 0x32b   : > { %v9389_v11 = vadd.low.f32.bf16 %v2178_v58, %v14724_v38  ;;  %v14736_v58 = vmov 0 }
 0x32c   : > { %3486 = vrot.lane.b32.xlu0 %v9373_v19, %s14405_s25  ;;  %v11450_v19 = vpop.permute.xlu1 %8793 }
 0x32d   : > { %3490 = vrot.lane.b32.xlu1 %v9374_v43, %s14405_s25  ;;  %v2179_v43 = vunpack.c.h.bf16 %v2161_v24 }
 0x330   : > { %4095 = vrot.lane.b32.xlu0 %v11040_v63, %s9700_s24  ;;  %v9380_v63 = vadd.high.f32.bf16 %v11176_v25, %v11178_v5  ;;  %v14711_v25 = vld [vmem:[#allocation92_spill] sm:$0xff]  ;;  %v14722_v5 = vld [vmem:[#allocation99_spill] sm:$0xff] }
 0x331   : > { %4099 = vrot.lane.b32.xlu1 %v11089_v47, %s9700_s24  ;;  %v4042_v47 = vsel %vm14358_vm5, %v14707_v30, %v11145_v2  ;;  %v4046_v8 = vsel %vm14358_vm5, %v14712_v9, %v14711_v25  ;;  %v14713_v2 = vld [vmem:[#allocation88_spill] sm:$0xff]  ;;  %v9387_v27 = vadd.low.f32.bf16 %v14722_v5, %v11233_v15 }
 0x332   : > { %v9383_v22 = vadd.high.f32.bf16 %v14713_v2, %v14705_v36  ;;  %v9392_v36 = vadd.low.f32.bf16 %v9389_v11, %v14727_v48  ;;  %v14729_v30 = vld [vmem:[#allocation112_spill] sm:$0xff]  ;;  %v9259_v2 = vld [vmem:[%s14174_s8 + $0x8] sm:$0xff]  }
 0x334   : > { %3488 = vrot.lane.b32.xlu0 %v9375_v7, %s14405_s25  ;;  %v14723_v7 = vld [vmem:[#allocation105_spill] sm:$0xff] }
 0x335   : > { %3492 = vrot.lane.b32.xlu1 %v9376_v59, %s14405_s25  ;;  %v4058_v34 = vsel %vm14358_vm5, %v14723_v7, %v11259_v53  ;;  %v9388_v59 = vadd.high.f32.bf16 %v2179_v43, %v14724_v38  ;;  %v14728_v53 = vld [vmem:[#allocation61_spill] sm:$0xff] }
 0x338   : > { %4101 = vrot.lane.b32.xlu0 %v4038_v10, %s9700_s24  ;;  %v11463_v10 = vpop.permute.xlu1 %8803 }
 0x339   : > { %3496 = vrot.lane.b32.xlu1 %v9377_v37, %s14405_s25  ;;  %v14725_v37 = vld [vmem:[#allocation114_spill] sm:$0xff] }
 0x33a   : > { %v9390_v13 = vadd.high.f32.bf16 %v14726_v52, %v14725_v37 }
 0x33c   : > { %3494 = vrot.lane.b32.xlu0 %v9378_v31, %s14405_s25  ;;  %v9391_v31 = vadd.high.f32.bf16 %v9388_v59, %v14727_v48  ;;  %v14739_v59 = vld [vmem:[#allocation63_spill] sm:$0xff] }
 0x33d   : > { %4107 = vrot.lane.b32.xlu1 %v11156_v33, %s9700_s24  ;;  %v14708_v33 = vld [vmem:[#allocation90_spill] sm:$0xff] }
 0x33e   : > { %v9381_v23 = vadd.high.f32.bf16 %v14708_v33, %v11128_v57  ;;  %v9384_v57 = vadd.high.f32.bf16 %v11230_v12, %v11233_v15  ;;  %v14719_v12 = vld [vmem:[#allocation108_spill] sm:$0xff]  ;;  %v9258_v15 = vld [vmem:[%s14174_s8] sm:$0xff]   ;;  %v11472_v33 = vpop.permute.xlu0 %8798 }
 0x33f   : > { %v4054_v40 = vsel %vm14358_vm5, %v14719_v12, %v14718_v21  ;;  %8255 = vmatprep.subr.bf16.mxu0 %v9258_v15 }
 0x340   : > { %4103 = vrot.lane.b32.xlu0 %v14706_v62, %s9700_s24  ;;  %v2181_v62 = vunpack.c.h.bf16 %v14728_v53  ;;  %8256 = vmatpush3.bf16.msra.mxu0 %v9258_v15  ;;  %v14740_v15 = vmov 0 }
 0x341   : > { %3500 = vrot.lane.b32.xlu1 %v9379_v6, %s14405_s25  ;;  %v2180_v6 = vunpack.c.l.bf16 %v14728_v53  ;;  %8257 = vmatprep.subr.bf16.mxu0 %v9259_v2 }
 0x343   : > { %v9395_v25 = vadd.low.f32.bf16 %v2180_v6, %v14731_v3 }
 0x344   : > { %4105 = vrot.lane.b32.xlu0 %v4042_v47, %s9700_s24  ;;  %v9393_v47 = vadd.low.f32.bf16 %v14729_v30, %v11443_v14  ;;  %8258 = vmatpush3.bf16.msra.mxu0 %v9259_v2  ;;  %v14743_v30 = vmov 0 }
 0x345   : > { %3506 = vrot.lane.b32.xlu1 %v9380_v63, %s14405_s25  ;;  %v2177_v63 = vld [vmem:[#allocation3 + $0x180] sm:$0xf] }
 0x346   : > { %v2940_v29 = vrot.slane %v2177_v63, 4 }
 0x348   : > { %3498 = vrot.lane.b32.xlu0 %v9381_v23, %s14405_s25  ;;  %v14730_v23 = vld [vmem:[#allocation7_spill] sm:$0xff]  ;;  %v11507_v52 = vsel %vm14356_vm4, %v10714_v41, %v2940_v29  ;;  %v4062_v41 = vsel %vm14358_vm5, %v11261_v17, %v11237_v28  ;;  %v14746_v28 = vunpack.c.h.bf16 %v14734_v16  ;;  %v14751_v29 = vld [vmem:[#allocation62_spill] sm:$0xff] }
 0x349   : > { %4115 = vrot.lane.b32.xlu1 %v11206_v49, %s9700_s24  ;;  %v14714_v49 = vld [vmem:[#allocation94_spill] sm:$0xff]  ;;  %v501_v42 = vadd.s32 16, %v14730_v23  ;;  %v535_v9 = vand.u32 15, %v14730_v23  ;;  %v11486_v12 = vadd.s32 32, %v14730_v23  ;;  %v502_v5 = vadd.s32 24, %v14730_v23 }
 0x34b   : > { %v549_v21 = vand.u32 15, %v501_v42  ;;  %vm11497_vm7 = vcmp.ge.s32.totalorder %v535_v9, 1  ;;  %v563_v48 = vand.u32 15, %v11486_v12  ;;  %v556_v6 = vand.u32 15, %v502_v5 }
 0x34c   : > { %4109 = vrot.lane.b32.xlu0 %v4046_v8, %s9700_s24  ;;  %v14737_v58 = vsel %vm11497_vm7, 4294967295, %v14736_v58 }
 0x34d   : > { %3508 = vrot.lane.b32.xlu1 %v9382_v56, %s14405_s25  ;;  %v9394_v56 = vadd.high.f32.bf16 %v2181_v62, %v14731_v3  ;;  %14738 = vst [vmem:[#allocation79_spill] sm:$0xff] %v14737_v58  ;;  %vm11509_vm8 = vcmp.ge.s32.totalorder %v549_v21, 1  ;;  %v2988_v62 = vunpack.c.l.bf16 %v11507_v52  ;;  %vm11539_vm10 = vcmp.le.s32.totalorder %v556_v6, 14  ;;  %v14752_v21 = vld [vmem:[#allocation42_spill] sm:$0xff] }
 0x34e   : > { %v14741_v15 = vsel %vm11509_vm8, 4294967295, %v14740_v15  ;;  %v14753_v12 = vunpack.c.h.bf16 %v14752_v21  ;;  %vm11590_vm11 = vcmp.ge.s32.totalorder %v563_v48, 1  ;;  %v14763_v48 = vld [vmem:[#allocation72_spill] sm:$0xff] }
 0x34f   : > { %v9396_v4 = vadd.high.f32.bf16 %v9394_v56, %v14732_v18  ;;  %14742 = vst [vmem:[#allocation75_spill] sm:$0xff] %v14741_v15 }
 0x350   : > { %3502 = vrot.lane.b32.xlu0 %v9383_v22, %s14405_s25  ;;  %v2731_v22 = vrot.slane %v9391_v31, 7  ;;  %v11515_v31 = vadd.s32 48, %v14730_v23 }
 0x351   : > { %3514 = vrot.lane.b32.xlu1 %v9384_v57, %s14405_s25  ;;  %v2730_v57 = vrot.slane %v9392_v36, 7 }
 0x353   : > { %v2732_v43 = vsel %vm14360_vm6, %v2730_v57, %v2731_v22  ;;  %v14750_v57 = vld [vmem:[#allocation117_spill] sm:$0xff] }
 0x354   : > { %4111 = vrot.lane.b32.xlu0 %v14714_v49, %s9700_s24  ;;  %v500_v49 = vadd.s32 8, %v14730_v23  ;;  %v2827_v36 = vsel %vm11497_vm7, %v2732_v43, 0.0 }
 0x356   : > { %v542_v7 = vand.u32 15, %v500_v49 }
 0x358   : > { %4113 = vrot.lane.b32.xlu0 %v4050_v61, %s9700_s24  ;;  %v9397_v61 = vadd.low.f32.bf16 %v9395_v25, %v14732_v18  ;;  %vm11525_vm9 = vcmp.le.s32.totalorder %v542_v7, 14 }
 0x359   : > { %v14744_v30 = vsel %vm11525_vm9, 4294967295, %v14743_v30 }
 0x35a   : > { %v2733_v38 = vrot.slane %v9397_v61, 7  ;;  %14745 = vst [vmem:[#allocation77_spill] sm:$0xff] %v14744_v30 }
 0x35c   : > { %3504 = vrot.lane.b32.xlu0 %v9385_v55, %s14405_s25  ;;  %v2734_v42 = vsel %vm14360_vm6, %v2731_v22, %v2733_v38  ;;  %v4066_v22 = vsel %vm14358_vm5, %v14750_v57, %v11312_v51  ;;  %v9403_v51 = vadd.low.f32.bf16 %v2988_v62, %v11472_v33 }
 0x360   : > { %4117 = vrot.lane.b32.xlu0 %v4054_v40, %s9700_s24  ;;  %v14733_v40 = vld [vmem:[#allocation60_spill] sm:$0xff] }
 0x361   : > { %v9400_v17 = vadd.high.f32.bf16 %v14746_v28, %v14733_v40  ;;  %v506_v28 = vadd.s32 56, %v14730_v23 }
 0x363   : > { %v9401_v49 = vadd.high.f32.bf16 %v9400_v17, %v14739_v59  ;;  %v577_v17 = vand.u32 15, %v11515_v31  ;;  %v14762_v31 = vld [vmem:[#allocation67_spill] sm:$0xff] }
 0x364   : > { %3510 = vrot.lane.b32.xlu0 %v9386_v26, %s14405_s25  ;;  %v14735_v26 = vunpack.c.l.bf16 %v14734_v16 }
 0x365   : > { %vm11616_vm13 = vcmp.ge.s32.totalorder %v577_v17, 1 }
 0x368   : > { %4119 = vrot.lane.b32.xlu0 %v14721_v0, %s9700_s24  ;;  %v9398_v0 = vadd.low.f32.bf16 %v14735_v26, %v14733_v40  ;;  %v9402_v40 = vadd.high.f32.bf16 %v14753_v12, %v14751_v29  ;;  %v9404_v26 = vadd.high.f32.bf16 %v11300_v35, %v11463_v10  ;;  %v504_v35 = vadd.s32 40, %v14730_v23 }
 0x36a   : > { %v9399_v11 = vadd.low.f32.bf16 %v9398_v0, %v14739_v59 }
 0x36c   : > { %3512 = vrot.lane.b32.xlu0 %v9387_v27, %s14405_s25  ;;  %v9260_v27 = vld [vmem:[%s14174_s8 + $0x10] sm:$0xff]  }
 0x36d   : > { %8259 = vmatprep.subr.bf16.mxu0 %v9260_v27 }
 0x36e   : > { %8260 = vmatpush3.bf16.msra.mxu0 %v9260_v27  ;;  %v14754_v27 = vunpack.c.l.bf16 %v14752_v21 }
 0x370   : > { %4121 = vrot.lane.b32.xlu0 %v4058_v34, %s9700_s24  ;;  %v2735_v34 = vrot.slane %v9396_v4, 7  ;;  %v9405_v43 = vadd.low.f32.bf16 %v14754_v27, %v14751_v29  ;;  %v14768_v27 = vld [vmem:[#allocation122_spill] sm:$0xff] }
 0x372   : > { %v2736_v3 = vsel %vm14360_vm6, %v2733_v38, %v2735_v34 }
 0x373   : > { %v2829_v61 = vsel %vm11509_vm8, %v2736_v3, 0.0 }
 0x374   : > { %3518 = vrot.lane.b32.xlu0 %v9390_v13, %s14405_s25 }
 0x377   : > { %v3469_v8 = vpop.permute.xlu1 %3468 }
 0x378   : > { %3520 = vrot.lane.b32.xlu0 %v9393_v47, %s14405_s25  ;;  %v3564_v63 = vadd.f32 %v3469_v8, %v2827_v36  ;;  %v2737_v47 = vrot.slane %v9399_v11, 7  ;;  %v14747_v8 = vmov 0  ;;  %v2739_v11 = vrot.slane %v9401_v49, 7 }
 0x379   : > { %v14748_v8 = vsel %vm11539_vm10, 4294967295, %v14747_v8 }
 0x37a   : > { %v4078_v55 = vpop.permute.xlu0 %4077  ;;  %14749 = vst [vmem:[#allocation81_spill] sm:$0xff] %v14748_v8  ;;  %v2738_v16 = vsel %vm14360_vm6, %v2735_v34, %v2737_v47  ;;  %v9262_v34 = vld [vmem:[%s14174_s8 + $0x20] sm:$0xff]   ;;  %v2740_v57 = vsel %vm14360_vm6, %v2737_v47, %v2739_v11 }
 0x37b   : > { %v11491_v24 = vpop.permute.xlu1 %4081  ;;  %v11547_v18 = vadd.f32 %v4078_v55, %v3564_v63  ;;  %v9408_v63 = vadd.low.f32.bf16 %v9403_v51, %v11270_v60  ;;  %v2831_v47 = vsel %vm11590_vm11, %v2740_v57, 0.0 }
 0x37c   : > { %4127 = vrot.lane.b32.xlu0 %v11248_v32, %s9700_s24  ;;  %v3603_v32 = vunpack.c.h.bf16 %v11285_v46  ;;  %v9261_v46 = vld [vmem:[%s14174_s8 + $0x18] sm:$0xff]  }
 0x37d   : > { %8261 = vmatprep.subr.bf16.mxu0 %v9261_v46 }
 0x37e   : > { %v3471_v13 = vpop.permute.xlu0 %3470  ;;  %8262 = vmatpush3.bf16.msra.mxu0 %v9261_v46  ;;  %v9409_v46 = vadd.low.f32.bf16 %v3603_v32, %v11450_v19  ;;  %v570_v32 = vand.u32 15, %v504_v35 }
 0x37f   : > { %v3475_v53 = vpop.permute.xlu1 %3474  ;;  %v3565_v56 = vadd.f32 %v3471_v13, %v2734_v42  ;;  %v14755_v13 = vld [vmem:[#allocation65_spill] sm:$0xff]  ;;  %8263 = vmatprep.subr.bf16.mxu0 %v9262_v34 }
 0x380   : > { %4125 = vrot.lane.b32.xlu0 %v4062_v41, %s9700_s24  ;;  %v3567_v7 = vadd.f32 %v3475_v53, %v2738_v16  ;;  %v9406_v36 = vadd.high.f32.bf16 %v9402_v40, %v14755_v13  ;;  %v9407_v41 = vadd.low.f32.bf16 %v9405_v43, %v14755_v13  ;;  %v9412_v12 = vadd.low.f32.bf16 %v9409_v46, %v14763_v48 }
 0x381   : > { %v584_v16 = vand.u32 15, %v506_v28  ;;  %vm11606_vm12 = vcmp.le.s32.totalorder %v570_v32, 14  ;;  %v14769_v43 = vmov 0  ;;  %v507_v28 = vadd.s32 64, %v14730_v23 }
 0x382   : > { %v4080_v25 = vpop.permute.xlu0 %4079  ;;  %8264 = vmatpush3.bf16.msra.mxu0 %v9262_v34  ;;  %v2743_v49 = vrot.slane %v9406_v36, 7  ;;  %v14770_v43 = vsel %vm11616_vm13, 4294967295, %v14769_v43 }
 0x383   : > { %v4174_v9 = vsel %vm11525_vm9, %v4080_v25, 0.0  ;;  %v4084_v2 = vpop.permute.xlu1 %4083  ;;  %v14757_v25 = vld [vmem:[#allocation43_spill] sm:$0xff]  ;;  %14771 = vst [vmem:[#allocation89_spill] sm:$0xff] %v14770_v43  ;;  %vm11625_vm14 = vcmp.le.s32.totalorder %v584_v16, 14  ;;  %v14780_v16 = vld [vmem:[#allocation69_spill] sm:$0xff] }
 0x384   : > { %v11549_v4 = vadd.f32 %v4174_v9, %v3565_v56  ;;  %4129 = vrot.lane.b32.xlu0 %v4066_v22, %s9700_s24  ;;  %v4176_v0 = vsel %vm11539_vm10, %v4084_v2, 0.0  ;;  %v14756_v56 = vld [vmem:[#allocation64_spill] sm:$0xff]  ;;  %v14758_v9 = vunpack.c.l.bf16 %v14757_v25  ;;  %v14759_v2 = vmov 0  ;;  %v9263_v22 = vld [vmem:[%s14174_s8 + $0x28] sm:$0xff]  }
 0x385   : > { %v11576_v6 = vadd.f32 %v4176_v0, %v3567_v7  ;;  %v14760_v2 = vsel %vm11590_vm11, 4294967295, %v14759_v2  ;;  %8265 = vmatprep.subr.bf16.mxu0 %v9263_v22 }
 0x386   : > { %v4398_v55 = vpack.c.bf16 %v11549_v4, %v11547_v18  ;;  %v3473_v5 = vpop.permute.xlu0 %3472  ;;  %14761 = vst [vmem:[#allocation76_spill] sm:$0xff] %v14760_v2  ;;  %8266 = vmatpush3.bf16.msra.mxu0 %v9263_v22 }
 0x387   : > { %v3566_v38 = vadd.f32 %v3473_v5, %v2829_v61  ;;  %v3477_v59 = vpop.permute.xlu1 %3476  ;;  %v2741_v61 = vrot.slane %v9407_v41, 7  ;;  %v4070_v41 = vsel %vm14358_vm5, %v11314_v44, %v11318_v20 }
 0x388   : > { %4430 = vrot.lane.b32.xlu1 %v4398_v55, %s9700_s24  ;;  %3526 = vrot.lane.b32.xlu0 %v9404_v26, %s14405_s25  ;;  %v3568_v51 = vadd.f32 %v3477_v59, %v2831_v47  ;;  %v14764_v26 = vmov 0  ;;  %v14767_v55 = vunpack.c.h.bf16 %v14757_v25  ;;  %v14777_v25 = vld [vmem:[#allocation44_spill] sm:$0xff] }
 0x389   : > { %v11579_v53 = vadd.f32 %v11491_v24, %v3566_v38  ;;  %v9410_v24 = vadd.low.f32.bf16 %v14758_v9, %v14756_v56  ;;  %v14765_v26 = vsel %vm11606_vm12, 4294967295, %v14764_v26  ;;  %v2742_v5 = vsel %vm14360_vm6, %v2739_v11, %v2741_v61  ;;  %v14772_v38 = vld [vmem:[#allocation115_spill] sm:$0xff] }
 0x38a   : > { %v4086_v62 = vpop.permute.xlu0 %4085  ;;  %14766 = vst [vmem:[#allocation78_spill] sm:$0xff] %v14765_v26  ;;  %v9413_v0 = vadd.high.f32.bf16 %v14767_v55, %v14756_v56  ;;  %v2744_v7 = vsel %vm14360_vm6, %v2741_v61, %v2743_v49  ;;  %v9414_v59 = vadd.low.f32.bf16 %v14772_v38, %v14725_v37  ;;  %v14773_v11 = vmov 0  ;;  %v14776_v56 = vld [vmem:[#allocation66_spill] sm:$0xff] }
 0x38b   : > { %v4399_v42 = vpack.c.bf16 %v11576_v6, %v11579_v53  ;;  %v4090_v3 = vpop.permute.xlu1 %4089  ;;  %v9411_v29 = vadd.low.f32.bf16 %v9410_v24, %v14762_v31  ;;  %v14774_v11 = vsel %vm11625_vm14, 4294967295, %v14773_v11  ;;  %v2833_v17 = vsel %vm11616_vm13, %v2744_v7, 0.0 }
 0x38c   : > { %3528 = vrot.lane.b32.xlu0 %v9408_v63, %s14405_s25  ;;  %14775 = vst [vmem:[#allocation83_spill] sm:$0xff] %v14774_v11  ;;  %v11632_v63 = vrot.slane %v9412_v12, 1  ;;  %v9415_v46 = vadd.high.f32.bf16 %v9413_v0, %v14762_v31  ;;  %v14778_v44 = vunpack.c.l.bf16 %v14777_v25  ;;  %v14779_v12 = vunpack.c.h.bf16 %v14777_v25 }
 0x38d   : > { %4432 = vrot.lane.b32.xlu1 %v4399_v42, %s9700_s24  ;;  %v11635_v42 = vadd.f32 %v4086_v62, %v3568_v51  ;;  %v510_v38 = vadd.s32 88, %v14730_v23 }
 0x38e   : > { %v3479_v21 = vpop.permute.xlu0 %3478  ;;  %v9416_v20 = vadd.low.f32.bf16 %v14778_v44, %v14776_v56  ;;  %v4074_v31 = vsel %vm14358_vm5, %v11320_v39, %v11632_v63  ;;  %v9417_v47 = vadd.high.f32.bf16 %v14779_v12, %v14776_v56  ;;  %v509_v39 = vadd.s32 80, %v14730_v23 }
 0x38f   : > { %v3483_v40 = vpop.permute.xlu1 %3482  ;;  %v3569_v34 = vadd.f32 %v3479_v21, %v2742_v5  ;;  %v591_v21 = vand.u32 15, %v507_v28  ;;  %v14787_v28 = vld [vmem:[#allocation71_spill] sm:$0xff]  ;;  %v14795_v12 = vmov 0 }
 0x390   : > { %4135 = vrot.lane.b32.xlu0 %v11328_v50, %s9700_s24  ;;  %v2745_v50 = vrot.slane %v9411_v29, 7  ;;  %v2747_v29 = vrot.slane %v9415_v46, 7  ;;  %v9418_v51 = vadd.low.f32.bf16 %v9416_v20, %v14780_v16  ;;  %v9419_v5 = vadd.high.f32.bf16 %v9417_v47, %v14780_v16 }
 0x391   : > { %4123 = vrot.lane.b32.xlu1 %v14768_v27, %s9700_s24  ;;  %vm11674_vm15 = vcmp.ge.s32.totalorder %v591_v21, 1  ;;  %v605_v25 = vand.u32 15, %v509_v39  ;;  %v9422_v20 = vadd.high.f32.bf16 %v11297_v54, %v11443_v14 }
 0x392   : > { %v4088_v35 = vpop.permute.xlu0 %4087  ;;  %v2746_v9 = vsel %vm14360_vm6, %v2743_v49, %v2745_v50  ;;  %v508_v49 = vadd.s32 72, %v14730_v23  ;;  %v2749_v46 = vrot.slane %v9418_v51, 7  ;;  %v2751_v44 = vrot.slane %v9419_v5, 7 }
 0x393   : > { %v4178_v13 = vsel %vm11606_vm12, %v4088_v35, 0.0  ;;  %v4092_v36 = vpop.permute.xlu1 %4091  ;;  %v3571_v32 = vadd.f32 %v3483_v40, %v2746_v9  ;;  %vm11694_vm3 = vcmp.ge.s32.totalorder %v605_v25, 1  ;;  %v511_v5 = vadd.s32 96, %v14730_v23  ;;  %v14801_v25 = vld [vmem:[#allocation74_spill] sm:$0xff] }
 0x394   : > { %v11637_v37 = vadd.f32 %v4178_v13, %v3569_v34  ;;  %4133 = vrot.lane.b32.xlu0 %v4070_v41, %s9700_s24  ;;  %v4180_v24 = vsel %vm11625_vm14, %v4092_v36, 0.0  ;;  %v14782_v34 = vld [vmem:[#allocation45_spill] sm:$0xff]  ;;  %v2748_v36 = vsel %vm14360_vm6, %v2745_v50, %v2747_v29  ;;  %v598_v41 = vand.u32 15, %v508_v49 }
 0x395   : > { %3516 = vrot.lane.b32.xlu1 %v9414_v59, %s14405_s25  ;;  %v11661_v55 = vadd.f32 %v4180_v24, %v3571_v32  ;;  %v14781_v59 = vld [vmem:[#allocation68_spill] sm:$0xff]  ;;  %v14783_v35 = vunpack.c.l.bf16 %v14782_v34  ;;  %v2835_v9 = vsel %vm11674_vm15, %v2748_v36, 0.0  ;;  %v612_v24 = vand.u32 15, %v510_v38 }
 0x396   : > { %v4400_v62 = vpack.c.bf16 %v11637_v37, %v11635_v42  ;;  %v3481_v57 = vpop.permute.xlu0 %3480  ;;  %vm11685_vm2 = vcmp.le.s32.totalorder %v598_v41, 14  ;;  %v14788_v50 = vmov 0  ;;  %v2750_v32 = vsel %vm14360_vm6, %v2747_v29, %v2749_v46 }
 0x397   : > { %v3570_v22 = vadd.f32 %v3481_v57, %v2833_v17  ;;  %v3485_v61 = vpop.permute.xlu1 %3484  ;;  %v9420_v13 = vadd.low.f32.bf16 %v14783_v35, %v14781_v59  ;;  %v14789_v50 = vsel %vm11685_vm2, 4294967295, %v14788_v50  ;;  %v14792_v49 = vmov 0  ;;  %v14798_v35 = vld [vmem:[#allocation70_spill] sm:$0xff] }
 0x398   : > { %4137 = vrot.lane.b32.xlu0 %v4074_v31, %s9700_s24  ;;  %v3572_v57 = vadd.f32 %v3485_v61, %v2835_v9  ;;  %14790 = vst [vmem:[#allocation90_spill] sm:$0xff] %v14789_v50  ;;  %v14793_v49 = vsel %vm11694_vm3, 4294967295, %v14792_v49  ;;  %vm11700_vm1 = vcmp.le.s32.totalorder %v612_v24, 14  ;;  %v2752_v47 = vsel %vm14360_vm6, %v2749_v46, %v2751_v44 }
 0x399   : > { %v11663_v40 = vadd.f32 %v4090_v3, %v3570_v22  ;;  %4434 = vrot.lane.b32.xlu1 %v4400_v62, %s9700_s24  ;;  %v14784_v3 = vmov 0  ;;  %v9421_v17 = vadd.low.f32.bf16 %v9420_v13, %v14787_v28  ;;  %v14791_v22 = vunpack.c.h.bf16 %v14782_v34  ;;  %14794 = vst [vmem:[#allocation101_spill] sm:$0xff] %v14793_v49  ;;  %v14799_v13 = vld [vmem:[#allocation46_spill] sm:$0xff] }
 0x39a   : > { %v4094_v0 = vpop.permute.xlu0 %4093  ;;  %v14785_v3 = vsel %vm11674_vm15, 4294967295, %v14784_v3  ;;  %v14796_v12 = vsel %vm11700_vm1, 4294967295, %v14795_v12  ;;  %v2837_v34 = vsel %vm11694_vm3, %v2752_v47, 0.0  ;;  %v14800_v36 = vunpack.c.l.bf16 %v14799_v13 }
 0x39b   : > { %v4401_v27 = vpack.c.bf16 %v11661_v55, %v11663_v40  ;;  %v4098_v7 = vpop.permute.xlu1 %4097  ;;  %14786 = vst [vmem:[#allocation82_spill] sm:$0xff] %v14785_v3  ;;  %v9423_v31 = vadd.high.f32.bf16 %v14791_v22, %v14781_v59  ;;  %v2753_v21 = vrot.slane %v9421_v17, 7  ;;  %14797 = vst [vmem:[#allocation102_spill] sm:$0xff] %v14796_v12  ;;  %v11706_v51 = vadd.f32 %v4094_v0, %v3572_v57 }
 0x39c   : > { %v9425_v41 = vadd.low.f32.bf16 %v14800_v36, %v14798_v35  ;;  %v514_v36 = vadd.s32 120, %v14730_v23  ;;  %vm14387_vm3 = vcmask 785408  }
 0x39d   : > { %4436 = vrot.lane.b32.xlu1 %v4401_v27, %s9700_s24  ;;  %v9424_v16 = vadd.high.f32.bf16 %v9423_v31, %v14787_v28  ;;  %v2754_v27 = vsel %vm14360_vm6, %v2751_v44, %v2753_v21  ;;  %v14805_v31 = vunpack.c.h.bf16 %v14799_v13 }
 0x39e   : > { %v3487_v56 = vpop.permute.xlu0 %3486  ;;  %v9426_v44 = vadd.low.f32.bf16 %v9425_v41, %v14801_v25 }
 0x39f   : > { %v3491_v62 = vpop.permute.xlu1 %3490  ;;  %v3573_v54 = vadd.f32 %v3487_v56, %v2750_v32  ;;  %v2755_v17 = vrot.slane %v9424_v16, 7  ;;  %v512_v56 = vadd.s32 104, %v14730_v23  ;;  %v14802_v32 = vmov 0 }
 0x3a0   : > { %v3575_v46 = vadd.f32 %v3491_v62, %v2754_v27 }
 0x3a1   : > { %3522 = vrot.lane.b32.xlu1 %v9422_v20, %s14405_s25  ;;  %v2756_v62 = vsel %vm14360_vm6, %v2753_v21, %v2755_v17  ;;  %v626_v22 = vand.u32 15, %v512_v56  ;;  %v9430_v21 = vadd.low.f32.bf16 %v11295_v1, %v11463_v10 }
 0x3a2   : > { %v4096_v14 = vpop.permute.xlu0 %4095 }
 0x3a3   : > { %v4182_v61 = vsel %vm11685_vm2, %v4096_v14, 0.0  ;;  %v4100_v29 = vpop.permute.xlu1 %4099  ;;  %v2757_v14 = vrot.slane %v9426_v44, 7  ;;  %vm11752_vm0 = vcmp.le.s32.totalorder %v626_v22, 14  ;;  %v14813_v22 = vld [vmem:[#allocation120_spill] sm:$0xff] }
 0x3a4   : > { %v11708_v39 = vadd.f32 %v4182_v61, %v3573_v54  ;;  %v4184_v59 = vsel %vm11700_vm1, %v4100_v29, 0.0  ;;  %v9427_v54 = vadd.high.f32.bf16 %v14805_v31, %v14798_v35  ;;  %v513_v29 = vadd.s32 112, %v14730_v23 }
 0x3a5   : > { %4131 = vrot.lane.b32.xlu1 %v11333_v45, %s9700_s24  ;;  %v619_v45 = vand.u32 15, %v511_v5  ;;  %v11725_v20 = vadd.f32 %v4184_v59, %v3575_v46  ;;  %v14807_v59 = vld [vmem:[#allocation47_spill] sm:$0xff]  ;;  %v14809_v35 = vmov 0  ;;  %v2758_v13 = vsel %vm14360_vm6, %v2755_v17, %v2757_v14 }
 0x3a6   : > { %v4402_v38 = vpack.c.bf16 %v11708_v39, %v11706_v51  ;;  %v3489_v0 = vpop.permute.xlu0 %3488  ;;  %v9428_v16 = vadd.high.f32.bf16 %v9427_v54, %v14801_v25  ;;  %v14810_v35 = vsel %vm11752_vm0, 4294967295, %v14809_v35  ;;  %v640_v17 = vand.u32 15, %v514_v36 }
 0x3a7   : > { %v3574_v28 = vadd.f32 %v3489_v0, %v2837_v34  ;;  %vm11732_vm4 = vcmp.ge.s32.totalorder %v619_v45, 1  ;;  %v3493_v61 = vpop.permute.xlu1 %3492  ;;  %v14808_v34 = vunpack.c.l.bf16 %v14807_v59  ;;  %14811 = vst [vmem:[#allocation95_spill] sm:$0xff] %v14810_v35  ;;  %v14814_v31 = vrot.slane %v14813_v22, 4 }
 0x3a8   : > { %v14803_v32 = vsel %vm11732_vm4, 4294967295, %v14802_v32  ;;  %v2839_v27 = vsel %vm11732_vm4, %v2756_v62, 0.0  ;;  %v2759_v46 = vrot.slane %v9428_v16, 7 }
 0x3a9   : > { %v11727_v9 = vadd.f32 %v4098_v7, %v3574_v28  ;;  %4438 = vrot.lane.b32.xlu1 %v4402_v38, %s9700_s24  ;;  %14804 = vst [vmem:[#allocation92_spill] sm:$0xff] %v14803_v32  ;;  %v2989_v7 = vunpack.c.h.bf16 %v11507_v52  ;;  %v14806_v38 = vld [vmem:[#allocation73_spill] sm:$0xff]  ;;  %v3576_v0 = vadd.f32 %v3493_v61, %v2839_v27  ;;  %v633_v28 = vand.u32 15, %v513_v29 }
 0x3aa   : > { %v4102_v24 = vpop.permute.xlu0 %4101  ;;  %v9431_v52 = vadd.low.f32.bf16 %v14808_v34, %v14806_v38  ;;  %v3604_v54 = vunpack.c.l.bf16 %v14814_v31  ;;  %v14815_v29 = vmov 0  ;;  %v515_v27 = vadd.s32 128, %v14730_v23 }
 0x3ab   : > { %v4403_v57 = vpack.c.bf16 %v11725_v20, %v11727_v9  ;;  %v9429_v5 = vadd.high.f32.bf16 %v2989_v7, %v11472_v33  ;;  %v14812_v33 = vld [vmem:[#allocation86_spill] sm:$0xff]  ;;  %v3497_v45 = vpop.permute.xlu1 %3496  ;;  %v11763_v44 = vadd.f32 %v4102_v24, %v3576_v0  ;;  %vm11772_vm5 = vcmp.ge.s32.totalorder %v633_v28, 1  ;;  %v14823_v0 = vld [vmem:[#allocation48_spill] sm:$0xff] }
 0x3ac   : > { %v9432_v1 = vadd.low.f32.bf16 %v9431_v52, %v14812_v33  ;;  %v14816_v29 = vsel %vm11772_vm5, 4294967295, %v14815_v29  ;;  %v14818_v24 = vunpack.c.h.bf16 %v14807_v59  ;;  %v9435_v16 = vadd.high.f32.bf16 %v3604_v54, %v11450_v19 }
 0x3ad   : > { %4440 = vrot.lane.b32.xlu1 %v4403_v57, %s9700_s24  ;;  %v9433_v25 = vadd.high.f32.bf16 %v9429_v5, %v11270_v60  ;;  %14817 = vst [vmem:[#allocation88_spill] sm:$0xff] %v14816_v29  ;;  %v2760_v60 = vsel %vm14360_vm6, %v2757_v14, %v2759_v46  ;;  %v14819_v5 = vmov 0  ;;  %v14824_v19 = vunpack.c.l.bf16 %v14823_v0 }
 0x3ae   : > { %v3495_v47 = vpop.permute.xlu0 %3494  ;;  %v2761_v62 = vrot.slane %v9432_v1, 7  ;;  %v2841_v14 = vsel %vm11772_vm5, %v2760_v60, 0.0  ;;  %v516_v28 = vadd.s32 136, %v14730_v23  ;;  %v14825_v22 = vunpack.c.h.bf16 %v14823_v0 }
 0x3af   : > { %v3577_v10 = vadd.f32 %v3495_v47, %v2758_v13  ;;  %v9434_v47 = vadd.high.f32.bf16 %v14818_v24, %v14806_v38  ;;  %v14822_v38 = vld [vmem:[#allocation84_spill] sm:$0xff]  ;;  %v3578_v36 = vadd.f32 %v3497_v45, %v2841_v14  ;;  %v14826_v45 = vld [vmem:[#allocation85_spill] sm:$0xff]  ;;  %v517_v14 = vadd.s32 144, %v14730_v23 }
 0x3b0   : > { %v2762_v52 = vsel %vm14360_vm6, %v2759_v46, %v2761_v62  ;;  %v9437_v13 = vadd.low.f32.bf16 %v14824_v19, %v14822_v38  ;;  %v647_v46 = vand.u32 15, %v515_v27  ;;  %v9439_v31 = vadd.high.f32.bf16 %v14825_v22, %v14822_v38 }
 0x3b1   : > { %3524 = vrot.lane.b32.xlu1 %v9430_v21, %s14405_s25  ;;  %v4108_v21 = vpop.permute.xlu1 %4107  ;;  %v9436_v34 = vadd.high.f32.bf16 %v9434_v47, %v14812_v33  ;;  %v654_v24 = vand.u32 15, %v516_v28  ;;  %vm14834_vm5 = vcmask 1046528  }
 0x3b2   : > { %v4104_v41 = vpop.permute.xlu0 %4103  ;;  %v9440_v54 = vadd.low.f32.bf16 %v9437_v13, %v14826_v45  ;;  %vm11809_vm6 = vcmp.ge.s32.totalorder %v647_v46, 1  ;;  %v14835_v13 = vmov 0 }
 0x3b3   : > { %v4186_v56 = vsel %vm11752_vm0, %v4104_v41, 0.0  ;;  %vm11781_vm0 = vcmp.le.s32.totalorder %v640_v17, 14  ;;  %vm11822_vm1 = vcmp.le.s32.totalorder %v654_v24, 14 }
 0x3b4   : > { %v11765_v57 = vadd.f32 %v4186_v56, %v3577_v10  ;;  %v14820_v5 = vsel %vm11781_vm0, 4294967295, %v14819_v5  ;;  %v9438_v10 = vadd.high.f32.bf16 %v9435_v16, %v14763_v48  ;;  %v4188_v41 = vsel %vm11781_vm0, %v4108_v21, 0.0 }
 0x3b5   : > { %3530 = vrot.lane.b32.xlu1 %v9433_v25, %s14405_s25  ;;  %14821 = vst [vmem:[#allocation94_spill] sm:$0xff] %v14820_v5  ;;  %v2763_v25 = vrot.slane %v9436_v34, 7  ;;  %vm14830_vm0 = vcmask 1040384   ;;  %v9441_v21 = vadd.high.f32.bf16 %v9439_v31, %v14826_v45  ;;  %v2765_v27 = vrot.slane %v9440_v54, 7  ;;  %v14866_v5 = vld [vmem:[#allocation52_spill] sm:$0xff]  ;;  %s9634_s25 = scalar_lea.vmem %s14114_s15, 4096 }
 0x3b6   : > { %v4404_v7 = vpack.c.bf16 %v11765_v57, %v11763_v44  ;;  %v4106_v61 = vpop.permute.xlu0 %4105  ;;  %v4075_v60 = vrot.slane %v9438_v10, 1  ;;  %v518_v34 = vadd.s32 152, %v14730_v23  ;;  %v14836_v13 = vsel %vm11822_vm1, 4294967295, %v14835_v13  ;;  %v14838_v10 = vld [vmem:[#allocation98_spill] sm:$0xff]  ;;  %p9635_p11 = scmp.ne.s32.totalorder %s14114_s15, %s9634_s25 }
 0x3b7   : > { %v11798_v33 = vadd.f32 %v4106_v61, %v3578_v36  ;;  %v14827_v61 = vmov 0  ;;  %v2764_v47 = vsel %vm14830_vm0, %v2761_v62, %v2763_v25  ;;  %14837 = vst [vmem:[#allocation93_spill] sm:$0xff] %v14836_v13  ;;  %v2767_v31 = vrot.slane %v9441_v21, 7  ;;  %v14865_v13 = vld [vmem:[#allocation109_spill] sm:$0xff] }
 0x3b8   : > { %v14828_v61 = vsel %vm11809_vm6, 4294967295, %v14827_v61  ;;  %v4076_v19 = vsel %vm14834_vm5, %v11632_v63, %v4075_v60  ;;  %v2843_v62 = vsel %vm11809_vm6, %v2764_v47, 0.0  ;;  %v668_v45 = vand.u32 15, %v518_v34  ;;  %p9636_p12 = pnand %p9635_p11, %p9803_p5 }
 0x3b9   : > { %4442 = vrot.lane.b32.xlu1 %v4404_v7, %s9700_s24  ;;  %v3501_v7 = vpop.permute.xlu1 %3500  ;;  %14829 = vst [vmem:[#allocation107_spill] sm:$0xff] %v14828_v61  ;;  %v661_v54 = vand.u32 15, %v517_v14  ;;  %v519_v14 = vadd.s32 160, %v14730_v23 }
 0x3ba   : > { %v3499_v59 = vpop.permute.xlu0 %3498  ;;  %v3580_v28 = vadd.f32 %v3501_v7, %v2843_v62  ;;  %vm11839_vm5 = vcmp.le.s32.totalorder %v668_v45, 14  ;;  %v520_v45 = vadd.s32 168, %v14730_v23  ;;  %p9637_p13 = pneg %p9636_p12 }
 0x3bb   : > { %v3579_v1 = vadd.f32 %v3499_v59, %v2762_v52  ;;  %v14831_v52 = vld [vmem:[#allocation80_spill] sm:$0xff]  ;;  %v14832_v59 = vld [vmem:[#allocation49_spill] sm:$0xff] }
 0x3bc   : > { %v14833_v38 = vunpack.c.l.bf16 %v14832_v59 }
 0x3bd   : > { %v11800_v56 = vadd.f32 %v4188_v41, %v3579_v1  ;;  %v3507_v36 = vpop.permute.xlu1 %3506  ;;  %v2766_v1 = vsel %vm14830_vm0, %v2763_v25, %v2765_v27  ;;  %vm11843_vm0 = vcmp.ge.s32.totalorder %v661_v54, 1  ;;  %v675_v54 = vand.u32 15, %v519_v14 }
 0x3be   : > { %v4110_v17 = vpop.permute.xlu0 %4109  ;;  %v9442_v0 = vadd.low.f32.bf16 %v14833_v38, %v14831_v52  ;;  %v14839_v38 = vmov 0  ;;  %v14855_v14 = vmov 0 }
 0x3bf   : > { %v4405_v48 = vpack.c.bf16 %v11800_v56, %v11798_v33  ;;  %v14840_v38 = vsel %vm11839_vm5, 4294967295, %v14839_v38 }
 0x3c0   : > { %v9443_v41 = vadd.low.f32.bf16 %v9442_v0, %v14838_v10  ;;  %14841 = vst [vmem:[#allocation87_spill] sm:$0xff] %v14840_v38 }
 0x3c1   : > { %4444 = vrot.lane.b32.xlu1 %v4405_v48, %s9700_s24  ;;  %v11833_v48 = vadd.f32 %v4110_v17, %v3580_v28  ;;  %v4116_v7 = vpop.permute.xlu1 %4115  ;;  %v14846_v17 = vunpack.c.h.bf16 %v14832_v59  ;;  %v14849_v28 = vld [vmem:[#allocation50_spill] sm:$0xff] }
 0x3c2   : > { %v3503_v16 = vpop.permute.xlu0 %3502  ;;  %v2769_v24 = vrot.slane %v9443_v41, 7  ;;  %v4192_v62 = vsel %vm11839_vm5, %v4116_v7, 0.0  ;;  %v14851_v7 = vld [vmem:[#allocation97_spill] sm:$0xff] }
 0x3c3   : > { %v3581_v46 = vadd.f32 %v3503_v16, %v2766_v1  ;;  %v14842_v16 = vmov 0  ;;  %v9444_v34 = vadd.high.f32.bf16 %v14846_v17, %v14831_v52 }
 0x3c4   : > { %v14843_v16 = vsel %vm11843_vm0, 4294967295, %v14842_v16 }
 0x3c5   : > { %4139 = vrot.lane.b32.xlu1 %v4076_v19, %s9700_s24  ;;  %14844 = vst [vmem:[#allocation104_spill] sm:$0xff] %v14843_v16  ;;  %v9445_v0 = vadd.high.f32.bf16 %v9444_v34, %v14838_v10  ;;  %v682_v34 = vand.u32 15, %v520_v45 }
 0x3c6   : > { %v4112_v22 = vpop.permute.xlu0 %4111 }
 0x3c7   : > { %v4190_v63 = vsel %vm11822_vm1, %v4112_v22, 0.0  ;;  %vm14845_vm1 = vcmask 1040384   ;;  %vm11876_vm5 = vcmp.le.s32.totalorder %v682_v34, 14 }
 0x3c8   : > { %v11835_v60 = vadd.f32 %v4190_v63, %v3581_v46  ;;  %v2768_v21 = vsel %vm14845_vm1, %v2765_v27, %v2767_v31  ;;  %vm14847_vm6 = vmmov %vm14845_vm1  ;;  %v14848_v27 = vld [vmem:[#allocation96_spill] sm:$0xff]  ;;  %v14850_v46 = vunpack.c.l.bf16 %v14849_v28  ;;  %vm11871_vm1 = vcmp.ge.s32.totalorder %v675_v54, 1 }
 0x3c9   : > { %v2770_v19 = vsel %vm14847_vm6, %v2767_v31, %v2769_v24  ;;  %v2845_v1 = vsel %vm11843_vm0, %v2768_v21, 0.0  ;;  %v2771_v31 = vrot.slane %v9445_v0, 7  ;;  %v14856_v14 = vsel %vm11876_vm5, 4294967295, %v14855_v14  ;;  %vm14858_vm0 = vmmov %vm14847_vm6 }
 0x3ca   : > { %v4406_v25 = vpack.c.bf16 %v11835_v60, %v11833_v48  ;;  %v4114_v47 = vpop.permute.xlu0 %4113  ;;  %v9446_v59 = vadd.low.f32.bf16 %v14850_v46, %v14848_v27  ;;  %v3583_v52 = vadd.f32 %v3507_v36, %v2770_v19  ;;  %v14852_v36 = vmov 0  ;;  %14857 = vst [vmem:[#allocation100_spill] sm:$0xff] %v14856_v14 }
 0x3cb   : > { %v14853_v36 = vsel %vm11871_vm1, 4294967295, %v14852_v36  ;;  %v2772_v19 = vsel %vm14847_vm6, %v2769_v24, %v2771_v31 }
 0x3cc   : > { %4446 = vrot.lane.b32.xlu1 %v4406_v25, %s9700_s24  ;;  %v11863_v63 = vadd.f32 %v4192_v62, %v3583_v52  ;;  %v9447_v17 = vadd.low.f32.bf16 %v9446_v59, %v14851_v7  ;;  %14854 = vst [vmem:[#allocation108_spill] sm:$0xff] %v14853_v36  ;;  %v2847_v0 = vsel %vm11871_vm1, %v2772_v19, 0.0  ;;  %v523_v36 = vadd.s32 192, %v14730_v23 }
 0x3ce   : > { %v3505_v41 = vpop.permute.xlu0 %3504  ;;  %v703_v12 = vand.u32 15, %v523_v36 }
 0x3cf   : > { %v3582_v22 = vadd.f32 %v3505_v41, %v2845_v1  ;;  %v3509_v1 = vpop.permute.xlu1 %3508 }
 0x3d0   : > { %v3584_v46 = vadd.f32 %v3509_v1, %v2847_v0  ;;  %v14860_v0 = vld [vmem:[#allocation91_spill] sm:$0xff]  ;;  %vm11940_vm4 = vcmp.ge.s32.totalorder %v703_v12, 1 }
 0x3d1   : > { %v11865_v10 = vadd.f32 %v4114_v47, %v3582_v22  ;;  %v2773_v47 = vrot.slane %v9447_v17, 7 }
 0x3d2   : > { %v4118_v25 = vpop.permute.xlu0 %4117 }
 0x3d3   : > { %v4407_v21 = vpack.c.bf16 %v11863_v63, %v11865_v10  ;;  %v2774_v41 = vsel %vm14858_vm0, %v2771_v31, %v2773_v47  ;;  %v11885_v45 = vadd.f32 %v4118_v25, %v3584_v46  ;;  %v14859_v31 = vunpack.c.h.bf16 %v14849_v28 }
 0x3d4   : > { %v521_v25 = vadd.s32 176, %v14730_v23  ;;  %vm14384_vm0 = vcmask 785920  }
 0x3d5   : > { %4448 = vrot.lane.b32.xlu0 %v4407_v21, %s9700_s24  ;;  %v9448_v34 = vadd.high.f32.bf16 %v14859_v31, %v14848_v27 }
 0x3d6   : > { %v3511_v62 = vpop.permute.xlu0 %3510 }
 0x3d7   : > { %v3585_v59 = vadd.f32 %v3511_v62, %v2774_v41  ;;  %v3515_v62 = vpop.permute.xlu1 %3514  ;;  %v9449_v1 = vadd.high.f32.bf16 %v9448_v34, %v14851_v7  ;;  %v14861_v41 = vld [vmem:[#allocation51_spill] sm:$0xff]  ;;  %v4534_v34 = vld [vmem:[%s14173_s7] sm:$0x1] }
 0x3d8   : > { %v14862_v46 = vunpack.c.l.bf16 %v14861_v41  ;;  %v14863_v27 = vunpack.c.h.bf16 %v14861_v41  ;;  %v14867_v41 = vunpack.c.l.bf16 %v14866_v5  ;;  %v4536_v29 = vpack.i.b16 %v4534_v34, %v4534_v34 }
 0x3d9   : > { %v2775_v14 = vrot.slane %v9449_v1, 7  ;;  %v14868_v1 = vmov 0 }
 0x3da   : > { %v4120_v52 = vpop.permute.xlu0 %4119  ;;  %v9451_v28 = vadd.high.f32.bf16 %v14863_v27, %v14860_v0  ;;  %v524_v27 = vadd.s32 200, %v14730_v23 }
 0x3db   : > { %v4194_v22 = vsel %vm11876_vm5, %v4120_v52, 0.0  ;;  %v4510_v52 = vld [vmem:[%s14172_s6] sm:$0x1]  ;;  %vm14871_vm5 = vcmask 1040384  }
 0x3dc   : > { %v11887_v24 = vadd.f32 %v4194_v22, %v3585_v59  ;;  %v9450_v59 = vadd.low.f32.bf16 %v14862_v46, %v14860_v0  ;;  %v522_v22 = vadd.s32 184, %v14730_v23  ;;  %v689_v46 = vand.u32 15, %v521_v25 }
 0x3dd   : > { %v4512_v16 = vpack.i.b16 %v4510_v52, %v4510_v52  ;;  %v9453_v0 = vadd.low.f32.bf16 %v14867_v41, %v14865_v13  ;;  %v2776_v25 = vsel %vm14871_vm5, %v2773_v47, %v2775_v14  ;;  %v14872_v52 = vld [vmem:[#allocation17_spill] sm:$0xff]  ;;  %v14873_v41 = vld [vmem:[#allocation110_spill] sm:$0xff] }
 0x3de   : > { %v4408_v54 = vpack.c.bf16 %v11887_v24, %v11885_v45  ;;  %v3513_v17 = vpop.permute.xlu0 %3512  ;;  %v696_v61 = vand.u32 15, %v522_v22  ;;  %vm11920_vm6 = vcmp.ge.s32.totalorder %v689_v46, 1 }
 0x3df   : > { %v14869_v1 = vsel %vm11920_vm6, 4294967295, %v14868_v1  ;;  %v11926_v32 = vrot.slane %v4512_v16, %v14872_v52  ;;  %v9455_v50 = vadd.low.f32.bf16 %v9453_v0, %v14873_v41  ;;  %v2849_v16 = vsel %vm11920_vm6, %v2776_v25, 0.0  ;;  %vm14884_vm6 = vmmov %vm14871_vm5 }
 0x3e0   : > { %4450 = vrot.lane.b32.xlu1 %v4408_v54, %s9700_s24  ;;  %v14864_v54 = vld [vmem:[#allocation111_spill] sm:$0xff]  ;;  %14870 = vst [vmem:[#allocation106_spill] sm:$0xff] %v14869_v1  ;;  %vm11930_vm1 = vcmp.le.s32.totalorder %v696_v61, 14  ;;  %v3586_v46 = vadd.f32 %v3513_v17, %v2849_v16 }
 0x3e1   : > { %v9452_v31 = vadd.low.f32.bf16 %v9450_v59, %v14864_v54  ;;  %v9454_v59 = vadd.high.f32.bf16 %v9451_v28, %v14864_v54  ;;  %v710_v28 = vand.u32 15, %v524_v27  ;;  %v14874_v54 = vmov 0 }
 0x3e2   : > { %v4122_v21 = vpop.permute.xlu0 %4121  ;;  %v14875_v54 = vsel %vm11930_vm1, 4294967295, %v14874_v54  ;;  %v2781_v27 = vrot.slane %v9455_v50, 7 }
 0x3e3   : > { %v2777_v35 = vrot.slane %v9452_v31, 7  ;;  %v2779_v49 = vrot.slane %v9454_v59, 7  ;;  %14876 = vst [vmem:[#allocation99_spill] sm:$0xff] %v14875_v54  ;;  %v11935_v31 = vrot.slane %v4536_v29, %v14872_v52  ;;  %v14877_v59 = vmov 0 }
 0x3e4   : > { %v14878_v59 = vsel %vm11940_vm4, 4294967295, %v14877_v59  ;;  %v11952_v25 = vadd.f32 %v4122_v21, %v3586_v46 }
 0x3e5   : > { %v2778_v47 = vsel %vm14871_vm5, %v2775_v14, %v2777_v35  ;;  %14879 = vst [vmem:[#allocation105_spill] sm:$0xff] %v14878_v59  ;;  %v2780_v14 = vsel %vm14871_vm5, %v2777_v35, %v2779_v49  ;;  %v2782_v50 = vsel %vm14884_vm6, %v2779_v49, %v2781_v27  ;;  %vm14888_vm6 = vcmask 785920  }
 0x3e6   : > { %v3519_v19 = vpop.permute.xlu0 %3518  ;;  %v3587_v34 = vadd.f32 %v3515_v62, %v2778_v47  ;;  %v14883_v62 = vunpack.c.h.bf16 %v14866_v5  ;;  %v2851_v21 = vsel %vm11940_vm4, %v2780_v14, 0.0  ;;  %v525_v14 = vadd.s32 208, %v14730_v23  ;;  %vm14890_vm5 = vmmov %vm14888_vm6 }
 0x3e8   : > { %v9456_v52 = vadd.high.f32.bf16 %v14883_v62, %v14865_v13  ;;  %v3589_v13 = vadd.f32 %v3519_v19, %v2782_v50  ;;  %v14885_v62 = vld [vmem:[#allocation103_spill] sm:$0xff]  ;;  %v14886_v19 = vld [vmem:[#allocation53_spill] sm:$0xff] }
 0x3e9   : > { %v14887_v50 = vunpack.c.l.bf16 %v14886_v19 }
 0x3ea   : > { %v11911_v38 = vpop.permute.xlu0 %3520 }
 0x3ee   : > { %v4128_v22 = vpop.permute.xlu0 %4127 }
 0x3f2   : > { %v4126_v47 = vpop.permute.xlu0 %4125 }
 0x3fa   : > { %v4431_v7 = vpop.permute.xlu1 %4430 }
 0x3fb   : > { %4478 = vst.msk [vmem:[#allocation2] sm:$0xff] %vm14384_vm0, %v4431_v7 }
 0x3ff   : > { %v4433_v7 = vpop.permute.xlu1 %4432 }
 0x400   : > { %4479 = vst.msk [vmem:[#allocation2 + $0x8] sm:$0xff] %vm14384_vm0, %v4433_v7  ;;  %vm11945_vm0 = vcmp.le.s32.totalorder %v710_v28, 14  ;;  %v14880_v7 = vmov 0 }
 0x401   : > { %v14881_v7 = vsel %vm11945_vm0, 4294967295, %v14880_v7  ;;  %v4198_v28 = vsel %vm11945_vm0, %v4128_v22, 0.0 }
 0x402   : > { %v4494_v36 = vld [vmem:[#allocation2] sm:$0xff]  ;;  %14882 = vst [vmem:[#allocation55_spill] sm:$0xff] %v14881_v7  ;;  %v11973_v22 = vadd.f32 %v4198_v28, %v3589_v13 }
 0x403   : > { %v4124_v0 = vpop.permute.xlu1 %4123  ;;  %v4518_v61 = vmul.bf16 %v11926_v32, %v4494_v36  ;;  %v11967_v36 = vld [vmem:[#allocation3 + $0x8] sm:$0xff] }
 0x404   : > { %v4196_v29 = vsel %vm11930_vm1, %v4124_v0, 0.0 }
 0x405   : > { %v11954_v17 = vadd.f32 %v4196_v29, %v3587_v34  ;;  %v4542_v12 = vadd.bf16 %v11935_v31, %v4518_v61  ;;  %v9457_v29 = vadd.high.f32.bf16 %v9456_v52, %v14873_v41  ;;  %v717_v52 = vand.u32 15, %v525_v14 }
 0x407   : > { %v4409_v35 = vpack.c.bf16 %v11954_v17, %v11952_v25  ;;  %v3517_v16 = vpop.permute.xlu1 %3516  ;;  %v4558_v34 = vmax.bf16 %v11967_v36, %v4542_v12  ;;  %v4495_v5 = vld [vmem:[#allocation2 + $0x8] sm:$0xff]  ;;  %v2783_v41 = vrot.slane %v9457_v29, 7 }
 0x408   : > { %v3588_v46 = vadd.f32 %v3517_v16, %v2851_v21  ;;  %v4519_v49 = vmul.bf16 %v11926_v32, %v4495_v5  ;;  %v9458_v21 = vadd.low.f32.bf16 %v14887_v50, %v14885_v62  ;;  %v14891_v50 = vmov 0 }
 0x409   : > { %8267 = vmatprep.mubr.msk.bf16.mxu0 %vm14387_vm3, %v4558_v34  ;;  %4452 = vrot.lane.b32.xlu0 %v4409_v35, %s9700_s24  ;;  %v526_v35 = vadd.s32 216, %v14730_v23  ;;  %v14889_v34 = vld [vmem:[#allocation121_spill] sm:$0xff] }
 0x40a   : > { %v11975_v0 = vadd.f32 %v4126_v47, %v3588_v46  ;;  %v4543_v61 = vadd.bf16 %v11935_v31, %v4519_v49  ;;  %v4130_v47 = vpop.permute.xlu0 %4129  ;;  %v9459_v5 = vadd.low.f32.bf16 %v9458_v21, %v14889_v34  ;;  %v9264_v46 = vld [vmem:[%s14176_s10] ss:$12 sps:$4 sm:$0xff]   ;;  %v9266_v49 = vld [vmem:[%s14176_s10 + $0x4] ss:$12 sps:$4 sm:$0xff]  }
 0x40b   : > { %v4435_v12 = vpop.permute.xlu1 %4434  ;;  %5047 = vmatprep.subr.bf16.mxu1 %v9266_v49 }
 0x40c   : > { %v4410_v16 = vpack.c.bf16 %v11973_v22, %v11975_v0  ;;  %4480 = vst.msk [vmem:[#allocation2 + $0x10] sm:$0xff] %vm14888_vm6, %v4435_v12  ;;  %v4559_v28 = vmax.bf16 %v11967_v36, %v4543_v61  ;;  %v724_v61 = vand.u32 15, %v526_v35  ;;  %v2785_v12 = vrot.slane %v9459_v5, 7  ;;  %5048 = vmatpush1.bf16.msra.mxu1 %v9264_v46 }
 0x40d   : > { %vm11998_vm6 = vcmp.ge.s32.totalorder %v717_v52, 1  ;;  %v14896_v35 = vmov 0 }
 0x40e   : > { %8268 = vmatmul.mubr.msk.bf16.vlgmr.msra.gmra.mrb[64].mxu0 %vm14387_vm3, %v4559_v28  ;;  %4454 = vrot.lane.b32.xlu1 %v4410_v16, %s9700_s24  ;;  %v14892_v50 = vsel %vm11998_vm6, 4294967295, %v14891_v50  ;;  %vm14894_vm3 = vcmask 1040384   ;;  %v12003_v14 = vpop.permute.xlu0 %3526 }
 0x40f   : > { %v4437_v13 = vpop.permute.xlu1 %4436  ;;  %14893 = vst [vmem:[#allocation114_spill] sm:$0xff] %v14892_v50  ;;  %v2784_v29 = vsel %vm14894_vm3, %v2781_v27, %v2783_v41  ;;  %vm14899_vm0 = vmmov %vm14894_vm3  ;;  %vm14903_vm3 = vcmask 785408  }
 0x410   : > { %4481 = vst.msk [vmem:[#allocation2 + $0x18] sm:$0xff] %vm14890_vm5, %v4437_v13  ;;  %v14895_v13 = vunpack.c.h.bf16 %v14886_v19  ;;  %vm12009_vm5 = vcmp.le.s32.totalorder %v724_v61, 14  ;;  %v2853_v5 = vsel %vm11998_vm6, %v2784_v29, 0.0  ;;  %v2786_v27 = vsel %vm14899_vm0, %v2783_v41, %v2785_v12 }
 0x411   : > { %v14897_v35 = vsel %vm12009_vm5, 4294967295, %v14896_v35  ;;  %v3590_v46 = vadd.f32 %v11911_v38, %v2853_v5  ;;  %v528_v19 = vadd.s32 232, %v14730_v23  ;;  %vm14904_vm0 = vcmask 785920  }
 0x412   : > { %v9460_v7 = vadd.high.f32.bf16 %v14895_v13, %v14885_v62  ;;  %14898 = vst [vmem:[#allocation113_spill] sm:$0xff] %v14897_v35  ;;  %v527_v62 = vadd.s32 224, %v14730_v23  ;;  %v14900_v13 = vld [vmem:[#allocation118_spill] sm:$0xff]  ;;  %v12030_v38 = vpop.permute.xlu0 %3528  ;;  %vm14909_vm6 = vmmov %vm14904_vm0 }
 0x413   : > { %v3523_v21 = vpop.permute.xlu1 %3522  ;;  %v4496_v16 = vld [vmem:[#allocation2 + $0x10] sm:$0xff] }
 0x414   : > { %v4520_v28 = vmul.bf16 %v11926_v32, %v4496_v16  ;;  %v9461_v49 = vadd.high.f32.bf16 %v9460_v7, %v14889_v34  ;;  %v3591_v16 = vadd.f32 %v3523_v21, %v2786_v27  ;;  %v12028_v34 = vadd.f32 %v4130_v47, %v3590_v46  ;;  %v14905_v46 = vld [vmem:[#allocation119_spill] sm:$0xff] }
 0x416   : > { %v4544_v52 = vadd.bf16 %v11935_v31, %v4520_v28  ;;  %v14901_v28 = vld [vmem:[#allocation54_spill] sm:$0xff] }
 0x417   : > { %v4132_v59 = vpop.permute.xlu1 %4131  ;;  %v4497_v54 = vld [vmem:[#allocation2 + $0x18] sm:$0xff]  ;;  %v14902_v50 = vunpack.c.l.bf16 %v14901_v28 }
 0x418   : > { %v4200_v61 = vsel %vm12009_vm5, %v4132_v59, 0.0  ;;  %v4560_v29 = vmax.bf16 %v11967_v36, %v4544_v52  ;;  %v4521_v41 = vmul.bf16 %v11926_v32, %v4497_v54  ;;  %v2787_v54 = vrot.slane %v9461_v49, 7 }
 0x419   : > { %v9462_v7 = vadd.low.f32.bf16 %v14902_v50, %v14900_v13  ;;  %v12032_v21 = vadd.f32 %v4200_v61, %v3591_v16  ;;  %v738_v52 = vand.u32 15, %v528_v19  ;;  %v731_v50 = vand.u32 15, %v527_v62  ;;  %v4136_v61 = vpop.permute.xlu0 %4135 }
 0x41a   : > { %8271 = vmatprep.mubr.msk.bf16.mxu0 %vm14903_vm3, %v4560_v29  ;;  %v4545_v5 = vadd.bf16 %v11935_v31, %v4521_v41  ;;  %v14906_v41 = vmov 0  ;;  %v14910_v49 = vmov 0 }
 0x41b   : > { %v4411_v59 = vpack.c.bf16 %v12032_v21, %v12028_v34  ;;  %v4439_v27 = vpop.permute.xlu1 %4438  ;;  %v9463_v16 = vadd.low.f32.bf16 %v9462_v7, %v14905_v46  ;;  %vm12043_vm5 = vcmp.le.s32.totalorder %v738_v52, 14  ;;  %vm12048_vm4 = vcmp.ge.s32.totalorder %v731_v50, 1  ;;  %v14921_v50 = vld [vmem:[#allocation11_spill] sm:$0xff] }
 0x41c   : > { %4482 = vst.msk [vmem:[#allocation2 + $0x20] sm:$0xff] %vm14904_vm0, %v4439_v27  ;;  %v4561_v47 = vmax.bf16 %v11967_v36, %v4545_v5  ;;  %v14907_v41 = vsel %vm12043_vm5, 4294967295, %v14906_v41  ;;  %v14911_v49 = vsel %vm12048_vm4, 4294967295, %v14910_v49  ;;  %vm14913_vm0 = vcmask 1040384  }
 0x41d   : > { %4456 = vrot.lane.b32.xlu0 %v4411_v59, %s9700_s24  ;;  %14908 = vst [vmem:[#allocation57_spill] sm:$0xff] %v14907_v41  ;;  %14912 = vst [vmem:[#allocation61_spill] sm:$0xff] %v14911_v49  ;;  %v2788_v62 = vsel %vm14913_vm0, %v2785_v12, %v2787_v54  ;;  %v12054_v19 = vrot.slane %v9463_v16, 7  ;;  %v4202_v5 = vsel %vm12043_vm5, %v4136_v61, 0.0  ;;  %v14917_v12 = vld [vmem:[#allocation9_spill] sm:$0xff]  ;;  %v14923_v16 = vld [vmem:[#allocation12_spill] sm:$0xff]  ;;  %v4134_v49 = vpop.permute.xlu0 %4133 }
 0x41e   : > { %8272 = vmatmul.mubr.msk.bf16.gmra.mrb[68].mxu0 %vm14903_vm3, %v4561_v47  ;;  %vm14914_vm3 = vmmov %vm14913_vm0  ;;  %v2855_v27 = vsel %vm12048_vm4, %v2788_v62, 0.0  ;;  %v14915_v47 = vld [vmem:[#allocation8_spill] sm:$0xff]  ;;  %v14925_v61 = vld [vmem:[#allocation13_spill] sm:$0xff] }
 0x41f   : > { %v4441_v29 = vpop.permute.xlu1 %4440  ;;  %v2790_v7 = vsel %vm14914_vm3, %v2787_v54, %v12054_v19  ;;  %v14919_v54 = vld [vmem:[#allocation10_spill] sm:$0xff]  ;;  %v14929_v62 = vld [vmem:[#allocation15_spill] sm:$0xff] }
 0x420   : > { %4483 = vst.msk [vmem:[#allocation2 + $0x28] sm:$0xff] %vm14909_vm6, %v4441_v29  ;;  %vm14916_vm6 = vcmask 523264   ;;  %v14927_v29 = vld [vmem:[#allocation14_spill] sm:$0xff] }
 0x421   : > { %434 = vst.msk [vmem:[%s12064_s30] sm:$0xff] %vm14916_vm6, %v14915_v47  ;;  %vm14918_vm0 = vmmov %vm14916_vm6  ;;  %v14930_v47 = vld [vmem:[#allocation16_spill] sm:$0xff] }
 0x422   : > { %435 = vst.msk [vmem:[%s12064_s30 + $0x8] sm:$0xff] %vm14918_vm0, %v14917_v12  ;;  %vm14920_vm3 = vmmov %vm14918_vm0  ;;  %v14932_v12 = vld [vmem:[#allocation18_spill] sm:$0xff] }
 0x423   : > { %v3525_v59 = vpop.permute.xlu1 %3524  ;;  %v4498_v52 = vld [vmem:[#allocation2 + $0x20] sm:$0xff]  ;;  %436 = vst.msk [vmem:[%s12064_s30 + $0x10] sm:$0xff] %vm14920_vm3, %v14919_v54  ;;  %vm14922_vm4 = vmmov %vm14918_vm0  ;;  %v14934_v54 = vld [vmem:[#allocation19_spill] sm:$0xff] }
 0x424   : > { %437 = vst.msk [vmem:[%s12064_s30 + $0x18] sm:$0xff] %vm14922_vm4, %v14921_v50  ;;  %vm14924_vm5 = vmmov %vm14918_vm0  ;;  %v14936_v50 = vld [vmem:[#allocation20_spill] sm:$0xff] }
 0x425   : > { %438 = vst.msk [vmem:[%s12064_s30 + $0x20] sm:$0xff] %vm14924_vm5, %v14923_v16  ;;  %vm14926_vm1 = vmmov %vm14918_vm0  ;;  %v14938_v16 = vld [vmem:[#allocation21_spill] sm:$0xff] }
 0x426   : > { %439 = vst.msk [vmem:[%s12064_s30 + $0x28] sm:$0xff] %vm14926_vm1, %v14925_v61  ;;  %vm14928_vm6 = vmmov %vm14918_vm0  ;;  %v14940_v61 = vld [vmem:[#allocation22_spill] sm:$0xff] }
 0x427   : > { %440 = vst.msk [vmem:[%s12064_s30 + $0x30] sm:$0xff] %vm14928_vm6, %v14927_v29  ;;  %vm14931_vm3 = vmmov %vm14918_vm0  ;;  %v14941_v29 = vld [vmem:[#allocation23_spill] sm:$0xff] }
 0x428   : > { %441 = vst.msk [vmem:[%s12064_s30 + $0x38] sm:$0xff] %vm14918_vm0, %v14929_v62  ;;  %vm14933_vm4 = vmmov %vm14918_vm0  ;;  %v14943_v62 = vld [vmem:[#allocation24_spill] sm:$0xff]  ;;  %v4499_v1 = vld [vmem:[#allocation2 + $0x28] sm:$0xff] }
 0x429   : > { %442 = vst.msk [vmem:[%s12064_s30 + $0x40] sm:$0xff] %vm14931_vm3, %v14930_v47  ;;  %vm14935_vm5 = vmmov %vm14918_vm0  ;;  %v14945_v47 = vld [vmem:[#allocation25_spill] sm:$0xff] }
 0x42a   : > { %443 = vst.msk [vmem:[%s12064_s30 + $0x48] sm:$0xff] %vm14933_vm4, %v14932_v12  ;;  %vm14937_vm1 = vmmov %vm14918_vm0  ;;  %v14947_v12 = vld [vmem:[#allocation26_spill] sm:$0xff] }
 0x42b   : > { %444 = vst.msk [vmem:[%s12064_s30 + $0x50] sm:$0xff] %vm14935_vm5, %v14934_v54  ;;  %vm14939_vm6 = vmmov %vm14918_vm0  ;;  %v14949_v54 = vld [vmem:[#allocation27_spill] sm:$0xff] }
 0x42c   : > { %445 = vst.msk [vmem:[%s12064_s30 + $0x58] sm:$0xff] %vm14937_vm1, %v14936_v50  ;;  %vm14942_vm3 = vmmov %vm14918_vm0  ;;  %v14951_v50 = vld [vmem:[#allocation28_spill] sm:$0xff] }
 0x42d   : > { %446 = vst.msk [vmem:[%s12064_s30 + $0x60] sm:$0xff] %vm14939_vm6, %v14938_v16  ;;  %vm14944_vm4 = vmmov %vm14918_vm0  ;;  %v14952_v16 = vld [vmem:[#allocation29_spill] sm:$0xff] }
 0x42e   : > { %447 = vst.msk [vmem:[%s12064_s30 + $0x68] sm:$0xff] %vm14918_vm0, %v14940_v61  ;;  %vm14946_vm5 = vmmov %vm14918_vm0  ;;  %v14954_v61 = vld [vmem:[#allocation30_spill] sm:$0xff] }
 0x42f   : > { %448 = vst.msk [vmem:[%s12064_s30 + $0x70] sm:$0xff] %vm14942_vm3, %v14941_v29  ;;  %vm14948_vm1 = vmmov %vm14918_vm0  ;;  %v14956_v29 = vld [vmem:[#allocation31_spill] sm:$0xff] }
 0x430   : > { %449 = vst.msk [vmem:[%s12064_s30 + $0x78] sm:$0xff] %vm14944_vm4, %v14943_v62  ;;  %vm14950_vm6 = vmmov %vm14918_vm0  ;;  %v14958_v62 = vld [vmem:[#allocation32_spill] sm:$0xff] }
 0x431   : > { %450 = vst.msk [vmem:[%s12064_s30 + $0x80] sm:$0xff] %vm14946_vm5, %v14945_v47  ;;  %vm14953_vm2 = vmmov %vm14918_vm0  ;;  %v14960_v47 = vld [vmem:[#allocation33_spill] sm:$0xff] }
 0x432   : > { %451 = vst.msk [vmem:[%s12064_s30 + $0x88] sm:$0xff] %vm14948_vm1, %v14947_v12  ;;  %vm14955_vm3 = vmmov %vm14918_vm0  ;;  %v14962_v12 = vld [vmem:[#allocation34_spill] sm:$0xff] }
 0x433   : > { %452 = vst.msk [vmem:[%s12064_s30 + $0x90] sm:$0xff] %vm14950_vm6, %v14949_v54  ;;  %vm14957_vm4 = vmmov %vm14918_vm0  ;;  %v14964_v54 = vld [vmem:[#allocation35_spill] sm:$0xff] }
 0x434   : > { %453 = vst.msk [vmem:[%s12064_s30 + $0x98] sm:$0xff] %vm14918_vm0, %v14951_v50  ;;  %vm14959_vm5 = vmmov %vm14918_vm0  ;;  %v14965_v50 = vld [vmem:[#allocation36_spill] sm:$0xff] }
 0x435   : > { %454 = vst.msk [vmem:[%s12064_s30 + $0xa0] sm:$0xff] %vm14953_vm2, %v14952_v16  ;;  %vm14961_vm1 = vmmov %vm14918_vm0  ;;  %v14967_v16 = vld [vmem:[#allocation37_spill] sm:$0xff] }
 0x436   : > { %455 = vst.msk [vmem:[%s12064_s30 + $0xa8] sm:$0xff] %vm14955_vm3, %v14954_v61  ;;  %vm14963_vm6 = vmmov %vm14918_vm0  ;;  %v14969_v61 = vld [vmem:[#allocation38_spill] sm:$0xff] }
 0x437   : > { %456 = vst.msk [vmem:[%s12064_s30 + $0xb0] sm:$0xff] %vm14957_vm4, %v14956_v29  ;;  %vm14966_vm2 = vmmov %vm14918_vm0  ;;  %v14971_v29 = vld [vmem:[#allocation39_spill] sm:$0xff] }
 0x438   : > { %457 = vst.msk [vmem:[%s12064_s30 + $0xb8] sm:$0xff] %vm14959_vm5, %v14958_v62  ;;  %vm14968_vm3 = vmmov %vm14918_vm0  ;;  %v14973_v62 = vld [vmem:[#allocation40_spill] sm:$0xff] }
 0x439   : > { %458 = vst.msk [vmem:[%s12064_s30 + $0xc0] sm:$0xff] %vm14961_vm1, %v14960_v47  ;;  %vm14970_vm4 = vmmov %vm14918_vm0  ;;  %v3593_v47 = vadd.f32 %v12003_v14, %v2790_v7  ;;  %v4523_v7 = vmul.bf16 %v11926_v32, %v4499_v1  ;;  %v9269_v1 = vld [vmem:[%s14176_s10 + $0x1c] ss:$12 sps:$4 sm:$0xff]  }
 0x43a   : > { %459 = vst.msk [vmem:[%s12064_s30 + $0xc8] sm:$0xff] %vm14963_vm6, %v14962_v12  ;;  %vm14972_vm5 = vmmov %vm14918_vm0  ;;  %v3592_v12 = vadd.f32 %v3525_v59, %v2855_v27  ;;  %v9298_v59 = vld [vmem:[#allocation3 + $0x180] sm:$0xf]  ;;  %vm14976_vm6 = vcmask 785408   ;;  %5049 = vmatprep.subr.bf16.mxu1 %v9269_v1 }
 0x43b   : > { %460 = vst.msk [vmem:[%s12064_s30 + $0xd0] sm:$0xff] %vm14918_vm0, %v14964_v54  ;;  %vm14974_vm1 = vmmov %vm14918_vm0  ;;  %v4522_v54 = vmul.bf16 %v11926_v32, %v4498_v52  ;;  %v12164_v41 = vadd.f32 %v4202_v5, %v3593_v47  ;;  %v2210_v5 = vunpack.c.l.bf16 %v9298_v59  ;;  %v9267_v52 = vld [vmem:[%s14176_s10 + $0x18] ss:$12 sps:$4 sm:$0xff]   ;;  %v14977_v47 = vld [vmem:[#allocation116_spill] sm:$0xff]  ;;  %vm14978_vm0 = vcmask 785920  }
 0x43c   : > { %461 = vst.msk [vmem:[%s12064_s30 + $0xd8] sm:$0xff] %vm14966_vm2, %v14965_v50  ;;  %v12166_v50 = vadd.f32 %v4134_v49, %v3592_v12  ;;  %v4547_v49 = vadd.bf16 %v11935_v31, %v4523_v7  ;;  %vm14979_vm2 = vmmov %vm14976_vm6  ;;  %5050 = vmatpush1.bf16.msra.mxu1 %v9267_v52  ;;  %v14981_v7 = vmov 0 }
 0x43d   : > { %462 = vst.msk [vmem:[%s12064_s30 + $0xe0] sm:$0xff] %vm14968_vm3, %v14967_v16  ;;  %v4546_v16 = vadd.bf16 %v11935_v31, %v4522_v54  ;;  %v9466_v12 = vadd.low.f32.bf16 %v2210_v5, %v14977_v47 }
 0x43e   : > { %463 = vst.msk [vmem:[%s12064_s30 + $0xe8] sm:$0xff] %vm14970_vm4, %v14969_v61  ;;  %v14975_v61 = vunpack.c.h.bf16 %v14901_v28  ;;  %v4563_v54 = vmax.bf16 %v11967_v36, %v4547_v49  ;;  %vm14984_vm4 = vcmask 1040384  }
 0x43f   : > { %464 = vst.msk [vmem:[%s12064_s30 + $0xf0] sm:$0xff] %vm14972_vm5, %v14971_v29  ;;  %v3531_v29 = vpop.permute.xlu1 %3530  ;;  %v4562_v14 = vmax.bf16 %v11967_v36, %v4546_v16  ;;  %v530_v16 = vadd.s32 248, %v14730_v23  ;;  %vm14985_vm5 = vmmov %vm14978_vm0 }
 0x440   : > { %465 = vst.msk [vmem:[%s12064_s30 + $0xf8] sm:$0xff] %vm14974_vm1, %v14973_v62  ;;  %v9464_v35 = vadd.high.f32.bf16 %v14975_v61, %v14900_v13  ;;  %v4412_v62 = vpack.c.bf16 %v12164_v41, %v12166_v50  ;;  %v529_v13 = vadd.s32 240, %v14730_v23  ;;  %v14980_v61 = vld [vmem:[#allocation59_spill] sm:$0xff] }
 0x441   : > { %8275 = vmatprep.mubr.msk.bf16.mxu0 %vm14976_vm6, %v4562_v14  ;;  %v752_v14 = vand.u32 15, %v530_v16  ;;  %vm14989_vm6 = vmmov %vm14984_vm4 }
 0x442   : > { %4458 = vrot.lane.b32.xlu1 %v4412_v62, %s9700_s24  ;;  %v9465_v28 = vadd.high.f32.bf16 %v9464_v35, %v14905_v46  ;;  %8276 = vmatmul.mubr.msk.bf16.gmra.mrb[72].mxu0 %vm14979_vm2, %v4563_v54  ;;  %v745_v46 = vand.u32 15, %v529_v13  ;;  %v9467_v62 = vadd.low.f32.bf16 %v9466_v12, %v14980_v61  ;;  %v4138_v13 = vpop.permute.xlu0 %4137  ;;  %v9272_v61 = vld [vmem:[%s14176_s10 + $0x34] ss:$12 sps:$4 sm:$0xff]  }
 0x443   : > { %v4443_v27 = vpop.permute.xlu1 %4442  ;;  %vm12205_vm1 = vcmp.le.s32.totalorder %v752_v14, 14  ;;  %5051 = vmatprep.subr.bf16.mxu1 %v9272_v61 }
 0x444   : > { %4484 = vst.msk [vmem:[#allocation2 + $0x30] sm:$0xff] %vm14978_vm0, %v4443_v27  ;;  %v2791_v35 = vrot.slane %v9465_v28, 7  ;;  %vm12197_vm3 = vcmp.ge.s32.totalorder %v745_v46, 1  ;;  %v2793_v49 = vrot.slane %v9467_v62, 7  ;;  %v14986_v28 = vmov 0  ;;  %vm14990_vm0 = vmmov %vm14979_vm2 }
 0x445   : > { %v14982_v7 = vsel %vm12197_vm3, 4294967295, %v14981_v7  ;;  %v14987_v28 = vsel %vm12205_vm1, 4294967295, %v14986_v28  ;;  %vm14991_vm2 = vmmov %vm14985_vm5 }
 0x446   : > { %4269 = vrot.lane.b32.xlu1 %v11547_v18, %s9700_s24  ;;  %14983 = vst [vmem:[#allocation112_spill] sm:$0xff] %v14982_v7  ;;  %v2792_v23 = vsel %vm14984_vm4, %v12054_v19, %v2791_v35  ;;  %14988 = vst [vmem:[#allocation7_spill] sm:$0xff] %v14987_v28  ;;  %v2794_v27 = vsel %vm14989_vm6, %v2791_v35, %v2793_v49  ;;  %v9270_v35 = vld [vmem:[%s14176_s10 + $0x30] ss:$12 sps:$4 sm:$0xff]   ;;  %v9277_v49 = vld [vmem:[%s14176_s10 + $0x20] ss:$12 sps:$4 sm:$0xff]  }
 0x447   : > { %v4445_v59 = vpop.permute.xlu1 %4444  ;;  %v3595_v1 = vadd.f32 %v3531_v29, %v2794_v27  ;;  %5052 = vmatpush1.bf16.msra.mxu1 %v9270_v35  ;;  %vm14992_vm4 = vmmov %vm14990_vm0 }
 0x448   : > { %4485 = vst.msk [vmem:[#allocation2 + $0x38] sm:$0xff] %vm14985_vm5, %v4445_v59  ;;  %vm14993_vm5 = vmmov %vm14991_vm2 }
 0x449   : > { %vm14994_vm6 = vmmov %vm14990_vm0 }
 0x44a   : > { %4273 = vrot.lane.b32.xlu1 %v11579_v53, %s9700_s24  ;;  %v2857_v53 = vsel %vm12197_vm3, %v2792_v23, 0.0  ;;  %v4449_v23 = vpop.permute.xlu0 %4448 }
 0x44b   : > { %v4500_v5 = vld [vmem:[#allocation2 + $0x30] sm:$0xff]  ;;  %v3594_v52 = vadd.f32 %v12030_v38, %v2857_v53  ;;  %v4140_v47 = vpop.permute.xlu1 %4139  ;;  %4487 = vst.msk [vmem:[#allocation2 + $0x48] sm:$0xff] %vm14993_vm5, %v4449_v23  ;;  %v9278_v53 = vld [vmem:[%s14176_s10 + $0x38] ss:$12 sps:$4 sm:$0xff]  }
 0x44c   : > { %v4524_v18 = vmul.bf16 %v11926_v32, %v4500_v5  ;;  %v4204_v12 = vsel %vm12205_vm1, %v4140_v47, 0.0  ;;  %v9276_v5 = vld [vmem:[%s14176_s10 + $0x8] ss:$12 sps:$4 sm:$0xff]  }
 0x44d   : > { %v12219_v16 = vadd.f32 %v4138_v13, %v3594_v52  ;;  %v12221_v46 = vadd.f32 %v4204_v12, %v3595_v1  ;;  %8299 = vmatprep.subr.bf16.mxu0 %v9276_v5  ;;  %v9290_v1 = vld [vmem:[%s14176_s10 + $0x94] ss:$12 sps:$4 sm:$0xff]  }
 0x44e   : > { %4277 = vrot.lane.b32.xlu1 %v11635_v42, %s9700_s24  ;;  %v4548_v19 = vadd.bf16 %v11935_v31, %v4524_v18  ;;  %8300 = vmatpush3.bf16.msra.mxu0 %v9276_v5 }
 0x44f   : > { %v4413_v42 = vpack.c.bf16 %v12221_v46, %v12219_v16  ;;  %v4501_v38 = vld [vmem:[#allocation2 + $0x38] sm:$0xff]  ;;  %v4447_v62 = vpop.permute.xlu1 %4446  ;;  %8301 = vmatprep.subr.bf16.mxu0 %v9277_v49 }
 0x450   : > { %v4564_v54 = vmax.bf16 %v11967_v36, %v4548_v19  ;;  %v4525_v29 = vmul.bf16 %v11926_v32, %v4501_v38  ;;  %4486 = vst.msk [vmem:[#allocation2 + $0x40] sm:$0xff] %vm14991_vm2, %v4447_v62  ;;  %v9286_v19 = vld [vmem:[%s14176_s10 + $0x7c] ss:$12 sps:$4 sm:$0xff]  }
 0x451   : > { %4460 = vrot.lane.b32.xlu0 %v4413_v42, %s9700_s24 }
 0x452   : > { %8279 = vmatprep.mubr.msk.bf16.mxu0 %vm14990_vm0, %v4564_v54  ;;  %4281 = vrot.lane.b32.xlu1 %v11663_v40, %s9700_s24  ;;  %v4549_v40 = vadd.bf16 %v11935_v31, %v4525_v29  ;;  %vm14995_vm0 = vmmov %vm14991_vm2 }
 0x453   : > { %v4451_v18 = vpop.permute.xlu1 %4450  ;;  %8302 = vmatpush3.bf16.msra.mxu0 %v9277_v49  ;;  %vm14996_vm2 = vmmov %vm14992_vm4 }
 0x454   : > { %v4565_v14 = vmax.bf16 %v11967_v36, %v4549_v40  ;;  %4488 = vst.msk [vmem:[#allocation2 + $0x50] sm:$0xff] %vm14995_vm0, %v4451_v18  ;;  %8303 = vmatprep.subr.bf16.mxu0 %v9278_v53  ;;  %vm14998_vm5 = vmmov %vm14995_vm0 }
 0x455   : > { %4271 = vrot.lane.b32.xlu0 %v11549_v4, %s9700_s24 }
 0x456   : > { %4285 = vrot.lane.b32.xlu1 %v11706_v51, %s9700_s24  ;;  %8280 = vmatmul.mubr.msk.bf16.gmra.mrb[76].mxu0 %vm14992_vm4, %v4565_v14  ;;  %vm14997_vm4 = vmmov %vm14996_vm2 }
 0x457   : > { %v4502_v51 = vld [vmem:[#allocation2 + $0x40] sm:$0xff]  ;;  %8304 = vmatpush3.bf16.msra.mxu0 %v9278_v53 }
 0x458   : > { %v4526_v59 = vmul.bf16 %v11926_v32, %v4502_v51 }
 0x459   : > { %4275 = vrot.lane.b32.xlu0 %v11576_v6, %s9700_s24  ;;  %v9273_v6 = vld [vmem:[%s14176_s10 + $0x48] ss:$12 sps:$4 sm:$0xff]  }
 0x45a   : > { %4289 = vrot.lane.b32.xlu1 %v11727_v9, %s9700_s24  ;;  %v4550_v4 = vadd.bf16 %v11935_v31, %v4526_v59 }
 0x45c   : > { %v4566_v9 = vmax.bf16 %v11967_v36, %v4550_v4 }
 0x45d   : > { %4279 = vrot.lane.b32.xlu0 %v11637_v37, %s9700_s24  ;;  %v4503_v37 = vld [vmem:[#allocation2 + $0x48] sm:$0xff] }
 0x45e   : > { %4293 = vrot.lane.b32.xlu1 %v11763_v44, %s9700_s24  ;;  %v9275_v44 = vld [vmem:[%s14176_s10 + $0x4c] ss:$12 sps:$4 sm:$0xff]   ;;  %8283 = vmatprep.mubr.msk.bf16.mxu0 %vm14994_vm6, %v4566_v9  ;;  %vm14999_vm6 = vmmov %vm14995_vm0 }
 0x45f   : > { %5053 = vmatprep.subr.bf16.mxu1 %v9275_v44  ;;  %vm15000_vm0 = vmmov %vm14996_vm2 }
 0x460   : > { %5054 = vmatpush1.bf16.msra.mxu1 %v9273_v6 }
 0x461   : > { %4283 = vrot.lane.b32.xlu0 %v11661_v55, %s9700_s24 }
 0x462   : > { %4297 = vrot.lane.b32.xlu1 %v11798_v33, %s9700_s24  ;;  %v4527_v33 = vmul.bf16 %v11926_v32, %v4503_v37 }
 0x464   : > { %v4551_v55 = vadd.bf16 %v11935_v31, %v4527_v33 }
 0x465   : > { %4287 = vrot.lane.b32.xlu0 %v11708_v39, %s9700_s24  ;;  %v9279_v39 = vld [vmem:[%s14176_s10 + $0x50] ss:$12 sps:$4 sm:$0xff]  }
 0x466   : > { %4301 = vrot.lane.b32.xlu1 %v11833_v48, %s9700_s24  ;;  %v4567_v48 = vmax.bf16 %v11967_v36, %v4551_v55  ;;  %8305 = vmatprep.subr.bf16.mxu0 %v9279_v39 }
 0x467   : > { %8306 = vmatpush3.bf16.msra.mxu0 %v9279_v39 }
 0x468   : > { %8284 = vmatmul.mubr.msk.bf16.gmra.mrb[80].mxu0 %vm14996_vm2, %v4567_v48  ;;  %vm15001_vm2 = vmmov %vm15000_vm0 }
 0x469   : > { %4291 = vrot.lane.b32.xlu0 %v11725_v20, %s9700_s24  ;;  %v9282_v20 = vld [vmem:[%s14176_s10 + $0x64] ss:$12 sps:$4 sm:$0xff]  }
 0x46a   : > { %4305 = vrot.lane.b32.xlu1 %v11865_v10, %s9700_s24  ;;  %v9280_v10 = vld [vmem:[%s14176_s10 + $0x60] ss:$12 sps:$4 sm:$0xff]   ;;  %5055 = vmatprep.subr.bf16.mxu1 %v9282_v20 }
 0x46b   : > { %5056 = vmatpush1.bf16.msra.mxu1 %v9280_v10 }
 0x46c   : > { %5057 = vmatprep.subr.bf16.mxu1 %v9286_v19 }
 0x46d   : > { %4295 = vrot.lane.b32.xlu0 %v11765_v57, %s9700_s24  ;;  %v9283_v57 = vld [vmem:[%s14176_s10 + $0x68] ss:$12 sps:$4 sm:$0xff]  }
 0x46e   : > { %4309 = vrot.lane.b32.xlu1 %v11885_v45, %s9700_s24  ;;  %v4504_v45 = vld [vmem:[#allocation2 + $0x50] sm:$0xff]  ;;  %8307 = vmatprep.subr.bf16.mxu0 %v9283_v57 }
 0x46f   : > { %v4528_v13 = vmul.bf16 %v11926_v32, %v4504_v45  ;;  %8308 = vmatpush3.bf16.msra.mxu0 %v9283_v57 }
 0x471   : > { %4299 = vrot.lane.b32.xlu0 %v11800_v56, %s9700_s24  ;;  %v4552_v27 = vadd.bf16 %v11935_v31, %v4528_v13  ;;  %v9287_v56 = vld [vmem:[%s14176_s10 + $0x80] ss:$12 sps:$4 sm:$0xff]  }
 0x472   : > { %4313 = vrot.lane.b32.xlu1 %v11952_v25, %s9700_s24  ;;  %v9284_v25 = vld [vmem:[%s14176_s10 + $0x78] ss:$12 sps:$4 sm:$0xff]   ;;  %8309 = vmatprep.subr.bf16.mxu0 %v9287_v56 }
 0x473   : > { %v4568_v52 = vmax.bf16 %v11967_v36, %v4552_v27  ;;  %5058 = vmatpush1.bf16.msra.mxu1 %v9284_v25  ;;  %8310 = vmatpush3.bf16.msra.mxu0 %v9287_v56 }
 0x474   : > { %5059 = vmatprep.subr.bf16.mxu1 %v9290_v1 }
 0x475   : > { %8287 = vmatprep.mubr.msk.bf16.mxu0 %vm14997_vm4, %v4568_v52  ;;  %4303 = vrot.lane.b32.xlu0 %v11835_v60, %s9700_s24  ;;  %v9291_v60 = vld [vmem:[%s14176_s10 + $0x98] ss:$12 sps:$4 sm:$0xff]   ;;  %vm15002_vm4 = vmmov %vm14998_vm5 }
 0x476   : > { %4317 = vrot.lane.b32.xlu1 %v11975_v0, %s9700_s24  ;;  %v9288_v0 = vld [vmem:[%s14176_s10 + $0x90] ss:$12 sps:$4 sm:$0xff]   ;;  %8311 = vmatprep.subr.bf16.mxu0 %v9291_v60 }
 0x477   : > { %5060 = vmatpush1.bf16.msra.mxu1 %v9288_v0  ;;  %8312 = vmatpush3.bf16.msra.mxu0 %v9291_v60 }
 0x479   : > { %4307 = vrot.lane.b32.xlu0 %v11863_v63, %s9700_s24  ;;  %v9294_v63 = vld [vmem:[%s14176_s10 + $0xac] ss:$12 sps:$4 sm:$0xff]  }
 0x47a   : > { %4321 = vrot.lane.b32.xlu1 %v12028_v34, %s9700_s24  ;;  %v9295_v34 = vld [vmem:[%s14176_s10 + $0xb0] ss:$12 sps:$4 sm:$0xff]   ;;  %5061 = vmatprep.subr.bf16.mxu1 %v9294_v63 }
 0x47b   : > { %8313 = vmatprep.subr.bf16.mxu0 %v9295_v34 }
 0x47c   : > { %8314 = vmatpush3.bf16.msra.mxu0 %v9295_v34 }
 0x47d   : > { %4311 = vrot.lane.b32.xlu0 %v11887_v24, %s9700_s24  ;;  %v9292_v24 = vld [vmem:[%s14176_s10 + $0xa8] ss:$12 sps:$4 sm:$0xff]  }
 0x47e   : > { %4325 = vrot.lane.b32.xlu1 %v12166_v50, %s9700_s24  ;;  %5062 = vmatpush1.bf16.msra.mxu1 %v9292_v24  ;;  %v4453_v50 = vpop.permute.xlu0 %4452 }
 0x47f   : > { %4489 = vst.msk [vmem:[#allocation2 + $0x58] sm:$0xff] %vm14998_vm5, %v4453_v50  ;;  %vm15003_vm5 = vmmov %vm15002_vm4 }
 0x480   : > { %v4455_v47 = vpop.permute.xlu1 %4454 }
 0x481   : > { %4315 = vrot.lane.b32.xlu0 %v11954_v17, %s9700_s24  ;;  %4490 = vst.msk [vmem:[#allocation2 + $0x60] sm:$0xff] %vm14999_vm6, %v4455_v47  ;;  %vm15004_vm6 = vmmov %vm15000_vm0  ;;  %v12446_v47 = vld [vmem:[%s14175_s9] ss:$0 sm:$0xff] }
 0x482   : > { %4329 = vrot.lane.b32.xlu1 %v12219_v16, %s9700_s24 }
 0x485   : > { %4319 = vrot.lane.b32.xlu0 %v11973_v22, %s9700_s24 }
 0x486   : > { %v4505_v17 = vld [vmem:[#allocation2 + $0x58] sm:$0xff] }
 0x487   : > { %v4529_v12 = vmul.bf16 %v11926_v32, %v4505_v17 }
 0x489   : > { %4323 = vrot.lane.b32.xlu0 %v12032_v21, %s9700_s24  ;;  %v4553_v22 = vadd.bf16 %v11935_v31, %v4529_v12  ;;  %v4506_v21 = vld [vmem:[#allocation2 + $0x60] sm:$0xff] }
 0x48b   : > { %v4569_v54 = vmax.bf16 %v11967_v36, %v4553_v22 }
 0x48d   : > { %4327 = vrot.lane.b32.xlu0 %v12164_v41, %s9700_s24  ;;  %v4530_v41 = vmul.bf16 %v11926_v32, %v4506_v21  ;;  %8288 = vmatmul.mubr.msk.bf16.gmra.mrb[84].mxu0 %vm15000_vm0, %v4569_v54  ;;  %vm15005_vm0 = vmmov %vm15002_vm4 }
 0x48e   : > { %vm15011_vm3 = vmmov %vm15005_vm0 }
 0x48f   : > { %v4554_v16 = vadd.bf16 %v11935_v31, %v4530_v41  ;;  %v4457_v42 = vpop.permute.xlu0 %4456  ;;  %vm15028_vm1 = vmmov %vm15005_vm0 }
 0x490   : > { %4491 = vst.msk [vmem:[#allocation2 + $0x68] sm:$0xff] %vm15002_vm4, %v4457_v42  ;;  %vm15007_vm4 = vmmov %vm15005_vm0 }
 0x491   : > { %4331 = vrot.lane.b32.xlu0 %v12221_v46, %s9700_s24  ;;  %v4570_v46 = vmax.bf16 %v11967_v36, %v4554_v16 }
 0x493   : > { %8291 = vmatprep.mubr.msk.bf16.mxu0 %vm15001_vm2, %v4570_v46  ;;  %vm15006_vm2 = vmmov %vm15005_vm0 }
 0x497   : > { %v4507_v38 = vld [vmem:[#allocation2 + $0x68] sm:$0xff] }
 0x498   : > { %v4531_v29 = vmul.bf16 %v11926_v32, %v4507_v38 }
 0x49a   : > { %v4555_v35 = vadd.bf16 %v11935_v31, %v4531_v29 }
 0x49c   : > { %v4571_v62 = vmax.bf16 %v11967_v36, %v4555_v35 }
 0x49e   : > { %8292 = vmatmul.mubr.msk.bf16.gmra.mrb[88].mxu0 %vm15004_vm6, %v4571_v62 }
 0x4b4   : > { %v4459_v61 = vpop.permute.xlu1 %4458 }
 0x4b5   : > { %4492 = vst.msk [vmem:[#allocation2 + $0x70] sm:$0xff] %vm15003_vm5, %v4459_v61  ;;  %vm15008_vm5 = vmmov %vm15004_vm6 }
 0x4b6   : > { %vm15009_vm6 = vmmov %vm15005_vm0 }
 0x4b8   : > { %v4270_v40 = vpop.permute.xlu1 %4269 }
 0x4b9   : > { %4366 = vst.msk [vmem:[%s12064_s30] sm:$0xff] %vm15005_vm0, %v4270_v40 }
 0x4bc   : > { %v4274_v14 = vpop.permute.xlu1 %4273  ;;  %v4508_v51 = vld [vmem:[#allocation2 + $0x70] sm:$0xff] }
 0x4bd   : > { %4368 = vst.msk [vmem:[%s12064_s30 + $0x10] sm:$0xff] %vm15006_vm2, %v4274_v14  ;;  %v4532_v23 = vmul.bf16 %v11926_v32, %v4508_v51  ;;  %vm15010_vm2 = vmmov %vm15005_vm0 }
 0x4bf   : > { %v4556_v59 = vadd.bf16 %v11935_v31, %v4532_v23 }
 0x4c0   : > { %v4278_v4 = vpop.permute.xlu1 %4277 }
 0x4c1   : > { %4370 = vst.msk [vmem:[%s12064_s30 + $0x20] sm:$0xff] %vm15007_vm4, %v4278_v4  ;;  %v4572_v9 = vmax.bf16 %v11967_v36, %v4556_v59  ;;  %vm15012_vm4 = vmmov %vm15005_vm0 }
 0x4c3   : > { %8295 = vmatprep.mubr.msk.bf16.mxu0 %vm15008_vm5, %v4572_v9  ;;  %v4461_v44 = vpop.permute.xlu0 %4460  ;;  %vm15013_vm5 = vmmov %vm15005_vm0 }
 0x4c4   : > { %v4282_v6 = vpop.permute.xlu1 %4281  ;;  %4493 = vst.msk [vmem:[#allocation2 + $0x78] sm:$0xff] %vm15005_vm0, %v4461_v44 }
 0x4c5   : > { %4372 = vst.msk [vmem:[%s12064_s30 + $0x30] sm:$0xff] %vm15009_vm6, %v4282_v6  ;;  %vm15014_vm6 = vmmov %vm15005_vm0 }
 0x4c7   : > { %v4272_v37 = vpop.permute.xlu0 %4271 }
 0x4c8   : > { %v4286_v5 = vpop.permute.xlu1 %4285  ;;  %4367 = vst.msk [vmem:[%s12064_s30 + $0x8] sm:$0xff] %vm15011_vm3, %v4272_v37  ;;  %vm15015_vm3 = vmmov %vm15005_vm0 }
 0x4c9   : > { %4374 = vst.msk [vmem:[%s12064_s30 + $0x40] sm:$0xff] %vm15010_vm2, %v4286_v5  ;;  %vm15016_vm2 = vcmask 785408  }
 0x4cb   : > { %v4276_v49 = vpop.permute.xlu0 %4275  ;;  %v4509_v18 = vld [vmem:[#allocation2 + $0x78] sm:$0xff] }
 0x4cc   : > { %v4290_v33 = vpop.permute.xlu1 %4289  ;;  %4369 = vst.msk [vmem:[%s12064_s30 + $0x18] sm:$0xff] %vm15013_vm5, %v4276_v49  ;;  %v4533_v48 = vmul.bf16 %v11926_v32, %v4509_v18  ;;  %vm15018_vm5 = vmmov %vm15005_vm0 }
 0x4cd   : > { %4376 = vst.msk [vmem:[%s12064_s30 + $0x50] sm:$0xff] %vm15012_vm4, %v4290_v33  ;;  %vm15017_vm4 = vmmov %vm15005_vm0 }
 0x4ce   : > { %v4557_v53 = vadd.bf16 %v11935_v31, %v4533_v48 }
 0x4cf   : > { %v4280_v39 = vpop.permute.xlu0 %4279 }
 0x4d0   : > { %v4294_v55 = vpop.permute.xlu1 %4293  ;;  %4371 = vst.msk [vmem:[%s12064_s30 + $0x28] sm:$0xff] %vm15015_vm3, %v4280_v39  ;;  %v4573_v20 = vmax.bf16 %v11967_v36, %v4557_v53  ;;  %vm15020_vm3 = vmmov %vm15005_vm0 }
 0x4d1   : > { %4378 = vst.msk [vmem:[%s12064_s30 + $0x60] sm:$0xff] %vm15014_vm6, %v4294_v55  ;;  %vm15019_vm6 = vmmov %vm15005_vm0 }
 0x4d2   : > { %8296 = vmatmul.mubr.msk.bf16.gmra.mrb[92].mxu0 %vm15016_vm2, %v4573_v20  ;;  %vm15021_vm2 = vmmov %vm15005_vm0 }
 0x4d3   : > { %v4284_v32 = vpop.permute.xlu0 %4283 }
 0x4d4   : > { %v4298_v10 = vpop.permute.xlu1 %4297  ;;  %4373 = vst.msk [vmem:[%s12064_s30 + $0x38] sm:$0xff] %vm15017_vm4, %v4284_v32  ;;  %vm15022_vm4 = vmmov %vm15005_vm0 }
 0x4d5   : > { %4380 = vst.msk [vmem:[%s12064_s30 + $0x70] sm:$0xff] %vm15005_vm0, %v4298_v10 }
 0x4d7   : > { %v4288_v31 = vpop.permute.xlu0 %4287 }
 0x4d8   : > { %v4302_v45 = vpop.permute.xlu1 %4301  ;;  %4375 = vst.msk [vmem:[%s12064_s30 + $0x48] sm:$0xff] %vm15019_vm6, %v4288_v31  ;;  %vm15024_vm6 = vmmov %vm15005_vm0 }
 0x4d9   : > { %4382 = vst.msk [vmem:[%s12064_s30 + $0x80] sm:$0xff] %vm15018_vm5, %v4302_v45  ;;  %vm15023_vm5 = vmmov %vm15005_vm0 }
 0x4db   : > { %v4292_v57 = vpop.permute.xlu0 %4291 }
 0x4dc   : > { %v4306_v13 = vpop.permute.xlu1 %4305  ;;  %4377 = vst.msk [vmem:[%s12064_s30 + $0x58] sm:$0xff] %vm15005_vm0, %v4292_v57 }
 0x4dd   : > { %4384 = vst.msk [vmem:[%s12064_s30 + $0x90] sm:$0xff] %vm15020_vm3, %v4306_v13  ;;  %vm15025_vm3 = vmmov %vm15005_vm0 }
 0x4df   : > { %v4296_v25 = vpop.permute.xlu0 %4295 }
 0x4e0   : > { %v4310_v27 = vpop.permute.xlu1 %4309  ;;  %4379 = vst.msk [vmem:[%s12064_s30 + $0x68] sm:$0xff] %vm15022_vm4, %v4296_v25  ;;  %vm15027_vm4 = vmmov %vm15005_vm0 }
 0x4e1   : > { %4386 = vst.msk [vmem:[%s12064_s30 + $0xa0] sm:$0xff] %vm15021_vm2, %v4310_v27  ;;  %vm15026_vm2 = vmmov %vm15005_vm0  ;;  %v8269_v17 = vpop.f32.mrb[64].mxu0 }
 0x4e2   : > { %v4721_v12 = vadd.f32 %v8269_v17, %v12446_v47  ;;  %v4712_v22 = vpop.f32.mrb[65].mxu0 }
 0x4e3   : > { %v4300_v52 = vpop.permute.xlu0 %4299  ;;  %v4713_v54 = vadd.f32 %v12446_v47, %v4712_v22  ;;  %v8270_v21 = vpop.f32.mrb[66].mxu0 }
 0x4e4   : > { %v4314_v19 = vpop.permute.xlu1 %4313  ;;  %4381 = vst.msk [vmem:[%s12064_s30 + $0x78] sm:$0xff] %vm15024_vm6, %v4300_v52  ;;  %vm15030_vm6 = vmmov %vm15005_vm0  ;;  %v4724_v16 = vadd.f32 %v8270_v21, %v12446_v47  ;;  %v4715_v46 = vpop.f32.mrb[67].mxu0  ;;  %v4841_v38 = vmax.f32 %v4721_v12, 0.0 }
 0x4e5   : > { %4388 = vst.msk [vmem:[%s12064_s30 + $0xb0] sm:$0xff] %vm15023_vm5, %v4314_v19  ;;  %vm15029_vm5 = vmmov %vm15005_vm0  ;;  %v4716_v42 = vadd.f32 %v12446_v47, %v4715_v46  ;;  %v4839_v35 = vmax.f32 %v4713_v54, 0.0 }
 0x4e6   : > { %v4842_v29 = vmax.f32 %v4724_v16, 0.0 }
 0x4e7   : > { %v4304_v0 = vpop.permute.xlu0 %4303  ;;  %v4840_v61 = vmax.f32 %v4716_v42, 0.0 }
 0x4e8   : > { %v4318_v56 = vpop.permute.xlu1 %4317  ;;  %4383 = vst.msk [vmem:[%s12064_s30 + $0x88] sm:$0xff] %vm15005_vm0, %v4304_v0  ;;  %v4872_v40 = vpack.c.bf16 %v4842_v29, %v4841_v38 }
 0x4e9   : > { %4390 = vst.msk [vmem:[%s12064_s30 + $0xc0] sm:$0xff] %vm15025_vm3, %v4318_v56  ;;  %vm15031_vm3 = vmmov %vm15005_vm0  ;;  %v4871_v14 = vpack.c.bf16 %v4840_v61, %v4839_v35 }
 0x4eb   : > { %v4308_v60 = vpop.permute.xlu0 %4307  ;;  %5080 = vmatmul.mubr.bf16.vlgmr.msra.gmra.mrb[64].mxu1 %v4871_v14  ;;  %8315 = vmatprep.mubr.bf16.mxu0 %v4871_v14 }
 0x4ec   : > { %v4322_v1 = vpop.permute.xlu1 %4321  ;;  %4385 = vst.msk [vmem:[%s12064_s30 + $0x98] sm:$0xff] %vm15027_vm4, %v4308_v60  ;;  %8316 = vmatmul.mubr.bf16.vlgmr.msra.gmra.mrb[96].mxu0 %v4872_v40  ;;  %5089 = vmatprep.mubr.bf16.mxu1 %v11967_v36  ;;  %vm15034_vm4 = vmmov %vm15005_vm0 }
 0x4ed   : > { %4392 = vst.msk [vmem:[%s12064_s30 + $0xd0] sm:$0xff] %vm15026_vm2, %v4322_v1  ;;  %vm15033_vm2 = vmmov %vm15005_vm0 }
 0x4ef   : > { %v4312_v34 = vpop.permute.xlu0 %4311 }
 0x4f0   : > { %v4326_v63 = vpop.permute.xlu1 %4325  ;;  %4387 = vst.msk [vmem:[%s12064_s30 + $0xa8] sm:$0xff] %vm15029_vm5, %v4312_v34  ;;  %vm15035_vm5 = vcmask 1043456  }
 0x4f1   : > { %4394 = vst.msk [vmem:[%s12064_s30 + $0xe0] sm:$0xff] %vm15028_vm1, %v4326_v63  ;;  %vm15032_vm1 = vmmov %vm15005_vm0  ;;  %v8273_v59 = vpop.f32.mrb[68].mxu0 }
 0x4f2   : > { %v4737_v4 = vadd.f32 %v8273_v59, %v12446_v47  ;;  %v4728_v9 = vpop.f32.mrb[69].mxu0 }
 0x4f3   : > { %v4316_v50 = vpop.permute.xlu0 %4315  ;;  %v4729_v6 = vadd.f32 %v12446_v47, %v4728_v9  ;;  %v8274_v44 = vpop.f32.mrb[70].mxu0  ;;  %5090 = vmatmul.mubr.bf16.gmra.mrb[68].mxu1 %v4872_v40 }
 0x4f4   : > { %v4330_v24 = vpop.permute.xlu1 %4329  ;;  %4389 = vst.msk [vmem:[%s12064_s30 + $0xb8] sm:$0xff] %vm15031_vm3, %v4316_v50  ;;  %v4740_v5 = vadd.f32 %v8274_v44, %v12446_v47  ;;  %v4731_v37 = vpop.f32.mrb[71].mxu0  ;;  %5099 = vmatprep.mubr.bf16.mxu1 %v11967_v36  ;;  %v4845_v49 = vmax.f32 %v4737_v4, 0.0  ;;  %vm15037_vm3 = vmmov %vm15035_vm5 }
 0x4f5   : > { %4396 = vst.msk [vmem:[%s12064_s30 + $0xf0] sm:$0xff] %vm15030_vm6, %v4330_v24  ;;  %v4732_v33 = vadd.f32 %v12446_v47, %v4731_v37  ;;  %v4843_v55 = vmax.f32 %v4729_v6, 0.0  ;;  %vm15036_vm6 = vcmask 261120  }
 0x4f6   : > { %v4846_v18 = vmax.f32 %v4740_v5, 0.0 }
 0x4f7   : > { %v4320_v41 = vpop.permute.xlu0 %4319  ;;  %v4844_v48 = vmax.f32 %v4732_v33, 0.0 }
 0x4f8   : > { %4391 = vst.msk [vmem:[%s12064_s30 + $0xc8] sm:$0xff] %vm15032_vm1, %v4320_v41  ;;  %v4874_v53 = vpack.c.bf16 %v4846_v18, %v4845_v49  ;;  %vm15039_vm1 = vmmov %vm15037_vm3 }
 0x4f9   : > { %v4873_v39 = vpack.c.bf16 %v4844_v48, %v4843_v55 }
 0x4fb   : > { %v4324_v62 = vpop.permute.xlu0 %4323  ;;  %5100 = vmatmul.mubr.bf16.gmra.mrb[72].mxu1 %v4873_v39  ;;  %8319 = vmatprep.mubr.bf16.mxu0 %v4873_v39 }
 0x4fc   : > { %4393 = vst.msk [vmem:[%s12064_s30 + $0xd8] sm:$0xff] %vm15005_vm0, %v4324_v62  ;;  %8320 = vmatmul.mubr.bf16.gmra.mrb[100].mxu0 %v4874_v53  ;;  %5109 = vmatprep.mubr.bf16.mxu1 %v11967_v36  ;;  %vm15041_vm0 = vmmov %vm15039_vm1 }
 0x4ff   : > { %v4328_v51 = vpop.permute.xlu0 %4327 }
 0x500   : > { %4395 = vst.msk [vmem:[%s12064_s30 + $0xe8] sm:$0xff] %vm15033_vm2, %v4328_v51  ;;  %vm15042_vm2 = vmmov %vm15041_vm0 }
 0x503   : > { %v4332_v23 = vpop.permute.xlu0 %4331  ;;  %5110 = vmatmul.mubr.bf16.gmra.mrb[76].mxu1 %v4874_v53 }
 0x504   : > { %4397 = vst.msk [vmem:[%s12064_s30 + $0xf8] sm:$0xff] %vm15034_vm4, %v4332_v23  ;;  %5119 = vmatprep.mubr.bf16.mxu1 %v11967_v36  ;;  %vm15044_vm4 = vmmov %vm15041_vm0 }
 0x515   : > { %v8277_v10 = vpop.f32.mrb[72].mxu0 }
 0x516   : > { %v4753_v20 = vadd.f32 %v8277_v10, %v12446_v47  ;;  %v4744_v32 = vpop.f32.mrb[73].mxu0 }
 0x517   : > { %v4745_v45 = vadd.f32 %v12446_v47, %v4744_v32  ;;  %v8278_v31 = vpop.f32.mrb[74].mxu0 }
 0x518   : > { %v4756_v13 = vadd.f32 %v8278_v31, %v12446_v47  ;;  %v4747_v57 = vpop.f32.mrb[75].mxu0  ;;  %v4849_v25 = vmax.f32 %v4753_v20, 0.0 }
 0x519   : > { %v4748_v27 = vadd.f32 %v12446_v47, %v4747_v57  ;;  %v4847_v52 = vmax.f32 %v4745_v45, 0.0 }
 0x51a   : > { %v4850_v19 = vmax.f32 %v4756_v13, 0.0 }
 0x51b   : > { %v4848_v56 = vmax.f32 %v4748_v27, 0.0 }
 0x51c   : > { %v4876_v0 = vpack.c.bf16 %v4850_v19, %v4849_v25 }
 0x51d   : > { %v4875_v1 = vpack.c.bf16 %v4848_v56, %v4847_v52 }
 0x51f   : > { %5120 = vmatmul.mubr.bf16.gmra.mrb[80].mxu1 %v4875_v1  ;;  %8323 = vmatprep.mubr.bf16.mxu0 %v4875_v1 }
 0x520   : > { %8324 = vmatmul.mubr.bf16.gmra.mrb[104].mxu0 %v4876_v0  ;;  %5129 = vmatprep.mubr.bf16.mxu1 %v11967_v36 }
 0x527   : > { %5130 = vmatmul.mubr.bf16.gmra.mrb[84].mxu1 %v4876_v0 }
 0x528   : > { %5139 = vmatprep.mubr.bf16.mxu1 %v11967_v36 }
 0x529   : > { %v8281_v60 = vpop.f32.mrb[76].mxu0 }
 0x52a   : > { %v4769_v63 = vadd.f32 %v8281_v60, %v12446_v47  ;;  %v4760_v34 = vpop.f32.mrb[77].mxu0 }
 0x52b   : > { %v4761_v24 = vadd.f32 %v12446_v47, %v4760_v34  ;;  %v8282_v50 = vpop.f32.mrb[78].mxu0 }
 0x52c   : > { %v4772_v17 = vadd.f32 %v8282_v50, %v12446_v47  ;;  %v4763_v12 = vpop.f32.mrb[79].mxu0  ;;  %v4853_v54 = vmax.f32 %v4769_v63, 0.0 }
 0x52d   : > { %v4764_v22 = vadd.f32 %v12446_v47, %v4763_v12  ;;  %v4851_v41 = vmax.f32 %v4761_v24, 0.0 }
 0x52e   : > { %v4854_v21 = vmax.f32 %v4772_v17, 0.0 }
 0x52f   : > { %v4852_v16 = vmax.f32 %v4764_v22, 0.0 }
 0x530   : > { %v4878_v46 = vpack.c.bf16 %v4854_v21, %v4853_v54 }
 0x531   : > { %v4877_v42 = vpack.c.bf16 %v4852_v16, %v4851_v41 }
 0x533   : > { %5140 = vmatmul.mubr.bf16.gmra.mrb[88].mxu1 %v4877_v42  ;;  %8327 = vmatprep.mubr.bf16.mxu0 %v4877_v42 }
 0x534   : > { %8328 = vmatmul.mubr.bf16.gmra.mrb[108].mxu0 %v4878_v46  ;;  %5149 = vmatprep.mubr.bf16.mxu1 %v11967_v36 }
 0x53b   : > { %5150 = vmatmul.mubr.bf16.gmra.mrb[92].mxu1 %v4878_v46  ;;  %v8285_v38 = vpop.f32.mrb[80].mxu0 }
 0x53c   : > { %5159 = vmatprep.mubr.bf16.mxu1 %v11967_v36  ;;  %v4785_v29 = vadd.f32 %v8285_v38, %v12446_v47  ;;  %v4776_v35 = vpop.f32.mrb[81].mxu0 }
 0x53d   : > { %v4777_v61 = vadd.f32 %v12446_v47, %v4776_v35  ;;  %v8286_v62 = vpop.f32.mrb[82].mxu0 }
 0x53e   : > { %v4788_v40 = vadd.f32 %v8286_v62, %v12446_v47  ;;  %v4779_v14 = vpop.f32.mrb[83].mxu0  ;;  %v4857_v23 = vmax.f32 %v4785_v29, 0.0 }
 0x53f   : > { %v4780_v51 = vadd.f32 %v12446_v47, %v4779_v14  ;;  %v4855_v4 = vmax.f32 %v4777_v61, 0.0 }
 0x540   : > { %v4858_v59 = vmax.f32 %v4788_v40, 0.0 }
 0x541   : > { %v4856_v9 = vmax.f32 %v4780_v51, 0.0 }
 0x542   : > { %v4880_v6 = vpack.c.bf16 %v4858_v59, %v4857_v23 }
 0x543   : > { %v4879_v44 = vpack.c.bf16 %v4856_v9, %v4855_v4 }
 0x545   : > { %5160 = vmatmul.mubr.bf16.gmra.mrb[96].mxu1 %v4879_v44  ;;  %8331 = vmatprep.mubr.bf16.mxu0 %v4879_v44 }
 0x546   : > { %8332 = vmatmul.mubr.bf16.gmra.mrb[112].mxu0 %v4880_v6  ;;  %5169 = vmatprep.mubr.bf16.mxu1 %v11967_v36 }
 0x54d   : > { %5170 = vmatmul.mubr.bf16.gmra.mrb[100].mxu1 %v4880_v6 }
 0x54e   : > { %5179 = vmatprep.mubr.bf16.mxu1 %v11967_v36 }
 0x560   : > { %v8289_v5 = vpop.f32.mrb[84].mxu0 }
 0x561   : > { %v4801_v37 = vadd.f32 %v8289_v5, %v12446_v47  ;;  %v4792_v33 = vpop.f32.mrb[85].mxu0 }
 0x562   : > { %v4793_v49 = vadd.f32 %v12446_v47, %v4792_v33  ;;  %v8290_v18 = vpop.f32.mrb[86].mxu0 }
 0x563   : > { %v4804_v55 = vadd.f32 %v8290_v18, %v12446_v47  ;;  %v4795_v48 = vpop.f32.mrb[87].mxu0  ;;  %v4861_v39 = vmax.f32 %v4801_v37, 0.0 }
 0x564   : > { %v4796_v53 = vadd.f32 %v12446_v47, %v4795_v48  ;;  %v4859_v20 = vmax.f32 %v4793_v49, 0.0 }
 0x565   : > { %v4862_v10 = vmax.f32 %v4804_v55, 0.0 }
 0x566   : > { %v4860_v32 = vmax.f32 %v4796_v53, 0.0 }
 0x567   : > { %v4882_v45 = vpack.c.bf16 %v4862_v10, %v4861_v39 }
 0x568   : > { %v4881_v31 = vpack.c.bf16 %v4860_v32, %v4859_v20 }
 0x56a   : > { %5180 = vmatmul.mubr.bf16.gmra.mrb[104].mxu1 %v4881_v31  ;;  %8335 = vmatprep.mubr.bf16.mxu0 %v4881_v31 }
 0x56b   : > { %8336 = vmatmul.mubr.bf16.gmra.mrb[116].mxu0 %v4882_v45  ;;  %5189 = vmatprep.mubr.bf16.mxu1 %v11967_v36 }
 0x571   : > { %v8293_v13 = vpop.f32.mrb[88].mxu0 }
 0x572   : > { %5190 = vmatmul.mubr.bf16.gmra.mrb[108].mxu1 %v4882_v45  ;;  %v4817_v57 = vadd.f32 %v8293_v13, %v12446_v47  ;;  %v4808_v27 = vpop.f32.mrb[89].mxu0 }
 0x573   : > { %5199 = vmatprep.mubr.bf16.mxu1 %v11967_v36  ;;  %v4809_v25 = vadd.f32 %v12446_v47, %v4808_v27  ;;  %v8294_v19 = vpop.f32.mrb[90].mxu0  ;;  %v9299_v36 = vld [vmem:[#allocation3 + $0x8] sm:$0xff] }
 0x574   : > { %v4820_v52 = vadd.f32 %v8294_v19, %v12446_v47  ;;  %v4811_v56 = vpop.f32.mrb[91].mxu0  ;;  %v4865_v1 = vmax.f32 %v4817_v57, 0.0 }
 0x575   : > { %v4812_v0 = vadd.f32 %v12446_v47, %v4811_v56  ;;  %v4863_v63 = vmax.f32 %v4809_v25, 0.0 }
 0x576   : > { %v4866_v60 = vmax.f32 %v4820_v52, 0.0 }
 0x577   : > { %v4864_v34 = vmax.f32 %v4812_v0, 0.0 }
 0x578   : > { %v4884_v24 = vpack.c.bf16 %v4866_v60, %v4865_v1 }
 0x579   : > { %v4883_v50 = vpack.c.bf16 %v4864_v34, %v4863_v63 }
 0x57b   : > { %5200 = vmatmul.mubr.bf16.gmra.mrb[112].mxu1 %v4883_v50  ;;  %8339 = vmatprep.mubr.bf16.mxu0 %v4883_v50 }
 0x57c   : > { %8340 = vmatmul.mubr.bf16.gmra.mrb[120].mxu0 %v4884_v24  ;;  %5209 = vmatprep.mubr.bf16.mxu1 %v9299_v36 }
 0x583   : > { %5210 = vmatmul.mubr.bf16.gmra.mrb[116].mxu1 %v4884_v24 }
 0x584   : > { %5219 = vmatprep.mubr.bf16.mxu1 %v9299_v36 }
 0x5a5   : > { %v8297_v17 = vpop.f32.mrb[92].mxu0 }
 0x5a6   : > { %v4833_v12 = vadd.f32 %v8297_v17, %v12446_v47  ;;  %v4824_v22 = vpop.f32.mrb[93].mxu0 }
 0x5a7   : > { %v4825_v54 = vadd.f32 %v12446_v47, %v4824_v22  ;;  %v8298_v21 = vpop.f32.mrb[94].mxu0 }
 0x5a8   : > { %v4836_v41 = vadd.f32 %v8298_v21, %v12446_v47  ;;  %v4827_v16 = vpop.f32.mrb[95].mxu0  ;;  %v4869_v42 = vmax.f32 %v4833_v12, 0.0 }
 0x5a9   : > { %v4828_v46 = vadd.f32 %v12446_v47, %v4827_v16  ;;  %v4867_v29 = vmax.f32 %v4825_v54, 0.0 }
 0x5aa   : > { %v4870_v38 = vmax.f32 %v4836_v41, 0.0 }
 0x5ab   : > { %v4868_v35 = vmax.f32 %v4828_v46, 0.0 }
 0x5ac   : > { %v4886_v61 = vpack.c.bf16 %v4870_v38, %v4869_v42 }
 0x5ad   : > { %v4885_v62 = vpack.c.bf16 %v4868_v35, %v4867_v29 }
 0x5af   : > { %5220 = vmatmul.mubr.bf16.gmra.mrb[120].mxu1 %v4885_v62  ;;  %8343 = vmatprep.mubr.bf16.mxu0 %v4885_v62 }
 0x5b0   : > { %8344 = vmatmul.mubr.bf16.gmra.mrb[124].mxu0 %v4886_v61  ;;  %5229 = vmatprep.mubr.bf16.mxu1 %v9299_v36 }
 0x5b7   : > { %5230 = vmatmul.mubr.bf16.gmra.mrb[124].mxu1 %v4886_v61 }
 0x5be   : > { %v5081_v40 = vpop.f32.mrb[64].mxu1 }
 0x5bf   : > { %v5083_v14 = vpop.f32.mrb[65].mxu1  ;;  %v8317_v51 = vpop.f32.mrb[96].mxu0 }
 0x5c0   : > { %v5085_v23 = vpop.f32.mrb[66].mxu1  ;;  %v5274_v59 = vpop.f32.mrb[97].mxu0 }
 0x5c1   : > { %v5401_v4 = vpack.c.bf16 %v5085_v23, %v5081_v40  ;;  %v5087_v9 = vpop.f32.mrb[67].mxu1  ;;  %v8318_v6 = vpop.f32.mrb[98].mxu0 }
 0x5c2   : > { %v5402_v47 = vpack.c.bf16 %v5087_v9, %v5083_v14  ;;  %v5406_v44 = vpack.c.bf16 %v8318_v6, %v8317_v51  ;;  %v5277_v5 = vpop.f32.mrb[99].mxu0 }
 0x5c3   : > { %v5497_v37 = vrot.slane %v5401_v4, 4  ;;  %v5403_v33 = vpack.c.bf16 %v5277_v5, %v5274_v59 }
 0x5c4   : > { %v5498_v49 = vrot.slane %v5402_v47, 4  ;;  %v5504_v18 = vrot.slane %v5406_v44, 4 }
 0x5c5   : > { %5641 = vst [vmem:[#allocation3 + $0x18] sm:$0xf0] %v5497_v37  ;;  %v5499_v55 = vrot.slane %v5403_v33, 4 }
 0x5c6   : > { %5642 = vst [vmem:[#allocation3 + $0x20] sm:$0xf0] %v5498_v49  ;;  %v5091_v48 = vpop.f32.mrb[68].mxu1 }
 0x5c7   : > { %v5505_v53 = vsel %vm15035_vm5, %v5499_v55, %v5504_v18  ;;  %v5093_v39 = vpop.f32.mrb[69].mxu1  ;;  %vm15045_vm5 = vmmov %vm15041_vm0 }
 0x5c8   : > { %5646 = vst.msk [vmem:[#allocation3 + $0x40] sm:$0xff] %vm15036_vm6, %v5505_v53  ;;  %v5095_v10 = vpop.f32.mrb[70].mxu1  ;;  %vm15046_vm6 = vmmov %vm15041_vm0 }
 0x5c9   : > { %v5404_v20 = vpack.c.bf16 %v5095_v10, %v5091_v48  ;;  %v5097_v32 = vpop.f32.mrb[71].mxu1  ;;  %v5964_v10 = vld [vmem:[#allocation3 + $0x1b8] sm:$0xf] }
 0x5ca   : > { %v5405_v45 = vpack.c.bf16 %v5097_v32, %v5093_v39 }
 0x5cb   : > { %v5500_v31 = vrot.slane %v5404_v20, 4 }
 0x5cc   : > { %v5502_v13 = vrot.slane %v5405_v45, 4  ;;  %v5775_v57 = vld [vmem:[#allocation3 + $0x18] sm:$0xf8] }
 0x5cd   : > { %v12504_v27 = vld [vmem:[#allocation3 + $0x18] sm:$0xff]  ;;  %v12507_v25 = vsel %vm15037_vm3, %v5497_v37, %v5500_v31  ;;  %v5778_v19 = vunpack.c.l.bf16 %v5775_v57  ;;  %v5779_v52 = vunpack.c.h.bf16 %v5775_v57  ;;  %v6488_v63 = vld [vmem:[#allocation3 + $0x20] sm:$0xf0]  ;;  %vm15047_vm3 = vmmov %vm15041_vm0 }
 0x5ce   : > { %15038 = vst [vmem:[#allocation56_spill] sm:$0xff] %v12507_v25  ;;  %v5503_v56 = vsel %vm15039_vm1, %v5498_v49, %v5502_v13  ;;  %v5101_v0 = vpop.f32.mrb[72].mxu1  ;;  %v14422_v1 = vunpack.c.l.bf16 %v12507_v25  ;;  %v14420_v60 = vunpack.c.h.bf16 %v12507_v25  ;;  %v14431_v36 = vrot.slane %v12504_v27, 4 }
 0x5cf   : > { %5645 = vst [vmem:[#allocation3 + $0x38] sm:$0xff] %v5503_v56  ;;  %v5103_v34 = vpop.f32.mrb[73].mxu1  ;;  %v8321_v24 = vpop.f32.mrb[100].mxu0  ;;  %v8807_v50 = vpack.i.bf16 %v5779_v52, %v5778_v19  ;;  %v6378_v54 = vrot.slane %v12507_v25, 4  ;;  %v6508_v46 = vrot.slane %v6488_v63, 4  ;;  %v6509_v42 = vrot.slane %v5503_v56, 4 }
 0x5d0   : > { %v5105_v17 = vpop.f32.mrb[74].mxu1  ;;  %v5290_v12 = vpop.f32.mrb[101].mxu0  ;;  %v8812_v22 = vpack.i.bf16 %v14420_v60, %v14422_v1  ;;  %vm15048_vm1 = vcmask 261120   ;;  %v5997_v63 = vunpack.c.l.bf16 %v5964_v10 }
 0x5d1   : > { %v5407_v21 = vpack.c.bf16 %v5105_v17, %v5101_v0  ;;  %v5107_v41 = vpop.f32.mrb[75].mxu1  ;;  %8808 = vrot.lane.b32.xlu1 %v8807_v50, %s15040_s13  ;;  %v8322_v16 = vpop.f32.mrb[102].mxu0  ;;  %v12523_v61 = vsel %vm15041_vm0, %v14431_v36, %v6378_v54  ;;  %v12531_v4 = vsel %vm15044_vm4, %v6508_v46, %v6509_v42  ;;  %vm15049_vm0 = vmmov %vm15048_vm1  ;;  %v7098_v46 = vld [vmem:[#allocation3 + $0x40] sm:$0xf0] }
 0x5d2   : > { %v5408_v38 = vpack.c.bf16 %v5107_v41, %v5103_v34  ;;  %v5412_v29 = vpack.c.bf16 %v8322_v16, %v8321_v24  ;;  %v5293_v35 = vpop.f32.mrb[103].mxu0  ;;  %8813 = vrot.lane.b32.xlu0 %v8812_v22, %s15040_s13  ;;  %vm15050_vm4 = vmmov %vm15042_vm2  ;;  %v6558_v17 = vunpack.c.h.bf16 %v12531_v4 }
 0x5d3   : > { %v5506_v62 = vrot.slane %v5407_v21, 4  ;;  %v5409_v40 = vpack.c.bf16 %v5293_v35, %v5290_v12 }
 0x5d4   : > { %v5508_v14 = vrot.slane %v5408_v38, 4  ;;  %v12525_v51 = vrot.slane %v5412_v29, 4 }
 0x5d5   : > { %v12528_v23 = vsel %vm15042_vm2, %v5500_v31, %v5506_v62  ;;  %v5510_v59 = vrot.slane %v5409_v40, 4 }
 0x5d6   : > { %15043 = vst [vmem:[#allocation58_spill] sm:$0xff] %v12528_v23  ;;  %v5509_v9 = vsel %vm15045_vm5, %v5502_v13, %v5508_v14  ;;  %v5111_v6 = vpop.f32.mrb[76].mxu1  ;;  %v5948_v47 = vld [vmem:[#allocation3 + $0x38] sm:$0xf8]  ;;  %v14421_v44 = vunpack.c.l.bf16 %v12528_v23  ;;  %v14419_v5 = vunpack.c.h.bf16 %v12528_v23  ;;  %v6380_v33 = vrot.slane %v12528_v23, 4  ;;  %vm15051_vm5 = vmmov %vm15042_vm2 }
 0x5d7   : > { %v6749_v37 = vld [vmem:[#allocation3 + $0x38] sm:$0xf0]  ;;  %v5511_v49 = vsel %vm15046_vm6, %v5504_v18, %v5510_v59  ;;  %v5517_v55 = vsel %vm15047_vm3, %v5510_v59, %v12525_v51  ;;  %v5113_v48 = vpop.f32.mrb[77].mxu1  ;;  %v5965_v53 = vunpack.c.l.bf16 %v5948_v47  ;;  %v5966_v39 = vunpack.c.h.bf16 %v5948_v47  ;;  %vm15052_vm6 = vmmov %vm15042_vm2 }
 0x5d8   : > { %5649 = vst.msk [vmem:[#allocation3 + $0x58] sm:$0xff] %vm15048_vm1, %v5511_v49  ;;  %v5115_v20 = vpop.f32.mrb[78].mxu1  ;;  %v8822_v32 = vpack.i.bf16 %v14419_v5, %v14421_v44  ;;  %v5967_v45 = vunpack.c.l.bf16 %v5509_v9  ;;  %v5968_v31 = vunpack.c.h.bf16 %v5509_v9  ;;  %v6511_v18 = vrot.slane %v5509_v9, 4  ;;  %vm15054_vm3 = vmmov %vm15042_vm2 }
 0x5d9   : > { %5652 = vst.msk [vmem:[#allocation3 + $0x70] sm:$0xff] %vm15049_vm0, %v5517_v55  ;;  %v5410_v13 = vpack.c.bf16 %v5115_v20, %v5111_v6  ;;  %v5117_v57 = vpop.f32.mrb[79].mxu1  ;;  %v8817_v19 = vpack.i.bf16 %v5966_v39, %v5965_v53  ;;  %v6753_v52 = vrot.slane %v6749_v37, 4  ;;  %v12547_v56 = vsel %vm15042_vm2, %v6378_v54, %v6380_v33  ;;  %vm15055_vm1 = vmmov %vm15042_vm2 }
 0x5da   : > { %v5411_v0 = vpack.c.bf16 %v5117_v57, %v5113_v48  ;;  %8823 = vrot.lane.b32.xlu1 %v8822_v32, %s15040_s13  ;;  %v12551_v34 = vsel %vm15050_vm4, %v6509_v42, %v6511_v18  ;;  %v8827_v21 = vpack.i.bf16 %v5968_v31, %v5967_v45  ;;  %v7132_v49 = vrot.slane %v7098_v46, 4  ;;  %vm15056_vm0 = vmmov %vm15055_vm1 }
 0x5db   : > { %v5512_v24 = vrot.slane %v5410_v13, 4  ;;  %8818 = vrot.lane.b32.xlu0 %v8817_v19, %s9700_s24  ;;  %v6754_v50 = vsel %vm15051_vm5, %v6753_v52, %v6511_v18  ;;  %v6559_v12 = vunpack.c.l.bf16 %v12551_v34  ;;  %v6560_v48 = vunpack.c.h.bf16 %v12551_v34  ;;  %vm15057_vm2 = vmmov %vm15056_vm0 }
 0x5dc   : > { %v5514_v22 = vrot.slane %v5411_v0, 4  ;;  %v6762_v54 = vunpack.c.l.bf16 %v6754_v50  ;;  %v6763_v32 = vunpack.c.h.bf16 %v6754_v50  ;;  %vm15058_vm4 = vmmov %vm15056_vm0  ;;  %v6428_v23 = vunpack.c.l.bf16 %v12547_v56 }
 0x5dd   : > { %v12558_v41 = vsel %vm15052_vm6, %v5506_v62, %v5512_v24  ;;  %v8837_v16 = vpack.i.bf16 %v6559_v12, %v6558_v17  ;;  %vm15059_vm5 = vmmov %vm15056_vm0 }
 0x5de   : > { %15053 = vst [vmem:[#allocation60_spill] sm:$0xff] %v12558_v41  ;;  %v12561_v42 = vsel %vm15054_vm3, %v5508_v14, %v5514_v22  ;;  %8828 = vrot.lane.b32.xlu1 %v8827_v21, %s9700_s24  ;;  %v8832_v29 = vpack.i.bf16 %v6762_v54, %v5997_v63  ;;  %v6382_v47 = vrot.slane %v12558_v41, 4  ;;  %v14413_v12 = vunpack.c.l.bf16 %v12558_v41  ;;  %vm15061_vm6 = vmmov %vm15056_vm0 }
 0x5df   : > { %v7099_v59 = vld [vmem:[#allocation3 + $0x58] sm:$0xff]  ;;  %v6513_v6 = vrot.slane %v12561_v42, 4  ;;  %v14414_v46 = vunpack.c.h.bf16 %v12558_v41  ;;  %vm15062_vm3 = vmmov %vm15056_vm0 }
 0x5e0   : > { %v12564_v9 = vld [vmem:[#allocation3 + $0x70] sm:$0xff]  ;;  %8833 = vrot.lane.b32.xlu0 %v8832_v29, %s9700_s24  ;;  %v7133_v14 = vrot.slane %v7099_v59, 4  ;;  %v12575_v45 = vsel %vm15056_vm0, %v6380_v33, %v6382_v47 }
 0x5e1   : > { %v7135_v55 = vrot.slane %v12564_v9, 4  ;;  %v6514_v20 = vsel %vm15055_vm1, %v6511_v18, %v6513_v6  ;;  %vm15063_vm1 = vmmov %vm15056_vm0  ;;  %vm15064_vm0 = vcmask 261120  }
 0x5e2   : > { %8838 = vrot.lane.b32.xlu1 %v8837_v16, %s15040_s13  ;;  %v12579_v19 = vsel %vm15057_vm2, %v7132_v49, %v7133_v14  ;;  %v6561_v17 = vunpack.c.l.bf16 %v6514_v20  ;;  %vm15065_vm2 = vmmov %vm15064_vm0 }
 0x5e3   : > { %v12584_v52 = vsel %vm15058_vm4, %v7133_v14, %v7135_v55  ;;  %v7183_v63 = vunpack.c.h.bf16 %v12579_v19  ;;  %vm15066_vm4 = vmmov %vm15063_vm1 }
 0x5e4   : > { %v7184_v33 = vunpack.c.l.bf16 %v12584_v52 }
 0x5e6   : > { %v8842_v16 = vpack.i.bf16 %v7184_v33, %v7183_v63 }
 0x5e8   : > { %8843 = vrot.lane.b32.xlu0 %v8842_v16, %s9700_s24 }
 0x5f2   : > { %v5121_v38 = vpop.f32.mrb[80].mxu1 }
 0x5f3   : > { %v5123_v35 = vpop.f32.mrb[81].mxu1  ;;  %v8325_v40 = vpop.f32.mrb[104].mxu0 }
 0x5f4   : > { %v5125_v62 = vpop.f32.mrb[82].mxu1  ;;  %v5306_v37 = vpop.f32.mrb[105].mxu0 }
 0x5f5   : > { %v5413_v53 = vpack.c.bf16 %v5125_v62, %v5121_v38  ;;  %v5127_v39 = vpop.f32.mrb[83].mxu1  ;;  %v8326_v10 = vpop.f32.mrb[106].mxu0 }
 0x5f6   : > { %v5414_v31 = vpack.c.bf16 %v5127_v39, %v5123_v35  ;;  %v5418_v13 = vpack.c.bf16 %v8326_v10, %v8325_v40  ;;  %v5309_v57 = vpop.f32.mrb[107].mxu0  ;;  %v8862_v35 = vpack.i.bf16 %v6561_v17, %v6763_v32  ;;  %v8847_v32 = vpack.i.bf16 %v14414_v46, %v14413_v12 }
 0x5f7   : > { %v5518_v18 = vrot.slane %v5413_v53, 4  ;;  %v5415_v0 = vpack.c.bf16 %v5309_v57, %v5306_v37  ;;  %v8857_v53 = vpack.i.bf16 %v6561_v17, %v6560_v48  ;;  %v6562_v48 = vunpack.c.h.bf16 %v6514_v20 }
 0x5f8   : > { %v5520_v34 = vrot.slane %v5414_v31, 4  ;;  %v12588_v50 = vrot.slane %v5418_v13, 4  ;;  %8863 = vrot.lane.b32.xlu1 %v8862_v35, %s9700_s24  ;;  %v5970_v31 = vunpack.c.h.bf16 %v12561_v42  ;;  %8848 = vrot.lane.b32.xlu0 %v8847_v32, %s15040_s13 }
 0x5f9   : > { %v12592_v21 = vsel %vm15059_vm5, %v5512_v24, %v5518_v18  ;;  %v5522_v54 = vrot.slane %v5415_v0, 4  ;;  %vm15067_vm5 = vmmov %vm15063_vm1 }
 0x5fa   : > { %15060 = vst [vmem:[#allocation41_spill] sm:$0xff] %v12592_v21  ;;  %v5521_v38 = vsel %vm15061_vm6, %v5514_v22, %v5520_v34  ;;  %v5131_v29 = vpop.f32.mrb[84].mxu1  ;;  %v14412_v40 = vunpack.c.l.bf16 %v12592_v21  ;;  %v14411_v59 = vunpack.c.h.bf16 %v12592_v21  ;;  %v6384_v13 = vrot.slane %v12592_v21, 4  ;;  %vm15068_vm6 = vmmov %vm15063_vm1 }
 0x5fb   : > { %v5523_v62 = vsel %vm15062_vm3, %v12525_v51, %v5522_v54  ;;  %v5529_v37 = vsel %vm15063_vm1, %v5522_v54, %v12588_v50  ;;  %v5133_v24 = vpop.f32.mrb[85].mxu1  ;;  %v5969_v51 = vunpack.c.l.bf16 %v12561_v42  ;;  %v6515_v14 = vrot.slane %v5521_v38, 4  ;;  %vm15070_vm3 = vmmov %vm15063_vm1 }
 0x5fc   : > { %5655 = vst.msk [vmem:[#allocation3 + $0x88] sm:$0xff] %vm15064_vm0, %v5523_v62  ;;  %v5135_v22 = vpop.f32.mrb[86].mxu1  ;;  %v8867_v49 = vpack.i.bf16 %v14411_v59, %v14412_v40  ;;  %v5971_v0 = vunpack.c.l.bf16 %v5521_v38  ;;  %v5972_v63 = vunpack.c.h.bf16 %v5521_v38  ;;  %v12622_v16 = vsel %vm15067_vm5, %v6382_v47, %v6384_v13  ;;  %vm15071_vm0 = vmmov %vm15063_vm1 }
 0x5fd   : > { %5658 = vst.msk [vmem:[#allocation3 + $0xa0] sm:$0xff] %vm15065_vm2, %v5529_v37  ;;  %v5416_v39 = vpack.c.bf16 %v5135_v22, %v5131_v29  ;;  %v5137_v10 = vpop.f32.mrb[87].mxu1  ;;  %v6516_v33 = vsel %vm15066_vm4, %v6513_v6, %v6515_v14  ;;  %v8852_v35 = vpack.i.bf16 %v5970_v31, %v5969_v51  ;;  %vm15072_vm2 = vmmov %vm15071_vm0 }
 0x5fe   : > { %v5417_v57 = vpack.c.bf16 %v5137_v10, %v5133_v24  ;;  %v6563_v17 = vunpack.c.l.bf16 %v6516_v33  ;;  %8868 = vrot.lane.b32.xlu1 %v8867_v49, %s15040_s13  ;;  %v8872_v62 = vpack.i.bf16 %v5972_v63, %v5971_v0  ;;  %vm15073_vm4 = vmmov %vm15071_vm0  ;;  %v6564_v32 = vunpack.c.h.bf16 %v6516_v33 }
 0x5ff   : > { %v5524_v54 = vrot.slane %v5416_v39, 4  ;;  %8853 = vrot.lane.b32.xlu0 %v8852_v35, %s9700_s24  ;;  %vm15074_vm5 = vmmov %vm15071_vm0 }
 0x600   : > { %v5526_v29 = vrot.slane %v5417_v57, 4  ;;  %v8877_v38 = vpack.i.bf16 %v6563_v17, %v6562_v48 }
 0x601   : > { %v12626_v42 = vsel %vm15068_vm6, %v5518_v18, %v5524_v54  ;;  %vm15076_vm6 = vmmov %vm15071_vm0 }
 0x602   : > { %15069 = vst [vmem:[#allocation63_spill] sm:$0xff] %v12626_v42  ;;  %v12629_v6 = vsel %vm15070_vm3, %v5520_v34, %v5526_v29  ;;  %v6386_v20 = vrot.slane %v12626_v42, 4  ;;  %8873 = vrot.lane.b32.xlu1 %v8872_v62, %s9700_s24  ;;  %vm15077_vm3 = vmmov %vm15071_vm0 }
 0x603   : > { %v7101_v37 = vld [vmem:[#allocation3 + $0x88] sm:$0xff]  ;;  %v6517_v47 = vrot.slane %v12629_v6, 4  ;;  %8858 = vrot.lane.b32.xlu0 %v8857_v53, %s15040_s13 }
 0x604   : > { %v12633_v24 = vld [vmem:[#allocation3 + $0xa0] sm:$0xff]  ;;  %v7137_v22 = vrot.slane %v7101_v37, 4  ;;  %v12639_v49 = vsel %vm15063_vm1, %v6384_v13, %v6386_v20  ;;  %vm15078_vm1 = vmmov %vm15071_vm0 }
 0x605   : > { %v7139_v18 = vrot.slane %v12633_v24, 4  ;;  %v12644_v34 = vsel %vm15071_vm0, %v6515_v14, %v6517_v47  ;;  %v7185_v14 = vunpack.c.h.bf16 %v12584_v52  ;;  %vm15079_vm0 = vcmask 261120  }
 0x606   : > { %v5141_v51 = vpop.f32.mrb[88].mxu1  ;;  %v7138_v39 = vsel %vm15072_vm2, %v7135_v55, %v7137_v22  ;;  %v6565_v31 = vunpack.c.l.bf16 %v12644_v34  ;;  %8878 = vrot.lane.b32.xlu1 %v8877_v38, %s15040_s13  ;;  %vm15080_vm2 = vmmov %vm15079_vm0 }
 0x607   : > { %v12652_v10 = vsel %vm15073_vm4, %v7137_v22, %v7139_v18  ;;  %v5143_v13 = vpop.f32.mrb[89].mxu1  ;;  %v8329_v57 = vpop.f32.mrb[108].mxu0  ;;  %v7186_v0 = vunpack.c.l.bf16 %v7138_v39  ;;  %v7187_v62 = vunpack.c.h.bf16 %v7138_v39  ;;  %8883 = vrot.lane.b32.xlu0 %v8877_v38, %s9700_s24  ;;  %vm15081_vm4 = vmmov %vm15078_vm1 }
 0x608   : > { %v5145_v63 = vpop.f32.mrb[90].mxu1  ;;  %v5322_v48 = vpop.f32.mrb[109].mxu0  ;;  %v12658_v9 = vpack.i.bf16 %v6565_v31, %v6564_v32  ;;  %v7188_v33 = vunpack.c.l.bf16 %v12652_v10 }
 0x609   : > { %v5419_v55 = vpack.c.bf16 %v5145_v63, %v5141_v51  ;;  %v5147_v17 = vpop.f32.mrb[91].mxu1  ;;  %v8330_v35 = vpop.f32.mrb[110].mxu0  ;;  %v8887_v37 = vpack.i.bf16 %v7186_v0, %v7185_v14  ;;  %v14417_v51 = vunpack.c.l.bf16 %v12626_v42 }
 0x60a   : > { %v5420_v22 = vpack.c.bf16 %v5147_v17, %v5143_v13  ;;  %v5424_v59 = vpack.c.bf16 %v8330_v35, %v8329_v57  ;;  %v5325_v40 = vpop.f32.mrb[111].mxu0  ;;  %v8892_v31 = vpack.i.bf16 %v7188_v33, %v7187_v62  ;;  %v14418_v13 = vunpack.c.h.bf16 %v12626_v42 }
 0x60b   : > { %v5530_v53 = vrot.slane %v5419_v55, 4  ;;  %v5421_v12 = vpack.c.bf16 %v5325_v40, %v5322_v48  ;;  %8888 = vrot.lane.b32.xlu1 %v8887_v37, %s9700_s24  ;;  %v5973_v62 = vunpack.c.l.bf16 %v12629_v6  ;;  %v5974_v33 = vunpack.c.h.bf16 %v12629_v6 }
 0x60c   : > { %v5532_v52 = vrot.slane %v5420_v22, 4  ;;  %v12662_v46 = vrot.slane %v5424_v59, 4  ;;  %8893 = vrot.lane.b32.xlu0 %v8892_v31, %s9700_s24  ;;  %v8897_v35 = vpack.i.bf16 %v14418_v13, %v14417_v51 }
 0x60d   : > { %v12667_v32 = vsel %vm15074_vm5, %v5524_v54, %v5530_v53  ;;  %v5534_v39 = vrot.slane %v5421_v12, 4  ;;  %vm15082_vm5 = vmmov %vm15078_vm1 }
 0x60e   : > { %15075 = vst [vmem:[#allocation117_spill] sm:$0xff] %v12667_v32  ;;  %v5533_v57 = vsel %vm15076_vm6, %v5526_v29, %v5532_v52  ;;  %v5151_v14 = vpop.f32.mrb[92].mxu1  ;;  %v14416_v40 = vunpack.c.l.bf16 %v12667_v32  ;;  %v14415_v38 = vunpack.c.h.bf16 %v12667_v32  ;;  %v6388_v59 = vrot.slane %v12667_v32, 4  ;;  %vm15083_vm6 = vmmov %vm15078_vm1 }
 0x60f   : > { %v5535_v0 = vsel %vm15077_vm3, %v12588_v50, %v5534_v39  ;;  %v5541_v54 = vsel %vm15078_vm1, %v5534_v39, %v12662_v46  ;;  %v5153_v63 = vpop.f32.mrb[93].mxu1  ;;  %8913 = vrot.lane.b32.xlu1 %v12658_v9, %s9700_s24  ;;  %v6519_v50 = vrot.slane %v5533_v57, 4  ;;  %v5975_v22 = vunpack.c.l.bf16 %v5533_v57  ;;  %vm15085_vm3 = vmmov %vm15078_vm1 }
 0x610   : > { %5661 = vst.msk [vmem:[#allocation3 + $0xb8] sm:$0xff] %vm15079_vm0, %v5535_v0  ;;  %v5155_v12 = vpop.f32.mrb[94].mxu1  ;;  %v8917_v29 = vpack.i.bf16 %v14415_v38, %v14416_v40  ;;  %v12688_v48 = vsel %vm15081_vm4, %v6386_v20, %v6388_v59  ;;  %v5976_v39 = vunpack.c.h.bf16 %v5533_v57  ;;  %8898 = vrot.lane.b32.xlu0 %v8897_v35, %s15040_s13  ;;  %v8902_v38 = vpack.i.bf16 %v5974_v33, %v5973_v62  ;;  %vm15086_vm0 = vmmov %vm15078_vm1 }
 0x611   : > { %5664 = vst.msk [vmem:[#allocation3 + $0xd0] sm:$0xff] %vm15080_vm2, %v5541_v54  ;;  %v5422_v55 = vpack.c.bf16 %v5155_v12, %v5151_v14  ;;  %v5157_v17 = vpop.f32.mrb[95].mxu1  ;;  %v6520_v31 = vsel %vm15082_vm5, %v6517_v47, %v6519_v50  ;;  %v6566_v14 = vunpack.c.h.bf16 %v12644_v34  ;;  %vm15087_vm2 = vmmov %vm15086_vm0 }
 0x612   : > { %v5423_v37 = vpack.c.bf16 %v5157_v17, %v5153_v63  ;;  %v6567_v0 = vunpack.c.l.bf16 %v6520_v31  ;;  %v8922_v6 = vpack.i.bf16 %v5976_v39, %v5975_v22  ;;  %vm15088_vm4 = vmmov %vm15086_vm0 }
 0x613   : > { %v5536_v20 = vrot.slane %v5422_v55, 4  ;;  %8918 = vrot.lane.b32.xlu1 %v8917_v29, %s15040_s13  ;;  %vm15089_vm5 = vmmov %vm15086_vm0 }
 0x614   : > { %v5538_v54 = vrot.slane %v5423_v37, 4  ;;  %v8932_v63 = vpack.i.bf16 %v6567_v0, %v6566_v14  ;;  %8903 = vrot.lane.b32.xlu0 %v8902_v38, %s9700_s24  ;;  %v6568_v37 = vunpack.c.h.bf16 %v6520_v31 }
 0x615   : > { %v12703_v12 = vsel %vm15083_vm6, %v5530_v53, %v5536_v20  ;;  %vm15091_vm6 = vmmov %vm15086_vm0 }
 0x616   : > { %15084 = vst [vmem:[#allocation62_spill] sm:$0xff] %v12703_v12  ;;  %v12706_v57 = vsel %vm15085_vm3, %v5532_v52, %v5538_v54  ;;  %v6390_v47 = vrot.slane %v12703_v12, 4  ;;  %vm15092_vm3 = vmmov %vm15086_vm0 }
 0x617   : > { %v7103_v55 = vld [vmem:[#allocation3 + $0xb8] sm:$0xff]  ;;  %v6521_v34 = vrot.slane %v12706_v57, 4  ;;  %8923 = vrot.lane.b32.xlu1 %v8922_v6, %s9700_s24 }
 0x618   : > { %v12710_v17 = vld [vmem:[#allocation3 + $0xd0] sm:$0xff]  ;;  %v7141_v29 = vrot.slane %v7103_v55, 4  ;;  %v12716_v35 = vsel %vm15078_vm1, %v6388_v59, %v6390_v47  ;;  %v5161_v62 = vpop.f32.mrb[96].mxu1  ;;  %8908 = vrot.lane.b32.xlu0 %v12658_v9, %s15040_s13  ;;  %vm15093_vm1 = vmmov %vm15086_vm0 }
 0x619   : > { %v7143_v53 = vrot.slane %v12710_v17, 4  ;;  %v12721_v52 = vsel %vm15086_vm0, %v6519_v50, %v6521_v34  ;;  %v5163_v59 = vpop.f32.mrb[97].mxu1  ;;  %v8333_v39 = vpop.f32.mrb[112].mxu0  ;;  %v7189_v50 = vunpack.c.h.bf16 %v12652_v10  ;;  %vm15094_vm0 = vcmask 261120  }
 0x61a   : > { %v7142_v38 = vsel %vm15087_vm2, %v7139_v18, %v7141_v29  ;;  %v6569_v22 = vunpack.c.l.bf16 %v12721_v52  ;;  %v5165_v0 = vpop.f32.mrb[98].mxu1  ;;  %v5338_v24 = vpop.f32.mrb[113].mxu0  ;;  %vm15095_vm2 = vmmov %vm15094_vm0 }
 0x61b   : > { %v12729_v33 = vsel %vm15088_vm4, %v7141_v29, %v7143_v53  ;;  %v7190_v14 = vunpack.c.l.bf16 %v7142_v38  ;;  %8928 = vrot.lane.b32.xlu1 %v8932_v63, %s15040_s13  ;;  %v5425_v6 = vpack.c.bf16 %v5165_v0, %v5161_v62  ;;  %v5167_v55 = vpop.f32.mrb[99].mxu1  ;;  %v8334_v29 = vpop.f32.mrb[114].mxu0  ;;  %v7191_v31 = vunpack.c.h.bf16 %v7142_v38  ;;  %vm15096_vm4 = vmmov %vm15093_vm1 }
 0x61c   : > { %v12736_v18 = vpack.i.bf16 %v6569_v22, %v6568_v37  ;;  %v7192_v40 = vunpack.c.l.bf16 %v12729_v33  ;;  %v5426_v13 = vpack.c.bf16 %v5167_v55, %v5163_v59  ;;  %v5430_v5 = vpack.c.bf16 %v8334_v29, %v8333_v39  ;;  %v5341_v60 = vpop.f32.mrb[115].mxu0  ;;  %8933 = vrot.lane.b32.xlu0 %v8932_v63, %s9700_s24 }
 0x61d   : > { %v8937_v51 = vpack.i.bf16 %v7190_v14, %v7189_v50  ;;  %v5542_v9 = vrot.slane %v5425_v6, 4  ;;  %v5427_v44 = vpack.c.bf16 %v5341_v60, %v5338_v24  ;;  %v14429_v62 = vunpack.c.l.bf16 %v12703_v12 }
 0x61e   : > { %v5544_v10 = vrot.slane %v5426_v13, 4  ;;  %v12740_v1 = vrot.slane %v5430_v5, 4  ;;  %v8942_v22 = vpack.i.bf16 %v7192_v40, %v7191_v31  ;;  %v14430_v59 = vunpack.c.h.bf16 %v12703_v12 }
 0x61f   : > { %8938 = vrot.lane.b32.xlu1 %v8937_v51, %s9700_s24  ;;  %v12745_v37 = vsel %vm15089_vm5, %v5536_v20, %v5542_v9  ;;  %v5546_v38 = vrot.slane %v5427_v44, 4  ;;  %v5977_v6 = vunpack.c.l.bf16 %v12706_v57  ;;  %v5978_v55 = vunpack.c.h.bf16 %v12706_v57  ;;  %vm15097_vm5 = vmmov %vm15093_vm1 }
 0x620   : > { %15090 = vst [vmem:[#allocation42_spill] sm:$0xff] %v12745_v37  ;;  %v5545_v39 = vsel %vm15091_vm6, %v5538_v54, %v5544_v10  ;;  %v5171_v50 = vpop.f32.mrb[100].mxu1  ;;  %v14426_v60 = vunpack.c.l.bf16 %v12745_v37  ;;  %v14425_v13 = vunpack.c.h.bf16 %v12745_v37  ;;  %v6392_v5 = vrot.slane %v12745_v37, 4  ;;  %8943 = vrot.lane.b32.xlu0 %v8942_v22, %s9700_s24  ;;  %vm15098_vm6 = vmmov %vm15093_vm1 }
 0x621   : > { %v5547_v51 = vsel %vm15092_vm3, %v12662_v46, %v5546_v38  ;;  %v5553_v20 = vsel %vm15093_vm1, %v5546_v38, %v12740_v1  ;;  %v5173_v63 = vpop.f32.mrb[101].mxu1  ;;  %v6523_v46 = vrot.slane %v5545_v39, 4  ;;  %v8947_v24 = vpack.i.bf16 %v14430_v59, %v14429_v62  ;;  %vm15100_vm3 = vmmov %vm15093_vm1 }
 0x622   : > { %5667 = vst.msk [vmem:[#allocation3 + $0xe8] sm:$0xff] %vm15094_vm0, %v5547_v51  ;;  %v5175_v44 = vpop.f32.mrb[102].mxu1  ;;  %v8967_v40 = vpack.i.bf16 %v14425_v13, %v14426_v60  ;;  %v12766_v54 = vsel %vm15096_vm4, %v6390_v47, %v6392_v5  ;;  %v5979_v31 = vunpack.c.l.bf16 %v5545_v39  ;;  %v5980_v38 = vunpack.c.h.bf16 %v5545_v39  ;;  %vm15101_vm0 = vmmov %vm15093_vm1 }
 0x623   : > { %5670 = vst.msk [vmem:[#allocation3 + $0x100] sm:$0xff] %vm15095_vm2, %v5553_v20  ;;  %8963 = vrot.lane.b32.xlu1 %v12736_v18, %s9700_s24  ;;  %v5428_v14 = vpack.c.bf16 %v5175_v44, %v5171_v50  ;;  %v5177_v0 = vpop.f32.mrb[103].mxu1  ;;  %v6524_v22 = vsel %vm15097_vm5, %v6521_v34, %v6523_v46  ;;  %v6570_v50 = vunpack.c.h.bf16 %v12721_v52  ;;  %vm15102_vm2 = vmmov %vm15101_vm0 }
 0x624   : > { %v5429_v29 = vpack.c.bf16 %v5177_v0, %v5173_v63  ;;  %8948 = vrot.lane.b32.xlu0 %v8947_v24, %s15040_s13  ;;  %v6571_v51 = vunpack.c.l.bf16 %v6524_v22  ;;  %v8952_v63 = vpack.i.bf16 %v5978_v55, %v5977_v6  ;;  %v8972_v34 = vpack.i.bf16 %v5980_v38, %v5979_v31  ;;  %vm15103_vm4 = vmmov %vm15101_vm0 }
 0x625   : > { %v12777_v47 = vrot.slane %v5428_v14, 4  ;;  %v6572_v31 = vunpack.c.h.bf16 %v6524_v22  ;;  %vm15104_vm5 = vmmov %vm15101_vm0 }
 0x626   : > { %v5550_v20 = vrot.slane %v5429_v29, 4  ;;  %v8982_v39 = vpack.i.bf16 %v6571_v51, %v6570_v50 }
 0x627   : > { %8968 = vrot.lane.b32.xlu1 %v8967_v40, %s15040_s13  ;;  %v12784_v44 = vsel %vm15098_vm6, %v5542_v9, %v12777_v47  ;;  %vm15106_vm6 = vmmov %vm15101_vm0 }
 0x628   : > { %15099 = vst [vmem:[#allocation65_spill] sm:$0xff] %v12784_v44  ;;  %v12787_v57 = vsel %vm15100_vm3, %v5544_v10, %v5550_v20  ;;  %v6394_v14 = vrot.slane %v12784_v44, 4  ;;  %8953 = vrot.lane.b32.xlu0 %v8952_v63, %s9700_s24  ;;  %v14423_v63 = vunpack.c.l.bf16 %v12784_v44  ;;  %vm15107_vm3 = vmmov %vm15101_vm0 }
 0x629   : > { %v7105_v0 = vld [vmem:[#allocation3 + $0xe8] sm:$0xff]  ;;  %v6525_v24 = vrot.slane %v12787_v57, 4 }
 0x62a   : > { %v12791_v52 = vld [vmem:[#allocation3 + $0x100] sm:$0xff]  ;;  %v7145_v40 = vrot.slane %v7105_v0, 4  ;;  %v12799_v10 = vsel %vm15093_vm1, %v6392_v5, %v6394_v14  ;;  %v7193_v5 = vunpack.c.h.bf16 %v12729_v33  ;;  %vm15108_vm1 = vmmov %vm15101_vm0 }
 0x62b   : > { %8973 = vrot.lane.b32.xlu1 %v8972_v34, %s9700_s24  ;;  %v7147_v9 = vrot.slane %v12791_v52, 4  ;;  %v12804_v6 = vsel %vm15101_vm0, %v6523_v46, %v6525_v24  ;;  %v14424_v34 = vunpack.c.h.bf16 %v12784_v44  ;;  %vm15109_vm0 = vcmask 261120  }
 0x62c   : > { %v7146_v55 = vsel %vm15102_vm2, %v7143_v53, %v7145_v40  ;;  %v6573_v38 = vunpack.c.l.bf16 %v12804_v6  ;;  %8958 = vrot.lane.b32.xlu0 %v12736_v18, %s15040_s13  ;;  %v5981_v18 = vunpack.c.l.bf16 %v12787_v57  ;;  %vm15110_vm2 = vmmov %vm15109_vm0 }
 0x62d   : > { %v12812_v29 = vsel %vm15103_vm4, %v7145_v40, %v7147_v9  ;;  %v7194_v50 = vunpack.c.l.bf16 %v7146_v55  ;;  %v7195_v17 = vunpack.c.h.bf16 %v7146_v55  ;;  %v8997_v33 = vpack.i.bf16 %v14424_v34, %v14423_v63  ;;  %vm15111_vm4 = vmmov %vm15108_vm1 }
 0x62e   : > { %v9012_v46 = vpack.i.bf16 %v6573_v38, %v6572_v31  ;;  %v7196_v53 = vunpack.c.l.bf16 %v12812_v29 }
 0x62f   : > { %8978 = vrot.lane.b32.xlu1 %v8982_v39, %s15040_s13  ;;  %v8987_v51 = vpack.i.bf16 %v7194_v50, %v7193_v5 }
 0x630   : > { %8983 = vrot.lane.b32.xlu0 %v8982_v39, %s9700_s24  ;;  %v8992_v22 = vpack.i.bf16 %v7196_v53, %v7195_v17  ;;  %v5982_v39 = vunpack.c.h.bf16 %v12787_v57 }
 0x632   : > { %v9002_v0 = vpack.i.bf16 %v5982_v39, %v5981_v18 }
 0x633   : > { %8988 = vrot.lane.b32.xlu1 %v8987_v51, %s9700_s24 }
 0x634   : > { %8993 = vrot.lane.b32.xlu0 %v8992_v22, %s9700_s24 }
 0x637   : > { %9013 = vrot.lane.b32.xlu1 %v9012_v46, %s9700_s24 }
 0x638   : > { %8998 = vrot.lane.b32.xlu0 %v8997_v33, %s15040_s13 }
 0x63c   : > { %9003 = vrot.lane.b32.xlu0 %v9002_v0, %s9700_s24 }
 0x63d   : > { %v5181_v40 = vpop.f32.mrb[104].mxu1 }
 0x63e   : > { %v5183_v55 = vpop.f32.mrb[105].mxu1  ;;  %v8337_v31 = vpop.f32.mrb[116].mxu0 }
 0x63f   : > { %v5185_v38 = vpop.f32.mrb[106].mxu1  ;;  %v5354_v5 = vpop.f32.mrb[117].mxu0 }
 0x640   : > { %9008 = vrot.lane.b32.xlu0 %v9012_v46, %s15040_s13  ;;  %v5431_v50 = vpack.c.bf16 %v5185_v38, %v5181_v40  ;;  %v5187_v17 = vpop.f32.mrb[107].mxu1  ;;  %v8338_v53 = vpop.f32.mrb[118].mxu0 }
 0x641   : > { %v5432_v51 = vpack.c.bf16 %v5187_v17, %v5183_v55  ;;  %v5436_v22 = vpack.c.bf16 %v8338_v53, %v8337_v31  ;;  %v5357_v63 = vpop.f32.mrb[119].mxu0 }
 0x642   : > { %v5554_v34 = vrot.slane %v5431_v50, 4  ;;  %v5433_v13 = vpack.c.bf16 %v5357_v63, %v5354_v5 }
 0x643   : > { %v5556_v60 = vrot.slane %v5432_v51, 4  ;;  %v12835_v33 = vrot.slane %v5436_v22, 4 }
 0x644   : > { %v12839_v18 = vsel %vm15104_vm5, %v12777_v47, %v5554_v34  ;;  %v5558_v46 = vrot.slane %v5433_v13, 4  ;;  %vm15113_vm5 = vmmov %vm15108_vm1 }
 0x645   : > { %15105 = vst [vmem:[#allocation64_spill] sm:$0xff] %v12839_v18  ;;  %v5557_v39 = vsel %vm15106_vm6, %v5550_v20, %v5556_v60  ;;  %v5191_v0 = vpop.f32.mrb[108].mxu1  ;;  %v14428_v40 = vunpack.c.l.bf16 %v12839_v18  ;;  %v14427_v38 = vunpack.c.h.bf16 %v12839_v18  ;;  %v6396_v17 = vrot.slane %v12839_v18, 4  ;;  %vm15114_vm6 = vmmov %vm15108_vm1 }
 0x646   : > { %v5559_v55 = vsel %vm15107_vm3, %v12740_v1, %v5558_v46  ;;  %v5565_v63 = vsel %vm15108_vm1, %v5558_v46, %v12835_v33  ;;  %v5193_v31 = vpop.f32.mrb[109].mxu1  ;;  %v6527_v5 = vrot.slane %v5557_v39, 4  ;;  %v5983_v20 = vunpack.c.l.bf16 %v5557_v39  ;;  %vm15116_vm3 = vmmov %vm15108_vm1 }
 0x647   : > { %5673 = vst.msk [vmem:[#allocation3 + $0x118] sm:$0xff] %vm15109_vm0, %v5559_v55  ;;  %v5195_v13 = vpop.f32.mrb[110].mxu1  ;;  %v9017_v47 = vpack.i.bf16 %v14427_v38, %v14428_v40  ;;  %v5984_v50 = vunpack.c.h.bf16 %v5557_v39  ;;  %v6574_v46 = vunpack.c.h.bf16 %v12804_v6  ;;  %v12863_v38 = vpop.permute.xlu1 %8808  ;;  %v12868_v57 = vsel %vm15113_vm5, %v6394_v14, %v6396_v17  ;;  %vm15119_vm0 = vmmov %vm15108_vm1 }
 0x648   : > { %5676 = vst.msk [vmem:[#allocation3 + $0x130] sm:$0xff] %vm15110_vm2, %v5565_v63  ;;  %v5434_v1 = vpack.c.bf16 %v5195_v13, %v5191_v0  ;;  %v5197_v53 = vpop.f32.mrb[111].mxu1  ;;  %v12858_v51 = vsel %vm15111_vm4, %v6525_v24, %v6527_v5  ;;  %15112 = vst [vmem:[#allocation43_spill] sm:$0xff] %v12863_v38  ;;  %v12876_v6 = vpop.permute.xlu0 %8813 }
 0x649   : > { %v5435_v22 = vpack.c.bf16 %v5197_v53, %v5193_v31  ;;  %9018 = vrot.lane.b32.xlu1 %v9017_v47, %s15040_s13  ;;  %v6575_v55 = vunpack.c.l.bf16 %v12858_v51  ;;  %v9022_v62 = vpack.i.bf16 %v5984_v50, %v5983_v20  ;;  %15117 = vst [vmem:[#allocation72_spill] sm:$0xff] %v12876_v6  ;;  %vm15121_vm2 = vmmov %vm15119_vm0 }
 0x64a   : > { %v5560_v63 = vrot.slane %v5434_v1, 4  ;;  %vm15122_vm4 = vmmov %vm15119_vm0 }
 0x64b   : > { %v5562_v39 = vrot.slane %v5435_v22, 4  ;;  %v9032_v40 = vpack.i.bf16 %v6575_v55, %v6574_v46  ;;  %vm15124_vm5 = vmmov %vm15119_vm0 }
 0x64c   : > { %v12871_v24 = vsel %vm15114_vm6, %v5554_v34, %v5560_v63  ;;  %v12884_v20 = vpop.permute.xlu1 %8823  ;;  %vm15126_vm6 = vmmov %vm15119_vm0 }
 0x64d   : > { %15115 = vst [vmem:[#allocation67_spill] sm:$0xff] %v12871_v24  ;;  %v12874_v0 = vsel %vm15116_vm3, %v5556_v60, %v5562_v39  ;;  %9033 = vrot.lane.b32.xlu0 %v9032_v40, %s9700_s24  ;;  %9023 = vrot.lane.b32.xlu1 %v9022_v62, %s9700_s24  ;;  %v14432_v31 = vrot.slane %v12871_v24, 4  ;;  %15118 = vst [vmem:[#allocation122_spill] sm:$0xff] %v12884_v20  ;;  %v12897_v53 = vpop.permute.xlu0 %8818  ;;  %v14450_v52 = vunpack.c.l.bf16 %v12871_v24 }
 0x64e   : > { %v7107_v13 = vld [vmem:[#allocation3 + $0x118] sm:$0xff]  ;;  %v14433_v14 = vrot.slane %v12874_v0, 4  ;;  %v5201_v1 = vpop.f32.mrb[112].mxu1  ;;  %15120 = vst [vmem:[#allocation115_spill] sm:$0xff] %v12897_v53  ;;  %vm15127_vm3 = vmmov %vm15119_vm0 }
 0x64f   : > { %v12881_v47 = vld [vmem:[#allocation3 + $0x130] sm:$0xff]  ;;  %v7149_v34 = vrot.slane %v7107_v13, 4  ;;  %v12890_v60 = vsel %vm15108_vm1, %v6396_v17, %v14432_v31  ;;  %v5203_v17 = vpop.f32.mrb[113].mxu1  ;;  %v8341_v55 = vpop.f32.mrb[120].mxu0  ;;  %vm15128_vm1 = vmmov %vm15119_vm0 }
 0x650   : > { %v14440_v50 = vrot.slane %v12881_v47, 4  ;;  %v12895_v62 = vsel %vm15119_vm0, %v6527_v5, %v14433_v14  ;;  %v5205_v59 = vpop.f32.mrb[114].mxu1  ;;  %v5370_v36 = vpop.f32.mrb[121].mxu0  ;;  %vm15129_vm0 = vcmask 261120  }
 0x651   : > { %9028 = vrot.lane.b32.xlu1 %v9032_v40, %s15040_s13  ;;  %v7150_v22 = vsel %vm15121_vm2, %v7147_v9, %v7149_v34  ;;  %v5437_v31 = vpack.c.bf16 %v5205_v59, %v5201_v1  ;;  %v5207_v14 = vpop.f32.mrb[115].mxu1  ;;  %v8342_v7 = vpop.f32.mrb[122].mxu0  ;;  %v14447_v9 = vunpack.c.h.bf16 %v12871_v24  ;;  %v6577_v37 = vunpack.c.l.bf16 %v12895_v62  ;;  %vm15130_vm2 = vmmov %vm15129_vm0 }
 0x652   : > { %v12906_v46 = vsel %vm15122_vm4, %v7149_v34, %v14440_v50  ;;  %v7199_v13 = vunpack.c.h.bf16 %v7150_v22  ;;  %v5438_v28 = vpack.c.bf16 %v5207_v14, %v5203_v17  ;;  %v5442_v18 = vpack.c.bf16 %v8342_v7, %v8341_v55  ;;  %v5373_v44 = vpop.f32.mrb[123].mxu0  ;;  %v12911_v34 = vpop.permute.xlu1 %8828  ;;  %vm15132_vm4 = vmmov %vm15128_vm1 }
 0x653   : > { %v7200_v5 = vunpack.c.l.bf16 %v12906_v46  ;;  %15123 = vst [vmem:[#allocation66_spill] sm:$0xff] %v12911_v34  ;;  %v7198_v50 = vunpack.c.l.bf16 %v7150_v22  ;;  %v5566_v12 = vrot.slane %v5437_v31, 4  ;;  %v5439_v32 = vpack.c.bf16 %v5373_v44, %v5370_v36  ;;  %v12923_v22 = vpop.permute.xlu0 %8833 }
 0x654   : > { %v7197_v59 = vunpack.c.h.bf16 %v12812_v29  ;;  %v5568_v1 = vrot.slane %v5438_v28, 4  ;;  %v6576_v14 = vunpack.c.h.bf16 %v12858_v51  ;;  %v9047_v36 = vpack.i.bf16 %v14447_v9, %v14450_v52 }
 0x655   : > { %v9042_v40 = vpack.i.bf16 %v7200_v5, %v7199_v13  ;;  %v12916_v13 = vrot.slane %v5442_v18, 4  ;;  %v5985_v5 = vunpack.c.l.bf16 %v12874_v0  ;;  %v12921_v7 = vsel %vm15124_vm5, %v5560_v63, %v5566_v12  ;;  %vm15133_vm5 = vmmov %vm15128_vm1 }
 0x656   : > { %15125 = vst [vmem:[#allocation44_spill] sm:$0xff] %v12921_v7  ;;  %v5570_v17 = vrot.slane %v5439_v32, 4  ;;  %v5986_v44 = vunpack.c.h.bf16 %v12874_v0  ;;  %v12931_v28 = vsel %vm15126_vm6, %v5562_v39, %v5568_v1  ;;  %v5211_v29 = vpop.f32.mrb[116].mxu1  ;;  %v9037_v18 = vpack.i.bf16 %v7198_v50, %v7197_v59  ;;  %v12933_v31 = vpop.permute.xlu1 %8838  ;;  %vm15136_vm6 = vmmov %vm15128_vm1 }
 0x657   : > { %9043 = vrot.lane.b32.xlu0 %v9042_v40, %s9700_s24  ;;  %v9062_v51 = vpack.i.bf16 %v6577_v37, %v6576_v14  ;;  %v5213_v55 = vpop.f32.mrb[117].mxu1  ;;  %v14449_v50 = vunpack.c.l.bf16 %v12921_v7  ;;  %v14448_v37 = vunpack.c.h.bf16 %v12921_v7  ;;  %v6531_v40 = vrot.slane %v12931_v28, 4 }
 0x658   : > { %v5571_v32 = vsel %vm15127_vm3, %v12835_v33, %v5570_v17  ;;  %v5577_v63 = vsel %vm15128_vm1, %v5570_v17, %v12916_v13  ;;  %v5215_v39 = vpop.f32.mrb[118].mxu1  ;;  %9038 = vrot.lane.b32.xlu1 %v9037_v18, %s9700_s24  ;;  %v9052_v17 = vpack.i.bf16 %v5986_v44, %v5985_v5  ;;  %v15131_v18 = vrot.slane %v12874_v0, 4  ;;  %vm15141_vm3 = vmmov %vm15128_vm1 }
 0x659   : > { %5679 = vst.msk [vmem:[#allocation3 + $0x148] sm:$0xff] %vm15129_vm0, %v5571_v32  ;;  %v5440_v33 = vpack.c.bf16 %v5215_v39, %v5211_v29  ;;  %v5217_v59 = vpop.f32.mrb[119].mxu1  ;;  %v9067_v29 = vpack.i.bf16 %v14448_v37, %v14449_v50  ;;  %v6578_v0 = vunpack.c.h.bf16 %v12895_v62  ;;  %v7201_v3 = vunpack.c.h.bf16 %v12906_v46  ;;  %vm15142_vm0 = vmmov %vm15128_vm1 }
 0x65a   : > { %5682 = vst.msk [vmem:[#allocation3 + $0x160] sm:$0xff] %vm15130_vm2, %v5577_v63  ;;  %v12946_v14 = vpop.permute.xlu0 %8843  ;;  %v5441_v9 = vpack.c.bf16 %v5217_v59, %v5213_v55  ;;  %v6532_v5 = vsel %vm15132_vm4, %v15131_v18, %v6531_v40  ;;  %v5988_v59 = vunpack.c.h.bf16 %v12931_v28  ;;  %vm15144_vm2 = vmmov %vm15142_vm0 }
 0x65b   : > { %9048 = vrot.lane.b32.xlu0 %v9047_v36, %s15040_s13  ;;  %v12950_v32 = vrot.slane %v5440_v33, 4  ;;  %v5987_v33 = vunpack.c.l.bf16 %v12931_v28  ;;  %v15140_v28 = vrot.slane %v12881_v47, 4  ;;  %vm15147_vm4 = vmmov %vm15142_vm0 }
 0x65c   : > { %v12953_v63 = vrot.slane %v5441_v9, 4  ;;  %9063 = vrot.lane.b32.xlu1 %v9062_v51, %s9700_s24 }
 0x65d   : > { %v12965_v44 = vsel %vm15133_vm5, %v5566_v12, %v12950_v32  ;;  %v9072_v42 = vpack.i.bf16 %v5988_v59, %v5987_v33  ;;  %vm15149_vm5 = vmmov %vm15142_vm0 }
 0x65e   : > { %15134 = vst [vmem:[#allocation69_spill] sm:$0xff] %v12965_v44  ;;  %v12971_v9 = vsel %vm15136_vm6, %v5568_v1, %v12953_v63  ;;  %vm15150_vm6 = vcmask 257024  }
 0x65f   : > { %9053 = vrot.lane.b32.xlu0 %v9052_v17, %s9700_s24  ;;  %v6579_v17 = vunpack.c.l.bf16 %v6532_v5  ;;  %v5990_v46 = vunpack.c.h.bf16 %v12971_v9 }
 0x660   : > { %v7109_v18 = vld [vmem:[#allocation3 + $0x148] sm:$0xff]  ;;  %9068 = vrot.lane.b32.xlu1 %v9067_v29, %s15040_s13 }
 0x661   : > { %v12979_v12 = vld [vmem:[#allocation3 + $0x160] sm:$0xff]  ;;  %v7153_v37 = vrot.slane %v7109_v18, 4  ;;  %v9082_v1 = vpack.i.bf16 %v6579_v17, %v6578_v0  ;;  %v14460_v18 = vunpack.c.l.bf16 %v12965_v44 }
 0x662   : > { %v14455_v52 = vrot.slane %v12979_v12, 4 }
 0x663   : > { %9058 = vrot.lane.b32.xlu0 %v9062_v51, %s15040_s13  ;;  %v7154_v51 = vsel %vm15141_vm3, %v15140_v28, %v7153_v37  ;;  %v14459_v28 = vunpack.c.h.bf16 %v12965_v44  ;;  %vm15152_vm3 = vmmov %vm15142_vm0 }
 0x664   : > { %v12994_v62 = vsel %vm15128_vm1, %v7153_v37, %v14455_v52  ;;  %v7203_v29 = vunpack.c.h.bf16 %v7154_v51  ;;  %9073 = vrot.lane.b32.xlu1 %v9072_v42, %s9700_s24  ;;  %v7202_v33 = vunpack.c.l.bf16 %v7154_v51  ;;  %v6533_v52 = vrot.slane %v12971_v9, 4  ;;  %vm15153_vm1 = vmmov %vm15142_vm0 }
 0x665   : > { %v7204_v0 = vunpack.c.l.bf16 %v12994_v62  ;;  %v9097_v51 = vpack.i.bf16 %v14459_v28, %v14460_v18 }
 0x666   : > { %v9087_v42 = vpack.i.bf16 %v7202_v33, %v7201_v3 }
 0x667   : > { %9083 = vrot.lane.b32.xlu0 %v9082_v1, %s9700_s24  ;;  %v9092_v47 = vpack.i.bf16 %v7204_v0, %v7203_v29  ;;  %v5989_v29 = vunpack.c.l.bf16 %v12971_v9  ;;  %v6580_v0 = vunpack.c.h.bf16 %v6532_v5  ;;  %v15143_v5 = vrot.slane %v12871_v24, 4 }
 0x668   : > { %9078 = vrot.lane.b32.xlu1 %v9082_v1, %s15040_s13  ;;  %v13019_v1 = vsel %vm15142_vm0, %v6531_v40, %v6533_v52  ;;  %vm15155_vm0 = vcmask 261120  }
 0x669   : > { %v6581_v3 = vunpack.c.l.bf16 %v13019_v1  ;;  %v9102_v40 = vpack.i.bf16 %v5990_v46, %v5989_v29 }
 0x66a   : > { %v12948_v36 = vpop.permute.xlu1 %8863  ;;  %v12967_v55 = vpop.permute.xlu0 %8848 }
 0x66b   : > { %15135 = vst [vmem:[#allocation68_spill] sm:$0xff] %v12967_v55  ;;  %9093 = vrot.lane.b32.xlu0 %v9092_v47, %s9700_s24  ;;  %v14472_v47 = vrot.slane %v12921_v7, 4  ;;  %v13029_v18 = vpack.i.bf16 %v6581_v3, %v6580_v0 }
 0x66c   : > { %9088 = vrot.lane.b32.xlu1 %v9087_v42, %s9700_s24 }
 0x66d   : > { %v13036_v42 = vsel %vm15144_vm2, %v15143_v5, %v14472_v47  ;;  %vm15156_vm2 = vmmov %vm15155_vm0 }
 0x66f   : > { %9098 = vrot.lane.b32.xlu0 %v9097_v51, %s15040_s13 }
 0x670   : > { %v12973_v39 = vpop.permute.xlu1 %8868 }
 0x671   : > { %15137 = vst [vmem:[#allocation45_spill] sm:$0xff] %v12973_v39  ;;  %v12982_v50 = vpop.permute.xlu0 %8853 }
 0x672   : > { %15138 = vst [vmem:[#allocation71_spill] sm:$0xff] %v12982_v50 }
 0x673   : > { %9103 = vrot.lane.b32.xlu0 %v9102_v40, %s9700_s24  ;;  %v7114_v40 = vld [vmem:[#allocation3 + $0x1c0] sm:$0x1f] }
 0x674   : > { %v12985_v11 = vpop.permute.xlu1 %8873 }
 0x675   : > { %15139 = vst [vmem:[#allocation70_spill] sm:$0xff] %v12985_v11  ;;  %v12998_v17 = vpop.permute.xlu0 %8858 }
 0x677   : > { %9113 = vrot.lane.b32.xlu0 %v13029_v18, %s15040_s13 }
 0x678   : > { %v13000_v59 = vpop.permute.xlu1 %8878 }
 0x679   : > { %v13007_v37 = vpop.permute.xlu0 %8883 }
 0x67d   : > { %v13010_v43 = vpop.permute.xlu1 %8888 }
 0x67e   : > { %v13024_v33 = vpop.permute.xlu0 %8893 }
 0x681   : > { %v13027_v28 = vpop.permute.xlu1 %8913 }
 0x682   : > { %v5221_v21 = vpop.f32.mrb[120].mxu1  ;;  %v13039_v11 = vpop.permute.xlu0 %8898 }
 0x683   : > { %v5223_v9 = vpop.f32.mrb[121].mxu1  ;;  %v8345_v26 = vpop.f32.mrb[124].mxu0  ;;  %15145 = vst [vmem:[#allocation46_spill] sm:$0xff] %v13039_v11 }
 0x684   : > { %v5225_v2 = vpop.f32.mrb[122].mxu1  ;;  %v5386_v41 = vpop.f32.mrb[125].mxu0 }
 0x685   : > { %v5443_v51 = vpack.c.bf16 %v5225_v2, %v5221_v21  ;;  %v5227_v39 = vpop.f32.mrb[123].mxu1  ;;  %v8346_v8 = vpop.f32.mrb[126].mxu0  ;;  %v6357_v21 = vld [vmem:[#allocation3] sm:$0xf0] }
 0x686   : > { %v5444_v15 = vpack.c.bf16 %v5227_v39, %v5223_v9  ;;  %v5448_v0 = vpack.c.bf16 %v8346_v8, %v8345_v26  ;;  %v5389_v3 = vpop.f32.mrb[127].mxu0  ;;  %v13041_v30 = vpop.permute.xlu1 %8918 }
 0x687   : > { %v5578_v29 = vrot.slane %v5443_v51, 4  ;;  %v5445_v46 = vpack.c.bf16 %v5389_v3, %v5386_v41  ;;  %15146 = vst [vmem:[#allocation74_spill] sm:$0xff] %v13041_v30  ;;  %v13054_v41 = vpop.permute.xlu0 %8903 }
 0x688   : > { %v5580_v50 = vrot.slane %v5444_v15, 4  ;;  %v5588_v58 = vrot.slane %v5448_v0, 4  ;;  %15151 = vst [vmem:[#allocation47_spill] sm:$0xff] %v13054_v41  ;;  %v6427_v41 = vunpack.c.h.bf16 %v12523_v61 }
 0x689   : > { %v13045_v5 = vsel %vm15147_vm4, %v12950_v32, %v5578_v29  ;;  %v5582_v2 = vrot.slane %v5445_v46, 4  ;;  %v6375_v46 = vrot.slane %v6357_v21, 4  ;;  %vm15157_vm4 = vmmov %vm15153_vm1  ;;  %v6582_v21 = vunpack.c.h.bf16 %v13019_v1 }
 0x68a   : > { %15148 = vst [vmem:[#allocation73_spill] sm:$0xff] %v13045_v5  ;;  %v13051_v8 = vsel %vm15149_vm5, %v12953_v63, %v5580_v50  ;;  %5691 = vst.msk [vmem:[#allocation3 + $0x1a8] sm:$0xf] %vm15150_vm6, %v5588_v58  ;;  %v5231_v26 = vpop.f32.mrb[124].mxu1  ;;  %v13059_v9 = vpop.permute.xlu1 %8923 }
 0x68b   : > { %v5583_v15 = vsel %vm15152_vm3, %v12916_v13, %v5582_v2  ;;  %v5589_v32 = vsel %vm15153_vm1, %v5582_v2, %v5588_v58  ;;  %v5233_v39 = vpop.f32.mrb[125].mxu1  ;;  %15154 = vst [vmem:[#allocation86_spill] sm:$0xff] %v13059_v9  ;;  %v14476_v51 = vrot.slane %v13051_v8, 4  ;;  %v13064_v24 = vpop.permute.xlu0 %8908  ;;  %vm15158_vm5 = vmmov %vm15153_vm1 }
 0x68c   : > { %5685 = vst.msk [vmem:[#allocation3 + $0x178] sm:$0xff] %vm15155_vm0, %v5583_v15  ;;  %v5235_v63 = vpop.f32.mrb[126].mxu1  ;;  %v7163_v15 = vrot.slane %v7114_v40, 4  ;;  %vm15160_vm6 = vmmov %vm15153_vm1 }
 0x68d   : > { %5688 = vst.msk [vmem:[#allocation3 + $0x190] sm:$0xff] %vm15156_vm2, %v5589_v32  ;;  %v5446_v0 = vpack.c.bf16 %v5235_v63, %v5231_v26  ;;  %v5237_v3 = vpop.f32.mrb[127].mxu1  ;;  %v13069_v58 = vsel %vm15157_vm4, %v6533_v52, %v14476_v51  ;;  %v15159_v63 = vrot.slane %v12504_v27, 4  ;;  %vm15161_vm3 = vmmov %vm15153_vm1  ;;  %v13093_v27 = vld [vmem:[#allocation3 + $0x1b8] sm:$0xf] }
 0x68e   : > { %v5447_v47 = vpack.c.bf16 %v5237_v3, %v5233_v39  ;;  %v13071_v2 = vpop.permute.xlu1 %8928  ;;  %v6583_v39 = vunpack.c.l.bf16 %v13069_v58  ;;  %vm15163_vm0 = vmmov %vm15153_vm1 }
 0x68f   : > { %v5584_v13 = vrot.slane %v5446_v0, 4  ;;  %v13081_v3 = vsel %vm15160_vm6, %v6375_v46, %v15159_v63  ;;  %v7214_v0 = vunpack.c.l.bf16 %v7163_v15  ;;  %vm15164_vm2 = vmmov %vm15163_vm0 }
 0x690   : > { %v5586_v32 = vrot.slane %v5447_v47, 4  ;;  %v13087_v47 = vpop.permute.xlu0 %8933  ;;  %v13091_v51 = vpack.i.bf16 %v6583_v39, %v6582_v21  ;;  %v15162_v21 = vrot.slane %v12979_v12, 4  ;;  %vm15167_vm4 = vmmov %vm15163_vm0 }
 0x691   : > { %v13074_v30 = vsel %vm15158_vm5, %v5578_v29, %v5584_v13  ;;  %5689 = vst [vmem:[#allocation3 + $0x198] sm:$0xf] %v5584_v13  ;;  %v7113_v26 = vld [vmem:[#allocation3 + $0x1a8] sm:$0xff]  ;;  %vm15172_vm5 = vmmov %vm15163_vm0 }
 0x692   : > { %5686 = vst [vmem:[#allocation3 + $0x180] sm:$0xff] %v13074_v30  ;;  %v13085_v52 = vsel %vm15161_vm3, %v5580_v50, %v5586_v32  ;;  %5690 = vst [vmem:[#allocation3 + $0x1a0] sm:$0xf] %v5586_v32  ;;  %v7161_v29 = vrot.slane %v7113_v26, 4  ;;  %v13089_v40 = vpop.permute.xlu1 %8938  ;;  %v6425_v50 = vunpack.c.h.bf16 %v13081_v3  ;;  %v6426_v32 = vunpack.c.l.bf16 %v12523_v61 }
 0x693   : > { %v7111_v1 = vld [vmem:[#allocation3 + $0x178] sm:$0xff]  ;;  %vm15175_vm6 = vmmov %vm15163_vm0 }
 0x694   : > { %v7112_v13 = vld [vmem:[#allocation3 + $0x190] sm:$0xff]  ;;  %v7164_v63 = vsel %vm15153_vm1, %v7161_v29, %v7163_v15  ;;  %v7157_v9 = vrot.slane %v7111_v1, 4  ;;  %v13101_v55 = vpop.permute.xlu0 %8943  ;;  %v6429_v15 = vunpack.c.h.bf16 %v12547_v56  ;;  %v13122_v46 = vadd.high.f32.bf16 %v6426_v32, %v12933_v31  ;;  %vm15182_vm3 = vmmov %vm15163_vm0 }
 0x695   : > { %v7213_v11 = vunpack.c.h.bf16 %v7164_v63  ;;  %v7159_v26 = vrot.slane %v7112_v13, 4  ;;  %v6430_v13 = vunpack.c.l.bf16 %v12575_v45  ;;  %v7212_v12 = vunpack.c.l.bf16 %v7164_v63  ;;  %vm15185_vm1 = vmmov %vm15163_vm0 }
 0x696   : > { %v7158_v39 = vsel %vm15163_vm0, %v15162_v21, %v7157_v9  ;;  %v13109_v20 = vpop.permute.xlu1 %8963  ;;  %v7205_v32 = vunpack.c.h.bf16 %v12994_v62  ;;  %v13155_v62 = vadd.high.f32.bf16 %v6428_v23, %v12998_v17  ;;  %v14493_v23 = vunpack.c.h.bf16 %v13045_v5 }
 0x697   : > { %v9107_v1 = vpack.i.bf16 %v7214_v0, %v7213_v11  ;;  %v7160_v25 = vsel %vm15164_vm2, %v7157_v9, %v7159_v26  ;;  %15165 = vst [vmem:[#allocation120_spill] sm:$0xff] %v13109_v20  ;;  %v7207_v34 = vunpack.c.h.bf16 %v7158_v39  ;;  %v7162_v0 = vsel %vm15167_vm4, %v7159_v26, %v7161_v29  ;;  %vm15190_vm2 = vmmov %vm15163_vm0 }
 0x698   : > { %v7208_v6 = vunpack.c.l.bf16 %v7160_v25  ;;  %v13118_v9 = vpop.permute.xlu0 %8948  ;;  %v7206_v38 = vunpack.c.l.bf16 %v7158_v39  ;;  %v7211_v21 = vunpack.c.h.bf16 %v7162_v0  ;;  %v9470_v29 = vadd.high.f32.bf16 %v13122_v46, %v12946_v14  ;;  %vm15194_vm4 = vmmov %vm15163_vm0 }
 0x699   : > { %9108 = vrot.lane.b32.xlu1 %v9107_v1, %s9700_s24  ;;  %15166 = vst [vmem:[#allocation84_spill] sm:$0xff] %v13118_v9  ;;  %v7210_v1 = vunpack.c.l.bf16 %v7162_v0  ;;  %v6584_v63 = vunpack.c.h.bf16 %v13069_v58  ;;  %v15176_v9 = vunpack.c.l.bf16 %v12622_v16  ;;  %v15179_v20 = vunpack.c.l.bf16 %v12639_v49 }
 0x69a   : > { %v9127_v56 = vpack.i.bf16 %v7208_v6, %v7207_v34  ;;  %v13124_v61 = vpop.permute.xlu1 %8968  ;;  %v13131_v34 = vadd.low.f32.bf16 %v6425_v50, %v12933_v31  ;;  %v9137_v26 = vpack.i.bf16 %v7212_v12, %v7211_v21  ;;  %v9122_v53 = vpack.i.bf16 %v7206_v38, %v7205_v32 }
 0x69b   : > { %15168 = vst [vmem:[#allocation48_spill] sm:$0xff] %v13124_v61  ;;  %v13146_v6 = vrot.slane %v9470_v29, 1  ;;  %v5780_v38 = vunpack.c.l.bf16 %v13074_v30  ;;  %v13158_v12 = vadd.high.f32.bf16 %v6430_v13, %v13000_v59  ;;  %v13161_v21 = vadd.low.f32.bf16 %v6429_v15, %v13000_v59  ;;  %v6490_v61 = vld [vmem:[#allocation3 + $0x1a0] sm:$0xf] }
 0x69c   : > { %9128 = vrot.lane.b32.xlu0 %v9127_v56, %s9700_s24  ;;  %v13138_v39 = vpop.permute.xlu0 %8953  ;;  %v7209_v56 = vunpack.c.h.bf16 %v7160_v25  ;;  %v5781_v25 = vunpack.c.h.bf16 %v13074_v30  ;;  %v6537_v29 = vrot.slane %v13085_v52, 4  ;;  %v14494_v30 = vunpack.c.l.bf16 %v13045_v5 }
 0x69d   : > { %9118 = vrot.lane.b32.xlu1 %v13029_v18, %s9700_s24  ;;  %15169 = vst [vmem:[#allocation85_spill] sm:$0xff] %v13138_v39  ;;  %v13149_v18 = vadd.low.f32.bf16 %v6427_v41, %v12998_v17  ;;  %v13164_v41 = vld [vmem:[#allocation3 + $0x1a0] sm:$0xff]  ;;  %v5994_v17 = vunpack.c.h.bf16 %v13085_v52 }
 0x69e   : > { %v13143_v31 = vpop.permute.xlu1 %8973  ;;  %v9132_v32 = vpack.i.bf16 %v7210_v1, %v7209_v56  ;;  %v9167_v15 = vpack.i.bf16 %v5781_v25, %v5780_v38  ;;  %v6755_v13 = vrot.slane %v13164_v41, 4  ;;  %v15171_v1 = vrot.slane %v13051_v8, 4 }
 0x69f   : > { %15170 = vst [vmem:[#allocation80_spill] sm:$0xff] %v13143_v31  ;;  %v9142_v38 = vpack.i.bf16 %v14493_v23, %v14494_v30  ;;  %v5991_v25 = vunpack.c.l.bf16 %v13051_v8  ;;  %v13198_v31 = vld [vmem:[#allocation3 + $0x1a0] sm:$0x1f]  ;;  %v13203_v23 = vadd.high.f32.bf16 %v15176_v9, %v13064_v24  ;;  %v9481_v9 = vadd.low.f32.bf16 %v13161_v21, %v13024_v33 }
 0x6a0   : > { %9138 = vrot.lane.b32.xlu0 %v9137_v26, %s9700_s24  ;;  %v8959_v0 = vpop.permute.xlu0 %8958  ;;  %v6538_v26 = vsel %vm15172_vm5, %v15171_v1, %v6537_v29  ;;  %v15174_v1 = vrot.slane %v13093_v27, 4  ;;  %v5777_v27 = vld [vmem:[#allocation3 + $0x198] sm:$0xf]  ;;  %vm15197_vm5 = vcmask 1046528  }
 0x6a1   : > { %9123 = vrot.lane.b32.xlu1 %v9122_v53, %s9700_s24  ;;  %v5993_v53 = vunpack.c.l.bf16 %v13085_v52  ;;  %v6585_v59 = vunpack.c.l.bf16 %v6538_v26 }
 0x6a2   : > { %v8979_v56 = vpop.permute.xlu1 %8978  ;;  %v6758_v11 = vsel %vm15175_vm6, %v6755_v13, %v15174_v1  ;;  %vm15198_vm6 = vmmov %vm15197_vm5 }
 0x6a3   : > { %v6767_v58 = vunpack.c.h.bf16 %v6758_v11  ;;  %v13196_v52 = vpack.i.bf16 %v6585_v59, %v6584_v63  ;;  %v9177_v1 = vpack.i.bf16 %v5994_v17, %v5993_v53  ;;  %v6539_v59 = vrot.slane %v6490_v61, 4 }
 0x6a4   : > { %9158 = vrot.lane.b32.xlu0 %v13091_v51, %s9700_s24  ;;  %v13184_v50 = vpop.permute.xlu0 %8983  ;;  %v6402_v53 = vrot.slane %v12965_v44, 4  ;;  %v6766_v44 = vunpack.c.l.bf16 %v6758_v11  ;;  %v15189_v11 = vrot.slane %v12921_v7, 4  ;;  %v6439_v7 = vunpack.c.h.bf16 %v12716_v35 }
 0x6a5   : > { %9133 = vrot.lane.b32.xlu1 %v9132_v32, %s9700_s24  ;;  %15173 = vst [vmem:[#allocation49_spill] sm:$0xff] %v13184_v50  ;;  %v5992_v32 = vunpack.c.h.bf16 %v13051_v8  ;;  %v15177_v8 = vunpack.c.h.bf16 %v12575_v45  ;;  %v14500_v50 = vrot.slane %v13198_v31, 4  ;;  %v13219_v45 = vadd.high.f32.bf16 %v15179_v20, %v13071_v2 }
 0x6a7   : > { %v13208_v30 = vadd.low.f32.bf16 %v15177_v8, %v13064_v24  ;;  %v9147_v39 = vpack.i.bf16 %v5992_v32, %v5991_v25  ;;  %15180 = vst [vmem:[#allocation98_spill] sm:$0xff] %v13219_v45  ;;  %v8989_v24 = vpop.permute.xlu1 %8988  ;;  %v9485_v25 = vadd.high.f32.bf16 %v13203_v23, %v13089_v40  ;;  %v9486_v20 = vadd.high.f32.bf16 %v13219_v45, %v13101_v55 }
 0x6a8   : > { %9168 = vrot.lane.b32.xlu0 %v9167_v15, %s15040_s13  ;;  %v15178_v15 = vunpack.c.l.bf16 %v12579_v19  ;;  %v15181_v19 = vunpack.c.h.bf16 %v12622_v16  ;;  %v8994_v32 = vpop.permute.xlu0 %8993  ;;  %v15183_v8 = vunpack.c.l.bf16 %v12688_v48  ;;  %v15184_v16 = vunpack.c.h.bf16 %v12639_v49 }
 0x6a9   : > { %9143 = vrot.lane.b32.xlu1 %v9142_v38, %s15040_s13  ;;  %v5782_v38 = vunpack.c.l.bf16 %v5777_v27  ;;  %v9484_v17 = vadd.low.f32.bf16 %v13208_v30, %v13089_v40  ;;  %v13247_v40 = vsel %vm15185_vm1, %v6537_v29, %v14500_v50  ;;  %v5995_v50 = vunpack.c.l.bf16 %v13164_v41 }
 0x6aa   : > { %v9182_v63 = vpack.i.bf16 %v15178_v15, %v6767_v58  ;;  %v13226_v61 = vadd.low.f32.bf16 %v15181_v19, %v13071_v2  ;;  %v6540_v58 = vsel %vm15182_vm3, %v6537_v29, %v6539_v59  ;;  %v13238_v27 = vadd.high.f32.bf16 %v15183_v8, %v8959_v0  ;;  %vm15199_vm3 = vmmov %vm15197_vm5 }
 0x6ab   : > { %v13242_v2 = vadd.low.f32.bf16 %v15184_v16, %v8959_v0  ;;  %v6756_v15 = vsel %vm15163_vm0, %v6537_v29, %v6755_v13  ;;  %v6586_v59 = vunpack.c.h.bf16 %v6538_v26  ;;  %v6587_v49 = vunpack.c.l.bf16 %v6540_v58  ;;  %vm15200_vm1 = vmmov %vm15199_vm3 }
 0x6ac   : > { %9178 = vrot.lane.b32.xlu0 %v9177_v1, %s9700_s24  ;;  %v6764_v19 = vunpack.c.l.bf16 %v6756_v15  ;;  %v6588_v0 = vunpack.c.h.bf16 %v6540_v58  ;;  %v7080_v8 = vunpack.c.l.bf16 %v13247_v40  ;;  %v6765_v16 = vunpack.c.h.bf16 %v6756_v15  ;;  %vm15201_vm0 = vmmov %vm15200_vm1 }
 0x6ad   : > { %9148 = vrot.lane.b32.xlu1 %v9147_v39, %s9700_s24  ;;  %v15186_v39 = vunpack.c.l.bf16 %v12531_v4  ;;  %v9192_v4 = vpack.i.bf16 %v6587_v49, %v6586_v59  ;;  %v13271_v58 = vsel %vm15190_vm2, %v15189_v11, %v6402_v53  ;;  %v9493_v15 = vadd.high.f32.bf16 %v13238_v27, %v8989_v24  ;;  %vm15202_vm2 = vmmov %vm15201_vm0 }
 0x6ae   : > { %v9207_v45 = vpack.i.bf16 %v6764_v19, %v6586_v59  ;;  %v9212_v26 = vpack.i.bf16 %v6766_v44, %v6765_v16  ;;  %v15191_v44 = vadd.low.f32.bf16 %v13131_v34, %v12946_v14  ;;  %v9197_v49 = vpack.i.bf16 %v7080_v8, %v6588_v0 }
 0x6af   : > { %v9162_v1 = vpack.i.bf16 %v15186_v39, %v5782_v38  ;;  %v15187_v38 = vunpack.c.l.bf16 %v12716_v35  ;;  %v9492_v39 = vadd.low.f32.bf16 %v13242_v2, %v8989_v24  ;;  %v15193_v24 = vadd.high.f32.bf16 %v13155_v62, %v13010_v43 }
 0x6b0   : > { %9183 = vrot.lane.b32.xlu0 %v9182_v63, %s9700_s24  ;;  %v5996_v63 = vunpack.c.h.bf16 %v13164_v41  ;;  %v9491_v41 = vadd.low.f32.bf16 %v13226_v61, %v13101_v55  ;;  %v15192_v55 = vadd.low.f32.bf16 %v13149_v18, %v13010_v43  ;;  %v13307_v0 = vrot.slane %v9481_v9, 1 }
 0x6b1   : > { %9153 = vrot.lane.b32.xlu1 %v13091_v51, %s15040_s13  ;;  %v13260_v29 = vadd.high.f32.bf16 %v15187_v38, %v8979_v56  ;;  %v15188_v51 = vunpack.c.h.bf16 %v12688_v48  ;;  %v13279_v48 = vrot.slane %v13045_v5, 4  ;;  %v13309_v8 = vrot.slane %v9484_v17, 1 }
 0x6b2   : > { %v13291_v16 = vrot.slane %v15192_v55, 1  ;;  %v9172_v38 = vpack.i.bf16 %v5996_v63, %v5995_v50  ;;  %v13311_v11 = vrot.slane %v9485_v25, 1  ;;  %v13314_v43 = vrot.slane %v9486_v20, 1  ;;  %v13375_v55 = vpop.permute.xlu1 %9013 }
 0x6b3   : > { %v13264_v13 = vadd.low.f32.bf16 %v15188_v51, %v8979_v56  ;;  %v13284_v56 = vrot.slane %v15191_v44, 1  ;;  %v9494_v59 = vadd.high.f32.bf16 %v13260_v29, %v8994_v32  ;;  %v13300_v14 = vsel %vm15194_vm4, %v6402_v53, %v13279_v48  ;;  %vm15203_vm4 = vmmov %vm15201_vm0 }
 0x6b4   : > { %9188 = vrot.lane.b32.xlu0 %v13196_v52, %s15040_s13  ;;  %v15195_v51 = vadd.high.f32.bf16 %v13158_v12, %v13024_v33  ;;  %v13316_v50 = vrot.slane %v9491_v41, 1  ;;  %v13318_v63 = vrot.slane %v9492_v39, 1  ;;  %v13320_v53 = vrot.slane %v9493_v15, 1 }
 0x6b5   : > { %9163 = vrot.lane.b32.xlu1 %v9162_v1, %s15040_s13  ;;  %v9495_v19 = vadd.low.f32.bf16 %v13264_v13, %v8994_v32  ;;  %v13296_v1 = vrot.slane %v15193_v24, 1  ;;  %v13323_v33 = vrot.slane %v9494_v59, 1  ;;  %v13330_v17 = vsel %vm15197_vm5, %v13284_v56, %v13146_v6  ;;  %vm15217_vm5 = vmmov %vm15201_vm0 }
 0x6b6   : > { %v13305_v32 = vrot.slane %v15195_v51, 1  ;;  %v13346_v41 = vsel %vm15200_vm1, %v13309_v8, %v13311_v11  ;;  %v13352_v39 = vsel %vm15201_vm0, %v13316_v50, %v13314_v43  ;;  %v9496_v15 = vadd.low.f32.bf16 %v13131_v34, %v12948_v36  ;;  %vm15237_vm1 = vmmov %vm15201_vm0 }
 0x6b7   : > { %15196 = vst [vmem:[#allocation96_spill] sm:$0xff] %v13323_v33  ;;  %v13325_v9 = vrot.slane %v9495_v19, 1  ;;  %v13335_v25 = vsel %vm15198_vm6, %v13291_v16, %v13296_v1  ;;  %v15205_v59 = vrot.slane %v13198_v31, 4  ;;  %v6441_v31 = vunpack.c.h.bf16 %v12766_v54  ;;  %vm15222_vm6 = vmmov %vm15201_vm0 }
 0x6b8   : > { %9198 = vrot.lane.b32.xlu0 %v9197_v49, %s15040_s13  ;;  %v13341_v20 = vsel %vm15199_vm3, %v13307_v0, %v13305_v32  ;;  %v13372_v49 = vpop.permute.xlu0 %8998  ;;  %vm15235_vm3 = vmmov %vm15201_vm0 }
 0x6b9   : > { %9173 = vrot.lane.b32.xlu1 %v9172_v38, %s9700_s24  ;;  %v13364_v44 = vsel %vm15203_vm4, %v13325_v9, %v13323_v33  ;;  %v7082_v19 = vunpack.c.l.bf16 %v15205_v59  ;;  %15206 = vst [vmem:[#allocation50_spill] sm:$0xff] %v13372_v49  ;;  %v6442_v59 = vunpack.c.l.bf16 %v12799_v10  ;;  %vm15258_vm4 = vmmov %vm15201_vm0 }
 0x6bb   : > { %v13380_v38 = vpop.permute.xlu1 %9018 }
 0x6bc   : > { %9208 = vrot.lane.b32.xlu0 %v9207_v45, %s9700_s24  ;;  %v13357_v45 = vsel %vm15202_vm2, %v13318_v63, %v13320_v53  ;;  %v13378_v24 = vpop.permute.xlu0 %9003  ;;  %15208 = vst [vmem:[#allocation91_spill] sm:$0xff] %v13380_v38  ;;  %v6440_v38 = vunpack.c.l.bf16 %v12766_v54  ;;  %vm15256_vm2 = vcmask 1043456  }
 0x6bd   : > { %9193 = vrot.lane.b32.xlu1 %v9192_v4, %s15040_s13  ;;  %v7081_v4 = vunpack.c.h.bf16 %v13247_v40  ;;  %15207 = vst [vmem:[#allocation97_spill] sm:$0xff] %v13378_v24 }
 0x6bf   : > { %v9217_v34 = vpack.i.bf16 %v7082_v19, %v7081_v4  ;;  %v13382_v51 = vpop.permute.xlu1 %9023 }
 0x6c0   : > { %6936 = vrot.lane.b32.xlu0 %v9496_v15, %s15204_s14  ;;  %15209 = vst [vmem:[#allocation51_spill] sm:$0xff] %v13382_v51 }
 0x6c1   : > { %9203 = vrot.lane.b32.xlu1 %v13196_v52, %s9700_s24  ;;  %v9009_v52 = vpop.permute.xlu0 %9008 }
 0x6c2   : > { %v13402_v33 = vadd.high.f32.bf16 %v6440_v38, %v9009_v52 }
 0x6c3   : > { %v9029_v40 = vpop.permute.xlu1 %9028 }
 0x6c4   : > { %v13388_v4 = vadd.high.f32.bf16 %v6442_v59, %v9029_v40  ;;  %v13390_v19 = vadd.low.f32.bf16 %v6441_v31, %v9029_v40  ;;  %15216 = vst [vmem:[#allocation53_spill] sm:$0xff] %v13402_v33  ;;  %v13404_v59 = vadd.low.f32.bf16 %v6439_v7, %v9009_v52 }
 0x6c5   : > { %9213 = vrot.lane.b32.xlu1 %v9212_v26, %s9700_s24  ;;  %v13384_v15 = vpop.permute.xlu0 %9033 }
 0x6c6   : > { %15210 = vst [vmem:[#allocation111_spill] sm:$0xff] %v13384_v15  ;;  %15211 = vst [vmem:[#allocation109_spill] sm:$0xff] %v13388_v4 }
 0x6c7   : > { %15212 = vst [vmem:[#allocation52_spill] sm:$0xff] %v13390_v19 }
 0x6c9   : > { %9218 = vrot.lane.b32.xlu1 %v9217_v34, %s15040_s13  ;;  %v9044_v26 = vpop.permute.xlu0 %9043  ;;  %s9702_s13 = smov [#allocation4]  }
 0x6ca   : > { %v9499_v34 = vadd.high.f32.bf16 %v13388_v4, %v9044_v26  ;;  %v9500_v5 = vadd.low.f32.bf16 %v13390_v19, %v9044_v26  ;;  %v9039_v15 = vpop.permute.xlu1 %9038 }
 0x6cb   : > { %v9503_v35 = vadd.low.f32.bf16 %v13404_v59, %v9039_v15  ;;  %v9504_v54 = vadd.high.f32.bf16 %v13402_v33, %v9039_v15 }
 0x6cc   : > { %v13398_v49 = vrot.slane %v9499_v34, 1  ;;  %v13400_v24 = vrot.slane %v9500_v5, 1 }
 0x6cd   : > { %v13396_v51 = vpop.permute.xlu0 %9048  ;;  %v13417_v5 = vrot.slane %v9503_v35, 1  ;;  %v13419_v34 = vrot.slane %v9504_v54, 1  ;;  %v6446_v35 = vunpack.c.l.bf16 %v12890_v60  ;;  %v6443_v54 = vunpack.c.h.bf16 %v12799_v10 }
 0x6ce   : > { %15213 = vst [vmem:[#allocation17_spill] sm:$0xff] %v13396_v51  ;;  %15214 = vst [vmem:[#allocation110_spill] sm:$0xff] %v13398_v49  ;;  %v13409_v40 = vsel %vm15217_vm5, %v13400_v24, %v13398_v49  ;;  %v13415_v26 = vpop.permute.xlu1 %9063 }
 0x6cf   : > { %15215 = vst [vmem:[#allocation103_spill] sm:$0xff] %v13400_v24  ;;  %15218 = vst [vmem:[#allocation121_spill] sm:$0xff] %v13409_v40  ;;  %v13424_v7 = vsel %vm15222_vm6, %v13417_v5, %v13419_v34  ;;  %v6444_v40 = vunpack.c.l.bf16 %v12868_v57 }
 0x6d0   : > { %15220 = vst [vmem:[#allocation54_spill] sm:$0xff] %v13415_v26  ;;  %15221 = vst [vmem:[#allocation119_spill] sm:$0xff] %v13419_v34 }
 0x6d1   : > { %v13413_v31 = vpop.permute.xlu0 %9053  ;;  %15223 = vst [vmem:[#allocation8_spill] sm:$0xff] %v13424_v7  ;;  %vm15259_vm5 = vmmov %vm15201_vm0 }
 0x6d2   : > { %15219 = vst [vmem:[#allocation118_spill] sm:$0xff] %v13413_v31  ;;  %v13426_v52 = vpop.permute.xlu1 %9068  ;;  %v6445_v31 = vunpack.c.h.bf16 %v12868_v57  ;;  %vm15260_vm6 = vmmov %vm15201_vm0 }
 0x6d3   : > { %15224 = vst [vmem:[#allocation9_spill] sm:$0xff] %v13426_v52 }
 0x6d5   : > { %v9059_v38 = vpop.permute.xlu0 %9058 }
 0x6d6   : > { %v13430_v49 = vpop.permute.xlu1 %9073  ;;  %v13440_v7 = vadd.high.f32.bf16 %v6444_v40, %v9059_v38  ;;  %v13442_v52 = vadd.low.f32.bf16 %v6443_v54, %v9059_v38 }
 0x6d7   : > { %15226 = vst [vmem:[#allocation11_spill] sm:$0xff] %v13430_v49 }
 0x6d8   : > { %15229 = vst [vmem:[#allocation14_spill] sm:$0xff] %v13440_v7  ;;  %15230 = vst [vmem:[#allocation15_spill] sm:$0xff] %v13442_v52 }
 0x6d9   : > { %v13428_v51 = vpop.permute.xlu0 %9083 }
 0x6da   : > { %15225 = vst [vmem:[#allocation10_spill] sm:$0xff] %v13428_v51  ;;  %v9079_v15 = vpop.permute.xlu1 %9078 }
 0x6db   : > { %v13436_v24 = vadd.high.f32.bf16 %v6446_v35, %v9079_v15  ;;  %v13438_v34 = vadd.low.f32.bf16 %v6445_v31, %v9079_v15 }
 0x6dd   : > { %v9094_v4 = vpop.permute.xlu0 %9093  ;;  %15227 = vst [vmem:[#allocation12_spill] sm:$0xff] %v13436_v24  ;;  %15228 = vst [vmem:[#allocation13_spill] sm:$0xff] %v13438_v34 }
 0x6de   : > { %v9089_v51 = vpop.permute.xlu1 %9088  ;;  %v9509_v49 = vadd.high.f32.bf16 %v13436_v24, %v9094_v4  ;;  %v9510_v19 = vadd.low.f32.bf16 %v13438_v34, %v9094_v4 }
 0x6df   : > { %v9511_v10 = vadd.low.f32.bf16 %v13442_v52, %v9089_v51  ;;  %v9512_v57 = vadd.high.f32.bf16 %v13440_v7, %v9089_v51 }
 0x6e0   : > { %v13446_v26 = vrot.slane %v9509_v49, 1  ;;  %v13448_v33 = vrot.slane %v9510_v19, 1 }
 0x6e1   : > { %v13452_v35 = vrot.slane %v9511_v10, 1  ;;  %v13454_v31 = vrot.slane %v9512_v57, 1  ;;  %v13466_v4 = vpop.permute.xlu0 %9098  ;;  %v6447_v10 = vunpack.c.h.bf16 %v12890_v60  ;;  %v6448_v57 = vunpack.c.l.bf16 %v13036_v42 }
 0x6e2   : > { %15231 = vst [vmem:[#allocation16_spill] sm:$0xff] %v13446_v26  ;;  %15232 = vst [vmem:[#allocation18_spill] sm:$0xff] %v13448_v33  ;;  %v13459_v40 = vsel %vm15235_vm3, %v13448_v33, %v13446_v26 }
 0x6e3   : > { %15233 = vst [vmem:[#allocation19_spill] sm:$0xff] %v13452_v35  ;;  %15234 = vst [vmem:[#allocation20_spill] sm:$0xff] %v13454_v31  ;;  %v13464_v49 = vsel %vm15237_vm1, %v13452_v35, %v13454_v31 }
 0x6e4   : > { %15236 = vst [vmem:[#allocation21_spill] sm:$0xff] %v13459_v40  ;;  %15238 = vst [vmem:[#allocation22_spill] sm:$0xff] %v13464_v49 }
 0x6e5   : > { %15239 = vst [vmem:[#allocation23_spill] sm:$0xff] %v13466_v4  ;;  %v13468_v19 = vpop.permute.xlu0 %9103  ;;  %vm15261_vm3 = vmmov %vm15201_vm0 }
 0x6e6   : > { %15240 = vst [vmem:[#allocation24_spill] sm:$0xff] %v13468_v19  ;;  %vm15262_vm1 = vmmov %vm15201_vm0 }
 0x6e9   : > { %v9114_v38 = vpop.permute.xlu0 %9113 }
 0x6ea   : > { %v13478_v26 = vadd.high.f32.bf16 %v6448_v57, %v9114_v38  ;;  %v13480_v31 = vadd.low.f32.bf16 %v6447_v10, %v9114_v38 }
 0x6ec   : > { %15243 = vst [vmem:[#allocation27_spill] sm:$0xff] %v13478_v26  ;;  %15244 = vst [vmem:[#allocation28_spill] sm:$0xff] %v13480_v31 }
 0x70b   : > { %v13470_v51 = vpop.permute.xlu1 %9108 }
 0x70c   : > { %15241 = vst [vmem:[#allocation25_spill] sm:$0xff] %v13470_v51 }
 0x70e   : > { %v9129_v15 = vpop.permute.xlu0 %9128 }
 0x70f   : > { %v13472_v54 = vpop.permute.xlu1 %9118 }
 0x710   : > { %15242 = vst [vmem:[#allocation26_spill] sm:$0xff] %v13472_v54 }
 0x712   : > { %v13476_v40 = vpop.permute.xlu0 %9138 }
 0x713   : > { %v9124_v24 = vpop.permute.xlu1 %9123 }
 0x714   : > { %v9515_v4 = vadd.low.f32.bf16 %v13480_v31, %v9124_v24  ;;  %v9516_v19 = vadd.high.f32.bf16 %v13478_v26, %v9124_v24  ;;  %v13505_v26 = vld [vmem:[#allocation3 + $0x180] sm:$0x1f] }
 0x715   : > { %15254 = vst [vmem:[#allocation38_spill] sm:$0xff] %v13505_v26 }
 0x716   : > { %v13484_v33 = vpop.permute.xlu0 %9158  ;;  %v13486_v49 = vrot.slane %v9515_v4, 1  ;;  %v13488_v34 = vrot.slane %v9516_v19, 1  ;;  %v6449_v19 = vunpack.c.h.bf16 %v13036_v42 }
 0x717   : > { %15245 = vst [vmem:[#allocation29_spill] sm:$0xff] %v13484_v33  ;;  %v9134_v51 = vpop.permute.xlu1 %9133  ;;  %v6424_v33 = vunpack.c.l.bf16 %v13081_v3 }
 0x718   : > { %15246 = vst [vmem:[#allocation30_spill] sm:$0xff] %v13486_v49  ;;  %15247 = vst [vmem:[#allocation31_spill] sm:$0xff] %v13488_v34  ;;  %v13495_v57 = vsel %vm15201_vm0, %v13486_v49, %v13488_v34  ;;  %v14546_v34 = vrot.slane %v13505_v26, 4  ;;  %v6452_v49 = vunpack.c.l.bf16 %v13300_v14 }
 0x719   : > { %15249 = vst [vmem:[#allocation33_spill] sm:$0xff] %v13495_v57 }
 0x71a   : > { %v13490_v60 = vpop.permute.xlu0 %9168 }
 0x71b   : > { %15248 = vst [vmem:[#allocation32_spill] sm:$0xff] %v13490_v60  ;;  %v13497_v38 = vpop.permute.xlu1 %9143  ;;  %v6450_v60 = vunpack.c.l.bf16 %v13271_v58 }
 0x71c   : > { %15250 = vst [vmem:[#allocation34_spill] sm:$0xff] %v13497_v38 }
 0x71e   : > { %v13499_v10 = vpop.permute.xlu0 %9178 }
 0x71f   : > { %15251 = vst [vmem:[#allocation35_spill] sm:$0xff] %v13499_v10  ;;  %v13501_v31 = vpop.permute.xlu1 %9148 }
 0x720   : > { %15252 = vst [vmem:[#allocation36_spill] sm:$0xff] %v13501_v31  ;;  %v6451_v31 = vunpack.c.h.bf16 %v13271_v58 }
 0x722   : > { %v13503_v24 = vpop.permute.xlu0 %9183 }
 0x723   : > { %15253 = vst [vmem:[#allocation37_spill] sm:$0xff] %v13503_v24  ;;  %v9154_v4 = vpop.permute.xlu1 %9153 }
 0x724   : > { %v13511_v57 = vadd.high.f32.bf16 %v6450_v60, %v9154_v4  ;;  %v13513_v38 = vadd.low.f32.bf16 %v6449_v19, %v9154_v4  ;;  %v13529_v60 = vsel %vm15256_vm2, %v13279_v48, %v14546_v34  ;;  %vm15263_vm2 = vmmov %vm15201_vm0 }
 0x726   : > { %v9189_v10 = vpop.permute.xlu0 %9188  ;;  %v9519_v7 = vadd.low.f32.bf16 %v13513_v38, %v9129_v15  ;;  %v9520_v42 = vadd.high.f32.bf16 %v13511_v57, %v9129_v15 }
 0x727   : > { %v13517_v54 = vpop.permute.xlu1 %9163  ;;  %v13521_v52 = vadd.high.f32.bf16 %v6452_v49, %v9189_v10  ;;  %v13523_v3 = vadd.low.f32.bf16 %v6451_v31, %v9189_v10  ;;  %v7068_v10 = vunpack.c.l.bf16 %v13529_v60 }
 0x728   : > { %15255 = vst [vmem:[#allocation39_spill] sm:$0xff] %v13517_v54  ;;  %v9523_v58 = vadd.high.f32.bf16 %v6424_v33, %v13517_v54  ;;  %v13534_v19 = vrot.slane %v9519_v7, 1  ;;  %v13536_v35 = vrot.slane %v9520_v42, 1 }
 0x729   : > { %v9524_v15 = vadd.low.f32.bf16 %v13523_v3, %v9134_v51  ;;  %v9527_v34 = vadd.high.f32.bf16 %v13521_v52, %v9134_v51 }
 0x72a   : > { %v13532_v4 = vpop.permute.xlu0 %9198  ;;  %v9525_v31 = vadd.high.f32.bf16 %v9523_v58, %v13503_v24  ;;  %v9526_v26 = vadd.high.f32.bf16 %v9523_v58, %v12923_v22  ;;  %v13550_v42 = vsel %vm15258_vm4, %v13534_v19, %v13536_v35  ;;  %v6453_v24 = vunpack.c.h.bf16 %v13300_v14  ;;  %vm15265_vm4 = vmmov %vm15201_vm0 }
 0x72b   : > { %v13539_v49 = vpop.permute.xlu1 %9173  ;;  %v9528_v33 = vadd.high.f32.bf16 %v7068_v10, %v13532_v4  ;;  %v13560_v51 = vrot.slane %v9527_v34, 1  ;;  %v7419_v34 = vsel %vm15261_vm3, %v13146_v6, %v13291_v16  ;;  %v9533_v10 = vadd.low.f32.bf16 %v13149_v18, %v13007_v37  ;;  %vm15271_vm3 = vmmov %vm15201_vm0 }
 0x72c   : > { %15257 = vst [vmem:[#allocation40_spill] sm:$0xff] %v13539_v49  ;;  %6934 = vrot.lane.b32.xlu1 %v9526_v26, %s15204_s14  ;;  %v7413_v7 = vrot.slane %v9525_v31, 1  ;;  %v13554_v49 = vrot.slane %v9524_v15, 1  ;;  %v9535_v6 = vadd.low.f32.bf16 %v13161_v21, %v13027_v28  ;;  %v9536_v18 = vadd.high.f32.bf16 %v13158_v12, %v13027_v28 }
 0x72d   : > { %v9529_v26 = vadd.high.f32.bf16 %v9528_v33, %v13476_v40  ;;  %v9537_v21 = vadd.low.f32.bf16 %v13208_v30, %v13087_v47  ;;  %v9538_v16 = vadd.high.f32.bf16 %v13203_v23, %v13087_v47  ;;  %v7431_v12 = vsel %vm15265_vm4, %v13311_v11, %v13316_v50  ;;  %v15266_v47 = vld [vmem:[#allocation98_spill] sm:$0xff]  ;;  %vm15295_vm4 = vmmov %vm15201_vm0 }
 0x72e   : > { %v7415_v58 = vsel %vm15259_vm5, %v7413_v7, %v13284_v56  ;;  %v13571_v15 = vsel %vm15260_vm6, %v13554_v49, %v13560_v51  ;;  %v9531_v56 = vadd.high.f32.bf16 %v13122_v46, %v12948_v36  ;;  %v9534_v36 = vadd.high.f32.bf16 %v13155_v62, %v13007_v37  ;;  %vm15267_vm5 = vmmov %vm15201_vm0  ;;  %v15284_v7 = vld [vmem:[#allocation10_spill] sm:$0xff] }
 0x72f   : > { %v13552_v54 = vpop.permute.xlu1 %9193  ;;  %7478 = vrot.lane.b32.xlu0 %v7415_v58, %s9700_s24  ;;  %v7423_v37 = vsel %vm15201_vm0, %v13296_v1, %v13307_v0  ;;  %v7427_v62 = vsel %vm15263_vm2, %v13305_v32, %v13309_v8  ;;  %v15264_v1 = vld [vmem:[#allocation120_spill] sm:$0xff]  ;;  %v7435_v23 = vsel %vm15267_vm5, %v13314_v43, %v13318_v63  ;;  %v9543_v8 = vadd.low.f32.bf16 %v13264_v13, %v13375_v55  ;;  %vm15269_vm6 = vmmov %vm15201_vm0  ;;  %v15272_v43 = vld [vmem:[#allocation111_spill] sm:$0xff] }
 0x730   : > { %v13564_v31 = vadd.low.f32.bf16 %v6453_v24, %v13552_v54  ;;  %7480 = vrot.lane.b32.xlu1 %v13330_v17, %s9700_s24  ;;  %v13584_v24 = vrot.slane %v9529_v26, 1  ;;  %v9539_v28 = vadd.low.f32.bf16 %v13226_v61, %v15264_v1  ;;  %v9540_v30 = vadd.high.f32.bf16 %v15266_v47, %v15264_v1  ;;  %v15268_v61 = vld [vmem:[#allocation49_spill] sm:$0xff]  ;;  %v15285_v58 = vld [vmem:[#allocation15_spill] sm:$0xff]  ;;  %vm15292_vm2 = vmmov %vm15201_vm0 }
 0x731   : > { %v9541_v32 = vadd.low.f32.bf16 %v13242_v2, %v15268_v61  ;;  %v9542_v0 = vadd.high.f32.bf16 %v13238_v27, %v15268_v61  ;;  %v7439_v11 = vsel %vm15269_vm6, %v13320_v53, %v13325_v9  ;;  %v9544_v27 = vadd.high.f32.bf16 %v13260_v29, %v13375_v55  ;;  %v15270_v2 = vld [vmem:[#allocation96_spill] sm:$0xff]  ;;  %v15273_v63 = vld [vmem:[#allocation53_spill] sm:$0xff]  ;;  %v15274_v9 = vld [vmem:[#allocation54_spill] sm:$0xff] }
 0x732   : > { %v9532_v14 = vadd.low.f32.bf16 %v13564_v31, %v13476_v40  ;;  %v7443_v13 = vsel %vm15271_vm3, %v15270_v2, %v13417_v5  ;;  %v9545_v50 = vadd.low.f32.bf16 %v13404_v59, %v15272_v43  ;;  %v9546_v53 = vadd.high.f32.bf16 %v15273_v63, %v15272_v43  ;;  %v15275_v29 = vld [vmem:[#allocation52_spill] sm:$0xff]  ;;  %v15281_v55 = vld [vmem:[#allocation109_spill] sm:$0xff]  ;;  %v15282_v5 = vld [vmem:[#allocation19_spill] sm:$0xff] }
 0x733   : > { %7482 = vrot.lane.b32.xlu0 %v7419_v34, %s9700_s24  ;;  %v9548_v59 = vadd.high.f32.bf16 %v15281_v55, %v15274_v9  ;;  %v15283_v40 = vld [vmem:[#allocation110_spill] sm:$0xff]  ;;  %v9549_v26 = vadd.low.f32.bf16 %v15285_v58, %v15284_v7  ;;  %v15297_v47 = vld [vmem:[#allocation21_spill] sm:$0xff]  ;;  %v15299_v61 = vld [vmem:[#allocation28_spill] sm:$0xff]  ;;  %vm15306_vm3 = vcmask 1043456  }
 0x734   : > { %6938 = vrot.lane.b32.xlu1 %v9531_v56, %s15204_s14  ;;  %v13582_v17 = vrot.slane %v9532_v14, 1  ;;  %v7451_v33 = vsel %vm15201_vm0, %v15283_v40, %v15282_v5  ;;  %v15286_v56 = vld [vmem:[#allocation14_spill] sm:$0xff]  ;;  %v15302_v2 = vld [vmem:[#allocation31_spill] sm:$0xff]  ;;  %vm15303_vm5 = vmmov %vm15201_vm0 }
 0x735   : > { %v9550_v14 = vadd.high.f32.bf16 %v15286_v56, %v15284_v7  ;;  %v15287_v34 = vld [vmem:[#allocation26_spill] sm:$0xff]  ;;  %vm15304_vm6 = vmmov %vm15201_vm0 }
 0x736   : > { %v13593_v46 = vsel %vm15262_vm1, %v13582_v17, %v13584_v24  ;;  %vm15279_vm1 = vmmov %vm15201_vm0  ;;  %v5692_v43 = vld [vmem:[#allocation3] sm:$0xf8] }
 0x737   : > { %6940 = vrot.lane.b32.xlu0 %v9533_v10, %s15204_s14  ;;  %v15288_v10 = vld [vmem:[#allocation13_spill] sm:$0xff] }
 0x738   : > { %6942 = vrot.lane.b32.xlu1 %v9534_v36, %s15204_s14  ;;  %v9551_v36 = vadd.low.f32.bf16 %v15288_v10, %v15287_v34  ;;  %v15310_v10 = vld [vmem:[#allocation25_spill] sm:$0xff] }
 0x73b   : > { %6944 = vrot.lane.b32.xlu0 %v9535_v6, %s15204_s14  ;;  %v15289_v6 = vld [vmem:[#allocation22_spill] sm:$0xff] }
 0x73c   : > { %7484 = vrot.lane.b32.xlu1 %v13335_v25, %s9700_s24  ;;  %v9547_v25 = vadd.low.f32.bf16 %v15275_v29, %v15274_v9  ;;  %v5710_v9 = vunpack.c.h.bf16 %v5692_v43 }
 0x73f   : > { %7486 = vrot.lane.b32.xlu0 %v7423_v37, %s9700_s24  ;;  %v15290_v37 = vld [vmem:[#allocation18_spill] sm:$0xff] }
 0x740   : > { %7488 = vrot.lane.b32.xlu1 %v13341_v20, %s9700_s24  ;;  %v15276_v20 = vld [vmem:[#allocation8_spill] sm:$0xff] }
 0x743   : > { %7490 = vrot.lane.b32.xlu0 %v7427_v62, %s9700_s24 }
 0x744   : > { %6946 = vrot.lane.b32.xlu1 %v9536_v18, %s15204_s14  ;;  %v15291_v18 = vld [vmem:[#allocation20_spill] sm:$0xff] }
 0x745   : > { %v7455_v62 = vsel %vm15292_vm2, %v15291_v18, %v15290_v37  ;;  %v15311_v18 = vld [vmem:[#allocation72_spill] sm:$0xff] }
 0x747   : > { %6948 = vrot.lane.b32.xlu0 %v9537_v21, %s15204_s14  ;;  %v15293_v21 = vld [vmem:[#allocation30_spill] sm:$0xff] }
 0x748   : > { %6950 = vrot.lane.b32.xlu1 %v9538_v16, %s15204_s14  ;;  %v15294_v16 = vld [vmem:[#allocation16_spill] sm:$0xff] }
 0x749   : > { %v7459_v1 = vsel %vm15295_vm4, %v15294_v16, %v15293_v21  ;;  %vm15327_vm4 = vmmov %vm15201_vm0 }
 0x74b   : > { %6952 = vrot.lane.b32.xlu0 %v9539_v28, %s15204_s14  ;;  %v15296_v28 = vld [vmem:[#allocation12_spill] sm:$0xff] }
 0x74c   : > { %7492 = vrot.lane.b32.xlu1 %v13346_v41, %s9700_s24  ;;  %v15277_v41 = vld [vmem:[#allocation103_spill] sm:$0xff] }
 0x74f   : > { %7494 = vrot.lane.b32.xlu0 %v7431_v12, %s9700_s24  ;;  %v9552_v12 = vadd.high.f32.bf16 %v15296_v28, %v15287_v34 }
 0x750   : > { %7496 = vrot.lane.b32.xlu1 %v13352_v39, %s9700_s24  ;;  %v15278_v39 = vld [vmem:[#allocation119_spill] sm:$0xff] }
 0x753   : > { %7498 = vrot.lane.b32.xlu0 %v7435_v23, %s9700_s24  ;;  %v15298_v23 = vld [vmem:[#allocation29_spill] sm:$0xff] }
 0x754   : > { %6954 = vrot.lane.b32.xlu1 %v9540_v30, %s15204_s14  ;;  %v9204_v30 = vpop.permute.xlu1 %9203 }
 0x755   : > { %v9555_v63 = vadd.low.f32.bf16 %v13513_v38, %v9204_v30 }
 0x757   : > { %6956 = vrot.lane.b32.xlu0 %v9541_v32, %s15204_s14  ;;  %v9553_v32 = vadd.low.f32.bf16 %v15299_v61, %v15298_v23 }
 0x758   : > { %6958 = vrot.lane.b32.xlu1 %v9542_v0, %s15204_s14  ;;  %v15300_v0 = vld [vmem:[#allocation33_spill] sm:$0xff] }
 0x75b   : > { %6960 = vrot.lane.b32.xlu0 %v9543_v8, %s15204_s14  ;;  %v15301_v8 = vld [vmem:[#allocation27_spill] sm:$0xff] }
 0x75c   : > { %7500 = vrot.lane.b32.xlu1 %v13357_v45, %s9700_s24  ;;  %v7447_v45 = vsel %vm15279_vm1, %v15278_v39, %v15277_v41  ;;  %v9556_v41 = vadd.high.f32.bf16 %v13511_v57, %v9204_v30  ;;  %v15305_v39 = vld [vmem:[#allocation43_spill] sm:$0xff]  ;;  %vm15314_vm1 = vcmask 1040384  }
 0x75d   : > { %vm15324_vm2 = vmmov %vm15314_vm1 }
 0x75f   : > { %7502 = vrot.lane.b32.xlu0 %v7439_v11, %s9700_s24  ;;  %v9554_v11 = vadd.high.f32.bf16 %v15301_v8, %v15298_v23 }
 0x760   : > { %7504 = vrot.lane.b32.xlu1 %v13364_v44, %s9700_s24  ;;  %v15280_v44 = vld [vmem:[#allocation121_spill] sm:$0xff] }
 0x763   : > { %7506 = vrot.lane.b32.xlu0 %v7443_v13, %s9700_s24  ;;  %v7463_v13 = vsel %vm15303_vm5, %v15302_v2, %v13534_v19  ;;  %v15316_v2 = vld [vmem:[#allocation56_spill] sm:$0xff]  ;;  %vm15332_vm5 = vmmov %vm15314_vm1 }
 0x764   : > { %6962 = vrot.lane.b32.xlu1 %v9544_v27, %s15204_s14  ;;  %v9214_v27 = vpop.permute.xlu1 %9213 }
 0x765   : > { %v9567_v56 = vadd.low.f32.bf16 %v13564_v31, %v9214_v27  ;;  %v15313_v31 = vld [vmem:[#allocation66_spill] sm:$0xff] }
 0x767   : > { %6964 = vrot.lane.b32.xlu0 %v9545_v50, %s15204_s14  ;;  %v13722_v50 = vld [vmem:[#allocation3 + $0x180] sm:$0xf] }
 0x768   : > { %6966 = vrot.lane.b32.xlu1 %v9546_v53, %s15204_s14  ;;  %v9209_v53 = vpop.permute.xlu0 %9208  ;;  %v6406_v29 = vrot.slane %v13722_v50, 4  ;;  %v9219_v19 = vpop.permute.xlu1 %9218 }
 0x769   : > { %v9560_v57 = vadd.high.f32.bf16 %v13521_v52, %v9209_v53 }
 0x76a   : > { %v6407_v38 = vsel %vm15306_vm3, %v13279_v48, %v6406_v29 }
 0x76b   : > { %6968 = vrot.lane.b32.xlu0 %v9547_v25, %s15204_s14  ;;  %v7467_v25 = vsel %vm15304_vm6, %v13536_v35, %v13554_v49  ;;  %v9558_v35 = vadd.low.f32.bf16 %v13523_v3, %v9209_v53  ;;  %v15307_v49 = vld [vmem:[#allocation38_spill] sm:$0xff]  ;;  %v6454_v40 = vunpack.c.l.bf16 %v6407_v38  ;;  %v15318_v53 = vld [vmem:[#allocation68_spill] sm:$0xff]  ;;  %vm15333_vm6 = vmmov %vm15314_vm1 }
 0x76c   : > { %7508 = vrot.lane.b32.xlu1 %v15276_v20, %s9700_s24  ;;  %v5709_v20 = vunpack.c.l.bf16 %v5692_v43  ;;  %v15308_v55 = vrot.slane %v15307_v49, 4  ;;  %v6937_v16 = vpop.permute.xlu0 %6936 }
 0x76e   : > { %v9559_v5 = vadd.low.f32.bf16 %v5709_v20, %v15305_v39  ;;  %v15322_v20 = vunpack.c.h.bf16 %v15316_v2 }
 0x76f   : > { %7510 = vrot.lane.b32.xlu0 %v7447_v45, %s9700_s24  ;;  %v9557_v45 = vadd.high.f32.bf16 %v5710_v9, %v15305_v39  ;;  %v15319_v9 = vld [vmem:[#allocation58_spill] sm:$0xff] }
 0x770   : > { %7512 = vrot.lane.b32.xlu1 %v15280_v44, %s9700_s24  ;;  %v7069_v44 = vunpack.c.h.bf16 %v13529_v60  ;;  %v15320_v29 = vunpack.c.l.bf16 %v15319_v9 }
 0x772   : > { %v9562_v48 = vadd.low.f32.bf16 %v7069_v44, %v9219_v19 }
 0x773   : > { %7514 = vrot.lane.b32.xlu0 %v7451_v33, %s9700_s24  ;;  %v6455_v33 = vunpack.c.h.bf16 %v6407_v38 }
 0x774   : > { %6970 = vrot.lane.b32.xlu1 %v9548_v59, %s15204_s14  ;;  %v7070_v59 = vunpack.c.l.bf16 %v15308_v55 }
 0x775   : > { %v9566_v3 = vadd.low.f32.bf16 %v6455_v33, %v13532_v4  ;;  %v15312_v4 = vld [vmem:[#allocation37_spill] sm:$0xff] }
 0x776   : > { %v9561_v7 = vadd.high.f32.bf16 %v7070_v59, %v9219_v19 }
 0x777   : > { %6972 = vrot.lane.b32.xlu0 %v9549_v26, %s15204_s14  ;;  %v9565_v26 = vadd.high.f32.bf16 %v6454_v40, %v13552_v54 }
 0x778   : > { %6974 = vrot.lane.b32.xlu1 %v9550_v14, %s15204_s14  ;;  %v9301_v14 = vld [vmem:[#allocation3 + $0x18] sm:$0xff] }
 0x779   : > { %v5711_v52 = vunpack.c.l.bf16 %v9301_v14  ;;  %v9568_v34 = vadd.high.f32.bf16 %v9565_v26, %v9214_v27  ;;  %v5712_v37 = vunpack.c.h.bf16 %v9301_v14  ;;  %v15315_v27 = vld [vmem:[#allocation122_spill] sm:$0xff] }
 0x77b   : > { %6976 = vrot.lane.b32.xlu0 %v9551_v36, %s15204_s14  ;;  %v9569_v36 = vadd.high.f32.bf16 %v9561_v7, %v15310_v10  ;;  %v15328_v7 = vunpack.c.h.bf16 %v15319_v9  ;;  %v15342_v9 = vld [vmem:[#allocation47_spill] sm:$0xff] }
 0x77c   : > { %7516 = vrot.lane.b32.xlu1 %v15289_v6, %s9700_s24  ;;  %v9570_v6 = vadd.low.f32.bf16 %v9562_v48, %v15310_v10 }
 0x77d   : > { %v7476_v23 = vrot.slane %v9569_v36, 1  ;;  %v9581_v48 = vadd.high.f32.bf16 %v15328_v7, %v15318_v53 }
 0x77e   : > { %v7474_v30 = vrot.slane %v9570_v6, 1 }
 0x77f   : > { %7518 = vrot.lane.b32.xlu0 %v7455_v62, %s9700_s24  ;;  %v9571_v62 = vadd.low.f32.bf16 %v5711_v52, %v15311_v18 }
 0x780   : > { %7522 = vrot.lane.b32.xlu1 %v7459_v1, %s9700_s24  ;;  %v9572_v1 = vadd.low.f32.bf16 %v9566_v3, %v15312_v4  ;;  %v7475_v33 = vsel %vm15327_vm4, %v13584_v24, %v7474_v30 }
 0x781   : > { %v9573_v28 = vadd.low.f32.bf16 %v9571_v62, %v15313_v31 }
 0x783   : > { %7520 = vrot.lane.b32.xlu0 %v15297_v47, %s9700_s24  ;;  %v9574_v47 = vadd.high.f32.bf16 %v5712_v37, %v15311_v18  ;;  %v6199_v8 = vrot.slane %v9573_v28, 7 }
 0x784   : > { %6978 = vrot.lane.b32.xlu1 %v9552_v12, %s15204_s14 }
 0x785   : > { %v9575_v61 = vadd.high.f32.bf16 %v9574_v47, %v15313_v31 }
 0x787   : > { %6980 = vrot.lane.b32.xlu0 %v9553_v32, %s15204_s14  ;;  %v6201_v39 = vrot.slane %v9575_v61, 7 }
 0x788   : > { %7524 = vrot.lane.b32.xlu1 %v15300_v0, %s9700_s24 }
 0x78b   : > { %7526 = vrot.lane.b32.xlu0 %v7463_v13, %s9700_s24  ;;  %v15317_v13 = vunpack.c.l.bf16 %v15316_v2 }
 0x78c   : > { %6982 = vrot.lane.b32.xlu1 %v9554_v11, %s15204_s14 }
 0x78d   : > { %v9576_v43 = vadd.low.f32.bf16 %v15317_v13, %v15315_v27 }
 0x78f   : > { %6984 = vrot.lane.b32.xlu0 %v9555_v63, %s15204_s14  ;;  %v7477_v63 = vsel %vm15201_vm0, %v7474_v30, %v7476_v23  ;;  %v15336_v30 = vld [vmem:[#allocation45_spill] sm:$0xff]  ;;  %v15337_v23 = vld [vmem:[#allocation60_spill] sm:$0xff] }
 0x790   : > { %7530 = vrot.lane.b32.xlu1 %v7467_v25, %s9700_s24  ;;  %v15338_v61 = vunpack.c.h.bf16 %v15337_v23 }
 0x793   : > { %7528 = vrot.lane.b32.xlu0 %v13550_v42, %s9700_s24  ;;  %v15309_v42 = vld [vmem:[#allocation115_spill] sm:$0xff] }
 0x794   : > { %6986 = vrot.lane.b32.xlu1 %v9556_v41, %s15204_s14  ;;  %v9563_v58 = vadd.high.f32.bf16 %v9557_v45, %v15309_v42  ;;  %v9564_v60 = vadd.low.f32.bf16 %v9559_v5, %v15309_v42  ;;  %v9578_v41 = vadd.high.f32.bf16 %v15322_v20, %v15315_v27  ;;  %v15323_v45 = vld [vmem:[#allocation71_spill] sm:$0xff]  ;;  %v15329_v42 = vld [vmem:[#allocation70_spill] sm:$0xff] }
 0x795   : > { %v9579_v38 = vadd.low.f32.bf16 %v9576_v43, %v15323_v45  ;;  %v9583_v24 = vadd.high.f32.bf16 %v9581_v48, %v15329_v42 }
 0x796   : > { %v6197_v54 = vrot.slane %v9563_v58, 7  ;;  %v6196_v21 = vrot.slane %v9564_v60, 7 }
 0x797   : > { %6988 = vrot.lane.b32.xlu0 %v9558_v35, %s15204_s14  ;;  %v6203_v60 = vrot.slane %v9579_v38, 7  ;;  %v6209_v31 = vrot.slane %v9583_v24, 7  ;;  %v15345_v38 = vld [vmem:[#allocation41_spill] sm:$0xff] }
 0x798   : > { %6990 = vrot.lane.b32.xlu1 %v9560_v57, %s15204_s14  ;;  %v6198_v32 = vsel %vm15314_vm1, %v6196_v21, %v6197_v54  ;;  %v6200_v35 = vsel %vm15324_vm2, %v6197_v54, %v6199_v8  ;;  %v9580_v57 = vadd.high.f32.bf16 %v9578_v41, %v15323_v45  ;;  %v15344_v45 = vld [vmem:[#allocation46_spill] sm:$0xff] }
 0x799   : > { %v6293_v19 = vsel %vm11497_vm7, %v6198_v32, 0.0  ;;  %vm15326_vm7 = vmmov %vm15201_vm0  ;;  %v7031_v40 = vadd.f32 %v6937_v16, %v6200_v35  ;;  %v6204_v37 = vsel %vm15332_vm5, %v6201_v39, %v6203_v60  ;;  %v9584_v32 = vadd.high.f32.bf16 %v15338_v61, %v15336_v30  ;;  %v15355_v16 = vld [vmem:[#allocation74_spill] sm:$0xff] }
 0x79a   : > { %v7471_v5 = vsel %vm15326_vm7, %v13560_v51, %v13582_v17  ;;  %v6205_v14 = vrot.slane %v9580_v57, 7  ;;  %v15348_v57 = vunpack.c.h.bf16 %v15345_v38  ;;  %v15359_v61 = vld [vmem:[#allocation90_spill] sm:$0xff]  ;;  %vm15370_vm0 = vmmov %vm15314_vm1 }
 0x79b   : > { %6992 = vrot.lane.b32.xlu0 %v9567_v56, %s15204_s14  ;;  %vm15375_vm4 = vmmov %vm15370_vm0 }
 0x79c   : > { %6994 = vrot.lane.b32.xlu1 %v9568_v34, %s15204_s14  ;;  %v6206_v21 = vsel %vm15333_vm6, %v6203_v60, %v6205_v14  ;;  %vm15382_vm5 = vmmov %vm15370_vm0 }
 0x79d   : > { %v6297_v27 = vsel %vm11590_vm11, %v6206_v21, 0.0  ;;  %vm15350_vm11 = vmmov %vm15314_vm1 }
 0x79e   : > { %v6935_v12 = vpop.permute.xlu1 %6934 }
 0x79f   : > { %6996 = vrot.lane.b32.xlu0 %v9572_v1, %s15204_s14  ;;  %v7030_v44 = vadd.f32 %v6935_v12, %v6293_v19 }
 0x7a0   : > { %7532 = vrot.lane.b32.xlu1 %v13571_v15, %s9700_s24  ;;  %v9577_v15 = vadd.low.f32.bf16 %v15320_v29, %v15318_v53  ;;  %v9586_v29 = vadd.high.f32.bf16 %v9584_v32, %v15342_v9 }
 0x7a1   : > { %v7479_v0 = vpop.permute.xlu0 %7478 }
 0x7a2   : > { %v7481_v11 = vpop.permute.xlu1 %7480  ;;  %v9582_v58 = vadd.low.f32.bf16 %v9577_v15, %v15329_v42  ;;  %v7606_v26 = vadd.f32 %v7479_v0, %v7030_v44  ;;  %v15339_v0 = vunpack.c.l.bf16 %v15337_v23  ;;  %v15346_v44 = vunpack.c.l.bf16 %v15345_v38 }
 0x7a3   : > { %7536 = vrot.lane.b32.xlu0 %v13593_v46, %s9700_s24  ;;  %v7575_v55 = vsel %vm11525_vm9, %v7481_v11, 0.0  ;;  %vm15330_vm9 = vmmov %vm15314_vm1  ;;  %v6213_v35 = vrot.slane %v9586_v29, 7  ;;  %v15365_v29 = vld [vmem:[#allocation84_spill] sm:$0xff] }
 0x7a4   : > { %7540 = vrot.lane.b32.xlu1 %v7477_v63, %s9700_s24  ;;  %v7607_v3 = vadd.f32 %v7575_v55, %v7031_v40  ;;  %v6202_v51 = vsel %vm15330_vm9, %v6199_v8, %v6201_v39  ;;  %v6207_v10 = vrot.slane %v9582_v58, 7  ;;  %v9585_v8 = vadd.low.f32.bf16 %v15339_v0, %v15336_v30  ;;  %v15363_v63 = vld [vmem:[#allocation101_spill] sm:$0xff] }
 0x7a5   : > { %v7483_v46 = vpop.permute.xlu0 %7482  ;;  %v6295_v34 = vsel %vm11509_vm8, %v6202_v51, 0.0  ;;  %vm15335_vm8 = vmmov %vm15314_vm1  ;;  %v9589_v40 = vadd.high.f32.bf16 %v15348_v57, %v15344_v45  ;;  %vm15364_vm3 = vnez %v15363_v63 }
 0x7a6   : > { %v6939_v59 = vpop.permute.xlu1 %6938  ;;  %v7799_v36 = vpack.c.bf16 %v7607_v3, %v7606_v26  ;;  %v6208_v12 = vsel %vm15335_vm8, %v6205_v14, %v6207_v10  ;;  %v9587_v15 = vadd.low.f32.bf16 %v9585_v8, %v15342_v9  ;;  %v15362_v8 = vld [vmem:[#allocation85_spill] sm:$0xff]  ;;  %vm15391_vm8 = vmmov %vm15370_vm0 }
 0x7a7   : > { %7534 = vrot.lane.b32.xlu0 %v7471_v5, %s9700_s24  ;;  %v7032_v6 = vadd.f32 %v6939_v59, %v6295_v34 }
 0x7a8   : > { %7538 = vrot.lane.b32.xlu1 %v7475_v33, %s9700_s24  ;;  %v6211_v5 = vrot.slane %v9587_v15, 7  ;;  %v15349_v33 = vld [vmem:[#allocation86_spill] sm:$0xff]  ;;  %v15366_v15 = vld [vmem:[#allocation117_spill] sm:$0xff]  ;;  %s8076_s24 = sshll.u32 %s9786_s21, 12  ;;  %s15472_s21 = sand.u32 1, %s9688_s18  }
 0x7a9   : > { %v6941_v17 = vpop.permute.xlu0 %6940  ;;  %v7608_v28 = vadd.f32 %v7483_v46, %v7032_v6  ;;  %v9588_v46 = vadd.low.f32.bf16 %v15346_v44, %v15344_v45  ;;  %v15368_v38 = vunpack.c.h.bf16 %v15366_v15  ;;  %s14112_s12 = scalar_lea.hbm %s14177_s11, %s8076_s24  ;;  %s14122_s22 = scalar_lea.sflag [#allocation5], %s15472_s21 }
 0x7aa   : > { %v6943_v56 = vpop.permute.xlu1 %6942  ;;  %v7033_v62 = vadd.f32 %v6941_v17, %v6204_v37 }
 0x7ab   : > { %7670 = vrot.lane.b32.xlu0 %v7606_v26, %s15204_s14  ;;  %v7034_v43 = vadd.f32 %v6943_v56, %v6297_v27  ;;  %v9590_v7 = vadd.low.f32.bf16 %v9588_v46, %v15349_v33  ;;  %v9591_v26 = vadd.high.f32.bf16 %v9589_v40, %v15349_v33  ;;  %v9597_v44 = vadd.high.f32.bf16 %v15368_v38, %v15365_v29  ;;  %v15369_v46 = vld [vmem:[#allocation80_spill] sm:$0xff] }
 0x7ac   : > { %7672 = vrot.lane.b32.xlu1 %v7607_v3, %s15204_s14  ;;  %v6214_v3 = vsel %vm15350_vm11, %v6211_v5, %v6213_v35 }
 0x7ad   : > { %v6945_v18 = vpop.permute.xlu0 %6944  ;;  %v6215_v56 = vrot.slane %v9590_v7, 7  ;;  %v6217_v34 = vrot.slane %v9591_v26, 7 }
 0x7ae   : > { %v7485_v54 = vpop.permute.xlu1 %7484  ;;  %v7035_v2 = vadd.f32 %v6945_v18, %v6208_v12 }
 0x7af   : > { %v7577_v4 = vsel %vm11539_vm10, %v7485_v54, 0.0  ;;  %7831 = vrot.lane.b32.xlu0 %v7799_v36, %s15204_s14  ;;  %vm15343_vm10 = vmmov %vm15314_vm1  ;;  %v6301_v36 = vsel %vm11674_vm15, %v6214_v3, 0.0  ;;  %v15373_v3 = vld [vmem:[#allocation102_spill] sm:$0xff] }
 0x7b0   : > { %v7609_v1 = vadd.f32 %v7577_v4, %v7033_v62  ;;  %v6210_v41 = vsel %vm15343_vm10, %v6207_v10, %v6209_v31  ;;  %v15356_v4 = vld [vmem:[#allocation63_spill] sm:$0xff]  ;;  %vm15361_vm15 = vmmov %vm15314_vm1  ;;  %vm15374_vm7 = vnez %v15373_v3  ;;  %v15377_v10 = vld [vmem:[#allocation62_spill] sm:$0xff] }
 0x7b1   : > { %v7487_v47 = vpop.permute.xlu0 %7486  ;;  %v6299_v59 = vsel %vm11616_vm13, %v6210_v41, 0.0  ;;  %vm15354_vm13 = vmmov %vm15314_vm1  ;;  %v6218_v0 = vsel %vm15361_vm15, %v6215_v56, %v6217_v34  ;;  %v15379_v6 = vunpack.c.l.bf16 %v15377_v10 }
 0x7b2   : > { %v7489_v13 = vpop.permute.xlu1 %7488  ;;  %7676 = vrot.lane.b32.xlu1 %v7609_v1, %s15204_s14  ;;  %v7610_v19 = vadd.f32 %v7487_v47, %v7034_v43  ;;  %v7800_v49 = vpack.c.bf16 %v7609_v1, %v7608_v28  ;;  %v6216_v54 = vsel %vm15354_vm13, %v6213_v35, %v6215_v56  ;;  %v15357_v1 = vunpack.c.h.bf16 %v15356_v4  ;;  %vm15392_vm10 = vmmov %vm15370_vm0 }
 0x7b3   : > { %v7579_v53 = vsel %vm11606_vm12, %v7489_v13, 0.0  ;;  %7674 = vrot.lane.b32.xlu0 %v7608_v28, %s15204_s14  ;;  %vm15351_vm12 = vmmov %vm15314_vm1  ;;  %v15358_v28 = vunpack.c.l.bf16 %v15356_v4 }
 0x7b4   : > { %v7611_v25 = vadd.f32 %v7579_v53, %v7035_v2  ;;  %v6212_v17 = vsel %vm15351_vm12, %v6209_v31, %v6211_v5  ;;  %v9592_v31 = vadd.high.f32.bf16 %v15357_v1, %v15355_v16  ;;  %v6303_v53 = vsel %vm15364_vm3, %v6218_v0, 0.0  ;;  %v15383_v1 = vld [vmem:[#allocation97_spill] sm:$0xff]  ;;  %v15386_v0 = vld [vmem:[#allocation50_spill] sm:$0xff]  ;;  %vm15397_vm13 = vmmov %vm15370_vm0 }
 0x7b5   : > { %v7491_v20 = vpop.permute.xlu0 %7490  ;;  %v9593_v12 = vadd.low.f32.bf16 %v15358_v28, %v15355_v16  ;;  %v9599_v5 = vadd.high.f32.bf16 %v9597_v44, %v15369_v46  ;;  %vm15404_vm15 = vmmov %vm15370_vm0 }
 0x7b6   : > { %v6947_v39 = vpop.permute.xlu1 %6946  ;;  %7680 = vrot.lane.b32.xlu1 %v7611_v25, %s15204_s14  ;;  %v7801_v48 = vpack.c.bf16 %v7611_v25, %v7610_v19  ;;  %v9594_v11 = vadd.high.f32.bf16 %v9592_v31, %v15362_v8  ;;  %v15367_v25 = vunpack.c.l.bf16 %v15366_v15 }
 0x7b7   : > { %7678 = vrot.lane.b32.xlu0 %v7610_v19, %s15204_s14  ;;  %v7036_v42 = vadd.f32 %v6947_v39, %v6299_v59  ;;  %v9595_v27 = vadd.low.f32.bf16 %v9593_v12, %v15362_v8  ;;  %v15387_v8 = vld [vmem:[#allocation42_spill] sm:$0xff] }
 0x7b8   : > { %v9596_v19 = vadd.low.f32.bf16 %v15367_v25, %v15365_v29  ;;  %v6221_v41 = vrot.slane %v9594_v11, 7  ;;  %v15388_v11 = vunpack.c.l.bf16 %v15387_v8  ;;  %v15390_v29 = vld [vmem:[#allocation51_spill] sm:$0xff] }
 0x7b9   : > { %v6949_v58 = vpop.permute.xlu0 %6948  ;;  %v7612_v51 = vadd.f32 %v7491_v20, %v7036_v42  ;;  %v6219_v45 = vrot.slane %v9595_v27, 7 }
 0x7ba   : > { %v6951_v60 = vpop.permute.xlu1 %6950  ;;  %7833 = vrot.lane.b32.xlu1 %v7800_v49, %s15204_s14  ;;  %v7037_v24 = vadd.f32 %v6949_v58, %v6212_v17  ;;  %v9598_v35 = vadd.low.f32.bf16 %v9596_v19, %v15369_v46  ;;  %v6225_v58 = vrot.slane %v9599_v5, 7  ;;  %v9604_v27 = vadd.low.f32.bf16 %v15388_v11, %v15386_v0  ;;  %v15395_v5 = vld [vmem:[#allocation94_spill] sm:$0xff] }
 0x7bb   : > { %7835 = vrot.lane.b32.xlu0 %v7801_v48, %s15204_s14  ;;  %v7038_v18 = vadd.f32 %v6951_v60, %v6301_v36  ;;  %v6222_v57 = vsel %vm15314_vm1, %v6219_v45, %v6221_v41  ;;  %v6220_v40 = vsel %vm15370_vm0, %v6217_v34, %v6219_v45  ;;  %v15371_v60 = vld [vmem:[#allocation92_spill] sm:$0xff]  ;;  %v15378_v36 = vunpack.c.h.bf16 %v15377_v10  ;;  %vm15413_vm1 = vmmov %vm15370_vm0 }
 0x7bc   : > { %v6223_v33 = vrot.slane %v9598_v35, 7  ;;  %vm15372_vm2 = vnez %v15371_v60  ;;  %v9606_v15 = vadd.low.f32.bf16 %v9604_v27, %v15390_v29  ;;  %vm15396_vm12 = vnez %v15395_v5  ;;  %v15399_v60 = vld [vmem:[#allocation65_spill] sm:$0xff]  ;;  %v15412_v27 = vld [vmem:[#allocation11_spill] sm:$0xff] }
 0x7bd   : > { %v6953_v14 = vpop.permute.xlu0 %6952  ;;  %v6305_v26 = vsel %vm15372_vm2, %v6222_v57, 0.0  ;;  %v15401_v3 = vunpack.c.l.bf16 %v15399_v60 }
 0x7be   : > { %v7493_v52 = vpop.permute.xlu1 %7492  ;;  %v7039_v47 = vadd.f32 %v6953_v14, %v6216_v54  ;;  %v6224_v14 = vsel %vm15375_vm4, %v6221_v41, %v6223_v33  ;;  %v6226_v4 = vsel %vm15382_vm5, %v6223_v33, %v6225_v58  ;;  %v6231_v38 = vrot.slane %v9606_v15, 7  ;;  %v15414_v15 = vld [vmem:[#allocation108_spill] sm:$0xff]  ;;  %vm15423_vm4 = vmmov %vm15370_vm0 }
 0x7bf   : > { %v7581_v37 = vsel %vm11625_vm14, %v7493_v52, 0.0  ;;  %7682 = vrot.lane.b32.xlu0 %v7612_v51, %s15204_s14  ;;  %vm15360_vm14 = vnez %v15359_v61  ;;  %v15376_v52 = vld [vmem:[#allocation48_spill] sm:$0xff]  ;;  %vm15415_vm2 = vnez %v15414_v15 }
 0x7c0   : > { %v7613_v62 = vadd.f32 %v7581_v37, %v7037_v24  ;;  %v9600_v34 = vadd.high.f32.bf16 %v15378_v36, %v15376_v52  ;;  %v9601_v37 = vadd.low.f32.bf16 %v15379_v6, %v15376_v52  ;;  %v15405_v36 = vld [vmem:[#allocation118_spill] sm:$0xff] }
 0x7c1   : > { %v7495_v21 = vpop.permute.xlu0 %7494 }
 0x7c2   : > { %v7614_v30 = vadd.f32 %v7495_v21, %v7038_v18  ;;  %v7497_v23 = vpop.permute.xlu1 %7496  ;;  %7684 = vrot.lane.b32.xlu1 %v7613_v62, %s15204_s14  ;;  %v7802_v39 = vpack.c.bf16 %v7613_v62, %v7612_v51  ;;  %v15380_v21 = vld [vmem:[#allocation95_spill] sm:$0xff]  ;;  %v9602_v31 = vadd.high.f32.bf16 %v9600_v34, %v15383_v1  ;;  %v9603_v28 = vadd.low.f32.bf16 %v9601_v37, %v15383_v1 }
 0x7c3   : > { %v7583_v32 = vsel %vm15360_vm14, %v7497_v23, 0.0  ;;  %vm15381_vm9 = vnez %v15380_v21  ;;  %v15384_v23 = vld [vmem:[#allocation88_spill] sm:$0xff] }
 0x7c4   : > { %v7615_v2 = vadd.f32 %v7583_v32, %v7039_v47  ;;  %7686 = vrot.lane.b32.xlu0 %v7614_v30, %s15204_s14  ;;  %vm15385_vm6 = vnez %v15384_v23  ;;  %v6227_v63 = vrot.slane %v9603_v28, 7  ;;  %v15409_v23 = vld [vmem:[#allocation64_spill] sm:$0xff] }
 0x7c5   : > { %v7499_v13 = vpop.permute.xlu0 %7498  ;;  %v6307_v61 = vsel %vm15385_vm6, %v6226_v4, 0.0 }
 0x7c6   : > { %v7803_v43 = vpack.c.bf16 %v7615_v2, %v7614_v30  ;;  %v6955_v9 = vpop.permute.xlu1 %6954  ;;  %7688 = vrot.lane.b32.xlu1 %v7615_v2, %s15204_s14  ;;  %v6228_v45 = vsel %vm15392_vm10, %v6225_v58, %v6227_v63  ;;  %vm15434_vm10 = vmmov %vm15370_vm0 }
 0x7c7   : > { %v7040_v20 = vadd.f32 %v6955_v9, %v6303_v53  ;;  %v15389_v53 = vunpack.c.h.bf16 %v15387_v8  ;;  %v15411_v8 = vunpack.c.h.bf16 %v15409_v23 }
 0x7c8   : > { %7839 = vrot.lane.b32.xlu0 %v7803_v43, %s15204_s14 }
 0x7c9   : > { %v7616_v49 = vadd.f32 %v7499_v13, %v7040_v20  ;;  %v6957_v55 = vpop.permute.xlu0 %6956  ;;  %v6229_v13 = vrot.slane %v9602_v31, 7  ;;  %v9605_v9 = vadd.high.f32.bf16 %v15389_v53, %v15386_v0 }
 0x7ca   : > { %v6959_v59 = vpop.permute.xlu1 %6958  ;;  %7837 = vrot.lane.b32.xlu1 %v7802_v39, %s15204_s14  ;;  %v7041_v48 = vadd.f32 %v6957_v55, %v6220_v40  ;;  %v15393_v55 = vld [vmem:[#allocation107_spill] sm:$0xff] }
 0x7cb   : > { %v7042_v17 = vadd.f32 %v6959_v59, %v6305_v26  ;;  %v9607_v41 = vadd.high.f32.bf16 %v9605_v9, %v15390_v29  ;;  %v6230_v39 = vsel %vm15391_vm8, %v6227_v63, %v6229_v13  ;;  %vm15394_vm11 = vnez %v15393_v55  ;;  %vm15432_vm8 = vmmov %vm15370_vm0 }
 0x7cc   : > { %7690 = vrot.lane.b32.xlu0 %v7616_v49, %s15204_s14  ;;  %v6309_v59 = vsel %vm15394_vm11, %v6230_v39, 0.0  ;;  %v15400_v26 = vunpack.c.h.bf16 %v15399_v60  ;;  %v15419_v39 = vld [vmem:[#allocation67_spill] sm:$0xff] }
 0x7cd   : > { %v6961_v7 = vpop.permute.xlu0 %6960  ;;  %v15421_v55 = vunpack.c.h.bf16 %v15419_v39 }
 0x7ce   : > { %v7501_v42 = vpop.permute.xlu1 %7500  ;;  %v7043_v18 = vadd.f32 %v6961_v7, %v6224_v14  ;;  %v6232_v7 = vsel %vm15397_vm13, %v6229_v13, %v6231_v38  ;;  %vm15440_vm13 = vmmov %vm15370_vm0 }
 0x7cf   : > { %v7585_v51 = vsel %vm15374_vm7, %v7501_v42, 0.0  ;;  %v15398_v42 = vld [vmem:[#allocation91_spill] sm:$0xff] }
 0x7d0   : > { %v7617_v56 = vadd.f32 %v7585_v51, %v7041_v48  ;;  %v9608_v58 = vadd.high.f32.bf16 %v15400_v26, %v15398_v42  ;;  %v9609_v51 = vadd.low.f32.bf16 %v15401_v3, %v15398_v42  ;;  %v15425_v3 = vld [vmem:[#allocation100_spill] sm:$0xff] }
 0x7d1   : > { %v7503_v24 = vpop.permute.xlu0 %7502  ;;  %vm15426_vm5 = vnez %v15425_v3 }
 0x7d2   : > { %v7618_v62 = vadd.f32 %v7503_v24, %v7042_v17  ;;  %v7505_v54 = vpop.permute.xlu1 %7504  ;;  %7692 = vrot.lane.b32.xlu1 %v7617_v56, %s15204_s14  ;;  %v7804_v43 = vpack.c.bf16 %v7617_v56, %v7616_v49  ;;  %v6233_v49 = vrot.slane %v9607_v41, 7  ;;  %v15402_v24 = vld [vmem:[#allocation93_spill] sm:$0xff]  ;;  %v9610_v34 = vadd.high.f32.bf16 %v9608_v58, %v15405_v36 }
 0x7d3   : > { %v7587_v16 = vsel %vm15381_vm9, %v7505_v54, 0.0  ;;  %vm15403_vm14 = vnez %v15402_v24  ;;  %v9611_v6 = vadd.low.f32.bf16 %v9609_v51, %v15405_v36  ;;  %v15406_v54 = vld [vmem:[#allocation104_spill] sm:$0xff]  ;;  %v15418_v41 = vld [vmem:[#allocation9_spill] sm:$0xff]  ;;  %vm15424_vm9 = vmmov %vm15370_vm0 }
 0x7d4   : > { %v7619_v12 = vadd.f32 %v7587_v16, %v7043_v18  ;;  %7694 = vrot.lane.b32.xlu0 %v7618_v62, %s15204_s14  ;;  %v6234_v10 = vsel %vm15404_vm15, %v6231_v38, %v6233_v49  ;;  %vm15407_vm3 = vnez %v15406_v54  ;;  %v6237_v1 = vrot.slane %v9610_v34, 7 }
 0x7d5   : > { %v7507_v47 = vpop.permute.xlu0 %7506  ;;  %v6311_v21 = vsel %vm15407_vm3, %v6234_v10, 0.0  ;;  %v6235_v28 = vrot.slane %v9611_v6, 7 }
 0x7d6   : > { %v7805_v30 = vpack.c.bf16 %v7619_v12, %v7618_v62  ;;  %v6963_v32 = vpop.permute.xlu1 %6962  ;;  %7696 = vrot.lane.b32.xlu1 %v7619_v12, %s15204_s14 }
 0x7d7   : > { %v7044_v2 = vadd.f32 %v6963_v32, %v6307_v61  ;;  %v15410_v61 = vunpack.c.l.bf16 %v15409_v23  ;;  %v6238_v13 = vsel %vm15413_vm1, %v6235_v28, %v6237_v1  ;;  %v6236_v63 = vsel %vm15370_vm0, %v6233_v49, %v6235_v28  ;;  %vm15457_vm1 = vmmov %vm15370_vm0 }
 0x7d8   : > { %7843 = vrot.lane.b32.xlu0 %v7805_v30, %s15204_s14  ;;  %v15408_v30 = vld [vmem:[#allocation17_spill] sm:$0xff]  ;;  %v9617_v49 = vadd.high.f32.bf16 %v15421_v55, %v15418_v41 }
 0x7d9   : > { %v7620_v25 = vadd.f32 %v7507_v47, %v7044_v2  ;;  %v6965_v19 = vpop.permute.xlu0 %6964  ;;  %v9612_v32 = vadd.low.f32.bf16 %v15410_v61, %v15408_v30  ;;  %v9613_v11 = vadd.high.f32.bf16 %v15411_v8, %v15408_v30  ;;  %v15435_v30 = vld [vmem:[#allocation36_spill] sm:$0xff]  ;;  %v15436_v61 = vld [vmem:[#allocation99_spill] sm:$0xff] }
 0x7da   : > { %v6967_v20 = vpop.permute.xlu1 %6966  ;;  %7841 = vrot.lane.b32.xlu1 %v7804_v43, %s15204_s14  ;;  %v7045_v46 = vadd.f32 %v6965_v19, %v6228_v45  ;;  %v15416_v19 = vld [vmem:[#allocation87_spill] sm:$0xff]  ;;  %v15420_v45 = vunpack.c.l.bf16 %v15419_v39  ;;  %vm15437_vm11 = vnez %v15436_v61 }
 0x7db   : > { %v7046_v40 = vadd.f32 %v6967_v20, %v6309_v59  ;;  %v9614_v2 = vadd.low.f32.bf16 %v9612_v32, %v15412_v27  ;;  %v9615_v43 = vadd.high.f32.bf16 %v9613_v11, %v15412_v27  ;;  %vm15417_vm7 = vnez %v15416_v19  ;;  %v15438_v27 = vld [vmem:[#allocation105_spill] sm:$0xff] }
 0x7dc   : > { %7698 = vrot.lane.b32.xlu0 %v7620_v25, %s15204_s14  ;;  %v9616_v38 = vadd.low.f32.bf16 %v15420_v45, %v15418_v41  ;;  %v15442_v45 = vld [vmem:[#allocation55_spill] sm:$0xff] }
 0x7dd   : > { %v6969_v44 = vpop.permute.xlu0 %6968  ;;  %v6241_v59 = vrot.slane %v9615_v43, 7  ;;  %vm15443_vm15 = vnez %v15442_v45 }
 0x7de   : > { %v7509_v35 = vpop.permute.xlu1 %7508  ;;  %v7047_v17 = vadd.f32 %v6969_v44, %v6232_v7 }
 0x7df   : > { %v7589_v57 = vsel %vm15396_vm12, %v7509_v35, 0.0  ;;  %vm15439_vm12 = vnez %v15438_v27 }
 0x7e0   : > { %v7621_v33 = vadd.f32 %v7589_v57, %v7045_v46  ;;  %v6239_v46 = vrot.slane %v9614_v2, 7  ;;  %v15422_v57 = vld [vmem:[#allocation24_spill] sm:$0xff] }
 0x7e1   : > { %v7511_v48 = vpop.permute.xlu0 %7510 }
 0x7e2   : > { %v7622_v56 = vadd.f32 %v7511_v48, %v7046_v40  ;;  %v7513_v14 = vpop.permute.xlu1 %7512  ;;  %7700 = vrot.lane.b32.xlu1 %v7621_v33, %s15204_s14  ;;  %v7806_v31 = vpack.c.bf16 %v7621_v33, %v7620_v25  ;;  %v6313_v25 = vsel %vm15415_vm2, %v6238_v13, 0.0  ;;  %v9618_v40 = vadd.low.f32.bf16 %v9616_v38, %v15422_v57  ;;  %vm15460_vm2 = vmmov %vm15457_vm1 }
 0x7e3   : > { %v7591_v52 = vsel %vm15403_vm14, %v7513_v14, 0.0  ;;  %v9619_v48 = vadd.high.f32.bf16 %v9617_v49, %v15422_v57  ;;  %v6240_v42 = vsel %vm15423_vm4, %v6237_v1, %v6239_v46  ;;  %v6242_v58 = vsel %vm15424_vm9, %v6239_v46, %v6241_v59  ;;  %vm15441_vm14 = vmmov %vm15370_vm0  ;;  %v15444_v46 = vld [vmem:[#allocation34_spill] sm:$0xff] }
 0x7e4   : > { %v7623_v37 = vadd.f32 %v7591_v52, %v7047_v17  ;;  %7702 = vrot.lane.b32.xlu0 %v7622_v56, %s15204_s14  ;;  %v15427_v52 = vld [vmem:[#allocation106_spill] sm:$0xff] }
 0x7e5   : > { %v7515_v18 = vpop.permute.xlu0 %7514  ;;  %v6245_v14 = vrot.slane %v9619_v48, 7  ;;  %vm15428_vm6 = vnez %v15427_v52 }
 0x7e6   : > { %v7807_v62 = vpack.c.bf16 %v7623_v37, %v7622_v56  ;;  %v6971_v16 = vpop.permute.xlu1 %6970  ;;  %7704 = vrot.lane.b32.xlu1 %v7623_v37, %s15204_s14  ;;  %v6243_v56 = vrot.slane %v9618_v40, 7  ;;  %v6315_v10 = vsel %vm15428_vm6, %v6242_v58, 0.0  ;;  %v15429_v37 = vld [vmem:[#allocation23_spill] sm:$0xff]  ;;  %v15448_v40 = vld [vmem:[#allocation114_spill] sm:$0xff]  ;;  %vm15467_vm6 = vmmov %vm15457_vm1 }
 0x7e7   : > { %v7048_v4 = vadd.f32 %v6971_v16, %v6311_v21  ;;  %vm15449_vm3 = vnez %v15448_v40 }
 0x7e8   : > { %7847 = vrot.lane.b32.xlu0 %v7807_v62, %s15204_s14  ;;  %v6244_v21 = vsel %vm15432_vm8, %v6241_v59, %v6243_v56 }
 0x7e9   : > { %v7624_v12 = vadd.f32 %v7515_v18, %v7048_v4  ;;  %v6973_v47 = vpop.permute.xlu0 %6972  ;;  %v15430_v18 = vld [vmem:[#allocation44_spill] sm:$0xff] }
 0x7ea   : > { %v6975_v0 = vpop.permute.xlu1 %6974  ;;  %7845 = vrot.lane.b32.xlu1 %v7806_v31, %s15204_s14  ;;  %v7049_v9 = vadd.f32 %v6973_v47, %v6236_v63  ;;  %v15431_v62 = vunpack.c.l.bf16 %v15430_v18  ;;  %v15433_v4 = vunpack.c.h.bf16 %v15430_v18  ;;  %v6246_v47 = vsel %vm15434_vm10, %v6243_v56, %v6245_v14 }
 0x7eb   : > { %v7050_v44 = vadd.f32 %v6975_v0, %v6313_v25  ;;  %v6317_v2 = vsel %vm15439_vm12, %v6246_v47, 0.0 }
 0x7ec   : > { %7706 = vrot.lane.b32.xlu0 %v7624_v12, %s15204_s14  ;;  %v9620_v54 = vadd.low.f32.bf16 %v15431_v62, %v15429_v37  ;;  %v9621_v1 = vadd.high.f32.bf16 %v15433_v4, %v15429_v37  ;;  %v15456_v62 = vld [vmem:[#allocation39_spill] sm:$0xff] }
 0x7ed   : > { %v6977_v53 = vpop.permute.xlu0 %6976 }
 0x7ee   : > { %v7517_v29 = vpop.permute.xlu1 %7516  ;;  %v7051_v60 = vadd.f32 %v6977_v53, %v6240_v42  ;;  %v9622_v23 = vadd.low.f32.bf16 %v9620_v54, %v15435_v30  ;;  %v9623_v0 = vadd.high.f32.bf16 %v9621_v1, %v15435_v30 }
 0x7ef   : > { %v7593_v20 = vsel %vm15417_vm7, %v7517_v29, 0.0  ;;  %vm15461_vm7 = vmmov %vm15457_vm1 }
 0x7f0   : > { %v7625_v35 = vadd.f32 %v7593_v20, %v7049_v9  ;;  %v6247_v63 = vrot.slane %v9622_v23, 7  ;;  %v6249_v53 = vrot.slane %v9623_v0, 7  ;;  %v15458_v23 = vld [vmem:[#allocation113_spill] sm:$0xff] }
 0x7f1   : > { %v7519_v5 = vpop.permute.xlu0 %7518  ;;  %vm15459_vm0 = vnez %v15458_v23 }
 0x7f2   : > { %v7626_v33 = vadd.f32 %v7519_v5, %v7050_v44  ;;  %v7523_v7 = vpop.permute.xlu1 %7522  ;;  %7708 = vrot.lane.b32.xlu1 %v7625_v35, %s15204_s14  ;;  %v7808_v31 = vpack.c.bf16 %v7625_v35, %v7624_v12  ;;  %v6248_v19 = vsel %vm15440_vm13, %v6245_v14, %v6247_v63  ;;  %v6250_v39 = vsel %vm15441_vm14, %v6247_v63, %v6249_v53  ;;  %v15445_v35 = vld [vmem:[#allocation69_spill] sm:$0xff] }
 0x7f3   : > { %v15446_v55 = vunpack.c.l.bf16 %v15445_v35  ;;  %v15447_v5 = vunpack.c.h.bf16 %v15445_v35  ;;  %v15464_v63 = vld [vmem:[#allocation61_spill] sm:$0xff] }
 0x7f4   : > { %7710 = vrot.lane.b32.xlu0 %v7626_v33, %s15204_s14  ;;  %vm15465_vm9 = vnez %v15464_v63 }
 0x7f5   : > { %v7521_v26 = vpop.permute.xlu0 %7520  ;;  %v9624_v49 = vadd.low.f32.bf16 %v15446_v55, %v15444_v46  ;;  %v9625_v57 = vadd.high.f32.bf16 %v15447_v5, %v15444_v46 }
 0x7f6   : > { %v7595_v51 = vsel %vm15426_vm5, %v7521_v26, 0.0  ;;  %v6979_v17 = vpop.permute.xlu1 %6978  ;;  %v15451_v26 = vld [vmem:[#allocation73_spill] sm:$0xff]  ;;  %vm15466_vm5 = vmmov %vm15457_vm1 }
 0x7f7   : > { %v7627_v24 = vadd.f32 %v7595_v51, %v7051_v60  ;;  %v7052_v34 = vadd.f32 %v6979_v17, %v6315_v10  ;;  %v15450_v60 = vld [vmem:[#allocation32_spill] sm:$0xff]  ;;  %v15452_v58 = vunpack.c.l.bf16 %v15451_v26  ;;  %v15453_v17 = vld [vmem:[#allocation35_spill] sm:$0xff]  ;;  %v5741_v10 = vunpack.c.l.bf16 %v13722_v50 }
 0x7f8   : > { %v9627_v56 = vadd.low.f32.bf16 %v9624_v49, %v15453_v17  ;;  %v9628_v14 = vadd.high.f32.bf16 %v9625_v57, %v15453_v17 }
 0x7f9   : > { %v7809_v36 = vpack.c.bf16 %v7627_v24, %v7626_v33  ;;  %v6981_v6 = vpop.permute.xlu0 %6980  ;;  %7712 = vrot.lane.b32.xlu1 %v7627_v24, %s15204_s14  ;;  %v7628_v8 = vadd.f32 %v7523_v7, %v7052_v34  ;;  %v6319_v33 = vsel %vm15449_vm3, %v6250_v39, 0.0  ;;  %v9626_v3 = vadd.low.f32.bf16 %v15452_v58, %v15450_v60  ;;  %v15454_v24 = vld [vmem:[#allocation40_spill] sm:$0xff] }
 0x7fa   : > { %v7525_v16 = vpop.permute.xlu1 %7524  ;;  %v7053_v28 = vadd.f32 %v6981_v6, %v6244_v21  ;;  %v15455_v6 = vunpack.c.h.bf16 %v15451_v26  ;;  %v9631_v54 = vadd.low.f32.bf16 %v5741_v10, %v15456_v62  ;;  %v6251_v21 = vrot.slane %v9627_v56, 7 }
 0x7fb   : > { %7851 = vrot.lane.b32.xlu0 %v7809_v36, %s15204_s14  ;;  %v7597_v32 = vsel %vm15437_vm11, %v7525_v16, 0.0  ;;  %v9629_v52 = vadd.low.f32.bf16 %v9626_v3, %v15454_v24  ;;  %v6253_v16 = vrot.slane %v9628_v14, 7  ;;  %vm7766_vm11 = vcmask 1048320  }
 0x7fc   : > { %v7629_v13 = vadd.f32 %v7597_v32, %v7053_v28  ;;  %v9630_v37 = vadd.high.f32.bf16 %v15455_v6, %v15450_v60  ;;  %v9633_v30 = vadd.low.f32.bf16 %v9631_v54, %v12923_v22 }
 0x7fd   : > { %v7527_v11 = vpop.permute.xlu0 %7526  ;;  %7849 = vrot.lane.b32.xlu1 %v7808_v31, %s15204_s14  ;;  %v6255_v1 = vrot.slane %v9629_v52, 7  ;;  %v6252_v31 = vsel %vm15457_vm1, %v6249_v53, %v6251_v21  ;;  %v6254_v0 = vsel %vm15460_vm2, %v6251_v21, %v6253_v16 }
 0x7fe   : > { %v6983_v12 = vpop.permute.xlu1 %6982  ;;  %v7810_v25 = vpack.c.bf16 %v7629_v13, %v7628_v8  ;;  %v9632_v4 = vadd.high.f32.bf16 %v9630_v37, %v15454_v24  ;;  %v6321_v22 = vsel %vm15465_vm9, %v6254_v0, 0.0  ;;  %v6259_v53 = vrot.slane %v9633_v30, 7 }
 0x7ff   : > { %v7054_v43 = vadd.f32 %v6983_v12, %v6317_v2  ;;  %7714 = vrot.lane.b32.xlu0 %v7628_v8, %s15204_s14  ;;  %v6256_v8 = vsel %vm15461_vm7, %v6253_v16, %v6255_v1  ;;  %v15462_v12 = vld [vmem:[#allocation57_spill] sm:$0xff] }
 0x800   : > { %v6257_v32 = vrot.slane %v9632_v4, 7  ;;  %vm15463_vm4 = vnez %v15462_v12 }
 0x801   : > { %v7630_v9 = vadd.f32 %v7527_v11, %v7054_v43  ;;  %v6985_v29 = vpop.permute.xlu0 %6984  ;;  %7716 = vrot.lane.b32.xlu1 %v7629_v13, %s15204_s14 }
 0x802   : > { %v7531_v15 = vpop.permute.xlu1 %7530  ;;  %v7055_v20 = vadd.f32 %v6985_v29, %v6248_v19  ;;  %v15468_v19 = vld [vmem:[#allocation7_spill] sm:$0xff] }
 0x803   : > { %7718 = vrot.lane.b32.xlu0 %v7630_v9, %s15204_s14  ;;  %vm15469_vm8 = vnez %v15468_v19 }
 0x805   : > { %v7529_v41 = vpop.permute.xlu0 %7528  ;;  %7853 = vrot.lane.b32.xlu1 %v7810_v25, %s15204_s14  ;;  %v6260_v25 = vsel %vm15467_vm6, %v6257_v32, %v6259_v53 }
 0x806   : > { %v7599_v38 = vsel %vm15443_vm15, %v7529_v41, 0.0  ;;  %v6987_v44 = vpop.permute.xlu1 %6986 }
 0x807   : > { %v7631_v59 = vadd.f32 %v7599_v38, %v7055_v20  ;;  %v7056_v48 = vadd.f32 %v6987_v44, %v6319_v33  ;;  %v15470_v44 = vld [vmem:[#allocation112_spill] sm:$0xff] }
 0x808   : > { %vm15471_vm10 = vnez %v15470_v44 }
 0x809   : > { %v7811_v7 = vpack.c.bf16 %v7631_v59, %v7630_v9  ;;  %v6989_v42 = vpop.permute.xlu0 %6988  ;;  %7720 = vrot.lane.b32.xlu1 %v7631_v59, %s15204_s14  ;;  %v7632_v36 = vadd.f32 %v7531_v15, %v7056_v48  ;;  %v6258_v15 = vsel %vm15466_vm5, %v6255_v1, %v6257_v32 }
 0x80a   : > { %v6991_v51 = vpop.permute.xlu1 %6990  ;;  %v7057_v50 = vadd.f32 %v6989_v42, %v6252_v31  ;;  %v6323_v46 = vsel %vm15471_vm10, %v6258_v15, 0.0 }
 0x80b   : > { %7855 = vrot.lane.b32.xlu0 %v7811_v7, %s15204_s14  ;;  %v7058_v29 = vadd.f32 %v6991_v51, %v6321_v22 }
 0x80d   : > { %v6993_v34 = vpop.permute.xlu0 %6992 }
 0x80e   : > { %v6995_v18 = vpop.permute.xlu1 %6994  ;;  %v7059_v27 = vadd.f32 %v6993_v34, %v6256_v8 }
 0x80f   : > { %7722 = vrot.lane.b32.xlu0 %v7632_v36, %s15204_s14  ;;  %v7060_v35 = vadd.f32 %v6995_v18, %v6323_v46 }
 0x811   : > { %v6997_v28 = vpop.permute.xlu0 %6996 }
 0x812   : > { %v7533_v47 = vpop.permute.xlu1 %7532  ;;  %v7061_v39 = vadd.f32 %v6997_v28, %v6260_v25 }
 0x813   : > { %v7601_v61 = vsel %vm15459_vm0, %v7533_v47, 0.0 }
 0x814   : > { %v7633_v11 = vadd.f32 %v7601_v61, %v7057_v50 }
 0x815   : > { %v7537_v2 = vpop.permute.xlu0 %7536 }
 0x816   : > { %v7603_v13 = vsel %vm15463_vm4, %v7537_v2, 0.0  ;;  %v7541_v43 = vpop.permute.xlu1 %7540  ;;  %7724 = vrot.lane.b32.xlu1 %v7633_v11, %s15204_s14  ;;  %v7812_v57 = vpack.c.bf16 %v7633_v11, %v7632_v36 }
 0x817   : > { %v7635_v9 = vadd.f32 %v7603_v13, %v7059_v27  ;;  %v7605_v20 = vsel %vm15469_vm8, %v7541_v43, 0.0 }
 0x818   : > { %v7637_v55 = vadd.f32 %v7605_v20, %v7061_v39 }
 0x819   : > { %v7535_v41 = vpop.permute.xlu0 %7534 }
 0x81a   : > { %v7634_v45 = vadd.f32 %v7535_v41, %v7058_v29  ;;  %v7539_v38 = vpop.permute.xlu1 %7538  ;;  %7728 = vrot.lane.b32.xlu1 %v7635_v9, %s15204_s14 }
 0x81b   : > { %v7636_v59 = vadd.f32 %v7539_v38, %v7060_v35 }
 0x81c   : > { %7726 = vrot.lane.b32.xlu0 %v7634_v45, %s15204_s14  ;;  %v7813_v33 = vpack.c.bf16 %v7635_v9, %v7634_v45 }
 0x81d   : > { %v7671_v49 = vpop.permute.xlu0 %7670  ;;  %v7814_v7 = vpack.c.bf16 %v7637_v55, %v7636_v59 }
 0x81e   : > { %7767 = vst.msk [vmem:[%s12064_s30] sm:$0xff] %vm7766_vm11, %v7671_v49  ;;  %7732 = vrot.lane.b32.xlu1 %v7637_v55, %s15204_s14  ;;  %v7673_v5 = vpop.permute.xlu1 %7672 }
 0x81f   : > { %7768 = vst.msk [vmem:[%s12064_s30 + $0x8] sm:$0xff] %vm7766_vm11, %v7673_v5 }
 0x820   : > { %7730 = vrot.lane.b32.xlu0 %v7636_v59, %s15204_s14 }
 0x821   : > { %v7832_v40 = vpop.permute.xlu0 %7831 }
 0x822   : > { %7879 = vst.msk [vmem:[#allocation2] sm:$0xff] %vm7766_vm11, %v7832_v40  ;;  %7857 = vrot.lane.b32.xlu1 %v7812_v57, %s15204_s14 }
 0x824   : > { %v7677_v48 = vpop.permute.xlu1 %7676  ;;  %7859 = vrot.lane.b32.xlu0 %v7813_v33, %s15204_s14 }
 0x825   : > { %7770 = vst.msk [vmem:[%s12064_s30 + $0x18] sm:$0xff] %vm7766_vm11, %v7677_v48  ;;  %v7675_v42 = vpop.permute.xlu0 %7674 }
 0x826   : > { %7769 = vst.msk [vmem:[%s12064_s30 + $0x10] sm:$0xff] %vm7766_vm11, %v7675_v42  ;;  %7861 = vrot.lane.b32.xlu1 %v7814_v7, %s15204_s14  ;;  %s9638_s14 = sshll.u32 %s9702_s13, 4  ;;  %s9639_s14 = int_to_ptr.vmem [resolvable:$false] %s9638_s14 }
 0x827   : > { %s9640_s24 = scalar_lea.vmem %s9639_s14, 8192  ;;  %p9641_p0 = scmp.lt.s32.totalorder %s14114_s15, %s9639_s14 }
 0x828   : > { %v7681_v60 = vpop.permute.xlu1 %7680  ;;  %p9642_p1 = scmp.lt.s32.totalorder %s9640_s24, %s9634_s25 }
 0x829   : > { %7772 = vst.msk [vmem:[%s12064_s30 + $0x28] sm:$0xff] %vm7766_vm11, %v7681_v60  ;;  %v7679_v26 = vpop.permute.xlu0 %7678 }
 0x82a   : > { %7771 = vst.msk [vmem:[%s12064_s30 + $0x20] sm:$0xff] %vm7766_vm11, %v7679_v26  ;;  %p9643_p2 = por %p9642_p1, %p9641_p0 }
 0x82c   : > { %v7834_v58 = vpop.permute.xlu1 %7833  ;;  %p9644_p3 = pnand %p9643_p2, %p9637_p13 }
 0x82d   : > { %7880 = vst.msk [vmem:[#allocation2 + $0x8] sm:$0xff] %vm7766_vm11, %v7834_v58  ;;  %v7836_v3 = vpop.permute.xlu0 %7835 }
 0x82e   : > { %7881 = vst.msk [vmem:[#allocation2 + $0x10] sm:$0xff] %vm7766_vm11, %v7836_v3 }
 0x831   : > { %v7683_v51 = vpop.permute.xlu0 %7682 }
 0x832   : > { %7773 = vst.msk [vmem:[%s12064_s30 + $0x30] sm:$0xff] %vm7766_vm11, %v7683_v51 }
 0x834   : > { %v7685_v17 = vpop.permute.xlu1 %7684 }
 0x835   : > { %7774 = vst.msk [vmem:[%s12064_s30 + $0x38] sm:$0xff] %vm7766_vm11, %v7685_v17 }
 0x836   : > { %v7687_v56 = vpop.permute.xlu0 %7686 }
 0x837   : > { %7775 = vst.msk [vmem:[%s12064_s30 + $0x40] sm:$0xff] %vm7766_vm11, %v7687_v56 }
 0x838   : > { %v7689_v14 = vpop.permute.xlu1 %7688 }
 0x839   : > { %7776 = vst.msk [vmem:[%s12064_s30 + $0x48] sm:$0xff] %vm7766_vm11, %v7689_v14 }
 0x83a   : > { %v7840_v24 = vpop.permute.xlu0 %7839 }
 0x83b   : > { %7883 = vst.msk [vmem:[#allocation2 + $0x20] sm:$0xff] %vm7766_vm11, %v7840_v24 }
 0x83c   : > { %v7838_v52 = vpop.permute.xlu1 %7837 }
 0x83d   : > { %7882 = vst.msk [vmem:[#allocation2 + $0x18] sm:$0xff] %vm7766_vm11, %v7838_v52 }
 0x83e   : > { %v7691_v10 = vpop.permute.xlu0 %7690 }
 0x83f   : > { %7777 = vst.msk [vmem:[%s12064_s30 + $0x50] sm:$0xff] %vm7766_vm11, %v7691_v10 }
 0x844   : > { %v7693_v36 = vpop.permute.xlu1 %7692 }
 0x845   : > { %7778 = vst.msk [vmem:[%s12064_s30 + $0x58] sm:$0xff] %vm7766_vm11, %v7693_v36 }
 0x846   : > { %v7695_v34 = vpop.permute.xlu0 %7694 }
 0x847   : > { %7779 = vst.msk [vmem:[%s12064_s30 + $0x60] sm:$0xff] %vm7766_vm11, %v7695_v34 }
 0x848   : > { %v7697_v6 = vpop.permute.xlu1 %7696 }
 0x849   : > { %7780 = vst.msk [vmem:[%s12064_s30 + $0x68] sm:$0xff] %vm7766_vm11, %v7697_v6 }
 0x84a   : > { %v7844_v37 = vpop.permute.xlu0 %7843 }
 0x84b   : > { %7885 = vst.msk [vmem:[#allocation2 + $0x30] sm:$0xff] %vm7766_vm11, %v7844_v37 }
 0x84c   : > { %v7842_v18 = vpop.permute.xlu1 %7841 }
 0x84d   : > { %7884 = vst.msk [vmem:[#allocation2 + $0x28] sm:$0xff] %vm7766_vm11, %v7842_v18 }
 0x84e   : > { %v7699_v62 = vpop.permute.xlu0 %7698 }
 0x84f   : > { %7781 = vst.msk [vmem:[%s12064_s30 + $0x70] sm:$0xff] %vm7766_vm11, %v7699_v62 }
 0x854   : > { %v7701_v54 = vpop.permute.xlu1 %7700 }
 0x855   : > { %7782 = vst.msk [vmem:[%s12064_s30 + $0x78] sm:$0xff] %vm7766_vm11, %v7701_v54 }
 0x856   : > { %v7703_v21 = vpop.permute.xlu0 %7702 }
 0x857   : > { %7783 = vst.msk [vmem:[%s12064_s30 + $0x80] sm:$0xff] %vm7766_vm11, %v7703_v21 }
 0x858   : > { %v7705_v16 = vpop.permute.xlu1 %7704 }
 0x859   : > { %7784 = vst.msk [vmem:[%s12064_s30 + $0x88] sm:$0xff] %vm7766_vm11, %v7705_v16 }
 0x85a   : > { %v7848_v4 = vpop.permute.xlu0 %7847 }
 0x85b   : > { %7887 = vst.msk [vmem:[#allocation2 + $0x40] sm:$0xff] %vm7766_vm11, %v7848_v4 }
 0x85c   : > { %v7846_v1 = vpop.permute.xlu1 %7845 }
 0x85d   : > { %7886 = vst.msk [vmem:[#allocation2 + $0x38] sm:$0xff] %vm7766_vm11, %v7846_v1 }
 0x85e   : > { %v7707_v31 = vpop.permute.xlu0 %7706 }
 0x85f   : > { %7785 = vst.msk [vmem:[%s12064_s30 + $0x90] sm:$0xff] %vm7766_vm11, %v7707_v31 }
 0x864   : > { %v7709_v28 = vpop.permute.xlu1 %7708 }
 0x865   : > { %7786 = vst.msk [vmem:[%s12064_s30 + $0x98] sm:$0xff] %vm7766_vm11, %v7709_v28 }
 0x866   : > { %v7711_v50 = vpop.permute.xlu0 %7710 }
 0x867   : > { %7787 = vst.msk [vmem:[%s12064_s30 + $0xa0] sm:$0xff] %vm7766_vm11, %v7711_v50 }
 0x86b   : > { %v7713_v47 = vpop.permute.xlu1 %7712 }
 0x86c   : > { %7788 = vst.msk [vmem:[%s12064_s30 + $0xa8] sm:$0xff] %vm7766_vm11, %v7713_v47 }
 0x86d   : > { %v7852_v30 = vpop.permute.xlu0 %7851 }
 0x86e   : > { %7889 = vst.msk [vmem:[#allocation2 + $0x50] sm:$0xff] %vm7766_vm11, %v7852_v30 }
 0x86f   : > { %v7850_v23 = vpop.permute.xlu1 %7849 }
 0x870   : > { %7888 = vst.msk [vmem:[#allocation2 + $0x48] sm:$0xff] %vm7766_vm11, %v7850_v23 }
 0x871   : > { %v7715_v61 = vpop.permute.xlu0 %7714 }
 0x872   : > { %7789 = vst.msk [vmem:[%s12064_s30 + $0xb0] sm:$0xff] %vm7766_vm11, %v7715_v61 }
 0x873   : > { %v7717_v32 = vpop.permute.xlu1 %7716 }
 0x874   : > { %7790 = vst.msk [vmem:[%s12064_s30 + $0xb8] sm:$0xff] %vm7766_vm11, %v7717_v32 }
 0x875   : > { %v7719_v0 = vpop.permute.xlu0 %7718 }
 0x876   : > { %7791 = vst.msk [vmem:[%s12064_s30 + $0xc0] sm:$0xff] %vm7766_vm11, %v7719_v0 }
 0x877   : > { %v7854_v8 = vpop.permute.xlu1 %7853 }
 0x878   : > { %7890 = vst.msk [vmem:[#allocation2 + $0x58] sm:$0xff] %vm7766_vm11, %v7854_v8 }
 0x87b   : > { %v7721_v11 = vpop.permute.xlu1 %7720 }
 0x87c   : > { %7792 = vst.msk [vmem:[%s12064_s30 + $0xc8] sm:$0xff] %vm7766_vm11, %v7721_v11 }
 0x87d   : > { %v7856_v27 = vpop.permute.xlu0 %7855 }
 0x87e   : > { %7891 = vst.msk [vmem:[#allocation2 + $0x60] sm:$0xff] %vm7766_vm11, %v7856_v27 }
 0x881   : > { %v7723_v2 = vpop.permute.xlu0 %7722 }
 0x882   : > { %7793 = vst.msk [vmem:[%s12064_s30 + $0xd0] sm:$0xff] %vm7766_vm11, %v7723_v2 }
 0x888   : > { %v7725_v12 = vpop.permute.xlu1 %7724 }
 0x889   : > { %7794 = vst.msk [vmem:[%s12064_s30 + $0xd8] sm:$0xff] %vm7766_vm11, %v7725_v12 }
 0x88c   : > { %v7729_v13 = vpop.permute.xlu1 %7728 }
 0x88d   : > { %7796 = vst.msk [vmem:[%s12064_s30 + $0xe8] sm:$0xff] %vm7766_vm11, %v7729_v13 }
 0x88e   : > { %v7727_v43 = vpop.permute.xlu0 %7726 }
 0x88f   : > { %7795 = vst.msk [vmem:[%s12064_s30 + $0xe0] sm:$0xff] %vm7766_vm11, %v7727_v43 }
 0x890   : > { %v7733_v63 = vpop.permute.xlu1 %7732 }
 0x891   : > { %7798 = vst.msk [vmem:[%s12064_s30 + $0xf8] sm:$0xff] %vm7766_vm11, %v7733_v63 }
 0x892   : > { %v7731_v22 = vpop.permute.xlu0 %7730 }
 0x893   : > { %7797 = vst.msk [vmem:[%s12064_s30 + $0xf0] sm:$0xff] %vm7766_vm11, %v7731_v22 }
 0x894   : > { %v7858_v53 = vpop.permute.xlu1 %7857 }
 0x895   : > { %9647 = shalt.err (!%p9644_p3)
}
 0x896   : > { %s9648_s30 = scalar_lea.hbm %s14112_s12, 4096  ;;  %s9652_s21 = scalar_lea.hbm %s14177_s11, 8192 }
 0x897   : > { %p9649_p4 = scmp.ne.s32.totalorder %s14112_s12, %s9648_s30  ;;  %p9653_p9 = scmp.lt.u32.totalorder %s14112_s12, %s14177_s11 }
 0x898   : > { %p9654_p10 = scmp.lt.u32.totalorder %s9652_s21, %s9648_s30  ;;  %p9656_p12 = scmp.lt.u32.totalorder %s9648_s30, %s14112_s12 }
 0x899   : > { %p9650_p7 = pnand %p9649_p4, %p9803_p5 }
 0x89a   : > { %p9655_p11 = por %p9654_p10, %p9653_p9 }
 0x89b   : > { %p9651_p8 = pneg %p9650_p7 }
 0x89c   : > { %p9657_p13 = por %p9656_p12, %p9655_p11 }
 0x89e   : > { %p9658_p0 = pnand %p9657_p13, %p9651_p8 }
 0x8a0   : > { %9661 = shalt.err (!%p9658_p0)
}
 0x8a1   : > { %s9703_s25 = smov 128   ;;  %s9704_s24 = smov 8   ;;  %7892 = vst.msk [vmem:[#allocation2 + $0x68] sm:$0xff] %vm7766_vm11, %v7858_v53  ;;  %v7860_v9 = vpop.permute.xlu0 %7859  ;;  %v7862_v29 = vpop.permute.xlu1 %7861 }
 0x8a2   : > { %8347 = dma.vmem_to_hbm [thread:$0]  (%p9803_p5), %s14114_s15, 4096, %s14112_s12, %s14122_s22, %s9703_s25, %s9703_s25, %s9704_s24   ;;  %7893 = vst.msk [vmem:[#allocation2 + $0x70] sm:$0xff] %vm7766_vm11, %v7860_v9  ;;  %7894 = vst.msk [vmem:[#allocation2 + $0x78] sm:$0xff] %vm7766_vm11, %v7862_v29 }
 0x8a3 PF: > { %p8353_p1 = scmp.ge.s32.totalorder %s9696_s20, 2  ;;  %s7924_s30 = sand.u32 1, %s9684_s17  }
 0x8a4   : > { %s7925_s29 = scalar_lea.sflag [#allocation5], %s7924_s30 }
 0x8a5   : > { %p8350_p2 = pnand %p8353_p1, %p9807_p6 }
 0x8a7   : > { %9679 = dma.done.wait (!%p8350_p2), %s7925_s29, 4096  }
 0x8a8   : > { %9681 = vsyncadd (!%p8350_p2), %s7925_s29, 4294963200  ;;  %p21_p5 = scmp.ge.s32.totalorder %s9790_s23, 4   ;;  %s15473_s17 = smov %s9688_s18 }
 0x8a9   : > { %s15474_s18 = smov %s9692_s19  ;;  %s15475_s19 = smov %s9801_s26 }
 0x8aa   : > { %s15476_s20 = smov %s9790_s23  ;;  %23 = sbr.rel (!%p21_p5) target bundleno = 3 (0x3), region = 99 }
 0x8b1   :  { %7930 = vsyncpa [#allocation5], 1 }
 0x8b2   :  { %7932 = vsyncpa [#allocation5 + $0x1], 1 }

</bundles_post_ra>
